<compile_context>
chip_gen: v7x
topology: tpu7x:2x2x1
jax: 0.10.0
libtpu: 0.0.40
codegen_flags: <defaults>
</compile_context>

<pallas_src>
import functools

import jax
import jax.numpy as jnp
from jax.experimental import pallas as pl
from jax.experimental.pallas import tpu as pltpu


def _round_up(x, m):
    return ((x + m - 1) // m) * m


def _geom(H, W):
    Wp = _round_up(W + 2, 8)       # flat row pitch (sublane-tile aligned)
    P = (H + 2) * Wp               # padded, flattened spatial grid
    return Wp, P


# ---------------------------------------------------------------------------
# Fused kernel: gated conv1 -> gated conv2 -> skip store -> 2x2 max pool
# ---------------------------------------------------------------------------
def _encoder_block_kernel(xcol_ref, mask_ref, w1_ref, w2_ref, vec_ref, sel_ref,
                          skip_ref, pool_ref, *, H, W, Wp, eps):
    P = (H + 2) * Wp
    M = Wp + 8                                   # slice margin (multiple of 8)
    inv_hw = 1.0 / float(H * W)
    Cp = w1_ref.shape[1]

    mask = mask_ref[...] > 0.5                   # (P, 1) interior-pixel mask
    vecs = vec_ref[...]                          # (6, Cp): b1, g1, t1, b2, g2, t2

    def gate_norm(y, gamma, beta):
        # Gated_block epilogue: relu(y)*sigmoid(y) then InstanceNorm2d.
        # sigmoid via tanh keeps the transcendental on the EUP (no vector divide).
        g = jnp.maximum(y, 0.0) * (0.5 * jnp.tanh(0.5 * y) + 0.5)
        g = jnp.where(mask, g, 0.0)              # zero the padding ring / pad cols
        mu = jnp.sum(g, axis=0, keepdims=True) * inv_hw
        d = jnp.where(mask, g - mu, 0.0)         # masked two-pass variance
        var = jnp.sum(d * d, axis=0, keepdims=True) * inv_hw
        return d * jax.lax.rsqrt(var + eps) * gamma + beta

    # ---- gated block 1: single K = 9*Cin matmul over the wrapper im2col ----
    y1 = jnp.dot(xcol_ref[...], w1_ref[...],
                 preferred_element_type=jnp.float32) + vecs[0:1]
    a1 = gate_norm(y1, vecs[1:2], vecs[2:3])
    a1 = jnp.where(mask, a1, 0.0).astype(jnp.bfloat16)   # ring -> conv2 zero padding

    # ---- gated block 2: 3 matmuls, K = 3*Cp (dx taps packed along K) -------
    zpad = jnp.zeros((M, Cp), jnp.bfloat16)
    a1e = jnp.concatenate([zpad, a1, zpad], axis=0)       # margins are exact zeros
    acc = None
    for ty in range(3):
        base = M + (ty - 1) * Wp                          # sublane-aligned offset
        taps = jnp.concatenate([a1e[base - 1:base - 1 + P],
                                a1e[base:base + P],
                                a1e[base + 1:base + 1 + P]], axis=1)   # (P, 3*Cp)
        part = jnp.dot(taps, w2_ref[ty], preferred_element_type=jnp.float32)
        acc = part if acc is None else acc + part
    y2 = acc + vecs[3:4]
    skip_flat = gate_norm(y2, vecs[4:5], vecs[5:6])       # (P, Cp) f32

    # ---- one lane-dense bf16 store of the whole flat skip slab -------------
    skip_ref[...] = skip_flat.astype(skip_ref.dtype)

    # ---- fused 2x2 / stride-2 max pool --------------------------------------
    # window-max over the flat slab, then a one-hot selection matmul performs
    # the stride-2 decimation on the MXU (no strided loads, no per-row loops).
    spad = jnp.zeros((M, Cp), jnp.float32)
    se = jnp.concatenate([skip_flat, spad], axis=0)
    win = jnp.maximum(jnp.maximum(se[0:P], se[1:1 + P]),
                      jnp.maximum(se[Wp:Wp + P], se[Wp + 1:Wp + 1 + P]))
    pool_ref[...] = jnp.dot(sel_ref[...], win.astype(jnp.bfloat16),
                            preferred_element_type=jnp.float32).astype(pool_ref.dtype)


# ---------------------------------------------------------------------------
# Wrapper: NCHW in / NCHW out, lane-dense channel padding, one pallas_call
# ---------------------------------------------------------------------------
def encoder_block_gated_forward(x_nchw, params, *, affine=True, eps=1e-5):
    x = jnp.transpose(x_nchw.astype(jnp.float32), (0, 2, 3, 1))   # NCHW -> NHWC
    N, H, W, Cin = x.shape
    assert H % 2 == 0 and W % 2 == 0, "2x2/stride-2 maxpool needs even H, W"
    Cout = params["conv1"]["w"].shape[-1]
    Cp = max(128, _round_up(Cout, 128))          # lane-dense channel padding
    Wp, P = _geom(H, W)
    K1 = 9 * Cin
    Npool = (H // 2) * (W // 2)

    # im2col of the input on the padded flat grid -> one K = 9*Cin matmul in-kernel
    xp = jnp.pad(x, ((0, 0), (2, 2), (2, Wp - W), (0, 0)))        # (N, H+4, Wp+2, Cin)
    cols = [xp[:, ty:ty + H + 2, tx:tx + Wp, :] for ty in range(3) for tx in range(3)]
    xcol = jnp.concatenate(cols, axis=-1).reshape(N, P, K1).astype(jnp.bfloat16)

    # interior-pixel mask on the padded flat grid
    mask = jnp.zeros((H + 2, Wp), jnp.float32).at[1:H + 1, 1:W + 1].set(1.0)
    mask = mask.reshape(P, 1)

    # one-hot selector: pool[(i,j)] = window-max at flat index (2i+1)*Wp + (2j+1)
    ii, jj = jnp.meshgrid(jnp.arange(H // 2), jnp.arange(W // 2), indexing="ij")
    tgt = ((2 * ii + 1) * Wp + (2 * jj + 1)).reshape(-1, 1)
    sel = (tgt == jnp.arange(P)[None, :]).astype(jnp.bfloat16)    # (Npool, P)

    def prep(p, cin_target):
        w, b = p["w"], p["b"]
        gmm = p["gamma"] if affine else jnp.ones_like(p["gamma"])
        bta = p["beta"] if affine else jnp.zeros_like(p["beta"])
        ci, co = w.shape[2], w.shape[3]
        w = jnp.pad(w, ((0, 0), (0, 0), (0, cin_target - ci), (0, Cp - co)))
        vec = jnp.stack([jnp.pad(b, (0, Cp - co)),
                         jnp.pad(gmm, (0, Cp - co), constant_values=1.0),
                         jnp.pad(bta, (0, Cp - co))])
        return w.astype(jnp.bfloat16), vec.astype(jnp.float32)

    w1, vec1 = prep(params["conv1"], Cin)
    w1 = w1.reshape(K1, Cp)              # (ty, tx, cin) row-major = im2col order
    w2, vec2 = prep(params["conv2"], Cp)
    w2 = w2.reshape(3, 3 * Cp, Cp)       # dx taps packed along K per dy row
    vecs = jnp.concatenate([vec1, vec2], axis=0)                  # (6, Cp)

    skip_p, pool_p = pl.pallas_call(
        functools.partial(_encoder_block_kernel, H=H, W=W, Wp=Wp, eps=eps),
        out_shape=(jax.ShapeDtypeStruct((N, P, Cp), jnp.bfloat16),
                   jax.ShapeDtypeStruct((N, Npool, Cp), jnp.bfloat16)),
        grid=(N,),
        in_specs=[
            pl.BlockSpec((None, P, K1), lambda n: (n, 0, 0)),      # im2col(x)
            pl.BlockSpec((P, 1), lambda n: (0, 0)),                # interior mask
            pl.BlockSpec((K1, Cp), lambda n: (0, 0)),              # conv1 weights
            pl.BlockSpec((3, 3 * Cp, Cp), lambda n: (0, 0, 0)),    # conv2 weights
            pl.BlockSpec((6, Cp), lambda n: (0, 0)),               # bias/gamma/beta
            pl.BlockSpec((Npool, P), lambda n: (0, 0)),            # pool selector
        ],
        out_specs=(pl.BlockSpec((None, P, Cp), lambda n: (n, 0, 0)),
                   pl.BlockSpec((None, Npool, Cp), lambda n: (n, 0, 0))),
        compiler_params=pltpu.CompilerParams(dimension_semantics=("parallel",)),
    )(xcol, mask, w1, w2, vecs, sel)

    skip = skip_p.reshape(N, H + 2, Wp, Cp)[:, 1:H + 1, 1:W + 1, :Cout]
    pooled = pool_p.reshape(N, H // 2, W // 2, Cp)[..., :Cout]
    skip = jnp.transpose(skip.astype(jnp.float32), (0, 3, 1, 2))    # NHWC -> NCHW
    pooled = jnp.transpose(pooled.astype(jnp.float32), (0, 3, 1, 2))
    return pooled, skip                                             # matches (x, skip)


# ---------------------------------------------------------------------------
# Pure-jnp reference (same bf16 matmul inputs / f32 accumulation)
# ---------------------------------------------------------------------------
def _reference_forward(x_nchw, params, *, affine=True, eps=1e-5):
    x = jnp.transpose(x_nchw.astype(jnp.float32), (0, 2, 3, 1))

    def conv3x3(x, w):
        n, h, ww, _ = x.shape
        xp = jnp.pad(x, ((0, 0), (1, 1), (1, 1), (0, 0))).astype(jnp.bfloat16)
        wb = w.astype(jnp.bfloat16)
        out = jnp.zeros((n, h, ww, w.shape[-1]), jnp.float32)
        for dy in range(3):
            for dx in range(3):
                out = out + jnp.einsum("nhwc,cd->nhwd",
                                       xp[:, dy:dy + h, dx:dx + ww, :], wb[dy, dx],
                                       preferred_element_type=jnp.float32)
        return out

    def gated(x, p):
        y = conv3x3(x, p["w"]) + p["b"]
        g = jnp.maximum(y, 0.0) * jax.nn.sigmoid(y)
        mu = jnp.mean(g, axis=(1, 2), keepdims=True)
        var = jnp.mean(jnp.square(g - mu), axis=(1, 2), keepdims=True)
        out = (g - mu) * jax.lax.rsqrt(var + eps)
        if affine:
            out = out * p["gamma"] + p["beta"]
        return out

    a = gated(x, params["conv1"])
    skip = gated(a, params["conv2"])
    n, h, w, c = skip.shape
    pooled = jnp.max(skip.reshape(n, h // 2, 2, w // 2, 2, c), axis=(2, 4))
    return jnp.transpose(pooled, (0, 3, 1, 2)), jnp.transpose(skip, (0, 3, 1, 2))


# ---------------------------------------------------------------------------
# Deterministic synthetic parameters (HWIO conv weights, InstanceNorm affine)
# ---------------------------------------------------------------------------
def init_params(key, cin, cout):
    def conv_ins(k, ci, co):
        k1, k2, k3, k4 = jax.random.split(k, 4)
        return dict(
            w=jax.random.normal(k1, (3, 3, ci, co), jnp.float32) / jnp.sqrt(9.0 * ci),
            b=0.05 * jax.random.normal(k2, (co,), jnp.float32),
            gamma=1.0 + 0.1 * jax.random.normal(k3, (co,), jnp.float32),
            beta=0.1 * jax.random.normal(k4, (co,), jnp.float32),
        )
    k1, k2 = jax.random.split(key)
    return dict(conv1=conv_ins(k1, cin, cout), conv2=conv_ins(k2, cout, cout))


if __name__ == "__main__":
    key = jax.random.PRNGKey(0)
    kx, kp = jax.random.split(key)
    N, Cin, H, W, Cout = 2, 4, 16, 16, 32
    x = jax.random.normal(kx, (N, Cin, H, W), jnp.float32)
    params = init_params(kp, Cin, Cout)

    fwd = jax.jit(functools.partial(encoder_block_gated_forward, affine=True))
    pooled, skip = fwd(x, params)
    jax.block_until_ready((pooled, skip))

    assert pooled.shape == (N, Cout, H // 2, W // 2)
    assert skip.shape == (N, Cout, H, W)
    assert bool(jnp.all(jnp.isfinite(pooled))) and bool(jnp.all(jnp.isfinite(skip)))

    pooled_r, skip_r = jax.jit(functools.partial(_reference_forward, affine=True))(x, params)
    err_s = float(jnp.max(jnp.abs(skip - skip_r)))
    err_p = float(jnp.max(jnp.abs(pooled - pooled_r)))
    assert bool(jnp.allclose(skip, skip_r, atol=5e-2, rtol=5e-2)), err_s
    assert bool(jnp.allclose(pooled, pooled_r, atol=5e-2, rtol=5e-2)), err_p
    print("KERNEL_OK")
</pallas_src>

<mosaic_0001>
module attributes {stable_mosaic.version = 11 : i64} {
  func.func @_encoder_block_kernel(%arg0: i32, %arg1: memref<1x432x36xbf16, #tpu.memory_space<vmem>>, %arg2: memref<432x1xf32, #tpu.memory_space<vmem>>, %arg3: memref<36x128xbf16, #tpu.memory_space<vmem>>, %arg4: memref<3x384x128xbf16, #tpu.memory_space<vmem>>, %arg5: memref<6x128xf32, #tpu.memory_space<vmem>>, %arg6: memref<64x432xbf16, #tpu.memory_space<vmem>>, %arg7: memref<1x432x128xbf16, #tpu.memory_space<vmem>>, %arg8: memref<1x64x128xbf16, #tpu.memory_space<vmem>>) attributes {dimension_semantics = [#tpu.dimension_semantics<parallel>], iteration_bounds = array<i64: 2>, scalar_prefetch = 0 : i64, scratch_operands = 0 : i64, tpu.core_type = #tpu.core_type<tc>, window_params = [{transform_indices = @transform_0, window_bounds = array<i64: 1, 432, 36>}, {pipeline_mode = #tpu.pipeline_mode<synchronous>, transform_indices = @transform_1, window_bounds = array<i64: 432, 1>}, {pipeline_mode = #tpu.pipeline_mode<synchronous>, transform_indices = @transform_2, window_bounds = array<i64: 36, 128>}, {pipeline_mode = #tpu.pipeline_mode<synchronous>, transform_indices = @transform_3, window_bounds = array<i64: 3, 384, 128>}, {pipeline_mode = #tpu.pipeline_mode<synchronous>, transform_indices = @transform_4, window_bounds = array<i64: 6, 128>}, {pipeline_mode = #tpu.pipeline_mode<synchronous>, transform_indices = @transform_5, window_bounds = array<i64: 64, 432>}, {transform_indices = @transform_6, window_bounds = array<i64: 1, 432, 128>}, {transform_indices = @transform_7, window_bounds = array<i64: 1, 64, 128>}]} {
    %c0 = arith.constant 0 : index
    %c0_0 = arith.constant 0 : index
    %0 = vector.load %arg2[%c0, %c0_0] : memref<432x1xf32, #tpu.memory_space<vmem>>, vector<432x1xf32>
    %cst = arith.constant 5.000000e-01 : f32
    %1 = vector.broadcast %cst : f32 to vector<432x1xf32>
    %2 = arith.cmpf ogt, %0, %1 : vector<432x1xf32>
    %c0_1 = arith.constant 0 : index
    %c0_2 = arith.constant 0 : index
    %3 = vector.load %arg5[%c0_1, %c0_2] : memref<6x128xf32, #tpu.memory_space<vmem>>, vector<6x128xf32>
    %c0_3 = arith.constant 0 : index
    %c0_4 = arith.constant 0 : index
    %c0_5 = arith.constant 0 : index
    %4 = vector.load %arg1[%c0_3, %c0_4, %c0_5] : memref<1x432x36xbf16, #tpu.memory_space<vmem>>, vector<1x432x36xbf16>
    %5 = vector.shape_cast %4 : vector<1x432x36xbf16> to vector<432x36xbf16>
    %c0_6 = arith.constant 0 : index
    %c0_7 = arith.constant 0 : index
    %6 = vector.load %arg3[%c0_6, %c0_7] : memref<36x128xbf16, #tpu.memory_space<vmem>>, vector<36x128xbf16>
    %cst_8 = arith.constant dense<0.000000e+00> : vector<432x128xf32>
    %7 = tpu.matmul %5, %6, %cst_8 {dimension_numbers = #tpu.dot_dimension_numbers<[1], [0], [0], [1], [0, 0, 1, 1], [], []>} : vector<432x36xbf16>, vector<36x128xbf16>, vector<432x128xf32> -> vector<432x128xf32>
    %8 = vector.extract_strided_slice %3 {offsets = [0, 0], sizes = [1, 128], strides = [1, 1]} : vector<6x128xf32> to vector<1x128xf32>
    %9 = vector.broadcast %8 : vector<1x128xf32> to vector<432x128xf32>
    %10 = arith.addf %7, %9 : vector<432x128xf32>
    %11 = vector.extract_strided_slice %3 {offsets = [1, 0], sizes = [1, 128], strides = [1, 1]} : vector<6x128xf32> to vector<1x128xf32>
    %12 = vector.extract_strided_slice %3 {offsets = [2, 0], sizes = [1, 128], strides = [1, 1]} : vector<6x128xf32> to vector<1x128xf32>
    %cst_9 = arith.constant 0.000000e+00 : f32
    %13 = vector.broadcast %cst_9 : f32 to vector<432x128xf32>
    %14 = arith.maximumf %10, %13 : vector<432x128xf32>
    %cst_10 = arith.constant 5.000000e-01 : f32
    %15 = vector.broadcast %cst_10 : f32 to vector<432x128xf32>
    %16 = arith.mulf %15, %10 : vector<432x128xf32>
    %17 = math.tanh %16 : vector<432x128xf32>
    %cst_11 = arith.constant 5.000000e-01 : f32
    %18 = vector.broadcast %cst_11 : f32 to vector<432x128xf32>
    %19 = arith.mulf %18, %17 : vector<432x128xf32>
    %cst_12 = arith.constant 5.000000e-01 : f32
    %20 = vector.broadcast %cst_12 : f32 to vector<432x128xf32>
    %21 = arith.addf %19, %20 : vector<432x128xf32>
    %22 = arith.mulf %14, %21 : vector<432x128xf32>
    %cst_13 = arith.constant 0.000000e+00 : f32
    %23 = vector.shape_cast %2 : vector<432x1xi1> to vector<432x1xi1>
    %24 = vector.broadcast %23 : vector<432x1xi1> to vector<432x128xi1>
    %25 = vector.broadcast %cst_13 : f32 to vector<432x128xf32>
    %26 = arith.select %24, %22, %25 : vector<432x128xi1>, vector<432x128xf32>
    %cst_14 = arith.constant dense<0.000000e+00> : vector<128xf32>
    %27 = vector.multi_reduction <add>, %26, %cst_14 [0] : vector<432x128xf32> to vector<128xf32>
    %28 = vector.shape_cast %27 : vector<128xf32> to vector<1x128xf32>
    %cst_15 = arith.constant 3.906250e-03 : f32
    %29 = vector.broadcast %cst_15 : f32 to vector<1x128xf32>
    %30 = arith.mulf %28, %29 : vector<1x128xf32>
    %31 = vector.broadcast %30 : vector<1x128xf32> to vector<432x128xf32>
    %32 = arith.subf %26, %31 : vector<432x128xf32>
    %cst_16 = arith.constant 0.000000e+00 : f32
    %33 = vector.shape_cast %2 : vector<432x1xi1> to vector<432x1xi1>
    %34 = vector.broadcast %33 : vector<432x1xi1> to vector<432x128xi1>
    %35 = vector.broadcast %cst_16 : f32 to vector<432x128xf32>
    %36 = arith.select %34, %32, %35 : vector<432x128xi1>, vector<432x128xf32>
    %37 = arith.mulf %36, %36 : vector<432x128xf32>
    %cst_17 = arith.constant dense<0.000000e+00> : vector<128xf32>
    %38 = vector.multi_reduction <add>, %37, %cst_17 [0] : vector<432x128xf32> to vector<128xf32>
    %39 = vector.shape_cast %38 : vector<128xf32> to vector<1x128xf32>
    %cst_18 = arith.constant 3.906250e-03 : f32
    %40 = vector.broadcast %cst_18 : f32 to vector<1x128xf32>
    %41 = arith.mulf %39, %40 : vector<1x128xf32>
    %cst_19 = arith.constant 9.99999974E-6 : f32
    %42 = vector.broadcast %cst_19 : f32 to vector<1x128xf32>
    %43 = arith.addf %41, %42 : vector<1x128xf32>
    %44 = math.rsqrt %43 : vector<1x128xf32>
    %45 = vector.broadcast %44 : vector<1x128xf32> to vector<432x128xf32>
    %46 = arith.mulf %36, %45 : vector<432x128xf32>
    %47 = vector.broadcast %11 : vector<1x128xf32> to vector<432x128xf32>
    %48 = arith.mulf %46, %47 : vector<432x128xf32>
    %49 = vector.broadcast %12 : vector<1x128xf32> to vector<432x128xf32>
    %50 = arith.addf %48, %49 : vector<432x128xf32>
    %cst_20 = arith.constant 0.000000e+00 : f32
    %51 = vector.shape_cast %2 : vector<432x1xi1> to vector<432x1xi1>
    %52 = vector.broadcast %51 : vector<432x1xi1> to vector<432x128xi1>
    %53 = vector.broadcast %cst_20 : f32 to vector<432x128xf32>
    %54 = arith.select %52, %50, %53 : vector<432x128xi1>, vector<432x128xf32>
    %55 = arith.truncf %54 : vector<432x128xf32> to vector<432x128xbf16>
    %cst_21 = arith.constant 0.000000e+00 : bf16
    %56 = vector.broadcast %cst_21 : bf16 to vector<32x128xbf16>
    %57 = tpu.concatenate %56, %55, %56 in 0 : vector<32x128xbf16>, vector<432x128xbf16>, vector<32x128xbf16> -> vector<496x128xbf16>
    %58 = vector.extract_strided_slice %57 {offsets = [7, 0], sizes = [432, 128], strides = [1, 1]} : vector<496x128xbf16> to vector<432x128xbf16>
    %59 = vector.extract_strided_slice %57 {offsets = [8, 0], sizes = [432, 128], strides = [1, 1]} : vector<496x128xbf16> to vector<432x128xbf16>
    %60 = vector.extract_strided_slice %57 {offsets = [9, 0], sizes = [432, 128], strides = [1, 1]} : vector<496x128xbf16> to vector<432x128xbf16>
    %61 = tpu.concatenate %58, %59, %60 in 1 : vector<432x128xbf16>, vector<432x128xbf16>, vector<432x128xbf16> -> vector<432x384xbf16>
    %c0_22 = arith.constant 0 : index
    %c0_23 = arith.constant 0 : index
    %c0_24 = arith.constant 0 : index
    %62 = vector.load %arg4[%c0_22, %c0_23, %c0_24] : memref<3x384x128xbf16, #tpu.memory_space<vmem>>, vector<1x384x128xbf16>
    %63 = vector.shape_cast %62 : vector<1x384x128xbf16> to vector<384x128xbf16>
    %cst_25 = arith.constant dense<0.000000e+00> : vector<432x128xf32>
    %64 = tpu.matmul %61, %63, %cst_25 {dimension_numbers = #tpu.dot_dimension_numbers<[1], [0], [0], [1], [0, 0, 1, 1], [], []>} : vector<432x384xbf16>, vector<384x128xbf16>, vector<432x128xf32> -> vector<432x128xf32>
    %65 = vector.extract_strided_slice %57 {offsets = [31, 0], sizes = [432, 128], strides = [1, 1]} : vector<496x128xbf16> to vector<432x128xbf16>
    %66 = vector.extract_strided_slice %57 {offsets = [32, 0], sizes = [432, 128], strides = [1, 1]} : vector<496x128xbf16> to vector<432x128xbf16>
    %67 = vector.extract_strided_slice %57 {offsets = [33, 0], sizes = [432, 128], strides = [1, 1]} : vector<496x128xbf16> to vector<432x128xbf16>
    %68 = tpu.concatenate %65, %66, %67 in 1 : vector<432x128xbf16>, vector<432x128xbf16>, vector<432x128xbf16> -> vector<432x384xbf16>
    %c1 = arith.constant 1 : index
    %c0_26 = arith.constant 0 : index
    %c0_27 = arith.constant 0 : index
    %69 = vector.load %arg4[%c1, %c0_26, %c0_27] : memref<3x384x128xbf16, #tpu.memory_space<vmem>>, vector<1x384x128xbf16>
    %70 = vector.shape_cast %69 : vector<1x384x128xbf16> to vector<384x128xbf16>
    %cst_28 = arith.constant dense<0.000000e+00> : vector<432x128xf32>
    %71 = tpu.matmul %68, %70, %cst_28 {dimension_numbers = #tpu.dot_dimension_numbers<[1], [0], [0], [1], [0, 0, 1, 1], [], []>} : vector<432x384xbf16>, vector<384x128xbf16>, vector<432x128xf32> -> vector<432x128xf32>
    %72 = arith.addf %64, %71 : vector<432x128xf32>
    %73 = vector.extract_strided_slice %57 {offsets = [55, 0], sizes = [432, 128], strides = [1, 1]} : vector<496x128xbf16> to vector<432x128xbf16>
    %74 = vector.extract_strided_slice %57 {offsets = [56, 0], sizes = [432, 128], strides = [1, 1]} : vector<496x128xbf16> to vector<432x128xbf16>
    %75 = vector.extract_strided_slice %57 {offsets = [57, 0], sizes = [432, 128], strides = [1, 1]} : vector<496x128xbf16> to vector<432x128xbf16>
    %76 = tpu.concatenate %73, %74, %75 in 1 : vector<432x128xbf16>, vector<432x128xbf16>, vector<432x128xbf16> -> vector<432x384xbf16>
    %c2 = arith.constant 2 : index
    %c0_29 = arith.constant 0 : index
    %c0_30 = arith.constant 0 : index
    %77 = vector.load %arg4[%c2, %c0_29, %c0_30] : memref<3x384x128xbf16, #tpu.memory_space<vmem>>, vector<1x384x128xbf16>
    %78 = vector.shape_cast %77 : vector<1x384x128xbf16> to vector<384x128xbf16>
    %cst_31 = arith.constant dense<0.000000e+00> : vector<432x128xf32>
    %79 = tpu.matmul %76, %78, %cst_31 {dimension_numbers = #tpu.dot_dimension_numbers<[1], [0], [0], [1], [0, 0, 1, 1], [], []>} : vector<432x384xbf16>, vector<384x128xbf16>, vector<432x128xf32> -> vector<432x128xf32>
    %80 = arith.addf %72, %79 : vector<432x128xf32>
    %81 = vector.extract_strided_slice %3 {offsets = [3, 0], sizes = [1, 128], strides = [1, 1]} : vector<6x128xf32> to vector<1x128xf32>
    %82 = vector.broadcast %81 : vector<1x128xf32> to vector<432x128xf32>
    %83 = arith.addf %80, %82 : vector<432x128xf32>
    %84 = vector.extract_strided_slice %3 {offsets = [4, 0], sizes = [1, 128], strides = [1, 1]} : vector<6x128xf32> to vector<1x128xf32>
    %85 = vector.extract_strided_slice %3 {offsets = [5, 0], sizes = [1, 128], strides = [1, 1]} : vector<6x128xf32> to vector<1x128xf32>
    %cst_32 = arith.constant 0.000000e+00 : f32
    %86 = vector.broadcast %cst_32 : f32 to vector<432x128xf32>
    %87 = arith.maximumf %83, %86 : vector<432x128xf32>
    %cst_33 = arith.constant 5.000000e-01 : f32
    %88 = vector.broadcast %cst_33 : f32 to vector<432x128xf32>
    %89 = arith.mulf %88, %83 : vector<432x128xf32>
    %90 = math.tanh %89 : vector<432x128xf32>
    %cst_34 = arith.constant 5.000000e-01 : f32
    %91 = vector.broadcast %cst_34 : f32 to vector<432x128xf32>
    %92 = arith.mulf %91, %90 : vector<432x128xf32>
    %cst_35 = arith.constant 5.000000e-01 : f32
    %93 = vector.broadcast %cst_35 : f32 to vector<432x128xf32>
    %94 = arith.addf %92, %93 : vector<432x128xf32>
    %95 = arith.mulf %87, %94 : vector<432x128xf32>
    %cst_36 = arith.constant 0.000000e+00 : f32
    %96 = vector.shape_cast %2 : vector<432x1xi1> to vector<432x1xi1>
    %97 = vector.broadcast %96 : vector<432x1xi1> to vector<432x128xi1>
    %98 = vector.broadcast %cst_36 : f32 to vector<432x128xf32>
    %99 = arith.select %97, %95, %98 : vector<432x128xi1>, vector<432x128xf32>
    %cst_37 = arith.constant dense<0.000000e+00> : vector<128xf32>
    %100 = vector.multi_reduction <add>, %99, %cst_37 [0] : vector<432x128xf32> to vector<128xf32>
    %101 = vector.shape_cast %100 : vector<128xf32> to vector<1x128xf32>
    %cst_38 = arith.constant 3.906250e-03 : f32
    %102 = vector.broadcast %cst_38 : f32 to vector<1x128xf32>
    %103 = arith.mulf %101, %102 : vector<1x128xf32>
    %104 = vector.broadcast %103 : vector<1x128xf32> to vector<432x128xf32>
    %105 = arith.subf %99, %104 : vector<432x128xf32>
    %cst_39 = arith.constant 0.000000e+00 : f32
    %106 = vector.shape_cast %2 : vector<432x1xi1> to vector<432x1xi1>
    %107 = vector.broadcast %106 : vector<432x1xi1> to vector<432x128xi1>
    %108 = vector.broadcast %cst_39 : f32 to vector<432x128xf32>
    %109 = arith.select %107, %105, %108 : vector<432x128xi1>, vector<432x128xf32>
    %110 = arith.mulf %109, %109 : vector<432x128xf32>
    %cst_40 = arith.constant dense<0.000000e+00> : vector<128xf32>
    %111 = vector.multi_reduction <add>, %110, %cst_40 [0] : vector<432x128xf32> to vector<128xf32>
    %112 = vector.shape_cast %111 : vector<128xf32> to vector<1x128xf32>
    %cst_41 = arith.constant 3.906250e-03 : f32
    %113 = vector.broadcast %cst_41 : f32 to vector<1x128xf32>
    %114 = arith.mulf %112, %113 : vector<1x128xf32>
    %cst_42 = arith.constant 9.99999974E-6 : f32
    %115 = vector.broadcast %cst_42 : f32 to vector<1x128xf32>
    %116 = arith.addf %114, %115 : vector<1x128xf32>
    %117 = math.rsqrt %116 : vector<1x128xf32>
    %118 = vector.broadcast %117 : vector<1x128xf32> to vector<432x128xf32>
    %119 = arith.mulf %109, %118 : vector<432x128xf32>
    %120 = vector.broadcast %84 : vector<1x128xf32> to vector<432x128xf32>
    %121 = arith.mulf %119, %120 : vector<432x128xf32>
    %122 = vector.broadcast %85 : vector<1x128xf32> to vector<432x128xf32>
    %123 = arith.addf %121, %122 : vector<432x128xf32>
    %124 = arith.truncf %123 : vector<432x128xf32> to vector<432x128xbf16>
    %c0_43 = arith.constant 0 : index
    %c0_44 = arith.constant 0 : index
    %c0_45 = arith.constant 0 : index
    %125 = vector.load %arg7[%c0_43, %c0_44, %c0_45] : memref<1x432x128xbf16, #tpu.memory_space<vmem>>, vector<1x432x128xbf16>
    %126 = vector.shape_cast %125 : vector<1x432x128xbf16> to vector<432x128xbf16>
    %127 = vector.shape_cast %124 : vector<432x128xbf16> to vector<1x432x128xbf16>
    tpu.vector_store %arg7[%c0_43, %c0_44, %c0_45], %127 {strides = array<i32>} : memref<1x432x128xbf16, #tpu.memory_space<vmem>>, vector<1x432x128xbf16>,
    %cst_46 = arith.constant 0.000000e+00 : f32
    %128 = vector.broadcast %cst_46 : f32 to vector<32x128xf32>
    %129 = tpu.concatenate %123, %128 in 0 : vector<432x128xf32>, vector<32x128xf32> -> vector<464x128xf32>
    %130 = vector.extract_strided_slice %129 {offsets = [0, 0], sizes = [432, 128], strides = [1, 1]} : vector<464x128xf32> to vector<432x128xf32>
    %131 = vector.extract_strided_slice %129 {offsets = [1, 0], sizes = [432, 128], strides = [1, 1]} : vector<464x128xf32> to vector<432x128xf32>
    %132 = arith.maximumf %130, %131 : vector<432x128xf32>
    %133 = vector.extract_strided_slice %129 {offsets = [24, 0], sizes = [432, 128], strides = [1, 1]} : vector<464x128xf32> to vector<432x128xf32>
    %134 = vector.extract_strided_slice %129 {offsets = [25, 0], sizes = [432, 128], strides = [1, 1]} : vector<464x128xf32> to vector<432x128xf32>
    %135 = arith.maximumf %133, %134 : vector<432x128xf32>
    %136 = arith.maximumf %132, %135 : vector<432x128xf32>
    %c0_47 = arith.constant 0 : index
    %c0_48 = arith.constant 0 : index
    %137 = vector.load %arg6[%c0_47, %c0_48] : memref<64x432xbf16, #tpu.memory_space<vmem>>, vector<64x432xbf16>
    %138 = arith.truncf %136 : vector<432x128xf32> to vector<432x128xbf16>
    %cst_49 = arith.constant dense<0.000000e+00> : vector<64x128xf32>
    %139 = tpu.matmul %137, %138, %cst_49 {dimension_numbers = #tpu.dot_dimension_numbers<[1], [0], [0], [1], [0, 0, 1, 1], [], []>} : vector<64x432xbf16>, vector<432x128xbf16>, vector<64x128xf32> -> vector<64x128xf32>
    %140 = arith.truncf %139 : vector<64x128xf32> to vector<64x128xbf16>
    %c0_50 = arith.constant 0 : index
    %c0_51 = arith.constant 0 : index
    %c0_52 = arith.constant 0 : index
    %141 = vector.load %arg8[%c0_50, %c0_51, %c0_52] : memref<1x64x128xbf16, #tpu.memory_space<vmem>>, vector<1x64x128xbf16>
    %142 = vector.shape_cast %141 : vector<1x64x128xbf16> to vector<64x128xbf16>
    %143 = vector.shape_cast %140 : vector<64x128xbf16> to vector<1x64x128xbf16>
    tpu.vector_store %arg8[%c0_50, %c0_51, %c0_52], %143 {strides = array<i32>} : memref<1x64x128xbf16, #tpu.memory_space<vmem>>, vector<1x64x128xbf16>,
    return
  }
  func.func @transform_0(%arg0: i32) -> (i32, i32, i32) {
    %c0_i32 = arith.constant 0 : i32
    %c0_i32_0 = arith.constant 0 : i32
    %c0_i32_1 = arith.constant 0 : i32
    return %arg0, %c0_i32, %c0_i32_0 : i32, i32, i32
  }
  func.func @transform_1(%arg0: i32) -> (i32, i32) {
    %c0_i32 = arith.constant 0 : i32
    %c0_i32_0 = arith.constant 0 : i32
    %c0_i32_1 = arith.constant 0 : i32
    return %c0_i32, %c0_i32_0 : i32, i32
  }
  func.func @transform_2(%arg0: i32) -> (i32, i32) {
    %c0_i32 = arith.constant 0 : i32
    %c0_i32_0 = arith.constant 0 : i32
    %c0_i32_1 = arith.constant 0 : i32
    return %c0_i32, %c0_i32_0 : i32, i32
  }
  func.func @transform_3(%arg0: i32) -> (i32, i32, i32) {
    %c0_i32 = arith.constant 0 : i32
    %c0_i32_0 = arith.constant 0 : i32
    %c0_i32_1 = arith.constant 0 : i32
    %c0_i32_2 = arith.constant 0 : i32
    return %c0_i32, %c0_i32_0, %c0_i32_1 : i32, i32, i32
  }
  func.func @transform_4(%arg0: i32) -> (i32, i32) {
    %c0_i32 = arith.constant 0 : i32
    %c0_i32_0 = arith.constant 0 : i32
    %c0_i32_1 = arith.constant 0 : i32
    return %c0_i32, %c0_i32_0 : i32, i32
  }
  func.func @transform_5(%arg0: i32) -> (i32, i32) {
    %c0_i32 = arith.constant 0 : i32
    %c0_i32_0 = arith.constant 0 : i32
    %c0_i32_1 = arith.constant 0 : i32
    return %c0_i32, %c0_i32_0 : i32, i32
  }
  func.func @transform_6(%arg0: i32) -> (i32, i32, i32) {
    %c0_i32 = arith.constant 0 : i32
    %c0_i32_0 = arith.constant 0 : i32
    %c0_i32_1 = arith.constant 0 : i32
    return %arg0, %c0_i32, %c0_i32_0 : i32, i32, i32
  }
  func.func @transform_7(%arg0: i32) -> (i32, i32, i32) {
    %c0_i32 = arith.constant 0 : i32
    %c0_i32_0 = arith.constant 0 : i32
    %c0_i32_1 = arith.constant 0 : i32
    return %arg0, %c0_i32, %c0_i32_0 : i32, i32, i32
  }
}

</mosaic_0001>

<bundles_post_ra>
// kernel: encoder_block_gated_forward.1
= control target key start
LH: loop header
LB: loop body
LE: loop exit
PB: predicated region body
PF: predicated region fallthrough
CT: control target
= control target key end

     0   :  { %s9199_s24 = smov 0   ;;  %s15765_s0 = inlined_call_operand.vmem [shape: bf16[2,432,36], index: 0, kind: input, shape index: {}]   ;;  %s15766_s1 = inlined_call_operand.vmem [shape: f32[432,1], index: 1, kind: input, shape index: {}]   ;;  %s15767_s2 = inlined_call_operand.vmem [shape: bf16[36,128], index: 2, kind: input, shape index: {}]   ;;  %s15768_s3 = inlined_call_operand.vmem [shape: bf16[3,384,128], index: 3, kind: input, shape index: {}]   ;;  %s15769_s4 = inlined_call_operand.vmem [shape: f32[6,128], index: 4, kind: input, shape index: {}]   ;;  %s15770_s5 = inlined_call_operand.vmem [shape: bf16[64,432], index: 5, kind: input, shape index: {}]   ;;  %s15771_s6 = inlined_call_operand.vmem [shape: bf16[2,432,128], index: 6, kind: output, shape index: {0}]   ;;  %s15772_s7 = inlined_call_operand.vmem [shape: bf16[2,64,128], index: 7, kind: output, shape index: {1}]  }
   0x1 LB: > { %s7553_s25 = sadd.s32 4294967295, %s9154_s24   ;;  %p7557_p0 = scmp.ge.s32.totalorder %s9154_s24, 1  ;;  %s9154_s24 = sphi %s9199_s24, %s18_s24  }
   0x2   : > { %p240_p1 = scmp.lt.s32.totalorder %s9154_s24, 3 }
   0x4   : > { %p241_p2 = pnand %p7557_p0, %p240_p1 }
   0x6   : > { %244 = sbr.rel (%p241_p2) target bundleno = 2089 (0x829), region = 44 }
   0xd   : > { %v8799_v0 = vld [vmem:[%s15767_s2] sm:$0xff]   ;;  %v15773_v1 = vmov 0.0   ;;  %v8800_v2 = vld [vmem:[%s15767_s2 + $0x8] sm:$0xff]   ;;  %v8801_v3 = vld [vmem:[%s15767_s2 + $0x10] ss:$0 sps:$4 sm:$0x33]  }
   0xe   : > { %8293 = vmatprep.subr.bf16.mxu0 %v15773_v1  ;;  %8779 = vmatprep.subr.bf16.mxu1 %v15773_v1  ;;  %vm15804_vm0 = vmmov 0   ;;  %p277_p3 = scmp.lt.s32.totalorder %s7553_s25, 1  ;;  %v293_v4 = vld [vmem:[%s15766_s1] sm:$0xff]  ;;  %v295_v5 = vld [vmem:[%s15766_s1 + $0x10] sm:$0xff]  ;;  %v294_v6 = vld [vmem:[%s15766_s1 + $0x8] sm:$0xff]  ;;  %vm697_vm1 = vcmask 1041408  }
   0xf   : > { %8294 = vmatpush3.bf16.msra.mxu0 %v8799_v0  ;;  %8782 = vmatpush3.bf16.msra.mxu1 %v8799_v0  ;;  %vm347_vm2 = vcmp.gt.f32.partialorder %v293_v4, 0.5  ;;  %vm349_vm3 = vcmp.gt.f32.partialorder %v295_v5, 0.5  ;;  %v296_v7 = vld [vmem:[%s15766_s1 + $0x18] sm:$0xff]  ;;  %v15775_v8 = vmov 0   ;;  %vm348_vm4 = vcmp.gt.f32.partialorder %v294_v6, 0.5  ;;  %v297_v11 = vld [vmem:[%s15766_s1 + $0x20] sm:$0xff] }
  0x10   : > { %8295 = vmatprep.subr.bf16.mxu0 %v15773_v1  ;;  %8299 = vmatprep.mubr.msk.bf16.mxu0 %vm15804_vm0, %v15773_v1  ;;  %s17523_s25 = smov (!%p277_p3, %s7553_s25), 1  ;;  %v1274_v9 = vsel %vm347_vm2, 1, %v15775_v8  ;;  %v1276_v10 = vsel %vm349_vm3, 1, %v15775_v8  ;;  %vm350_vm5 = vcmp.gt.f32.partialorder %v296_v7, 0.5  ;;  %v699_v12 = vsel %vm697_vm1, %v8801_v3, 0  ;;  %v298_v13 = vld [vmem:[%s15766_s1 + $0x28] sm:$0xff] }
  0x11   : > { %8780 = vmatprep.subr.bf16.mxu1 %v15773_v1  ;;  %8375 = vmatprep.mubr.msk.bf16.mxu1 %vm15804_vm0, %v15773_v1  ;;  %s8785_s19 = smul.u32 216, %s17523_s25  ;;  %v299_v14 = vld [vmem:[%s15766_s1 + $0x30] sm:$0xff]  ;;  %vm615_vm6 = vcmask 293888   ;;  %v1275_v15 = vsel %vm348_vm4, 1, %v15775_v8  ;;  %v1277_v16 = vsel %vm350_vm5, 1, %v15775_v8  ;;  %vm351_vm7 = vcmp.gt.f32.partialorder %v297_v11, 0.5 }
  0x12   : > { %8797 = vset.pattern.permute.xlu0 %v15775_v8  ;;  %8798 = vset.pattern.permute.xlu1 %v15775_v8  ;;  %v300_v17 = vld [vmem:[%s15766_s1 + $0x38] sm:$0xff]  ;;  %vm352_vm8 = vcmp.gt.f32.partialorder %v298_v13, 0.5  ;;  %vm353_vm9 = vcmp.gt.f32.partialorder %v299_v14, 0.5  ;;  %v301_v19 = vld [vmem:[%s15766_s1 + $0x40] sm:$0xff]  ;;  %v1278_v21 = vsel %vm351_vm7, 1, %v15775_v8  ;;  %v302_v23 = vld [vmem:[%s15766_s1 + $0x48] sm:$0xff] }
  0x13   : > { %8296 = vmatpush3.bf16.msra.mxu0 %v8800_v2  ;;  %8783 = vmatpush3.bf16.msra.mxu1 %v8800_v2  ;;  %s9260_s28 = scalar_lea.vmem %s15765_s0, %s8785_s19  ;;  %vm354_vm10 = vcmp.gt.f32.partialorder %v300_v17, 0.5  ;;  %v1279_v22 = vsel %vm352_vm8, 1, %v15775_v8  ;;  %v1280_v24 = vsel %vm353_vm9, 1, %v15775_v8  ;;  %vm355_vm11 = vcmp.gt.f32.partialorder %v301_v19, 0.5  ;;  %v303_v26 = vld [vmem:[%s15766_s1 + $0x50] sm:$0xff]  ;;  %v304_v27 = vld [vmem:[%s15766_s1 + $0x58] sm:$0xff]  ;;  %s15327_s21 = scalar_lea.vmem %s15771_s6, %s8785_s19 }
  0x14   : > { %8297 = vmatprep.subr.bf16.mxu0 %v15773_v1  ;;  %8781 = vmatprep.subr.bf16.mxu1 %v15773_v1  ;;  %v8802_v18 = vld [vmem:[%s9260_s28] sm:$0xff]   ;;  %v8804_v20 = vld [vmem:[%s9260_s28 + $0x98] sm:$0xff]   ;;  %v1281_v25 = vsel %vm354_vm10, 1, %v15775_v8  ;;  %v8803_v28 = vld [vmem:[%s9260_s28 + $0x8] sm:$0xff]   ;;  %vm356_vm12 = vcmp.gt.f32.partialorder %v302_v23, 0.5  ;;  %v1282_v30 = vsel %vm355_vm11, 1, %v15775_v8 }
  0x15   : > { %1329 = vperm.xlu0 %8797, %v1274_v9   ;;  %1335 = vperm.xlu1 %8798, %v1276_v10   ;;  %v8806_v29 = vld [vmem:[%s9260_s28 + $0xa0] sm:$0xff]   ;;  %v1283_v31 = vsel %vm356_vm12, 1, %v15775_v8  ;;  %vm357_vm13 = vcmp.gt.f32.partialorder %v303_v26, 0.5  ;;  %vm358_vm14 = vcmp.gt.f32.partialorder %v304_v27, 0.5  ;;  %v306_v33 = vld [vmem:[%s15766_s1 + $0x68] sm:$0xff]  ;;  %v8805_v36 = vld [vmem:[%s9260_s28 + $0x10] sm:$0xff]  }
  0x16   : > { %v305_v32 = vld [vmem:[%s15766_s1 + $0x60] sm:$0xff]  ;;  %v1284_v34 = vsel %vm357_vm13, 1, %v15775_v8  ;;  %v1285_v35 = vsel %vm358_vm14, 1, %v15775_v8  ;;  %v8808_v37 = vld [vmem:[%s9260_s28 + $0xa8] sm:$0xff]   ;;  %vm360_vm1 = vcmp.gt.f32.partialorder %v306_v33, 0.5  ;;  %v307_v40 = vld [vmem:[%s15766_s1 + $0x70] sm:$0xff] }
  0x17   : > { %8298 = vmatpush3.bf16.msra.mxu0 %v699_v12  ;;  %8784 = vmatpush3.bf16.msra.mxu1 %v699_v12  ;;  %vm359_vm15 = vcmp.gt.f32.partialorder %v305_v32, 0.5  ;;  %v1287_v39 = vsel %vm360_vm1, 1, %v15775_v8  ;;  %v308_v41 = vld [vmem:[%s15766_s1 + $0x78] sm:$0xff]  ;;  %v309_v42 = vld [vmem:[%s15766_s1 + $0x80] sm:$0xff]  ;;  %vm361_vm2 = vcmp.gt.f32.partialorder %v307_v40, 0.5  ;;  %v310_v46 = vld [vmem:[%s15766_s1 + $0x88] sm:$0xff] }
  0x18   : > { %3289 = vmatprep.subr.bf16.mxu1 %v15775_v8  ;;  %8407 = vmatprep.subr.bf16.mxu0 %v15773_v1  ;;  %v1286_v38 = vsel %vm359_vm15, 1, %v15775_v8  ;;  %vm362_vm3 = vcmp.gt.f32.partialorder %v308_v41, 0.5  ;;  %v8807_v43 = vld [vmem:[%s9260_s28 + $0x18] sm:$0xff]   ;;  %v1288_v44 = vsel %vm361_vm2, 1, %v15775_v8  ;;  %v8810_v47 = vld [vmem:[%s9260_s28 + $0xb0] sm:$0xff]   ;;  %vm363_vm4 = vcmp.gt.f32.partialorder %v309_v42, 0.5 }
  0x19   : > { %1332 = vperm.xlu0 %8797, %v1275_v15   ;;  %1338 = vperm.xlu1 %8798, %v1277_v16   ;;  %v1289_v45 = vsel %vm362_vm3, 1, %v15775_v8  ;;  %vm364_vm5 = vcmp.gt.f32.partialorder %v310_v46, 0.5  ;;  %v311_v48 = vld [vmem:[%s15766_s1 + $0x90] sm:$0xff]  ;;  %v312_v49 = vld [vmem:[%s15766_s1 + $0x98] sm:$0xff]  ;;  %v1290_v50 = vsel %vm363_vm4, 1, %v15775_v8  ;;  %v313_v52 = vld [vmem:[%s15766_s1 + $0xa0] sm:$0xff] }
  0x1a   : > { %8300 = vmatmul.mubr.msk.bf16.vlgmr.msra.gmra.mrb[0].mxu0 %vm615_vm6, %v8802_v18  ;;  %8376 = vmatmul.mubr.msk.bf16.vlgmr.msra.gmra.mrb[0].mxu1 %vm615_vm6, %v8804_v20  ;;  %v1291_v51 = vsel %vm364_vm5, 1, %v15775_v8  ;;  %v314_v53 = vld [vmem:[%s15766_s1 + $0xa8] sm:$0xff]  ;;  %vm365_vm7 = vcmp.gt.f32.partialorder %v311_v48, 0.5  ;;  %vm366_vm8 = vcmp.gt.f32.partialorder %v312_v49, 0.5  ;;  %v315_v54 = vld [vmem:[%s15766_s1 + $0xb0] sm:$0xff]  ;;  %v316_v55 = vld [vmem:[%s15766_s1 + $0xb8] sm:$0xff] }
  0x1b   : > { %8303 = vmatprep.mubr.msk.bf16.mxu0 %vm15804_vm0, %v15773_v1  ;;  %8379 = vmatprep.mubr.msk.bf16.mxu1 %vm15804_vm0, %v15773_v1  ;;  %v317_v56 = vld [vmem:[%s15766_s1 + $0xc0] sm:$0xff]  ;;  %vm367_vm9 = vcmp.gt.f32.partialorder %v313_v52, 0.5  ;;  %vm368_vm10 = vcmp.gt.f32.partialorder %v314_v53, 0.5  ;;  %v318_v58 = vld [vmem:[%s15766_s1 + $0xc8] sm:$0xff]  ;;  %v319_v59 = vld [vmem:[%s15766_s1 + $0xd0] sm:$0xff]  ;;  %v1292_v60 = vsel %vm365_vm7, 1, %v15775_v8 }
  0x1c   : > { %v8809_v57 = vld [vmem:[%s9260_s28 + $0x20] sm:$0xff]   ;;  %v1293_v61 = vsel %vm366_vm8, 1, %v15775_v8  ;;  %vm369_vm11 = vcmp.gt.f32.partialorder %v315_v54, 0.5  ;;  %v320_v62 = vld [vmem:[%s15766_s1 + $0xd8] sm:$0xff]  ;;  %vm370_vm12 = vcmp.gt.f32.partialorder %v316_v55, 0.5  ;;  %vm371_vm13 = vcmp.gt.f32.partialorder %v317_v56, 0.5 }
  0x1d   : > { %1341 = vperm.xlu0 %8797, %v1278_v21   ;;  %1344 = vperm.xlu1 %8798, %v1279_v22   ;;  %v8812_v63 = vld [vmem:[%s9260_s28 + $0xb8] sm:$0xff]   ;;  %v321_v0 = vld [vmem:[%s15766_s1 + $0xe0] sm:$0xff]  ;;  %v1294_v2 = vsel %vm367_vm9, 1, %v15775_v8  ;;  %v1295_v3 = vsel %vm368_vm10, 1, %v15775_v8  ;;  %vm372_vm14 = vcmp.gt.f32.partialorder %v318_v58, 0.5  ;;  %vm373_vm15 = vcmp.gt.f32.partialorder %v319_v59, 0.5 }
  0x1e   : > { %v322_v4 = vld [vmem:[%s15766_s1 + $0xe8] sm:$0xff]  ;;  %v323_v5 = vld [vmem:[%s15766_s1 + $0xf0] sm:$0xff]  ;;  %v1296_v6 = vsel %vm369_vm11, 1, %v15775_v8  ;;  %vm374_vm1 = vcmp.gt.f32.partialorder %v320_v62, 0.5  ;;  %v324_v7 = vld [vmem:[%s15766_s1 + $0xf8] sm:$0xff]  ;;  %v1297_v10 = vsel %vm370_vm12, 1, %v15775_v8 }
  0x1f   : > { %v325_v9 = vld [vmem:[%s15766_s1 + $0x100] sm:$0xff]  ;;  %v9402_v11 = vsel %vm371_vm13, 1, %v15775_v8  ;;  %vm375_vm2 = vcmp.gt.f32.partialorder %v321_v0, 0.5  ;;  %vm376_vm3 = vcmp.gt.f32.partialorder %v322_v4, 0.5  ;;  %v9409_v12 = vsel %vm372_vm14, 1, %v15775_v8  ;;  %v326_v14 = vld [vmem:[%s15766_s1 + $0x108] sm:$0xff] }
  0x20   : > { %v9413_v13 = vsel %vm373_vm15, 1, %v15775_v8  ;;  %vm377_vm4 = vcmp.gt.f32.partialorder %v323_v5, 0.5  ;;  %vm378_vm5 = vcmp.gt.f32.partialorder %v324_v7, 0.5  ;;  %v327_v15 = vld [vmem:[%s15766_s1 + $0x110] sm:$0xff]  ;;  %v8811_v16 = vld [vmem:[%s9260_s28 + $0x28] sm:$0xff]   ;;  %v9426_v17 = vsel %vm374_vm1, 1, %v15775_v8 }
  0x21   : > { %1347 = vperm.xlu0 %8797, %v1280_v24   ;;  %1350 = vperm.xlu1 %8798, %v1281_v25   ;;  %vm379_vm7 = vcmp.gt.f32.partialorder %v325_v9, 0.5  ;;  %v328_v18 = vld [vmem:[%s15766_s1 + $0x118] sm:$0xff]  ;;  %v329_v19 = vld [vmem:[%s15766_s1 + $0x120] sm:$0xff]  ;;  %v9437_v21 = vsel %vm375_vm2, 1, %v15775_v8  ;;  %v9441_v22 = vsel %vm376_vm3, 1, %v15775_v8  ;;  %vm380_vm8 = vcmp.gt.f32.partialorder %v326_v14, 0.5 }
  0x22   : > { %8304 = vmatmul.mubr.msk.bf16.gmra.mrb[4].mxu0 %vm615_vm6, %v8803_v28  ;;  %8380 = vmatmul.mubr.msk.bf16.gmra.mrb[4].mxu1 %vm615_vm6, %v8806_v29  ;;  %v8814_v20 = vld [vmem:[%s9260_s28 + $0xc0] sm:$0xff]   ;;  %vm381_vm9 = vcmp.gt.f32.partialorder %v327_v15, 0.5  ;;  %v9445_v23 = vsel %vm377_vm4, 1, %v15775_v8  ;;  %v9449_v24 = vsel %vm378_vm5, 1, %v15775_v8  ;;  %vm382_vm10 = vcmp.gt.f32.partialorder %v328_v18, 0.5  ;;  %v330_v25 = vld [vmem:[%s15766_s1 + $0x128] sm:$0xff] }
  0x23   : > { %8307 = vmatprep.mubr.msk.bf16.mxu0 %vm15804_vm0, %v15773_v1  ;;  %8383 = vmatprep.mubr.msk.bf16.mxu1 %vm15804_vm0, %v15773_v1  ;;  %vm383_vm11 = vcmp.gt.f32.partialorder %v329_v19, 0.5  ;;  %v331_v26 = vld [vmem:[%s15766_s1 + $0x130] sm:$0xff]  ;;  %v9459_v27 = vsel %vm379_vm7, 1, %v15775_v8  ;;  %vm384_vm12 = vcmp.gt.f32.partialorder %v330_v25, 0.5  ;;  %v332_v28 = vld [vmem:[%s15766_s1 + $0x138] sm:$0xff]  ;;  %v333_v29 = vld [vmem:[%s15766_s1 + $0x140] sm:$0xff] }
  0x24   : > { %vm385_vm13 = vcmp.gt.f32.partialorder %v331_v26, 0.5  ;;  %v9474_v32 = vsel %vm381_vm9, 1, %v15775_v8  ;;  %vm386_vm14 = vcmp.gt.f32.partialorder %v332_v28, 0.5  ;;  %vm387_vm15 = vcmp.gt.f32.partialorder %v333_v29, 0.5  ;;  %v335_v33 = vld [vmem:[%s15766_s1 + $0x150] sm:$0xff]  ;;  %v340_v42 = vld [vmem:[%s15766_s1 + $0x178] sm:$0xff] }
  0x25   : > { %1353 = vperm.xlu0 %8797, %v1282_v30   ;;  %1356 = vperm.xlu1 %8798, %v1283_v31   ;;  %v334_v30 = vld [vmem:[%s15766_s1 + $0x148] sm:$0xff]  ;;  %v9471_v31 = vsel %vm380_vm8, 1, %v15775_v8  ;;  %vm389_vm2 = vcmp.gt.f32.partialorder %v335_v33, 0.5  ;;  %v1312_v40 = vsel %vm385_vm13, 1, %v15775_v8  ;;  %v339_v41 = vld [vmem:[%s15766_s1 + $0x170] sm:$0xff]  ;;  %vm394_vm8 = vcmp.gt.f32.partialorder %v340_v42, 0.5 }
  0x26   : > { %vm388_vm1 = vcmp.gt.f32.partialorder %v334_v30, 0.5  ;;  %vm393_vm7 = vcmp.gt.f32.partialorder %v339_v41, 0.5  ;;  %v342_v46 = vld [vmem:[%s15766_s1 + $0x188] sm:$0xff]  ;;  %v1316_v48 = vsel %vm389_vm2, 1, %v15775_v8  ;;  %v343_v49 = vld [vmem:[%s15766_s1 + $0x190] sm:$0xff]  ;;  %v8815_v62 = vld [vmem:[%s9260_s28 + $0x38] sm:$0xff]  }
  0x27   : > { %v8813_v53 = vld [vmem:[%s9260_s28 + $0x30] sm:$0xff]   ;;  %v8816_v54 = vld [vmem:[%s9260_s28 + $0xc8] sm:$0xff]   ;;  %v1320_v56 = vsel %vm393_vm7, 1, %v15775_v8  ;;  %v8817_v0 = vld [vmem:[%s9260_s28 + $0x40] sm:$0xff]   ;;  %s7871_s9 = sshll.u32 %s17523_s25, 5 }
  0x28   : > { %v345_v4 = vld [vmem:[%s15766_s1 + $0x1a0] sm:$0xff]  ;;  %v346_v5 = vld [vmem:[%s15766_s1 + $0x1a8] sm:$0xff]  ;;  %s291_s12 = scalar_lea.vmem %s15772_s7, %s7871_s9 }
  0x29   : > { %1359 = vperm.xlu0 %8797, %v1284_v34   ;;  %1362 = vperm.xlu1 %8798, %v1285_v35   ;;  %v336_v34 = vld [vmem:[%s15766_s1 + $0x158] sm:$0xff]  ;;  %v1309_v35 = vsel %vm382_vm10, 1, %v15775_v8  ;;  %vm396_vm10 = vcmp.gt.f32.partialorder %v342_v46, 0.5  ;;  %vm399_vm13 = vcmp.gt.f32.partialorder %v345_v4, 0.5  ;;  %v8822_v7 = vld [vmem:[%s9260_s28 + $0x60] sm:$0xff]   ;;  %v8827_v15 = vld [vmem:[%s9260_s28 + $0x88] sm:$0xff]  }
  0x2a   : > { %8308 = vmatmul.mubr.msk.bf16.gmra.mrb[8].mxu0 %vm615_vm6, %v8805_v36  ;;  %8384 = vmatmul.mubr.msk.bf16.gmra.mrb[8].mxu1 %vm615_vm6, %v8808_v37  ;;  %v9486_v36 = vsel %vm383_vm11, 1, %v15775_v8  ;;  %v337_v37 = vld [vmem:[%s15766_s1 + $0x160] sm:$0xff]  ;;  %vm390_vm3 = vcmp.gt.f32.partialorder %v336_v34, 0.5  ;;  %vm397_vm11 = vcmp.gt.f32.partialorder %v343_v49, 0.5  ;;  %v1323_v59 = vsel %vm396_vm10, 1, %v15775_v8 }
  0x2b   : > { %8311 = vmatprep.mubr.msk.bf16.mxu0 %vm15804_vm0, %v15773_v1  ;;  %8387 = vmatprep.mubr.msk.bf16.mxu1 %vm15804_vm0, %v15773_v1  ;;  %vm391_vm4 = vcmp.gt.f32.partialorder %v337_v37, 0.5  ;;  %v1326_v9 = vsel %vm399_vm13, 1, %v15775_v8  ;;  %v8826_v14 = vld [vmem:[%s9260_s28 + $0x80] sm:$0xff]  }
  0x2c   : > { %v1318_v52 = vsel %vm391_vm4, 1, %v15775_v8 }
  0x2d   : > { %1365 = vperm.xlu0 %8797, %v1286_v38   ;;  %1368 = vperm.xlu1 %8798, %v1287_v39   ;;  %v338_v38 = vld [vmem:[%s15766_s1 + $0x168] sm:$0xff]  ;;  %v1311_v39 = vsel %vm384_vm12, 1, %v15775_v8 }
  0x2e   : > { %vm392_vm5 = vcmp.gt.f32.partialorder %v338_v38, 0.5 }
  0x2f   : > { %v1319_v55 = vsel %vm392_vm5, 1, %v15775_v8 }
  0x31   : > { %1371 = vperm.xlu0 %8797, %v1288_v44   ;;  %1374 = vperm.xlu1 %8798, %v1289_v45   ;;  %v1314_v44 = vsel %vm387_vm15, 1, %v15775_v8  ;;  %v341_v45 = vld [vmem:[%s15766_s1 + $0x180] sm:$0xff] }
  0x32   : > { %8312 = vmatmul.mubr.msk.bf16.gmra.mrb[12].mxu0 %vm615_vm6, %v8807_v43  ;;  %8388 = vmatmul.mubr.msk.bf16.gmra.mrb[12].mxu1 %vm615_vm6, %v8810_v47  ;;  %v1313_v43 = vsel %vm386_vm14, 1, %v15775_v8  ;;  %v1315_v47 = vsel %vm388_vm1, 1, %v15775_v8  ;;  %vm395_vm9 = vcmp.gt.f32.partialorder %v341_v45, 0.5  ;;  %vm400_vm14 = vcmp.gt.f32.partialorder %v346_v5, 0.5 }
  0x33   : > { %8315 = vmatprep.mubr.msk.bf16.mxu0 %vm15804_vm0, %v15773_v1  ;;  %8391 = vmatprep.mubr.msk.bf16.mxu1 %vm15804_vm0, %v15773_v1  ;;  %v1322_v58 = vsel %vm395_vm9, 1, %v15775_v8 }
  0x35   : > { %1377 = vperm.xlu0 %8797, %v1290_v50   ;;  %1380 = vperm.xlu1 %8798, %v1291_v51   ;;  %v344_v50 = vld [vmem:[%s15766_s1 + $0x198] sm:$0xff]  ;;  %v1317_v51 = vsel %vm390_vm3, 1, %v15775_v8 }
  0x36   : > { %vm398_vm12 = vcmp.gt.f32.partialorder %v344_v50, 0.5 }
  0x39   : > { %1383 = vperm.xlu0 %8797, %v1292_v60   ;;  %1386 = vperm.xlu1 %8798, %v1293_v61   ;;  %v1324_v60 = vsel %vm397_vm11, 1, %v15775_v8  ;;  %v1325_v61 = vsel %vm398_vm12, 1, %v15775_v8 }
  0x3a   : > { %8316 = vmatmul.mubr.msk.bf16.gmra.mrb[16].mxu0 %vm615_vm6, %v8809_v57  ;;  %8392 = vmatmul.mubr.msk.bf16.gmra.mrb[16].mxu1 %vm615_vm6, %v8812_v63  ;;  %v1321_v57 = vsel %vm394_vm8, 1, %v15775_v8  ;;  %v8818_v63 = vld [vmem:[%s9260_s28 + $0xd0] sm:$0xff]  }
  0x3b   : > { %8319 = vmatprep.mubr.msk.bf16.mxu0 %vm15804_vm0, %v15773_v1  ;;  %8395 = vmatprep.mubr.msk.bf16.mxu1 %vm15804_vm0, %v15773_v1 }
  0x3d   : > { %1389 = vperm.xlu0 %8797, %v1294_v2   ;;  %1392 = vperm.xlu1 %8798, %v1295_v3   ;;  %v8819_v2 = vld [vmem:[%s9260_s28 + $0x48] sm:$0xff]   ;;  %v8820_v3 = vld [vmem:[%s9260_s28 + $0x50] sm:$0xff]  }
  0x41   : > { %1395 = vperm.xlu0 %8797, %v1296_v6   ;;  %1398 = vperm.xlu1 %8798, %v1297_v10   ;;  %v8821_v6 = vld [vmem:[%s9260_s28 + $0x58] sm:$0xff]   ;;  %v1327_v10 = vsel %vm400_vm14, 1, %v15775_v8 }
  0x42   : > { %8320 = vmatmul.mubr.msk.bf16.gmra.mrb[20].mxu0 %vm615_vm6, %v8811_v16  ;;  %8396 = vmatmul.mubr.msk.bf16.gmra.mrb[20].mxu1 %vm615_vm6, %v8814_v20  ;;  %v8828_v16 = vld [vmem:[%s9260_s28 + $0x90] sm:$0xff]  }
  0x43   : > { %8323 = vmatprep.mubr.msk.bf16.mxu0 %vm15804_vm0, %v15773_v1  ;;  %8399 = vmatprep.mubr.msk.bf16.mxu1 %vm15804_vm0, %v15773_v1 }
  0x45   : > { %1401 = vperm.xlu0 %8797, %v9402_v11   ;;  %1404 = vperm.xlu1 %8798, %v9409_v12   ;;  %v8823_v11 = vld [vmem:[%s9260_s28 + $0x68] sm:$0xff]   ;;  %v8824_v12 = vld [vmem:[%s9260_s28 + $0x70] sm:$0xff]  }
  0x49   : > { %1407 = vperm.xlu0 %8797, %v9413_v13   ;;  %1410 = vperm.xlu1 %8798, %v9426_v17   ;;  %v8825_v13 = vld [vmem:[%s9260_s28 + $0x78] sm:$0xff]  }
  0x4a   : > { %8324 = vmatmul.mubr.msk.bf16.gmra.mrb[24].mxu0 %vm615_vm6, %v8813_v53  ;;  %8400 = vmatmul.mubr.msk.bf16.gmra.mrb[24].mxu1 %vm615_vm6, %v8816_v54 }
  0x4b   : > { %8327 = vmatprep.mubr.msk.bf16.mxu0 %vm15804_vm0, %v15773_v1  ;;  %8403 = vmatprep.mubr.msk.bf16.mxu1 %vm15804_vm0, %v15773_v1 }
  0x4d   : > { %1413 = vperm.xlu0 %8797, %v9437_v21   ;;  %1416 = vperm.xlu1 %8798, %v9441_v22  }
  0x51   : > { %1419 = vperm.xlu0 %8797, %v9445_v23   ;;  %1422 = vperm.xlu1 %8798, %v9449_v24  }
  0x52   : > { %8328 = vmatmul.mubr.msk.bf16.gmra.mrb[28].mxu0 %vm615_vm6, %v8815_v62  ;;  %8404 = vmatmul.mubr.msk.bf16.gmra.mrb[28].mxu1 %vm615_vm6, %v8818_v63 }
  0x53   : > { %8331 = vmatprep.mubr.msk.bf16.mxu0 %vm15804_vm0, %v15773_v1 }
  0x55   : > { %1425 = vperm.xlu0 %8797, %v9459_v27   ;;  %1428 = vperm.xlu1 %8798, %v9471_v31  }
  0x59   : > { %1431 = vperm.xlu0 %8797, %v9474_v32   ;;  %1434 = vperm.xlu1 %8798, %v1309_v35   ;;  %v461_v32 = vlaneseq }
  0x5a   : > { %8332 = vmatmul.mubr.msk.bf16.gmra.mrb[32].mxu0 %vm615_vm6, %v8817_v0 }
  0x5b   : > { %8335 = vmatprep.mubr.msk.bf16.mxu0 %vm15804_vm0, %v15773_v1  ;;  %v9629_v34 = vshrl.u32 %v461_v32, 7 }
  0x5d   : > { %1437 = vperm.xlu0 %8797, %v9486_v36   ;;  %1440 = vperm.xlu1 %8798, %v1311_v39   ;;  %16280 = vst [vmem:[#allocation2_spill] sm:$0xff] %v9629_v34  ;;  %v463_v42 = vsub.s32 0, %v9629_v34 }
  0x61   : > { %1443 = vperm.xlu0 %8797, %v1312_v40   ;;  %1446 = vperm.xlu1 %8798, %v1313_v43  }
  0x62   : > { %8336 = vmatmul.mubr.msk.bf16.gmra.mrb[36].mxu0 %vm615_vm6, %v8819_v2 }
  0x63   : > { %8339 = vmatprep.mubr.msk.bf16.mxu0 %vm15804_vm0, %v15773_v1 }
  0x65   : > { %1449 = vperm.xlu0 %8797, %v1314_v44   ;;  %1452 = vperm.xlu1 %8798, %v1315_v47   ;;  %v401_v44 = vld [vmem:[%s15769_s4] sm:$0x3f] }
  0x66   : > { %v9639_v45 = vrot.slane %v401_v44, %v463_v42 }
  0x69   : > { %1455 = vperm.xlu0 %8797, %v1316_v48   ;;  %1458 = vperm.xlu1 %8798, %v1317_v51  }
  0x6a   : > { %8340 = vmatmul.mubr.msk.bf16.gmra.mrb[40].mxu0 %vm615_vm6, %v8820_v3 }
  0x6b   : > { %8343 = vmatprep.mubr.msk.bf16.mxu0 %vm15804_vm0, %v15773_v1 }
  0x6d   : > { %1461 = vperm.xlu0 %8797, %v1318_v52   ;;  %1464 = vperm.xlu1 %8798, %v1319_v55  }
  0x71   : > { %1467 = vperm.xlu0 %8797, %v1320_v56   ;;  %1470 = vperm.xlu1 %8798, %v1321_v57  }
  0x72   : > { %8344 = vmatmul.mubr.msk.bf16.gmra.mrb[44].mxu0 %vm615_vm6, %v8821_v6 }
  0x73   : > { %8347 = vmatprep.mubr.msk.bf16.mxu0 %vm15804_vm0, %v15773_v1 }
  0x75   : > { %1473 = vperm.xlu0 %8797, %v1322_v58   ;;  %1476 = vperm.xlu1 %8798, %v1323_v59  }
  0x79   : > { %1479 = vperm.xlu0 %8797, %v1324_v60   ;;  %1482 = vperm.xlu1 %8798, %v1325_v61  }
  0x7a   : > { %8348 = vmatmul.mubr.msk.bf16.gmra.mrb[48].mxu0 %vm615_vm6, %v8822_v7 }
  0x7b   : > { %8351 = vmatprep.mubr.msk.bf16.mxu0 %vm15804_vm0, %v15773_v1 }
  0x7d   : > { %1485 = vperm.xlu0 %8797, %v1326_v9   ;;  %1488 = vperm.xlu1 %8798, %v1327_v10  }
  0x82   : > { %8352 = vmatmul.mubr.msk.bf16.gmra.mrb[52].mxu0 %vm615_vm6, %v8823_v11 }
  0x83   : > { %8355 = vmatprep.mubr.msk.bf16.mxu0 %vm15804_vm0, %v15773_v1 }
  0x8a   : > { %8356 = vmatmul.mubr.msk.bf16.gmra.mrb[56].mxu0 %vm615_vm6, %v8824_v12 }
  0x8b   : > { %8359 = vmatprep.mubr.msk.bf16.mxu0 %vm15804_vm0, %v15773_v1 }
  0x92   : > { %8360 = vmatmul.mubr.msk.bf16.gmra.mrb[60].mxu0 %vm615_vm6, %v8825_v13 }
  0x93   : > { %8363 = vmatprep.mubr.msk.bf16.mxu0 %vm15804_vm0, %v15773_v1 }
  0x94   : > { %v9654_v57 = vpop.permute.xlu0 %1329  ;;  %v9657_v59 = vpop.permute.xlu1 %1335 }
  0x95   : > { %16281 = vst [vmem:[#allocation3_spill] sm:$0xff] %v9654_v57  ;;  %16282 = vst [vmem:[#allocation4_spill] sm:$0xff] %v9657_v59  ;;  %vm1490_vm15 = vcmp.eq.s32.totalorder %v9654_v57, 1  ;;  %vm15969_vm1 = vcmp.eq.s32.totalorder %v9657_v59, 1 }
  0x98   : > { %v9672_v11 = vpop.permute.xlu0 %1332 }
  0x99   : > { %16283 = vst [vmem:[#allocation5_spill] sm:$0xff] %v9672_v11 }
  0x9a   : > { %8364 = vmatmul.mubr.msk.bf16.gmra.mrb[64].mxu0 %vm615_vm6, %v8826_v14  ;;  %v9678_v14 = vpop.permute.xlu1 %1338 }
  0x9b   : > { %8367 = vmatprep.mubr.msk.bf16.mxu0 %vm15804_vm0, %v15773_v1  ;;  %16284 = vst [vmem:[#allocation6_spill] sm:$0xff] %v9678_v14  ;;  %vm15970_vm2 = vcmp.eq.s32.totalorder %v9678_v14, 1 }
  0xa2   : > { %8368 = vmatmul.mubr.msk.bf16.gmra.mrb[68].mxu0 %vm615_vm6, %v8827_v15 }
  0xa3   : > { %8371 = vmatprep.mubr.msk.bf16.mxu0 %vm15804_vm0, %v15773_v1 }
  0xaa   : > { %8372 = vmatmul.mubr.msk.bf16.gmra.mrb[72].mxu0 %vm615_vm6, %v8828_v16  ;;  %vm1491_vm6 = vcmp.eq.s32.totalorder %v9672_v11, 1 }
  0xab   : > { %8423 = vmatprep.mubr.msk.bf16.mxu0 %vm15804_vm0, %v15773_v1 }
  0xed   : > { %v735_v17 = vpop.f32.mrb[0].mxu0  ;;  %v9621_v19 = vpop.f32.mrb[0].mxu1 }
  0xee   : > { %v8301_v18 = vpop.f32.mrb[1].mxu0  ;;  %v8377_v21 = vpop.f32.mrb[1].mxu1  ;;  %v9649_v54 = vadd.f32 %v735_v17, %v9639_v45 }
  0xef   : > { %v738_v20 = vpop.f32.mrb[2].mxu0  ;;  %v9623_v23 = vpop.f32.mrb[2].mxu1 }
  0xf0   : > { %v8302_v22 = vpop.f32.mrb[3].mxu0  ;;  %v8378_v24 = vpop.f32.mrb[3].mxu1  ;;  %v9644_v51 = vadd.f32 %v738_v20, %v9639_v45  ;;  %v1004_v60 = vmul.f32 0.5, %v9649_v54 }
  0xf2   : > { %v1005_v58 = vmul.f32 0.5, %v9644_v51 }
  0xf4   : > { %8925 = vtanh.f32 %v1005_v58 }
  0xf5   : > { %v743_v25 = vpop.f32.mrb[4].mxu0  ;;  %v9625_v27 = vpop.f32.mrb[4].mxu1  ;;  %8927 = vtanh.f32 %v1004_v60 }
  0xf6   : > { %v8305_v26 = vpop.f32.mrb[5].mxu0  ;;  %v8381_v29 = vpop.f32.mrb[5].mxu1  ;;  %v9652_v56 = vadd.f32 %v743_v25, %v9639_v45 }
  0xf7   : > { %v746_v28 = vpop.f32.mrb[6].mxu0  ;;  %v9627_v31 = vpop.f32.mrb[6].mxu1 }
  0xf8   : > { %v8306_v30 = vpop.f32.mrb[7].mxu0  ;;  %v8382_v33 = vpop.f32.mrb[7].mxu1  ;;  %v1006_v62 = vmul.f32 0.5, %v9652_v56  ;;  %v9662_v63 = vadd.f32 %v746_v28, %v9639_v45 }
  0xfa   : > { %8929 = vtanh.f32 %v1006_v62  ;;  %v1007_v10 = vmul.f32 0.5, %v9662_v63 }
  0xfc   : > { %8931 = vtanh.f32 %v1007_v10 }
  0xfd   : > { %v751_v35 = vpop.f32.mrb[8].mxu0  ;;  %v9631_v37 = vpop.f32.mrb[8].mxu1 }
  0xfe   : > { %v8309_v36 = vpop.f32.mrb[9].mxu0  ;;  %v8385_v39 = vpop.f32.mrb[9].mxu1  ;;  %v9667_v5 = vadd.f32 %v751_v35, %v9639_v45 }
  0xff   : > { %v754_v38 = vpop.f32.mrb[10].mxu0  ;;  %v9633_v41 = vpop.f32.mrb[10].mxu1 }
 0x100   : > { %v8310_v40 = vpop.f32.mrb[11].mxu0  ;;  %v8386_v43 = vpop.f32.mrb[11].mxu1  ;;  %v1008_v12 = vmul.f32 0.5, %v9667_v5  ;;  %v9676_v13 = vadd.f32 %v754_v38, %v9639_v45 }
 0x101   : > { %v8926_v28 = vpop.eup %8925  ;;  %v9692_v35 = vpop.permute.xlu0 %1341 }
 0x102   : > { %8933 = vtanh.f32 %v1008_v12  ;;  %v1009_v22 = vmul.f32 0.5, %v9676_v13  ;;  %v8928_v32 = vpop.eup %8927  ;;  %16285 = vst [vmem:[#allocation7_spill] sm:$0xff] %v9692_v35  ;;  %v9697_v38 = vpop.permute.xlu1 %1344  ;;  %v1113_v39 = vmul.f32 0.5, %v8926_v28  ;;  %v951_v12 = vmax.f32 %v9644_v51, 0.0 }
 0x103   : > { %16286 = vst [vmem:[#allocation8_spill] sm:$0xff] %v9697_v38  ;;  %v952_v28 = vmax.f32 %v9652_v56, 0.0  ;;  %vm1494_vm3 = vcmp.eq.s32.totalorder %v9692_v35, 1  ;;  %vm1495_vm4 = vcmp.eq.s32.totalorder %v9697_v38, 1 }
 0x104   : > { %v8930_v33 = vpop.eup %8929  ;;  %8935 = vtanh.f32 %v1009_v22  ;;  %v1167_v62 = vadd.f32 0.5, %v1113_v39  ;;  %v950_v22 = vmax.f32 %v9649_v54, 0.0 }
 0x105   : > { %v759_v46 = vpop.f32.mrb[12].mxu0  ;;  %v9641_v48 = vpop.f32.mrb[12].mxu1 }
 0x106   : > { %v8313_v47 = vpop.f32.mrb[13].mxu0  ;;  %v8389_v50 = vpop.f32.mrb[13].mxu1  ;;  %v9681_v16 = vadd.f32 %v759_v46, %v9639_v45  ;;  %v1112_v46 = vmul.f32 0.5, %v8928_v32 }
 0x107   : > { %v762_v49 = vpop.f32.mrb[14].mxu0  ;;  %v9646_v53 = vpop.f32.mrb[14].mxu1  ;;  %v1114_v47 = vmul.f32 0.5, %v8930_v33 }
 0x108   : > { %v8314_v52 = vpop.f32.mrb[15].mxu0  ;;  %v8390_v55 = vpop.f32.mrb[15].mxu1  ;;  %v1010_v29 = vmul.f32 0.5, %v9681_v16  ;;  %v9690_v30 = vadd.f32 %v762_v49, %v9639_v45  ;;  %v1166_v10 = vadd.f32 0.5, %v1112_v46  ;;  %v956_v1 = vmax.f32 %v9681_v16, 0.0 }
 0x109   : > { %v8932_v52 = vpop.eup %8931 }
 0x10a   : > { %8937 = vtanh.f32 %v1010_v29  ;;  %v1011_v42 = vmul.f32 0.5, %v9690_v30 }
 0x10c   : > { %8939 = vtanh.f32 %v1011_v42 }
 0x10d   : > { %v767_v61 = vpop.f32.mrb[16].mxu0  ;;  %v9664_v2 = vpop.f32.mrb[16].mxu1 }
 0x10e   : > { %v8317_v0 = vpop.f32.mrb[17].mxu0  ;;  %v8393_v4 = vpop.f32.mrb[17].mxu1  ;;  %v9695_v36 = vadd.f32 %v767_v61, %v9639_v45 }
 0x10f   : > { %v770_v3 = vpop.f32.mrb[18].mxu0  ;;  %v9669_v7 = vpop.f32.mrb[18].mxu1 }
 0x110   : > { %v8318_v6 = vpop.f32.mrb[19].mxu0  ;;  %v8394_v9 = vpop.f32.mrb[19].mxu1  ;;  %v1012_v55 = vmul.f32 0.5, %v9695_v36  ;;  %v9704_v58 = vadd.f32 %v770_v3, %v9639_v45  ;;  %v958_v38 = vmax.f32 %v9695_v36, 0.0 }
 0x111   : > { %v8934_v4 = vpop.eup %8933  ;;  %v9711_v9 = vpop.permute.xlu0 %1347 }
 0x112   : > { %16287 = vst [vmem:[#allocation9_spill] sm:$0xff] %v9711_v9  ;;  %8941 = vtanh.f32 %v1012_v55  ;;  %v1013_v3 = vmul.f32 0.5, %v9704_v58  ;;  %v1116_v29 = vmul.f32 0.5, %v8934_v4  ;;  %v8936_v32 = vpop.eup %8935  ;;  %vm15968_vm5 = vcmp.eq.s32.totalorder %v9711_v9, 1 }
 0x114   : > { %8943 = vtanh.f32 %v1013_v3  ;;  %v1170_v4 = vadd.f32 0.5, %v1116_v29 }
 0x115   : > { %v775_v15 = vpop.f32.mrb[20].mxu0  ;;  %v9683_v18 = vpop.f32.mrb[20].mxu1 }
 0x116   : > { %v8321_v17 = vpop.f32.mrb[21].mxu0  ;;  %v8397_v21 = vpop.f32.mrb[21].mxu1  ;;  %v9709_v6 = vadd.f32 %v775_v15, %v9639_v45 }
 0x117   : > { %v778_v20 = vpop.f32.mrb[22].mxu0  ;;  %v9686_v25 = vpop.f32.mrb[22].mxu1  ;;  %v1168_v17 = vadd.f32 0.5, %v1114_v47  ;;  %v1115_v21 = vmul.f32 0.5, %v8932_v52 }
 0x118   : > { %v8322_v24 = vpop.f32.mrb[23].mxu0  ;;  %v8398_v26 = vpop.f32.mrb[23].mxu1  ;;  %v1014_v33 = vmul.f32 0.5, %v9709_v6  ;;  %v9722_v51 = vadd.f32 %v778_v20, %v9639_v45 }
 0x119   : > { %v9716_v24 = vpop.permute.xlu1 %1350  ;;  %v1221_v26 = vmul.f32 %v1167_v62, %v951_v12  ;;  %v1222_v54 = vmul.f32 %v1168_v17, %v952_v28  ;;  %v1169_v46 = vadd.f32 0.5, %v1115_v21  ;;  %v8938_v52 = vpop.eup %8937  ;;  %v954_v17 = vmax.f32 %v9667_v5, 0.0 }
 0x11a   : > { %16288 = vst [vmem:[#allocation10_spill] sm:$0xff] %v9716_v24  ;;  %8945 = vtanh.f32 %v1014_v33  ;;  %v8940_v28 = vpop.eup %8939  ;;  %vm15967_vm7 = vcmp.eq.s32.totalorder %v9716_v24, 1 }
 0x11b   : > { %v9737_v62 = vsel %vm1491_vm6, %v1221_v26, 0.0  ;;  %v1224_v33 = vmul.f32 %v1170_v4, %v954_v17 }
 0x11d   : > { %v783_v40 = vpop.f32.mrb[24].mxu0  ;;  %v9700_v44 = vpop.f32.mrb[24].mxu1 }
 0x11e   : > { %v8325_v43 = vpop.f32.mrb[25].mxu0  ;;  %v8401_v50 = vpop.f32.mrb[25].mxu1  ;;  %v9729_v56 = vadd.f32 %v783_v40, %v9639_v45  ;;  %v1015_v40 = vmul.f32 0.5, %v9722_v51 }
 0x11f   : > { %v786_v49 = vpop.f32.mrb[26].mxu0  ;;  %v9706_v61 = vpop.f32.mrb[26].mxu1  ;;  %v1220_v43 = vmul.f32 %v1166_v10, %v950_v22  ;;  %v1117_v10 = vmul.f32 0.5, %v8936_v32  ;;  %v9750_v22 = vsel %vm15969_vm1, %v1222_v54, 0.0 }
 0x120   : > { %v8326_v60 = vpop.f32.mrb[27].mxu0  ;;  %v8402_v0 = vpop.f32.mrb[27].mxu1  ;;  %v1016_v29 = vmul.f32 0.5, %v9729_v56  ;;  %v9757_v32 = vadd.f32 %v786_v49, %v9639_v45  ;;  %8947 = vtanh.f32 %v1015_v40  ;;  %v955_v49 = vmax.f32 %v9676_v13, 0.0 }
 0x121   : > { %v9733_v60 = vpop.permute.xlu0 %1353  ;;  %v953_v0 = vmax.f32 %v9662_v63, 0.0  ;;  %v9744_v21 = vsel %vm1490_vm15, %v1220_v43, 0.0  ;;  %v9746_v3 = vpop.permute.xlu1 %1356  ;;  %v1118_v63 = vmul.f32 0.5, %v8938_v52 }
 0x122   : > { %16289 = vst [vmem:[#allocation11_spill] sm:$0xff] %v9733_v60  ;;  %16290 = vst [vmem:[#allocation12_spill] sm:$0xff] %v9746_v3  ;;  %v1598_v5 = vadd.f32 %v9737_v62, %v9744_v21  ;;  %8949 = vtanh.f32 %v1016_v29  ;;  %v1017_v17 = vmul.f32 0.5, %v9757_v32  ;;  %vm15920_vm8 = vcmp.eq.s32.totalorder %v9733_v60, 1 }
 0x123   : > { %v1223_v26 = vmul.f32 %v1169_v46, %v953_v0  ;;  %v1172_v4 = vadd.f32 0.5, %v1118_v63  ;;  %vm15922_vm9 = vcmp.eq.s32.totalorder %v9746_v3, 1 }
 0x124   : > { %v1599_v54 = vadd.f32 %v1598_v5, %v9750_v22  ;;  %8951 = vtanh.f32 %v1017_v17 }
 0x125   : > { %v791_v15 = vpop.f32.mrb[28].mxu0  ;;  %v9724_v42 = vpop.f32.mrb[28].mxu1  ;;  %v9768_v0 = vsel %vm15970_vm2, %v1223_v26, 0.0  ;;  %v1226_v29 = vmul.f32 %v1172_v4, %v956_v1 }
 0x126   : > { %v8329_v39 = vpop.f32.mrb[29].mxu0  ;;  %v8405_v50 = vpop.f32.mrb[29].mxu1  ;;  %v9762_v46 = vadd.f32 %v791_v15, %v9639_v45  ;;  %v9776_v15 = vsel %vm1494_vm3, %v1224_v33, 0.0  ;;  %v1600_v13 = vadd.f32 %v1599_v54, %v9768_v0 }
 0x127   : > { %v794_v47 = vpop.f32.mrb[30].mxu0  ;;  %v9731_v20 = vpop.f32.mrb[30].mxu1  ;;  %v1171_v39 = vadd.f32 0.5, %v1117_v10  ;;  %v1119_v10 = vmul.f32 0.5, %v8940_v28 }
 0x128   : > { %v8330_v55 = vpop.f32.mrb[31].mxu0  ;;  %v8406_v12 = vpop.f32.mrb[31].mxu1  ;;  %v1018_v63 = vmul.f32 0.5, %v9762_v46  ;;  %v9783_v28 = vadd.f32 %v794_v47, %v9639_v45  ;;  %v1601_v33 = vadd.f32 %v1600_v13, %v9776_v15  ;;  %v957_v47 = vmax.f32 %v9690_v30, 0.0 }
 0x129   : > { %v8942_v50 = vpop.eup %8941  ;;  %v9764_v55 = vpop.permute.xlu0 %1359 }
 0x12a   : > { %16291 = vst [vmem:[#allocation13_spill] sm:$0xff] %v9764_v55  ;;  %v9772_v40 = vpop.permute.xlu1 %1362  ;;  %v1120_v26 = vmul.f32 0.5, %v8942_v50  ;;  %v8944_v8 = vpop.eup %8943  ;;  %8953 = vtanh.f32 %v1018_v63  ;;  %v1019_v4 = vmul.f32 0.5, %v9783_v28  ;;  %vm15888_vm10 = vcmp.eq.s32.totalorder %v9764_v55, 1 }
 0x12b   : > { %16292 = vst [vmem:[#allocation14_spill] sm:$0xff] %v9772_v40  ;;  %v8946_v34 = vpop.eup %8945  ;;  %v1121_v1 = vmul.f32 0.5, %v8944_v8  ;;  %vm15882_vm11 = vcmp.eq.s32.totalorder %v9772_v40, 1  ;;  %v964_v40 = vmax.f32 %v9762_v46, 0.0 }
 0x12c   : > { %v1174_v54 = vadd.f32 0.5, %v1120_v26  ;;  %v8948_v14 = vpop.eup %8947  ;;  %8955 = vtanh.f32 %v1019_v4 }
 0x12d   : > { %v799_v43 = vpop.f32.mrb[32].mxu0  ;;  %v1175_v9 = vadd.f32 0.5, %v1121_v1 }
 0x12e   : > { %v8333_v52 = vpop.f32.mrb[33].mxu0  ;;  %v9788_v16 = vadd.f32 %v799_v43, %v9639_v45  ;;  %v9798_v13 = vpop.permute.xlu1 %1368  ;;  %v9802_v43 = vsel %vm15968_vm5, %v1226_v29, 0.0 }
 0x12f   : > { %v802_v12 = vpop.f32.mrb[34].mxu0  ;;  %v1225_v52 = vmul.f32 %v1171_v39, %v955_v49  ;;  %v9790_v39 = vpop.permute.xlu0 %1365  ;;  %16295 = vst [vmem:[#allocation17_spill] sm:$0xff] %v9798_v13  ;;  %16296 = vst [vmem:[#allocation18_spill] sm:$0xff] %v9802_v43  ;;  %vm15856_vm13 = vcmp.eq.s32.totalorder %v9798_v13, 1 }
 0x130   : > { %v8334_v5 = vpop.f32.mrb[35].mxu0  ;;  %16293 = vst [vmem:[#allocation15_spill] sm:$0xff] %v9790_v39  ;;  %v1020_v30 = vmul.f32 0.5, %v9788_v16  ;;  %v9809_v26 = vadd.f32 %v802_v12, %v9639_v45  ;;  %v8950_v29 = vpop.eup %8949  ;;  %v959_v12 = vmax.f32 %v9704_v58, 0.0  ;;  %vm15864_vm12 = vcmp.eq.s32.totalorder %v9790_v39, 1 }
 0x131   : > { %v1173_v5 = vadd.f32 0.5, %v1119_v10  ;;  %v9794_v50 = vsel %vm1495_vm4, %v1225_v52, 0.0  ;;  %v1122_v52 = vmul.f32 0.5, %v8946_v34  ;;  %v966_v13 = vmax.f32 %v9788_v16, 0.0 }
 0x132   : > { %16294 = vst [vmem:[#allocation16_spill] sm:$0xff] %v9794_v50  ;;  %v1602_v8 = vadd.f32 %v1601_v33, %v9794_v50  ;;  %8957 = vtanh.f32 %v1020_v30  ;;  %v9824_v1 = vpop.permute.xlu1 %1374 }
 0x133   : > { %v1227_v17 = vmul.f32 %v1173_v5, %v957_v47  ;;  %v9816_v5 = vpop.permute.xlu0 %1371  ;;  %v1176_v47 = vadd.f32 0.5, %v1122_v52  ;;  %16298 = vst [vmem:[#allocation20_spill] sm:$0xff] %v9824_v1  ;;  %vm15814_vm0 = vcmp.eq.s32.totalorder %v9824_v1, 1 }
 0x134   : > { %v1603_v36 = vadd.f32 %v1602_v8, %v9802_v43  ;;  %16297 = vst [vmem:[#allocation19_spill] sm:$0xff] %v9816_v5  ;;  %v960_v8 = vmax.f32 %v9709_v6, 0.0  ;;  %vm15811_vm14 = vcmp.eq.s32.totalorder %v9816_v5, 1 }
 0x135   : > { %v807_v49 = vpop.f32.mrb[36].mxu0  ;;  %v9820_v33 = vsel %vm15967_vm7, %v1227_v17, 0.0  ;;  %v8952_v17 = vpop.eup %8951 }
 0x136   : > { %v8337_v10 = vpop.f32.mrb[37].mxu0  ;;  %v9814_v34 = vadd.f32 %v807_v49, %v9639_v45  ;;  %v1229_v49 = vmul.f32 %v1175_v9, %v959_v12  ;;  %v1604_v58 = vadd.f32 %v1603_v36, %v9820_v33  ;;  %v1230_v43 = vmul.f32 %v1176_v47, %v960_v8  ;;  %v8954_v50 = vpop.eup %8953 }
 0x137   : > { %v810_v35 = vpop.f32.mrb[38].mxu0  ;;  %v1228_v10 = vmul.f32 %v1174_v54, %v958_v38  ;;  %v1123_v38 = vmul.f32 0.5, %v8948_v14  ;;  %v1021_v54 = vmul.f32 0.5, %v9809_v26  ;;  %v9842_v36 = vpop.permute.xlu0 %1377  ;;  %v961_v12 = vmax.f32 %v9722_v51, 0.0 }
 0x138   : > { %v8338_v63 = vpop.f32.mrb[39].mxu0  ;;  %v1022_v14 = vmul.f32 0.5, %v9814_v34  ;;  %v9835_v52 = vadd.f32 %v810_v35, %v9639_v45  ;;  %16300 = vst [vmem:[#allocation22_spill] sm:$0xff] %v9842_v36  ;;  %v9846_v35 = vsel %vm15922_vm9, %v1229_v49, 0.0  ;;  %v8956_v3 = vpop.eup %8955 }
 0x139   : > { %v9828_v4 = vsel %vm15920_vm8, %v1228_v10, 0.0  ;;  %v1124_v63 = vmul.f32 0.5, %v8950_v29  ;;  %v1177_v60 = vadd.f32 0.5, %v1123_v38  ;;  %8959 = vtanh.f32 %v1021_v54  ;;  %16301 = vst [vmem:[#allocation23_spill] sm:$0xff] %v9846_v35 }
 0x13a   : > { %16299 = vst [vmem:[#allocation21_spill] sm:$0xff] %v9828_v4  ;;  %v1605_v6 = vadd.f32 %v1604_v58, %v9828_v4  ;;  %v1125_v38 = vmul.f32 0.5, %v8952_v17  ;;  %8961 = vtanh.f32 %v1022_v14  ;;  %v1023_v8 = vmul.f32 0.5, %v9835_v52 }
 0x13b   : > { %v1178_v47 = vadd.f32 0.5, %v1124_v63  ;;  %v1231_v54 = vmul.f32 %v1177_v60, %v961_v12  ;;  %v962_v58 = vmax.f32 %v9729_v56, 0.0 }
 0x13c   : > { %v1606_v51 = vadd.f32 %v1605_v6, %v9846_v35  ;;  %v1179_v14 = vadd.f32 0.5, %v1125_v38  ;;  %v8958_v55 = vpop.eup %8957  ;;  %8963 = vtanh.f32 %v1023_v8 }
 0x13d   : > { %v815_v24 = vpop.f32.mrb[40].mxu0  ;;  %v1232_v17 = vmul.f32 %v1178_v47, %v962_v58  ;;  %v9872_v6 = vsel %vm15882_vm11, %v1231_v54, 0.0  ;;  %v1127_v47 = vmul.f32 0.5, %v8956_v3  ;;  %v1128_v54 = vmul.f32 0.5, %v8958_v55 }
 0x13e   : > { %v8341_v30 = vpop.f32.mrb[41].mxu0  ;;  %v9840_v9 = vadd.f32 %v815_v24, %v9639_v45  ;;  %v9854_v24 = vsel %vm15888_vm10, %v1230_v43, 0.0  ;;  %v9868_v43 = vpop.permute.xlu0 %1383 }
 0x13f   : > { %v818_v10 = vpop.f32.mrb[42].mxu0  ;;  %v9850_v30 = vpop.permute.xlu1 %1380  ;;  %16303 = vst [vmem:[#allocation25_spill] sm:$0xff] %v9854_v24  ;;  %v1607_v60 = vadd.f32 %v1606_v51, %v9854_v24  ;;  %16304 = vst [vmem:[#allocation26_spill] sm:$0xff] %v9868_v43 }
 0x140   : > { %v8342_v29 = vpop.f32.mrb[43].mxu0  ;;  %16302 = vst [vmem:[#allocation24_spill] sm:$0xff] %v9850_v30  ;;  %v1024_v49 = vmul.f32 0.5, %v9840_v9  ;;  %v9861_v63 = vadd.f32 %v818_v10, %v9639_v45  ;;  %v963_v10 = vmax.f32 %v9757_v32, 0.0 }
 0x141   : > { %v1126_v29 = vmul.f32 0.5, %v8954_v50  ;;  %v1608_v3 = vadd.f32 %v1607_v60, %v9872_v6  ;;  %v1182_v60 = vadd.f32 0.5, %v1128_v54 }
 0x142   : > { %8965 = vtanh.f32 %v1024_v49  ;;  %v1025_v58 = vmul.f32 0.5, %v9861_v63  ;;  %v9891_v46 = vpop.permute.xlu0 %1389 }
 0x143   : > { %v1180_v12 = vadd.f32 0.5, %v1126_v29  ;;  %v9876_v8 = vpop.permute.xlu1 %1386  ;;  %v8960_v24 = vpop.eup %8959  ;;  %16307 = vst [vmem:[#allocation29_spill] sm:$0xff] %v9891_v46 }
 0x144   : > { %16305 = vst [vmem:[#allocation27_spill] sm:$0xff] %v9876_v8  ;;  %v8962_v35 = vpop.eup %8961  ;;  %8967 = vtanh.f32 %v1025_v58 }
 0x145   : > { %v823_v4 = vpop.f32.mrb[44].mxu0  ;;  %v1234_v49 = vmul.f32 %v1180_v12, %v964_v40 }
 0x146   : > { %v9866_v56 = vadd.f32 %v823_v4, %v9639_v45  ;;  %v8345_v50 = vpop.f32.mrb[45].mxu0  ;;  %v9880_v4 = vsel %vm15864_vm12, %v1232_v17, 0.0 }
 0x147   : > { %v826_v38 = vpop.f32.mrb[46].mxu0  ;;  %16306 = vst [vmem:[#allocation28_spill] sm:$0xff] %v9880_v4  ;;  %v1233_v50 = vmul.f32 %v1179_v14, %v963_v10  ;;  %v1609_v17 = vadd.f32 %v1608_v3, %v9880_v4  ;;  %v965_v14 = vmax.f32 %v9783_v28, 0.0  ;;  %v1129_v10 = vmul.f32 0.5, %v8960_v24  ;;  %v9902_v3 = vpop.permute.xlu1 %1392 }
 0x148   : > { %v8346_v51 = vpop.f32.mrb[47].mxu0  ;;  %v1026_v32 = vmul.f32 0.5, %v9866_v56  ;;  %v9887_v29 = vadd.f32 %v826_v38, %v9639_v45  ;;  %16309 = vst [vmem:[#allocation31_spill] sm:$0xff] %v9902_v3  ;;  %v9906_v58 = vsel %vm15811_vm14, %v1234_v49, 0.0  ;;  %v1130_v28 = vmul.f32 0.5, %v8962_v35  ;;  %v8964_v24 = vpop.eup %8963 }
 0x149   : > { %v1181_v51 = vadd.f32 0.5, %v1127_v47  ;;  %v9895_v55 = vsel %vm15856_vm13, %v1233_v50, 0.0  ;;  %16310 = vst [vmem:[#allocation32_spill] sm:$0xff] %v9906_v58  ;;  %v1236_v4 = vmul.f32 %v1182_v60, %v966_v13  ;;  %v1183_v5 = vadd.f32 0.5, %v1129_v10  ;;  %v9917_v35 = vpop.permute.xlu0 %1395 }
 0x14a   : > { %16308 = vst [vmem:[#allocation30_spill] sm:$0xff] %v9895_v55  ;;  %8969 = vtanh.f32 %v1026_v32  ;;  %v1027_v40 = vmul.f32 0.5, %v9887_v29  ;;  %v1610_v32 = vadd.f32 %v1609_v17, %v9895_v55  ;;  %vm15819_vm14 = vcmp.eq.s32.totalorder %v9842_v36, 1  ;;  %16311 = vst [vmem:[#allocation33_spill] sm:$0xff] %v9917_v35 }
 0x14b   : > { %v1235_v50 = vmul.f32 %v1181_v51, %v965_v14  ;;  %v967_v17 = vmax.f32 %v9809_v26, 0.0  ;;  %v1184_v14 = vadd.f32 0.5, %v1130_v28  ;;  %v9925_v13 = vpop.permute.xlu1 %1398  ;;  %v9929_v60 = vsel %vm15819_vm14, %v1236_v4, 0.0 }
 0x14c   : > { %v8966_v49 = vpop.eup %8965  ;;  %v1611_v16 = vadd.f32 %v1610_v32, %v9906_v58  ;;  %8971 = vtanh.f32 %v1027_v40  ;;  %16312 = vst [vmem:[#allocation34_spill] sm:$0xff] %v9925_v13  ;;  %16313 = vst [vmem:[#allocation35_spill] sm:$0xff] %v9929_v60  ;;  %v968_v40 = vmax.f32 %v9814_v34, 0.0  ;;  %vm15826_vm14 = vcmp.eq.s32.totalorder %v9868_v43, 1 }
 0x14d   : > { %v831_v38 = vpop.f32.mrb[48].mxu0  ;;  %v9921_v51 = vsel %vm15814_vm0, %v1235_v50, 0.0  ;;  %v1237_v10 = vmul.f32 %v1183_v5, %v967_v17  ;;  %v1132_v32 = vmul.f32 0.5, %v8966_v49  ;;  %vm15820_vm0 = vcmp.eq.s32.totalorder %v9850_v30, 1  ;;  %v9942_v17 = vpop.permute.xlu0 %1401 }
 0x14e   : > { %v9900_v12 = vadd.f32 %v831_v38, %v9639_v45  ;;  %v8349_v47 = vpop.f32.mrb[49].mxu0  ;;  %v8968_v50 = vpop.eup %8967  ;;  %v1612_v26 = vadd.f32 %v1611_v16, %v9921_v51  ;;  %16314 = vst [vmem:[#allocation36_spill] sm:$0xff] %v9942_v17  ;;  %v969_v16 = vmax.f32 %v9835_v52, 0.0 }
 0x14f   : > { %v834_v54 = vpop.f32.mrb[50].mxu0 }
 0x150   : > { %v1028_v38 = vmul.f32 0.5, %v9900_v12  ;;  %v9913_v47 = vadd.f32 %v834_v54, %v9639_v45  ;;  %v8350_v39 = vpop.f32.mrb[51].mxu0  ;;  %v1131_v54 = vmul.f32 0.5, %v8964_v24  ;;  %v1613_v4 = vadd.f32 %v1612_v26, %v9929_v60 }
 0x152   : > { %8973 = vtanh.f32 %v1028_v38  ;;  %v1029_v39 = vmul.f32 0.5, %v9913_v47  ;;  %v1238_v38 = vmul.f32 %v1184_v14, %v968_v40  ;;  %v1185_v58 = vadd.f32 0.5, %v1131_v54  ;;  %v9951_v40 = vpop.permute.xlu1 %1404 }
 0x153   : > { %v1186_v14 = vadd.f32 0.5, %v1132_v32  ;;  %v1133_v54 = vmul.f32 0.5, %v8968_v50  ;;  %16316 = vst [vmem:[#allocation38_spill] sm:$0xff] %v9951_v40 }
 0x154   : > { %v8970_v36 = vpop.eup %8969  ;;  %8975 = vtanh.f32 %v1029_v39  ;;  %v1239_v26 = vmul.f32 %v1185_v58, %v969_v16  ;;  %v9964_v58 = vpop.permute.xlu0 %1407 }
 0x155   : > { %v839_v1 = vpop.f32.mrb[52].mxu0  ;;  %v1187_v50 = vadd.f32 0.5, %v1133_v54  ;;  %16318 = vst [vmem:[#allocation40_spill] sm:$0xff] %v9964_v58 }
 0x156   : > { %v9935_v28 = vadd.f32 %v839_v1, %v9639_v45  ;;  %v8353_v24 = vpop.f32.mrb[53].mxu0  ;;  %v9946_v1 = vsel %vm15820_vm0, %v1237_v10, 0.0  ;;  %v1134_v10 = vmul.f32 0.5, %v8970_v36  ;;  %vm15831_vm0 = vcmp.eq.s32.totalorder %v9876_v8, 1 }
 0x157   : > { %v842_v55 = vpop.f32.mrb[54].mxu0  ;;  %16315 = vst [vmem:[#allocation37_spill] sm:$0xff] %v9946_v1  ;;  %v970_v24 = vmax.f32 %v9840_v9, 0.0  ;;  %v1614_v52 = vadd.f32 %v1613_v4, %v9946_v1  ;;  %v9968_v9 = vsel %vm15831_vm0, %v1239_v26, 0.0  ;;  %v971_v36 = vmax.f32 %v9861_v63, 0.0 }
 0x158   : > { %v1030_v34 = vmul.f32 0.5, %v9935_v28  ;;  %v9940_v5 = vadd.f32 %v842_v55, %v9639_v45  ;;  %v8354_v49 = vpop.f32.mrb[55].mxu0  ;;  %v9955_v55 = vsel %vm15826_vm14, %v1238_v38, 0.0  ;;  %v1188_v4 = vadd.f32 0.5, %v1134_v10 }
 0x159   : > { %16317 = vst [vmem:[#allocation39_spill] sm:$0xff] %v9955_v55  ;;  %v8972_v49 = vpop.eup %8971  ;;  %v1240_v32 = vmul.f32 %v1186_v14, %v970_v24  ;;  %v1615_v60 = vadd.f32 %v1614_v52, %v9955_v55  ;;  %vm15832_vm14 = vcmp.eq.s32.totalorder %v9891_v46, 1  ;;  %v9976_v52 = vpop.permute.xlu1 %1410  ;;  %v1241_v26 = vmul.f32 %v1187_v50, %v971_v36 }
 0x15a   : > { %8977 = vtanh.f32 %v1030_v34  ;;  %v1031_v39 = vmul.f32 0.5, %v9940_v5  ;;  %v1135_v16 = vmul.f32 0.5, %v8972_v49  ;;  %16319 = vst [vmem:[#allocation41_spill] sm:$0xff] %v9976_v52  ;;  %v972_v63 = vmax.f32 %v9866_v56, 0.0 }
 0x15b   : > { %vm15838_vm0 = vcmp.eq.s32.totalorder %v9902_v3, 1 }
 0x15c   : > { %v8974_v30 = vpop.eup %8973  ;;  %8979 = vtanh.f32 %v1031_v39  ;;  %v1242_v55 = vmul.f32 %v1188_v4, %v972_v63  ;;  %v9991_v56 = vsel %vm15838_vm0, %v1241_v26, 0.0  ;;  %v974_v26 = vmax.f32 %v9900_v12, 0.0 }
 0x15d   : > { %v847_v34 = vpop.f32.mrb[56].mxu0  ;;  %v1136_v10 = vmul.f32 0.5, %v8974_v30  ;;  %v973_v30 = vmax.f32 %v9887_v29, 0.0  ;;  %vm15842_vm0 = vcmp.eq.s32.totalorder %v9925_v13, 1 }
 0x15e   : > { %v9962_v43 = vadd.f32 %v847_v34, %v9639_v45  ;;  %v8357_v38 = vpop.f32.mrb[57].mxu0  ;;  %v9980_v34 = vsel %vm15832_vm14, %v1240_v32, 0.0  ;;  %v8976_v49 = vpop.eup %8975  ;;  %vm15839_vm14 = vcmp.eq.s32.totalorder %v9917_v35, 1 }
 0x15f   : > { %v850_v14 = vpop.f32.mrb[58].mxu0  ;;  %16320 = vst [vmem:[#allocation42_spill] sm:$0xff] %v9980_v34  ;;  %v1616_v38 = vadd.f32 %v1615_v60, %v9968_v9  ;;  %v9987_v32 = vpop.permute.xlu0 %1413  ;;  %v1190_v60 = vadd.f32 0.5, %v1136_v10  ;;  %v1137_v50 = vmul.f32 0.5, %v8976_v49 }
 0x160   : > { %v1032_v54 = vmul.f32 0.5, %v9962_v43  ;;  %v9974_v39 = vadd.f32 %v850_v14, %v9639_v45  ;;  %v8358_v24 = vpop.f32.mrb[59].mxu0  ;;  %v1189_v14 = vadd.f32 0.5, %v1135_v16  ;;  %16321 = vst [vmem:[#allocation43_spill] sm:$0xff] %v9987_v32 }
 0x161   : > { %v1617_v24 = vadd.f32 %v1616_v38, %v9980_v34  ;;  %v1244_v46 = vmul.f32 %v1190_v60, %v974_v26  ;;  %v1191_v34 = vadd.f32 0.5, %v1137_v50  ;;  %v976_v26 = vmax.f32 %v9935_v28, 0.0 }
 0x162   : > { %8981 = vtanh.f32 %v1032_v54  ;;  %v1033_v8 = vmul.f32 0.5, %v9974_v39  ;;  %v9998_v54 = vpop.permute.xlu1 %1416  ;;  %v1243_v63 = vmul.f32 %v1189_v14, %v973_v30 }
 0x163   : > { %16322 = vst [vmem:[#allocation44_spill] sm:$0xff] %v9998_v54  ;;  %v1618_v49 = vadd.f32 %v1617_v24, %v9991_v56  ;;  %v975_v24 = vmax.f32 %v9913_v47, 0.0  ;;  %v10030_v47 = vadd.f32 %v9621_v19, %v9639_v45  ;;  %vm15870_vm13 = vcmp.eq.s32.totalorder %v9998_v54, 1 }
 0x164   : > { %v8978_v1 = vpop.eup %8977  ;;  %8983 = vtanh.f32 %v1033_v8  ;;  %v10002_v8 = vsel %vm15839_vm14, %v1242_v55, 0.0  ;;  %v10017_v14 = vsel %vm15842_vm0, %v1243_v63, 0.0  ;;  %vm15845_vm14 = vcmp.eq.s32.totalorder %v9942_v17, 1 }
 0x165   : > { %v855_v36 = vpop.f32.mrb[60].mxu0  ;;  %v1138_v38 = vmul.f32 0.5, %v8978_v1  ;;  %v1619_v55 = vadd.f32 %v1618_v49, %v10002_v8  ;;  %v10013_v1 = vpop.permute.xlu0 %1419  ;;  %16324 = vst [vmem:[#allocation46_spill] sm:$0xff] %v10017_v14  ;;  %v1245_v50 = vmul.f32 %v1191_v34, %v975_v24  ;;  %vm15848_vm0 = vcmp.eq.s32.totalorder %v9951_v40, 1 }
 0x166   : > { %v9996_v4 = vadd.f32 %v855_v36, %v9639_v45  ;;  %v8361_v16 = vpop.f32.mrb[61].mxu0  ;;  %v8980_v10 = vpop.eup %8979  ;;  %16323 = vst [vmem:[#allocation45_spill] sm:$0xff] %v10013_v1 }
 0x167   : > { %v858_v29 = vpop.f32.mrb[62].mxu0  ;;  %v1192_v30 = vadd.f32 0.5, %v1138_v38  ;;  %v10021_v60 = vpop.permute.xlu1 %1422  ;;  %v1620_v38 = vadd.f32 %v1619_v55, %v10017_v14 }
 0x168   : > { %v1034_v3 = vmul.f32 0.5, %v9996_v4  ;;  %v10008_v36 = vadd.f32 %v858_v29, %v9639_v45  ;;  %v8362_v16 = vpop.f32.mrb[63].mxu0  ;;  %v1139_v29 = vmul.f32 0.5, %v8980_v10  ;;  %16325 = vst [vmem:[#allocation47_spill] sm:$0xff] %v10021_v60 }
 0x169   : > { %v10043_v55 = vpop.permute.xlu0 %1425 }
 0x16a   : > { %8985 = vtanh.f32 %v1034_v3  ;;  %v1035_v12 = vmul.f32 0.5, %v10008_v36  ;;  %v10025_v3 = vsel %vm15845_vm14, %v1244_v46, 0.0  ;;  %v1246_v46 = vmul.f32 %v1192_v30, %v976_v26  ;;  %16327 = vst [vmem:[#allocation49_spill] sm:$0xff] %v10043_v55 }
 0x16b   : > { %16326 = vst [vmem:[#allocation48_spill] sm:$0xff] %v10025_v3  ;;  %v1193_v17 = vadd.f32 0.5, %v1139_v29  ;;  %vm15855_vm14 = vcmp.eq.s32.totalorder %v9964_v58, 1  ;;  %v1621_v28 = vadd.f32 %v1620_v38, %v10025_v3  ;;  %v977_v30 = vmax.f32 %v9940_v5, 0.0 }
 0x16c   : > { %v8982_v16 = vpop.eup %8981  ;;  %8987 = vtanh.f32 %v1035_v12  ;;  %v10053_v38 = vadd.f32 %v9623_v23, %v9639_v45  ;;  %v10060_v40 = vsel %vm15855_vm14, %v1246_v46, 0.0  ;;  %v978_v5 = vmax.f32 %v9962_v43, 0.0 }
 0x16d   : > { %v1140_v49 = vmul.f32 0.5, %v8982_v16  ;;  %v863_v63 = vpop.f32.mrb[64].mxu0  ;;  %16329 = vst [vmem:[#allocation51_spill] sm:$0xff] %v10060_v40  ;;  %v10067_v23 = vadd.f32 %v9625_v27, %v9639_v45  ;;  %vm15863_vm14 = vcmp.eq.s32.totalorder %v9987_v32, 1  ;;  %vm15880_vm12 = vcmp.eq.s32.totalorder %v10043_v55, 1 }
 0x16e   : > { %v8984_v13 = vpop.eup %8983  ;;  %v10034_v10 = vadd.f32 %v863_v63, %v9639_v45  ;;  %v8365_v12 = vpop.f32.mrb[65].mxu0  ;;  %v10047_v63 = vsel %vm15848_vm0, %v1245_v50, 0.0  ;;  %v1247_v50 = vmul.f32 %v1193_v17, %v977_v30  ;;  %vm15859_vm0 = vcmp.eq.s32.totalorder %v9976_v52, 1 }
 0x16f   : > { %v866_v34 = vpop.f32.mrb[66].mxu0  ;;  %v1194_v29 = vadd.f32 0.5, %v1140_v49  ;;  %v1141_v26 = vmul.f32 0.5, %v8984_v13  ;;  %v1042_v12 = vmul.f32 0.5, %v10030_v47  ;;  %v1622_v13 = vadd.f32 %v1621_v28, %v10047_v63  ;;  %v10074_v28 = vpop.permute.xlu0 %1431 }
 0x170   : > { %v1036_v24 = vmul.f32 0.5, %v10034_v10  ;;  %v10041_v19 = vadd.f32 %v866_v34, %v9639_v45  ;;  %v8366_v16 = vpop.f32.mrb[67].mxu0  ;;  %v1043_v17 = vmul.f32 0.5, %v10053_v38  ;;  %16330 = vst [vmem:[#allocation52_spill] sm:$0xff] %v10074_v28  ;;  %v10078_v27 = vsel %vm15859_vm0, %v1247_v50, 0.0 }
 0x171   : > { %v10056_v16 = vpop.permute.xlu1 %1428  ;;  %v1195_v35 = vadd.f32 0.5, %v1141_v26  ;;  %v1623_v43 = vadd.f32 %v1622_v13, %v10060_v40  ;;  %16331 = vst [vmem:[#allocation53_spill] sm:$0xff] %v10078_v27  ;;  %v1044_v13 = vmul.f32 0.5, %v10067_v23  ;;  %v10097_v50 = vadd.f32 %v9627_v31, %v9639_v45 }
 0x172   : > { %8989 = vtanh.f32 %v1036_v24  ;;  %v1037_v34 = vmul.f32 0.5, %v10041_v19  ;;  %16328 = vst [vmem:[#allocation50_spill] sm:$0xff] %v10056_v16  ;;  %v1248_v24 = vmul.f32 %v1194_v29, %v978_v5  ;;  %v979_v29 = vmax.f32 %v9974_v39, 0.0 }
 0x173   : > { %v1624_v52 = vadd.f32 %v1623_v43, %v10078_v27  ;;  %vm15869_vm0 = vcmp.eq.s32.totalorder %v10013_v1, 1  ;;  %v10107_v31 = vadd.f32 %v9631_v37, %v9639_v45 }
 0x174   : > { %v8986_v49 = vpop.eup %8985  ;;  %8991 = vtanh.f32 %v1037_v34  ;;  %v10092_v39 = vsel %vm15863_vm14, %v1248_v24, 0.0  ;;  %vm15875_vm14 = vcmp.eq.s32.totalorder %v10021_v60, 1 }
 0x175   : > { %v1142_v3 = vmul.f32 0.5, %v8986_v49  ;;  %v871_v14 = vpop.f32.mrb[68].mxu0  ;;  %8993 = vtanh.f32 %v1042_v12  ;;  %16333 = vst [vmem:[#allocation55_spill] sm:$0xff] %v10092_v39 }
 0x176   : > { %v8988_v58 = vpop.eup %8987  ;;  %v10072_v46 = vadd.f32 %v871_v14, %v9639_v45  ;;  %v8369_v30 = vpop.f32.mrb[69].mxu0 }
 0x177   : > { %v1196_v26 = vadd.f32 0.5, %v1142_v3  ;;  %v1143_v34 = vmul.f32 0.5, %v8988_v58  ;;  %v874_v5 = vpop.f32.mrb[70].mxu0  ;;  %v10088_v30 = vpop.permute.xlu1 %1434  ;;  %v1249_v58 = vmul.f32 %v1195_v35, %v979_v29  ;;  %v980_v3 = vmax.f32 %v9996_v4, 0.0 }
 0x178   : > { %v1038_v12 = vmul.f32 0.5, %v10072_v46  ;;  %v10085_v14 = vadd.f32 %v874_v5, %v9639_v45  ;;  %v8370_v49 = vpop.f32.mrb[71].mxu0  ;;  %16332 = vst [vmem:[#allocation54_spill] sm:$0xff] %v10088_v30  ;;  %v1625_v35 = vadd.f32 %v1624_v52, %v10092_v39  ;;  %v10109_v4 = vpop.permute.xlu0 %1437  ;;  %v982_v52 = vmax.f32 %v10034_v10, 0.0 }
 0x179   : > { %v1250_v49 = vmul.f32 %v1196_v26, %v980_v3  ;;  %v1197_v40 = vadd.f32 0.5, %v1143_v34  ;;  %16334 = vst [vmem:[#allocation56_spill] sm:$0xff] %v10109_v4  ;;  %v10113_v24 = vsel %vm15870_vm13, %v1249_v58, 0.0  ;;  %v1045_v34 = vmul.f32 0.5, %v10097_v50 }
 0x17a   : > { %8995 = vtanh.f32 %v1038_v12  ;;  %v1039_v5 = vmul.f32 0.5, %v10085_v14  ;;  %16335 = vst [vmem:[#allocation57_spill] sm:$0xff] %v10113_v24  ;;  %v1626_v10 = vadd.f32 %v1625_v35, %v10113_v24  ;;  %vm15883_vm13 = vcmp.eq.s32.totalorder %v10074_v28, 1 }
 0x17b   : > { %8997 = vtanh.f32 %v1043_v17  ;;  %v981_v17 = vmax.f32 %v10008_v36, 0.0  ;;  %v10121_v3 = vpop.permute.xlu1 %1440  ;;  %v10125_v58 = vsel %vm15869_vm0, %v1250_v49, 0.0  ;;  %v1046_v49 = vmul.f32 0.5, %v10107_v31 }
 0x17c   : > { %v8990_v32 = vpop.eup %8989  ;;  %8999 = vtanh.f32 %v1039_v5  ;;  %16336 = vst [vmem:[#allocation58_spill] sm:$0xff] %v10121_v3  ;;  %16337 = vst [vmem:[#allocation59_spill] sm:$0xff] %v10125_v58  ;;  %vm15881_vm0 = vcmp.eq.s32.totalorder %v10056_v16, 1  ;;  %v10212_v28 = vadd.f32 %v9700_v44, %v9639_v45  ;;  %v10226_v44 = vadd.f32 %v9706_v61, %v9639_v45 }
 0x17d   : > { %v1144_v43 = vmul.f32 0.5, %v8990_v32  ;;  %v879_v29 = vpop.f32.mrb[72].mxu0  ;;  %9001 = vtanh.f32 %v1044_v13  ;;  %v1251_v5 = vmul.f32 %v1197_v40, %v981_v17  ;;  %v10129_v13 = vadd.f32 %v9633_v41, %v9639_v45 }
 0x17e   : > { %v8992_v26 = vpop.eup %8991  ;;  %v10119_v12 = vadd.f32 %v879_v29, %v9639_v45  ;;  %v8373_v37 = vpop.f32.mrb[73].mxu0  ;;  %v1627_v41 = vadd.f32 %v1626_v10, %v10125_v58  ;;  %v984_v58 = vmax.f32 %v10072_v46, 0.0  ;;  %v985_v46 = vmax.f32 %v10085_v14, 0.0 }
 0x17f   : > { %v1198_v36 = vadd.f32 0.5, %v1144_v43  ;;  %v1145_v32 = vmul.f32 0.5, %v8992_v26  ;;  %v882_v54 = vpop.f32.mrb[74].mxu0  ;;  %v8994_v39 = vpop.eup %8993  ;;  %v10140_v43 = vadd.f32 %v9641_v48, %v9639_v45  ;;  %v10155_v48 = vadd.f32 %v9646_v53, %v9639_v45 }
 0x180   : > { %v1040_v29 = vmul.f32 0.5, %v10119_v12  ;;  %v10134_v37 = vadd.f32 %v882_v54, %v9639_v45  ;;  %v8374_v27 = vpop.f32.mrb[75].mxu0  ;;  %v1150_v26 = vmul.f32 0.5, %v8994_v39  ;;  %v10144_v54 = vpop.permute.xlu0 %1443  ;;  %v10168_v53 = vadd.f32 %v9664_v2, %v9639_v45 }
 0x181   : > { %v1252_v40 = vmul.f32 %v1198_v36, %v982_v52  ;;  %v1199_v17 = vadd.f32 0.5, %v1145_v32  ;;  %16338 = vst [vmem:[#allocation60_spill] sm:$0xff] %v10144_v54  ;;  %v10148_v27 = vsel %vm15875_vm14, %v1251_v5, 0.0  ;;  %v983_v52 = vmax.f32 %v10041_v19, 0.0  ;;  %v10158_v10 = vpop.permute.xlu1 %1446 }
 0x182   : > { %9003 = vtanh.f32 %v1040_v29  ;;  %v1041_v35 = vmul.f32 0.5, %v10134_v37  ;;  %v1047_v32 = vmul.f32 0.5, %v10129_v13  ;;  %16339 = vst [vmem:[#allocation61_spill] sm:$0xff] %v10158_v10  ;;  %v1048_v1 = vmul.f32 0.5, %v10140_v43 }
 0x183   : > { %9005 = vtanh.f32 %v1045_v34  ;;  %v988_v34 = vmax.f32 %v10030_v47, 0.0  ;;  %v10162_v5 = vsel %vm15880_vm12, %v1252_v40, 0.0  ;;  %v1253_v19 = vmul.f32 %v1199_v17, %v983_v52 }
 0x184   : > { %v8996_v36 = vpop.eup %8995  ;;  %9007 = vtanh.f32 %v1041_v35  ;;  %16340 = vst [vmem:[#allocation62_spill] sm:$0xff] %v10162_v5  ;;  %vm1525_vm14 = vcmp.eq.s32.totalorder %v10088_v30, 1  ;;  %v1628_v47 = vadd.f32 %v1627_v41, %v10148_v27  ;;  %v1204_v35 = vadd.f32 0.5, %v1150_v26 }
 0x185   : > { %v8998_v39 = vpop.eup %8997  ;;  %v1146_v29 = vmul.f32 0.5, %v8996_v36  ;;  %9009 = vtanh.f32 %v1046_v49  ;;  %v1049_v17 = vmul.f32 0.5, %v10155_v48  ;;  %v10175_v49 = vadd.f32 %v9669_v7, %v9639_v45  ;;  %v10178_v36 = vpop.permute.xlu0 %1449 }
 0x186   : > { %v9000_v60 = vpop.eup %8999  ;;  %9011 = vtanh.f32 %v1047_v32  ;;  %v1629_v52 = vadd.f32 %v1628_v47, %v10162_v5  ;;  %16341 = vst [vmem:[#allocation63_spill] sm:$0xff] %v10178_v36  ;;  %v10182_v2 = vsel %vm15881_vm0, %v1253_v19, 0.0  ;;  %v989_v26 = vmax.f32 %v10053_v38, 0.0  ;;  %v10193_v19 = vpop.permute.xlu1 %1452 }
 0x187   : > { %v1200_v55 = vadd.f32 0.5, %v1146_v29  ;;  %v1147_v40 = vmul.f32 0.5, %v9000_v60  ;;  %v9002_v24 = vpop.eup %9001  ;;  %16342 = vst [vmem:[#allocation64_spill] sm:$0xff] %v10182_v2  ;;  %9013 = vtanh.f32 %v1048_v1  ;;  %vm15966_vm12 = vcmp.eq.s32.totalorder %v10109_v4, 1  ;;  %16343 = vst [vmem:[#allocation65_spill] sm:$0xff] %v10193_v19 }
 0x188   : > { %v1050_v7 = vmul.f32 0.5, %v10168_v53  ;;  %v10190_v32 = vadd.f32 %v9683_v18, %v9639_v45  ;;  %v1151_v29 = vmul.f32 0.5, %v8998_v39  ;;  %v990_v47 = vmax.f32 %v10067_v23, 0.0 }
 0x189   : > { %v1254_v41 = vmul.f32 %v1200_v55, %v984_v58  ;;  %v1201_v60 = vadd.f32 0.5, %v1147_v40  ;;  %9015 = vtanh.f32 %v1049_v17  ;;  %v1051_v1 = vmul.f32 0.5, %v10175_v49  ;;  %v10215_v16 = vpop.permute.xlu0 %1455 }
 0x18a   : > { %vm15909_vm0 = vcmp.eq.s32.totalorder %v10121_v3, 1  ;;  %vm15896_vm11 = vcmp.eq.s32.totalorder %v10144_v54, 1  ;;  %v10204_v18 = vadd.f32 %v9686_v25, %v9639_v45  ;;  %v1630_v23 = vadd.f32 %v1629_v52, %v10182_v2  ;;  %16345 = vst [vmem:[#allocation67_spill] sm:$0xff] %v10215_v16 }
 0x18b   : > { %v10197_v55 = vsel %vm15883_vm13, %v1254_v41, 0.0  ;;  %v1255_v14 = vmul.f32 %v1201_v60, %v985_v46  ;;  %v1258_v39 = vmul.f32 %v1204_v35, %v988_v34  ;;  %v1152_v40 = vmul.f32 0.5, %v9002_v24 }
 0x18c   : > { %16344 = vst [vmem:[#allocation66_spill] sm:$0xff] %v10197_v55  ;;  %v9004_v38 = vpop.eup %9003  ;;  %v991_v41 = vmax.f32 %v10097_v50, 0.0  ;;  %9017 = vtanh.f32 %v1050_v7  ;;  %v1052_v17 = vmul.f32 0.5, %v10190_v32  ;;  %vm15897_vm13 = vcmp.eq.s32.totalorder %v10158_v10, 1 }
 0x18d   : > { %v9006_v58 = vpop.eup %9005  ;;  %v1148_v46 = vmul.f32 0.5, %v9004_v38  ;;  %v1631_v25 = vadd.f32 %v1630_v23, %v10197_v55  ;;  %v10219_v24 = vsel %vm1525_vm14, %v1255_v14, 0.0  ;;  %v986_v50 = vmax.f32 %v10119_v12, 0.0  ;;  %v10228_v55 = vpop.permute.xlu1 %1458 }
 0x18e   : > { %v9008_v60 = vpop.eup %9007  ;;  %v1205_v7 = vadd.f32 0.5, %v1151_v29  ;;  %9019 = vtanh.f32 %v1051_v1  ;;  %v1053_v38 = vmul.f32 0.5, %v10204_v18  ;;  %vm15898_vm10 = vcmp.eq.s32.totalorder %v10178_v36, 1  ;;  %16346 = vst [vmem:[#allocation68_spill] sm:$0xff] %v10228_v55 }
 0x18f   : > { %v1202_v34 = vadd.f32 0.5, %v1148_v46  ;;  %v1149_v35 = vmul.f32 0.5, %v9008_v60  ;;  %v9010_v52 = vpop.eup %9009  ;;  %v1153_v23 = vmul.f32 0.5, %v9006_v58  ;;  %v987_v30 = vmax.f32 %v10134_v37, 0.0 }
 0x190   : > { %v9012_v46 = vpop.eup %9011  ;;  %9021 = vtanh.f32 %v1052_v17  ;;  %v1054_v29 = vmul.f32 0.5, %v10212_v28  ;;  %v10234_v1 = vadd.f32 %v9724_v42, %v9639_v45  ;;  %v1632_v60 = vadd.f32 %v1631_v25, %v10219_v24 }
 0x191   : > { %v1256_v14 = vmul.f32 %v1202_v34, %v986_v50  ;;  %v1203_v12 = vadd.f32 0.5, %v1149_v35  ;;  %v1206_v2 = vadd.f32 0.5, %v1152_v40  ;;  %v1154_v61 = vmul.f32 0.5, %v9010_v52  ;;  %v9014_v34 = vpop.eup %9013  ;;  %v10247_v40 = vpop.permute.xlu0 %1461 }
 0x192   : > { %9023 = vtanh.f32 %v1053_v38  ;;  %v1055_v37 = vmul.f32 0.5, %v10226_v44  ;;  %v10244_v17 = vadd.f32 %v9731_v20, %v9639_v45  ;;  %v1259_v35 = vmul.f32 %v1205_v7, %v989_v26  ;;  %16347 = vst [vmem:[#allocation69_spill] sm:$0xff] %v10247_v40  ;;  %v10260_v7 = vpop.permute.xlu1 %1464 }
 0x193   : > { %v10239_v58 = vsel %vm15966_vm12, %v1256_v14, 0.0  ;;  %v1257_v50 = vmul.f32 %v1203_v12, %v987_v30  ;;  %v1207_v5 = vadd.f32 0.5, %v1153_v23  ;;  %v1155_v25 = vmul.f32 0.5, %v9012_v46  ;;  %v9016_v30 = vpop.eup %9015  ;;  %16348 = vst [vmem:[#allocation70_spill] sm:$0xff] %v10260_v7 }
 0x194   : > { %v1633_v42 = vadd.f32 %v1632_v60, %v10239_v58  ;;  %v992_v38 = vmax.f32 %v10107_v31, 0.0  ;;  %9025 = vtanh.f32 %v1054_v29  ;;  %v1056_v14 = vmul.f32 0.5, %v10234_v1 }
 0x195   : > { %v10251_v52 = vsel %vm15909_vm0, %v1257_v50, 0.0  ;;  %v1260_v20 = vmul.f32 %v1206_v2, %v990_v47  ;;  %v1208_v12 = vadd.f32 0.5, %v1154_v61  ;;  %v1156_v60 = vmul.f32 0.5, %v9014_v34 }
 0x196   : > { %v1634_v45 = vadd.f32 %v1633_v42, %v10251_v52  ;;  %v10258_v26 = vsel %vm15896_vm11, %v1258_v39, 0.0  ;;  %v9018_v23 = vpop.eup %9017  ;;  %v993_v46 = vmax.f32 %v10129_v13, 0.0  ;;  %9027 = vtanh.f32 %v1055_v37 }
 0x197   : > { %v1057_v31 = vmul.f32 0.5, %v10244_v17  ;;  %v1261_v50 = vmul.f32 %v1207_v5, %v991_v41  ;;  %v1209_v3 = vadd.f32 0.5, %v1155_v25  ;;  %v1157_v42 = vmul.f32 0.5, %v9016_v30  ;;  %v10276_v41 = vpop.permute.xlu0 %1467 }
 0x198   : > { %v1635_v29 = vadd.f32 %v1634_v45, %v10258_v26  ;;  %v10267_v2 = vsel %vm15897_vm13, %v1259_v35, 0.0  ;;  %v9020_v47 = vpop.eup %9019  ;;  %v994_v39 = vmax.f32 %v10140_v43, 0.0  ;;  %vm15899_vm11 = vcmp.eq.s32.totalorder %v10193_v19, 1  ;;  %16349 = vst [vmem:[#allocation71_spill] sm:$0xff] %v10276_v41 }
 0x199   : > { %9029 = vtanh.f32 %v1056_v14  ;;  %v1262_v61 = vmul.f32 %v1208_v12, %v992_v38  ;;  %v1210_v34 = vadd.f32 0.5, %v1156_v60  ;;  %v1158_v37 = vmul.f32 0.5, %v9018_v23  ;;  %v10285_v12 = vpop.permute.xlu1 %1470 }
 0x19a   : > { %v1636_v13 = vadd.f32 %v1635_v29, %v10267_v2  ;;  %v10274_v5 = vsel %vm15898_vm10, %v1260_v20, 0.0  ;;  %v9022_v25 = vpop.eup %9021  ;;  %v995_v35 = vmax.f32 %v10155_v48, 0.0  ;;  %vm15900_vm13 = vcmp.eq.s32.totalorder %v10215_v16, 1  ;;  %16350 = vst [vmem:[#allocation72_spill] sm:$0xff] %v10285_v12 }
 0x19b   : > { %9031 = vtanh.f32 %v1057_v31  ;;  %v1263_v30 = vmul.f32 %v1209_v3, %v993_v46  ;;  %v1211_v14 = vadd.f32 0.5, %v1157_v42  ;;  %v1159_v45 = vmul.f32 0.5, %v9020_v47 }
 0x19c   : > { %v1637_v43 = vadd.f32 %v1636_v13, %v10274_v5  ;;  %v10283_v38 = vsel %vm15899_vm11, %v1261_v50, 0.0  ;;  %v9024_v20 = vpop.eup %9023  ;;  %v996_v60 = vmax.f32 %v10168_v53, 0.0  ;;  %vm15903_vm10 = vcmp.eq.s32.totalorder %v10228_v55, 1 }
 0x19d   : > { %v1264_v23 = vmul.f32 %v1210_v34, %v994_v39  ;;  %v1212_v31 = vadd.f32 0.5, %v1158_v37  ;;  %v1160_v29 = vmul.f32 0.5, %v9022_v25  ;;  %v10292_v3 = vsel %vm15900_vm13, %v1262_v61, 0.0  ;;  %v10301_v39 = vpop.permute.xlu0 %1473 }
 0x19e   : > { %v1638_v48 = vadd.f32 %v1637_v43, %v10283_v38  ;;  %v9026_v46 = vpop.eup %9025  ;;  %v997_v50 = vmax.f32 %v10175_v49, 0.0  ;;  %vm15906_vm11 = vcmp.eq.s32.totalorder %v10247_v40, 1  ;;  %v1265_v47 = vmul.f32 %v1211_v14, %v995_v35  ;;  %16351 = vst [vmem:[#allocation73_spill] sm:$0xff] %v10301_v39  ;;  %v10310_v14 = vpop.permute.xlu1 %1476 }
 0x19f   : > { %v1213_v53 = vadd.f32 0.5, %v1159_v45  ;;  %v1161_v13 = vmul.f32 0.5, %v9024_v20  ;;  %v10299_v43 = vsel %vm15903_vm10, %v1263_v30, 0.0  ;;  %v998_v61 = vmax.f32 %v10190_v32, 0.0  ;;  %16352 = vst [vmem:[#allocation74_spill] sm:$0xff] %v10310_v14 }
 0x1a0   : > { %v1639_v42 = vadd.f32 %v1638_v48, %v10292_v3  ;;  %v9028_v34 = vpop.eup %9027  ;;  %vm15907_vm13 = vcmp.eq.s32.totalorder %v10260_v7, 1  ;;  %v1266_v37 = vmul.f32 %v1212_v31, %v996_v60  ;;  %v1214_v25 = vadd.f32 0.5, %v1160_v29 }
 0x1a1   : > { %v1162_v16 = vmul.f32 0.5, %v9026_v46  ;;  %v10308_v35 = vsel %vm15906_vm11, %v1264_v23, 0.0  ;;  %v999_v45 = vmax.f32 %v10204_v18, 0.0  ;;  %vm15908_vm10 = vcmp.eq.s32.totalorder %v10276_v41, 1 }
 0x1a2   : > { %v1640_v49 = vadd.f32 %v1639_v42, %v10299_v43  ;;  %v1267_v20 = vmul.f32 %v1213_v53, %v997_v50  ;;  %v1215_v48 = vadd.f32 0.5, %v1161_v13  ;;  %v1163_v55 = vmul.f32 0.5, %v9028_v34  ;;  %v10326_v50 = vpop.permute.xlu0 %1479 }
 0x1a3   : > { %v9030_v30 = vpop.eup %9029  ;;  %v10317_v60 = vsel %vm15907_vm13, %v1265_v47, 0.0  ;;  %v1000_v23 = vmax.f32 %v10212_v28, 0.0  ;;  %vm15910_vm11 = vcmp.eq.s32.totalorder %v10285_v12, 1  ;;  %v1268_v46 = vmul.f32 %v1214_v25, %v998_v61  ;;  %16353 = vst [vmem:[#allocation75_spill] sm:$0xff] %v10326_v50 }
 0x1a4   : > { %v1641_v32 = vadd.f32 %v1640_v49, %v10308_v35  ;;  %v1216_v18 = vadd.f32 0.5, %v1162_v16  ;;  %v1164_v42 = vmul.f32 0.5, %v9030_v30  ;;  %v10324_v49 = vsel %vm15908_vm10, %v1266_v37, 0.0  ;;  %v10335_v16 = vpop.permute.xlu1 %1482 }
 0x1a5   : > { %v9032_v31 = vpop.eup %9031  ;;  %v1001_v53 = vmax.f32 %v10226_v44, 0.0  ;;  %vm15911_vm13 = vcmp.eq.s32.totalorder %v10301_v39, 1  ;;  %v1269_v28 = vmul.f32 %v1215_v48, %v999_v45  ;;  %v1217_v13 = vadd.f32 0.5, %v1163_v55  ;;  %16354 = vst [vmem:[#allocation76_spill] sm:$0xff] %v10335_v16 }
 0x1a6   : > { %v1642_v29 = vadd.f32 %v1641_v32, %v10317_v60  ;;  %v1165_v34 = vmul.f32 0.5, %v9032_v31  ;;  %v10333_v61 = vsel %vm15910_vm11, %v1267_v20, 0.0  ;;  %vm15912_vm10 = vcmp.eq.s32.totalorder %v10310_v14, 1 }
 0x1a7   : > { %v1270_v25 = vmul.f32 %v1216_v18, %v1000_v23  ;;  %v1002_v44 = vmax.f32 %v10234_v1, 0.0  ;;  %v1218_v30 = vadd.f32 0.5, %v1164_v42  ;;  %v10342_v32 = vsel %vm15911_vm13, %v1268_v46, 0.0  ;;  %v10351_v23 = vpop.permute.xlu0 %1485 }
 0x1a8   : > { %v1643_v47 = vadd.f32 %v1642_v29, %v10324_v49  ;;  %vm1540_vm0 = vcmp.eq.s32.totalorder %v10326_v50, 1  ;;  %v1271_v45 = vmul.f32 %v1217_v13, %v1001_v53  ;;  %v1003_v20 = vmax.f32 %v10244_v17, 0.0  ;;  %16355 = vst [vmem:[#allocation77_spill] sm:$0xff] %v10351_v23  ;;  %v10359_v18 = vpop.permute.xlu1 %1488 }
 0x1a9   : > { %v1219_v48 = vadd.f32 0.5, %v1165_v34  ;;  %v10349_v31 = vsel %vm15912_vm10, %v1269_v28, 0.0  ;;  %vm1541_vm11 = vcmp.eq.s32.totalorder %v10335_v16, 1  ;;  %v1272_v29 = vmul.f32 %v1218_v30, %v1002_v44  ;;  %16356 = vst [vmem:[#allocation78_spill] sm:$0xff] %v10359_v18 }
 0x1aa   : > { %v1644_v37 = vadd.f32 %v1643_v47, %v10333_v61  ;;  %v10357_v46 = vsel %vm1540_vm0, %v1270_v25, 0.0  ;;  %vm1542_vm13 = vcmp.eq.s32.totalorder %v10351_v23, 1  ;;  %v10365_v53 = vsel %vm1541_vm11, %v1271_v45, 0.0 }
 0x1ab   : > { %v1273_v42 = vmul.f32 %v1219_v48, %v1003_v20  ;;  %vm1543_vm10 = vcmp.eq.s32.totalorder %v10359_v18, 1  ;;  %v10371_v28 = vsel %vm1542_vm13, %v1272_v29, 0.0 }
 0x1ac   : > { %v1645_v55 = vadd.f32 %v1644_v37, %v10342_v32 }
 0x1ad   : > { %v10376_v34 = vsel %vm1543_vm10, %v1273_v42, 0.0 }
 0x1ae   : > { %v1646_v1 = vadd.f32 %v1645_v55, %v10349_v31 }
 0x1b0   : > { %v1647_v17 = vadd.f32 %v1646_v1, %v10357_v46 }
 0x1b2   : > { %v1648_v47 = vadd.f32 %v1647_v17, %v10365_v53  ;;  %v16363_v17 = vld [vmem:[#allocation18_spill] sm:$0xff] }
 0x1b4   : > { %v1649_v13 = vadd.f32 %v1648_v47, %v10371_v28 }
 0x1b6   : > { %v1650_v37 = vadd.f32 %v1649_v13, %v10376_v34 }
 0x1b8   : > { %v1651_v25 = vrot.slane %v1650_v37, 4 }
 0x1ba   : > { %v1652_v44 = vadd.f32 %v1651_v25, %v1650_v37 }
 0x1bc   : > { %v1653_v30 = vrot.slane %v1652_v44, 2 }
 0x1be   : > { %v1654_v55 = vadd.f32 %v1653_v30, %v1652_v44 }
 0x1c0   : > { %v1655_v45 = vrot.slane %v1654_v55, 1 }
 0x1c2   : > { %v1656_v20 = vadd.f32 %v1655_v45, %v1654_v55  ;;  %v16360_v55 = vld [vmem:[#allocation16_spill] sm:$0xff] }
 0x1c4   : > { %v10379_v48 = vmul.f32 0.00390625, %v1656_v20 }
 0x1c6   : > { %v1658_v20 = vsub.f32 %v9744_v21, %v10379_v48  ;;  %v1659_v37 = vsub.f32 %v9737_v62, %v10379_v48  ;;  %v1660_v25 = vsub.f32 %v9750_v22, %v10379_v48  ;;  %v1661_v45 = vsub.f32 %v9768_v0, %v10379_v48 }
 0x1c7   : > { %v1662_v22 = vsub.f32 %v9776_v15, %v10379_v48  ;;  %v1664_v29 = vsub.f32 %v16363_v17, %v10379_v48  ;;  %v16368_v17 = vld [vmem:[#allocation21_spill] sm:$0xff] }
 0x1c8   : > { %v10427_v44 = vsel %vm1490_vm15, %v1658_v20, 0.0  ;;  %v10431_v30 = vsel %vm1491_vm6, %v1659_v37, 0.0  ;;  %v10443_v20 = vsel %vm15969_vm1, %v1660_v25, 0.0  ;;  %v1663_v37 = vsub.f32 %v16360_v55, %v10379_v48 }
 0x1c9   : > { %16357 = vst [vmem:[#allocation79_spill] sm:$0xff] %v10427_v44  ;;  %16358 = vst [vmem:[#allocation80_spill] sm:$0xff] %v10431_v30  ;;  %v1766_v21 = vmul.f32 %v10427_v44, %v10427_v44  ;;  %v1767_v62 = vmul.f32 %v10431_v30, %v10431_v30  ;;  %v10449_v47 = vsel %vm15970_vm2, %v1661_v45, 0.0  ;;  %v1768_v0 = vmul.f32 %v10443_v20, %v10443_v20  ;;  %v16449_v44 = vld [vmem:[#allocation47_spill] sm:$0xff] }
 0x1ca   : > { %16359 = vst [vmem:[#allocation81_spill] sm:$0xff] %v10443_v20  ;;  %16362 = vst [vmem:[#allocation16_spill] sm:$0xff] %v10449_v47  ;;  %v10457_v15 = vsel %vm1494_vm3, %v1662_v22, 0.0  ;;  %v1769_v25 = vmul.f32 %v10449_v47, %v10449_v47  ;;  %v1665_v55 = vsub.f32 %v9820_v33, %v10379_v48  ;;  %v10465_v57 = vsel %vm1495_vm4, %v1663_v37, 0.0  ;;  %v16371_v33 = vld [vmem:[#allocation23_spill] sm:$0xff]  ;;  %v16456_v20 = vld [vmem:[#allocation52_spill] sm:$0xff] }
 0x1cb   : > { %v1820_v42 = vadd.f32 %v1767_v62, %v1766_v21  ;;  %16365 = vst [vmem:[#allocation18_spill] sm:$0xff] %v10457_v15  ;;  %16367 = vst [vmem:[#allocation82_spill] sm:$0xff] %v10465_v57  ;;  %v1770_v21 = vmul.f32 %v10457_v15, %v10457_v15  ;;  %v1666_v1 = vsub.f32 %v16368_v17, %v10379_v48  ;;  %v10473_v13 = vsel %vm15968_vm5, %v1664_v29, 0.0  ;;  %v16374_v17 = vld [vmem:[#allocation25_spill] sm:$0xff] }
 0x1cc   : > { %16370 = vst [vmem:[#allocation21_spill] sm:$0xff] %v10473_v13  ;;  %v1667_v45 = vsub.f32 %v16371_v33, %v10379_v48  ;;  %v10481_v59 = vsel %vm15967_vm7, %v1665_v55, 0.0  ;;  %v1668_v22 = vsub.f32 %v16374_v17, %v10379_v48  ;;  %v1669_v33 = vsub.f32 %v9872_v6, %v10379_v48  ;;  %v16379_v17 = vld [vmem:[#allocation28_spill] sm:$0xff]  ;;  %v16383_v6 = vld [vmem:[#allocation30_spill] sm:$0xff] }
 0x1cd   : > { %v1821_v11 = vadd.f32 %v1820_v42, %v1768_v0  ;;  %v1771_v42 = vmul.f32 %v10465_v57, %v10465_v57  ;;  %16373 = vst [vmem:[#allocation23_spill] sm:$0xff] %v10481_v59  ;;  %v10489_v15 = vsel %vm15920_vm8, %v1666_v1, 0.0  ;;  %v1670_v29 = vsub.f32 %v16379_v17, %v10379_v48  ;;  %v16380_v1 = vld [vmem:[#allocation13_spill] sm:$0xff]  ;;  %v16387_v17 = vld [vmem:[#allocation32_spill] sm:$0xff] }
 0x1ce   : > { %16376 = vst [vmem:[#allocation25_spill] sm:$0xff] %v10489_v15  ;;  %v10497_v37 = vsel %vm15922_vm9, %v1667_v45, 0.0  ;;  %vm16381_vm8 = vcmp.eq.s32.totalorder %v16380_v1, 1  ;;  %v1671_v55 = vsub.f32 %v16383_v6, %v10379_v48  ;;  %v16384_v45 = vld [vmem:[#allocation14_spill] sm:$0xff]  ;;  %v1672_v1 = vsub.f32 %v16387_v17, %v10379_v48  ;;  %v16394_v17 = vld [vmem:[#allocation35_spill] sm:$0xff] }
 0x1cf   : > { %v1822_v62 = vadd.f32 %v1821_v11, %v1769_v25  ;;  %v1772_v11 = vmul.f32 %v10473_v13, %v10473_v13  ;;  %16378 = vst [vmem:[#allocation83_spill] sm:$0xff] %v10497_v37  ;;  %v10505_v13 = vsel %vm16381_vm8, %v1668_v22, 0.0  ;;  %vm16385_vm9 = vcmp.eq.s32.totalorder %v16384_v45, 1  ;;  %v16388_v22 = vld [vmem:[#allocation15_spill] sm:$0xff] }
 0x1d0   : > { %16382 = vst [vmem:[#allocation28_spill] sm:$0xff] %v10505_v13  ;;  %vm16389_vm8 = vcmp.eq.s32.totalorder %v16388_v22, 1  ;;  %v1673_v6 = vsub.f32 %v9921_v51, %v10379_v48  ;;  %v1674_v22 = vsub.f32 %v16394_v17, %v10379_v48  ;;  %v16402_v17 = vmov 0  }
 0x1d1   : > { %v1823_v0 = vadd.f32 %v1822_v62, %v1770_v21  ;;  %v1773_v21 = vmul.f32 %v10481_v59, %v10481_v59  ;;  %v10513_v59 = vsel %vm16385_vm9, %v1669_v33, 0.0  ;;  %v16391_v33 = vld [vmem:[#allocation17_spill] sm:$0xff] }
 0x1d2   : > { %16386 = vst [vmem:[#allocation30_spill] sm:$0xff] %v10513_v59  ;;  %vm16392_vm9 = vcmp.eq.s32.totalorder %v16391_v33, 1 }
 0x1d3   : > { %v1824_v25 = vadd.f32 %v1823_v0, %v1771_v42  ;;  %v1774_v42 = vmul.f32 %v10489_v15, %v10489_v15  ;;  %v10521_v15 = vsel %vm16389_vm8, %v1670_v29, 0.0  ;;  %v10529_v45 = vsel %vm16392_vm9, %v1671_v55, 0.0  ;;  %v16395_v29 = vld [vmem:[#allocation19_spill] sm:$0xff]  ;;  %v16503_v4 = vld [vmem:[#allocation21_spill] sm:$0xff] }
 0x1d4   : > { %16390 = vst [vmem:[#allocation32_spill] sm:$0xff] %v10521_v15  ;;  %16393 = vst [vmem:[#allocation84_spill] sm:$0xff] %v10529_v45  ;;  %vm16396_vm8 = vcmp.eq.s32.totalorder %v16395_v29, 1  ;;  %v1779_v51 = vmul.f32 %v10529_v45, %v10529_v45  ;;  %v16403_v29 = vld [vmem:[#allocation39_spill] sm:$0xff]  ;;  %v16428_v45 = vld [vmem:[#allocation36_spill] sm:$0xff] }
 0x1d5   : > { %v1825_v62 = vadd.f32 %v1824_v25, %v1772_v11  ;;  %v1775_v11 = vmul.f32 %v10497_v37, %v10497_v37  ;;  %v16404_v37 = vld [vmem:[#allocation22_spill] sm:$0xff] }
 0x1d7   : > { %v1826_v0 = vadd.f32 %v1825_v62, %v1773_v21  ;;  %v1776_v21 = vmul.f32 %v10505_v13, %v10505_v13  ;;  %v10537_v13 = vsel %vm16396_vm8, %v1672_v1, 0.0  ;;  %vm16405_vm8 = vcmp.eq.s32.totalorder %v16404_v37, 1  ;;  %v16410_v37 = vld [vmem:[#allocation42_spill] sm:$0xff]  ;;  %v16507_v18 = vld [vmem:[#allocation28_spill] sm:$0xff] }
 0x1d8   : > { %16397 = vst [vmem:[#allocation35_spill] sm:$0xff] %v10537_v13  ;;  %v1780_v1 = vmul.f32 %v10537_v13, %v10537_v13  ;;  %v16411_v13 = vld [vmem:[#allocation26_spill] sm:$0xff] }
 0x1d9   : > { %v1827_v25 = vadd.f32 %v1826_v0, %v1774_v42  ;;  %v1777_v42 = vmul.f32 %v10513_v59, %v10513_v59  ;;  %v1676_v59 = vsub.f32 %v16403_v29, %v10379_v48 }
 0x1db   : > { %v1828_v62 = vadd.f32 %v1827_v25, %v1775_v11  ;;  %v1778_v11 = vmul.f32 %v10521_v15, %v10521_v15  ;;  %v16399_v15 = vld [vmem:[#allocation20_spill] sm:$0xff] }
 0x1dc   : > { %vm16400_vm9 = vcmp.eq.s32.totalorder %v16399_v15, 1  ;;  %v1678_v15 = vsub.f32 %v16410_v37, %v10379_v48 }
 0x1dd   : > { %v1829_v0 = vadd.f32 %v1828_v62, %v1776_v21  ;;  %v8829_v21 = vld [vmem:[%s15768_s3 + $0xc0] sm:$0xff]   ;;  %v16398_v62 = vld [vmem:[#allocation37_spill] sm:$0xff] }
 0x1de   : > { %v1675_v33 = vsub.f32 %v16398_v62, %v10379_v48  ;;  %3290 = vmatpush1.bf16.msra.mxu1 %v8829_v21 }
 0x1df   : > { %v1830_v25 = vadd.f32 %v1829_v0, %v1777_v42  ;;  %v10548_v42 = vsel %vm16400_vm9, %v1673_v6, 0.0  ;;  %3291 = vmatprep.subr.bf16.mxu1 %v16402_v17 }
 0x1e0   : > { %16401 = vst [vmem:[#allocation37_spill] sm:$0xff] %v10548_v42  ;;  %v1781_v6 = vmul.f32 %v10548_v42, %v10548_v42 }
 0x1e1   : > { %v1831_v55 = vadd.f32 %v1830_v25, %v1778_v11  ;;  %v10557_v11 = vsel %vm16405_vm8, %v1674_v22, 0.0  ;;  %v8830_v25 = vld [vmem:[%s15768_s3 + $0xc8] sm:$0xff]   ;;  %vm16412_vm8 = vcmp.eq.s32.totalorder %v16411_v13, 1  ;;  %v1680_v13 = vsub.f32 %v10002_v8, %v10379_v48 }
 0x1e2   : > { %16406 = vst [vmem:[#allocation39_spill] sm:$0xff] %v10557_v11  ;;  %3292 = vmatpush1.bf16.msra.mxu1 %v8830_v25  ;;  %v1782_v22 = vmul.f32 %v10557_v11, %v10557_v11  ;;  %v1679_v25 = vsub.f32 %v9991_v56, %v10379_v48  ;;  %v8832_v56 = vld [vmem:[%s15768_s3 + $0xd8] sm:$0xff]  }
 0x1e3   : > { %v1832_v0 = vadd.f32 %v1831_v55, %v1779_v51  ;;  %v1677_v51 = vsub.f32 %v9968_v9, %v10379_v48  ;;  %v16407_v55 = vld [vmem:[#allocation24_spill] sm:$0xff]  ;;  %3293 = vmatprep.subr.bf16.mxu1 %v16402_v17  ;;  %v16423_v11 = vld [vmem:[#allocation33_spill] sm:$0xff] }
 0x1e4   : > { %vm16408_vm9 = vcmp.eq.s32.totalorder %v16407_v55, 1  ;;  %v8831_v9 = vld [vmem:[%s15768_s3 + $0xd0] sm:$0xff]   ;;  %v16417_v55 = vld [vmem:[#allocation29_spill] sm:$0xff] }
 0x1e5   : > { %v1833_v21 = vadd.f32 %v1832_v0, %v1780_v1  ;;  %v10568_v62 = vsel %vm16408_vm9, %v1675_v33, 0.0  ;;  %v10577_v1 = vsel %vm16412_vm8, %v1676_v59, 0.0  ;;  %vm16418_vm8 = vcmp.eq.s32.totalorder %v16417_v55, 1  ;;  %v16440_v55 = vld [vmem:[#allocation43_spill] sm:$0xff] }
 0x1e6   : > { %16409 = vst [vmem:[#allocation85_spill] sm:$0xff] %v10568_v62  ;;  %16413 = vst [vmem:[#allocation42_spill] sm:$0xff] %v10577_v1  ;;  %v1783_v33 = vmul.f32 %v10568_v62, %v10568_v62  ;;  %3294 = vmatpush1.bf16.msra.mxu1 %v8831_v9  ;;  %v1784_v59 = vmul.f32 %v10577_v1, %v10577_v1  ;;  %v16419_v9 = vld [vmem:[#allocation46_spill] sm:$0xff]  ;;  %v16422_v1 = vld [vmem:[#allocation48_spill] sm:$0xff] }
 0x1e7   : > { %v1834_v29 = vadd.f32 %v1833_v21, %v1781_v6  ;;  %v16414_v6 = vld [vmem:[#allocation27_spill] sm:$0xff]  ;;  %3295 = vmatprep.subr.bf16.mxu1 %v16402_v17  ;;  %v1682_v62 = vsub.f32 %v16422_v1, %v10379_v48 }
 0x1e8   : > { %vm16415_vm9 = vcmp.eq.s32.totalorder %v16414_v6, 1 }
 0x1e9   : > { %v1835_v0 = vadd.f32 %v1834_v29, %v1782_v22  ;;  %v10588_v21 = vsel %vm16415_vm9, %v1677_v51, 0.0  ;;  %v10597_v22 = vsel %vm16418_vm8, %v1678_v15, 0.0  ;;  %vm16424_vm8 = vcmp.eq.s32.totalorder %v16423_v11, 1 }
 0x1ea   : > { %16416 = vst [vmem:[#allocation86_spill] sm:$0xff] %v10588_v21  ;;  %v1785_v51 = vmul.f32 %v10588_v21, %v10588_v21  ;;  %3296 = vmatpush1.bf16.msra.mxu1 %v8832_v56  ;;  %v1786_v8 = vmul.f32 %v10597_v22, %v10597_v22  ;;  %v16427_v21 = vld [vmem:[#allocation51_spill] sm:$0xff] }
 0x1eb   : > { %v1836_v37 = vadd.f32 %v1835_v0, %v1783_v33  ;;  %v1681_v33 = vsub.f32 %v16419_v9, %v10379_v48  ;;  %v16420_v0 = vld [vmem:[#allocation31_spill] sm:$0xff]  ;;  %3297 = vmatprep.subr.bf16.mxu1 %v16402_v17  ;;  %v1684_v42 = vsub.f32 %v16427_v21, %v10379_v48 }
 0x1ec   : > { %vm16421_vm9 = vcmp.eq.s32.totalorder %v16420_v0, 1  ;;  %v16434_v0 = vld [vmem:[#allocation40_spill] sm:$0xff] }
 0x1ed   : > { %v1837_v29 = vadd.f32 %v1836_v37, %v1784_v59  ;;  %v10608_v6 = vsel %vm16421_vm9, %v1679_v25, 0.0  ;;  %v10617_v59 = vsel %vm16424_vm8, %v1680_v13, 0.0  ;;  %v8833_v37 = vld [vmem:[%s15768_s3 + $0xe0] sm:$0xff]   ;;  %vm16429_vm8 = vcmp.eq.s32.totalorder %v16428_v45, 1  ;;  %v16433_v45 = vld [vmem:[#allocation55_spill] sm:$0xff] }
 0x1ee   : > { %v1787_v25 = vmul.f32 %v10608_v6, %v10608_v6  ;;  %3298 = vmatpush1.bf16.msra.mxu1 %v8833_v37  ;;  %v1788_v13 = vmul.f32 %v10617_v59, %v10617_v59  ;;  %v16430_v37 = vld [vmem:[#allocation53_spill] sm:$0xff]  ;;  %v1686_v11 = vsub.f32 %v16433_v45, %v10379_v48 }
 0x1ef   : > { %v1838_v15 = vadd.f32 %v1837_v29, %v1785_v51  ;;  %v1683_v51 = vsub.f32 %v10047_v63, %v10379_v48  ;;  %v16425_v29 = vld [vmem:[#allocation34_spill] sm:$0xff]  ;;  %3299 = vmatprep.subr.bf16.mxu1 %v16402_v17  ;;  %v8834_v63 = vld [vmem:[%s15768_s3 + $0xe8] sm:$0xff]  }
 0x1f0   : > { %vm16426_vm9 = vcmp.eq.s32.totalorder %v16425_v29, 1 }
 0x1f1   : > { %v1839_v56 = vadd.f32 %v1838_v15, %v1786_v8  ;;  %v10628_v9 = vsel %vm16426_vm9, %v1681_v33, 0.0  ;;  %v10637_v8 = vsel %vm16429_vm8, %v1682_v62, 0.0  ;;  %vm16435_vm8 = vcmp.eq.s32.totalorder %v16434_v0, 1  ;;  %v8836_v0 = vld [vmem:[%s15768_s3 + $0x140] sm:$0xff]  }
 0x1f2   : > { %v1789_v33 = vmul.f32 %v10628_v9, %v10628_v9  ;;  %3300 = vmatpush1.bf16.msra.mxu1 %v8834_v63  ;;  %v1790_v62 = vmul.f32 %v10637_v8, %v10637_v8  ;;  %8408 = vmatpush3.bf16.msra.mxu0 %v8836_v0  ;;  %v8838_v0 = vld [vmem:[%s15768_s3 + $0x148] sm:$0xff]  }
 0x1f3   : > { %v1840_v1 = vadd.f32 %v1839_v56, %v1787_v25  ;;  %v1685_v25 = vsub.f32 %v16430_v37, %v10379_v48  ;;  %v16431_v56 = vld [vmem:[#allocation38_spill] sm:$0xff]  ;;  %3301 = vmatprep.subr.bf16.mxu1 %v16402_v17  ;;  %v16436_v37 = vld [vmem:[#allocation57_spill] sm:$0xff] }
 0x1f4   : > { %vm16432_vm9 = vcmp.eq.s32.totalorder %v16431_v56, 1 }
 0x1f5   : > { %v1841_v15 = vadd.f32 %v1840_v1, %v1788_v13  ;;  %v10648_v29 = vsel %vm16432_vm9, %v1683_v51, 0.0  ;;  %v10657_v13 = vsel %vm16435_vm8, %v1684_v42, 0.0  ;;  %v8835_v1 = vld [vmem:[%s15768_s3 + $0xf0] sm:$0xff]   ;;  %vm16441_vm8 = vcmp.eq.s32.totalorder %v16440_v55, 1 }
 0x1f6   : > { %v1791_v51 = vmul.f32 %v10648_v29, %v10648_v29  ;;  %3302 = vmatpush1.bf16.msra.mxu1 %v8835_v1  ;;  %v1792_v45 = vmul.f32 %v10657_v13, %v10657_v13 }
 0x1f7   : > { %v1842_v21 = vadd.f32 %v1841_v15, %v1789_v33  ;;  %v1687_v33 = vsub.f32 %v16436_v37, %v10379_v48  ;;  %v16437_v15 = vld [vmem:[#allocation41_spill] sm:$0xff]  ;;  %3303 = vmatprep.subr.bf16.mxu1 %v16402_v17  ;;  %v10680_v37 = vsel %vm16441_vm8, %v1686_v11, 0.0 }
 0x1f8   : > { %vm16438_vm9 = vcmp.eq.s32.totalorder %v16437_v15, 1  ;;  %v16442_v15 = vld [vmem:[#allocation44_spill] sm:$0xff]  ;;  %v1794_v11 = vmul.f32 %v10680_v37, %v10680_v37 }
 0x1f9   : > { %v1843_v63 = vadd.f32 %v1842_v21, %v1790_v62  ;;  %v10668_v56 = vsel %vm16438_vm9, %v1685_v25, 0.0  ;;  %v16439_v62 = vld [vmem:[#allocation59_spill] sm:$0xff]  ;;  %v8837_v25 = vld [vmem:[%s15768_s3 + $0xf8] sm:$0xff]   ;;  %vm16443_vm9 = vcmp.eq.s32.totalorder %v16442_v15, 1  ;;  %v16448_v15 = vld [vmem:[#allocation64_spill] sm:$0xff] }
 0x1fa   : > { %v1688_v21 = vsub.f32 %v16439_v62, %v10379_v48  ;;  %v1793_v1 = vmul.f32 %v10668_v56, %v10668_v56  ;;  %v10691_v57 = vsel %vm16443_vm9, %v1687_v33, 0.0  ;;  %3304 = vmatpush1.bf16.msra.mxu1 %v8837_v25  ;;  %v16444_v62 = vmov 0.0   ;;  %v8839_v25 = vld [vmem:[%s15768_s3 + $0x100] sm:$0xff]  }
 0x1fb   : > { %v1844_v42 = vadd.f32 %v1843_v63, %v1791_v51  ;;  %v1689_v63 = vsub.f32 %v10148_v27, %v10379_v48  ;;  %8409 = vmatprep.subr.bf16.mxu0 %v16444_v62  ;;  %3305 = vmatprep.subr.bf16.mxu1 %v16402_v17  ;;  %v1691_v30 = vsub.f32 %v16448_v15, %v10379_v48  ;;  %vm16450_vm9 = vcmp.eq.s32.totalorder %v16449_v44, 1  ;;  %v16454_v44 = vld [vmem:[#allocation50_spill] sm:$0xff] }
 0x1fc   : > { %8410 = vmatpush3.bf16.msra.mxu0 %v8838_v0  ;;  %v16452_v0 = vld [vmem:[#allocation49_spill] sm:$0xff] }
 0x1fd   : > { %v1845_v51 = vadd.f32 %v1844_v42, %v1792_v45  ;;  %v16445_v45 = vld [vmem:[#allocation62_spill] sm:$0xff]  ;;  %v16446_v42 = vld [vmem:[#allocation45_spill] sm:$0xff]  ;;  %v10715_v47 = vsel %vm16450_vm9, %v1689_v63, 0.0  ;;  %8411 = vmatprep.subr.bf16.mxu0 %v16444_v62  ;;  %vm16455_vm9 = vcmp.eq.s32.totalorder %v16454_v44, 1 }
 0x1fe   : > { %v1690_v27 = vsub.f32 %v16445_v45, %v10379_v48  ;;  %vm16447_vm8 = vcmp.eq.s32.totalorder %v16446_v42, 1  ;;  %3306 = vmatpush1.bf16.msra.mxu1 %v8839_v25  ;;  %v8841_v25 = vld [vmem:[%s15768_s3 + $0x108] sm:$0xff]   ;;  %v10737_v42 = vsel %vm16455_vm9, %v1691_v30, 0.0  ;;  %v8843_v30 = vld [vmem:[%s15768_s3 + $0x110] sm:$0xff]  }
 0x1ff   : > { %v1846_v55 = vadd.f32 %v1845_v51, %v1793_v1  ;;  %v10704_v33 = vsel %vm16447_vm8, %v1688_v21, 0.0  ;;  %v1795_v1 = vmul.f32 %v10691_v57, %v10691_v57  ;;  %3307 = vmatprep.subr.bf16.mxu1 %v16402_v17  ;;  %vm16453_vm8 = vcmp.eq.s32.totalorder %v16452_v0, 1  ;;  %v8842_v0 = vld [vmem:[%s15768_s3 + $0x158] sm:$0xff]  }
 0x200   : > { %v1796_v21 = vmul.f32 %v10704_v33, %v10704_v33  ;;  %v10728_v63 = vsel %vm16453_vm8, %v1690_v27, 0.0  ;;  %vm16457_vm8 = vcmp.eq.s32.totalorder %v16456_v20, 1 }
 0x201   : > { %v1847_v51 = vadd.f32 %v1846_v55, %v1794_v11  ;;  %v8840_v55 = vld [vmem:[%s15768_s3 + $0x150] sm:$0xff]   ;;  %v16451_v11 = vld [vmem:[#allocation66_spill] sm:$0xff]  ;;  %v1798_v27 = vmul.f32 %v10728_v63, %v10728_v63 }
 0x202   : > { %v1692_v15 = vsub.f32 %v16451_v11, %v10379_v48  ;;  %8412 = vmatpush3.bf16.msra.mxu0 %v8840_v55  ;;  %3308 = vmatpush1.bf16.msra.mxu1 %v8841_v25  ;;  %v16458_v25 = vsub.f32 %v10219_v24, %v10379_v48  ;;  %v16460_v24 = vsub.f32 %v10239_v58, %v10379_v48 }
 0x203   : > { %v1848_v45 = vadd.f32 %v1847_v51, %v1795_v1  ;;  %v1797_v1 = vmul.f32 %v10715_v47, %v10715_v47  ;;  %8413 = vmatprep.subr.bf16.mxu0 %v16444_v62  ;;  %3309 = vmatprep.subr.bf16.mxu1 %v16402_v17 }
 0x205   : > { %v1849_v51 = vadd.f32 %v1848_v45, %v1796_v21  ;;  %v10748_v21 = vsel %vm16457_vm8, %v1692_v15, 0.0  ;;  %v1799_v45 = vmul.f32 %v10737_v42, %v10737_v42  ;;  %vm16465_vm8 = vcmp.eq.s32.totalorder %v10144_v54, 1 }
 0x206   : > { %8414 = vmatpush3.bf16.msra.mxu0 %v8842_v0  ;;  %3310 = vmatpush1.bf16.msra.mxu1 %v8843_v30  ;;  %v1800_v15 = vmul.f32 %v10748_v21, %v10748_v21  ;;  %v8844_v0 = vld [vmem:[%s15768_s3 + $0x160] sm:$0xff]  }
 0x207   : > { %v1850_v11 = vadd.f32 %v1849_v51, %v1797_v1  ;;  %v10760_v51 = vsel %vm1525_vm14, %v16458_v25, 0.0  ;;  %8415 = vmatprep.subr.bf16.mxu0 %v16444_v62  ;;  %3311 = vmatprep.subr.bf16.mxu1 %v16402_v17  ;;  %v16462_v25 = vld [vmem:[#allocation58_spill] sm:$0xff] }
 0x208   : > { %v1801_v30 = vmul.f32 %v10760_v51, %v10760_v51  ;;  %vm16463_vm9 = vcmp.eq.s32.totalorder %v16462_v25, 1 }
 0x209   : > { %v1851_v55 = vadd.f32 %v1850_v11, %v1798_v27  ;;  %v10774_v27 = vsel %vm15966_vm12, %v16460_v24, 0.0  ;;  %v8845_v11 = vld [vmem:[%s15768_s3 + $0x118] sm:$0xff]  }
 0x20a   : > { %8416 = vmatpush3.bf16.msra.mxu0 %v8844_v0  ;;  %3312 = vmatpush1.bf16.msra.mxu1 %v8845_v11  ;;  %v1802_v58 = vmul.f32 %v10774_v27, %v10774_v27  ;;  %v8847_v0 = vld [vmem:[%s15768_s3 + $0x120] sm:$0xff]  }
 0x20b   : > { %v1852_v20 = vadd.f32 %v1851_v55, %v1799_v45  ;;  %v16461_v55 = vsub.f32 %v10251_v52, %v10379_v48  ;;  %8417 = vmatprep.subr.bf16.mxu0 %v16444_v62  ;;  %3313 = vmatprep.subr.bf16.mxu1 %v16402_v17  ;;  %v16464_v52 = vsub.f32 %v10258_v26, %v10379_v48 }
 0x20d   : > { %v1853_v45 = vadd.f32 %v1852_v20, %v1800_v15  ;;  %v10786_v1 = vsel %vm16463_vm9, %v16461_v55, 0.0  ;;  %v8846_v20 = vld [vmem:[%s15768_s3 + $0x168] sm:$0xff]   ;;  %v10800_v15 = vsel %vm16465_vm8, %v16464_v52, 0.0  ;;  %vm16467_vm9 = vcmp.eq.s32.totalorder %v10158_v10, 1  ;;  %v16476_v10 = vld [vmem:[#allocation68_spill] sm:$0xff] }
 0x20e   : > { %v1803_v11 = vmul.f32 %v10786_v1, %v10786_v1  ;;  %8418 = vmatpush3.bf16.msra.mxu0 %v8846_v20  ;;  %3314 = vmatpush1.bf16.msra.mxu1 %v8847_v0  ;;  %v1804_v26 = vmul.f32 %v10800_v15, %v10800_v15  ;;  %vm16469_vm8 = vcmp.eq.s32.totalorder %v10178_v36, 1  ;;  %v8849_v20 = vld [vmem:[%s15768_s3 + $0x128] sm:$0xff]   ;;  %v16475_v36 = vsub.f32 %v10299_v43, %v10379_v48 }
 0x20f   : > { %v1854_v24 = vadd.f32 %v1853_v45, %v1801_v30  ;;  %v16466_v45 = vsub.f32 %v10267_v2, %v10379_v48  ;;  %8419 = vmatprep.subr.bf16.mxu0 %v16444_v62  ;;  %3315 = vmatprep.subr.bf16.mxu1 %v16402_v17  ;;  %v16468_v2 = vsub.f32 %v10274_v5, %v10379_v48 }
 0x210   : > { %v16470_v5 = vsub.f32 %v10283_v38, %v10379_v48  ;;  %v16472_v38 = vsub.f32 %v10292_v3, %v10379_v48 }
 0x211   : > { %v1855_v30 = vadd.f32 %v1854_v24, %v1802_v58  ;;  %v10812_v55 = vsel %vm16467_vm9, %v16466_v45, 0.0  ;;  %v8848_v58 = vld [vmem:[%s15768_s3 + $0x170] sm:$0xff]   ;;  %v10826_v24 = vsel %vm16469_vm8, %v16468_v2, 0.0  ;;  %vm16471_vm9 = vcmp.eq.s32.totalorder %v10193_v19, 1 }
 0x212   : > { %v1805_v0 = vmul.f32 %v10812_v55, %v10812_v55  ;;  %8420 = vmatpush3.bf16.msra.mxu0 %v8848_v58  ;;  %v10841_v45 = vsel %vm16471_vm9, %v16470_v5, 0.0  ;;  %3316 = vmatpush1.bf16.msra.mxu1 %v8849_v20  ;;  %v8851_v2 = vld [vmem:[%s15768_s3 + $0x130] sm:$0xff]   ;;  %v16473_v58 = vld [vmem:[#allocation67_spill] sm:$0xff]  ;;  %vm16477_vm9 = vcmp.eq.s32.totalorder %v16476_v10, 1 }
 0x213   : > { %v1856_v52 = vadd.f32 %v1855_v30, %v1803_v11  ;;  %v8850_v30 = vld [vmem:[%s15768_s3 + $0x178] sm:$0xff]   ;;  %8421 = vmatprep.subr.bf16.mxu0 %v16444_v62  ;;  %3317 = vmatprep.subr.bf16.mxu1 %v16402_v17  ;;  %vm16474_vm8 = vcmp.eq.s32.totalorder %v16473_v58, 1  ;;  %v1807_v20 = vmul.f32 %v10841_v45, %v10841_v45 }
 0x214   : > { %v10855_v5 = vsel %vm16474_vm8, %v16472_v38, 0.0  ;;  %vm16479_vm8 = vcmp.eq.s32.totalorder %v10247_v40, 1 }
 0x215   : > { %v1857_v11 = vadd.f32 %v1856_v52, %v1804_v26  ;;  %v1806_v26 = vmul.f32 %v10826_v24, %v10826_v24  ;;  %v1808_v3 = vmul.f32 %v10855_v5, %v10855_v5 }
 0x216   : > { %8422 = vmatpush3.bf16.msra.mxu0 %v8850_v30  ;;  %3318 = vmatpush1.bf16.msra.mxu1 %v8851_v2  ;;  %v16480_v2 = vsub.f32 %v10317_v60, %v10379_v48 }
 0x217   : > { %v1858_v52 = vadd.f32 %v1857_v11, %v1805_v0  ;;  %v10864_v0 = vsel %vm16477_vm9, %v16475_v36, 0.0  ;;  %8531 = vmatprep.subr.bf16.mxu0 %v16444_v62  ;;  %3319 = vmatprep.subr.bf16.mxu1 %v16402_v17  ;;  %vm16481_vm9 = vcmp.eq.s32.totalorder %v10260_v7, 1 }
 0x218   : > { %v1809_v36 = vmul.f32 %v10864_v0, %v10864_v0 }
 0x219   : > { %v1859_v19 = vadd.f32 %v1858_v52, %v1806_v26  ;;  %v16478_v26 = vsub.f32 %v10308_v35, %v10379_v48  ;;  %v10884_v52 = vsel %vm16481_vm9, %v16480_v2, 0.0  ;;  %vm16485_vm9 = vcmp.eq.s32.totalorder %v10285_v12, 1 }
 0x21a   : > { %v1811_v60 = vmul.f32 %v10884_v52, %v10884_v52  ;;  %v16486_v2 = vsub.f32 %v10342_v32, %v10379_v48  ;;  %v16490_v32 = vsub.f32 %v10357_v46, %v10379_v48  ;;  %v16492_v46 = vsub.f32 %v10371_v28, %v10379_v48 }
 0x21b   : > { %v1860_v11 = vadd.f32 %v1859_v19, %v1807_v20  ;;  %v10875_v30 = vsel %vm16479_vm8, %v16478_v26, 0.0  ;;  %v8852_v19 = vld [vmem:[%s15768_s3 + $0x138] sm:$0xff]   ;;  %v16482_v20 = vsub.f32 %v10324_v49, %v10379_v48  ;;  %vm16483_vm8 = vcmp.eq.s32.totalorder %v10276_v41, 1 }
 0x21c   : > { %v1810_v35 = vmul.f32 %v10875_v30, %v10875_v30  ;;  %3320 = vmatpush1.bf16.msra.mxu1 %v8852_v19  ;;  %v16484_v26 = vsub.f32 %v10333_v61, %v10379_v48  ;;  %v16488_v61 = vsub.f32 %v10349_v31, %v10379_v48  ;;  %v16491_v31 = vsub.f32 %v10365_v53, %v10379_v48 }
 0x21d   : > { %v1861_v43 = vadd.f32 %v1860_v11, %v1808_v3  ;;  %v10896_v3 = vsel %vm16483_vm8, %v16482_v20, 0.0  ;;  %4373 = vmatprep.subr.bf16.mxu1 %v16402_v17  ;;  %vm16487_vm8 = vcmp.eq.s32.totalorder %v10301_v39, 1  ;;  %v16493_v53 = vsub.f32 %v10376_v34, %v10379_v48  ;;  %v16494_v34 = vld [vmem:[#allocation2_spill] sm:$0xff] }
 0x21e   : > { %v1812_v49 = vmul.f32 %v10896_v3, %v10896_v3  ;;  %v10915_v19 = vsel %vm16487_vm8, %v16486_v2, 0.0  ;;  %v10942_v2 = vsel %vm1541_vm11, %v16491_v31, 0.0  ;;  %v1938_v48 = vsub.s32 1, %v16494_v34 }
 0x21f   : > { %v1862_v38 = vadd.f32 %v1861_v43, %v1809_v36  ;;  %v10906_v36 = vsel %vm16485_vm9, %v16484_v26, 0.0  ;;  %vm16489_vm9 = vcmp.eq.s32.totalorder %v10310_v14, 1  ;;  %v10933_v26 = vsel %vm1540_vm0, %v16490_v32, 0.0 }
 0x220   : > { %v10924_v20 = vsel %vm16489_vm9, %v16488_v61, 0.0  ;;  %v10951_v61 = vsel %vm1542_vm13, %v16492_v46, 0.0  ;;  %v1765_v32 = vsel %vm1543_vm10, %v16493_v53, 0.0  ;;  %v1996_v53 = vsub.s32 2, %v16494_v34  ;;  %v16505_v34 = vld [vmem:[#allocation25_spill] sm:$0xff] }
 0x221   : > { %v1863_v11 = vadd.f32 %v1862_v38, %v1810_v35  ;;  %v1813_v35 = vmul.f32 %v10906_v36, %v10906_v36  ;;  %v1819_v31 = vmul.f32 %v1765_v32, %v1765_v32  ;;  %vm16495_vm8 = vcmp.eq.s32.totalorder %v16462_v25, 1 }
 0x223   : > { %v1864_v43 = vadd.f32 %v1863_v11, %v1811_v60  ;;  %v1814_v60 = vmul.f32 %v10915_v19, %v10915_v19 }
 0x225   : > { %v1865_v38 = vadd.f32 %v1864_v43, %v1812_v49  ;;  %v1815_v49 = vmul.f32 %v10924_v20, %v10924_v20 }
 0x227   : > { %v1866_v11 = vadd.f32 %v1865_v38, %v1813_v35  ;;  %v1816_v35 = vmul.f32 %v10933_v26, %v10933_v26 }
 0x229   : > { %v1867_v43 = vadd.f32 %v1866_v11, %v1814_v60  ;;  %v1817_v60 = vmul.f32 %v10942_v2, %v10942_v2 }
 0x22b   : > { %v1868_v38 = vadd.f32 %v1867_v43, %v1815_v49  ;;  %v1818_v49 = vmul.f32 %v10951_v61, %v10951_v61 }
 0x22d   : > { %v1869_v11 = vadd.f32 %v1868_v38, %v1816_v35 }
 0x22f   : > { %v1870_v43 = vadd.f32 %v1869_v11, %v1817_v60  ;;  %v9145_v60 = vld [vmem:[%s15769_s4] sm:$0x3f] }
 0x230   : > { %v10967_v11 = vrot.slane %v9145_v60, %v1938_v48 }
 0x231   : > { %v1871_v28 = vadd.f32 %v1870_v43, %v1818_v49 }
 0x233   : > { %v1872_v62 = vadd.f32 %v1871_v28, %v1819_v31 }
 0x235   : > { %v1873_v17 = vrot.slane %v1872_v62, 4 }
 0x237   : > { %v1874_v46 = vadd.f32 %v1873_v17, %v1872_v62  ;;  %v10971_v17 = vrot.slane %v9145_v60, %v1996_v53 }
 0x239   : > { %v1875_v23 = vrot.slane %v1874_v46, 2 }
 0x23b   : > { %v1876_v16 = vadd.f32 %v1875_v23, %v1874_v46 }
 0x23d   : > { %v1877_v50 = vrot.slane %v1876_v16, 1 }
 0x23f   : > { %v1878_v14 = vadd.f32 %v1877_v50, %v1876_v16 }
 0x241   : > { %v1879_v35 = vmul.f32 0.00390625, %v1878_v14 }
 0x243   : > { %v1880_v38 = vadd.f32 1e-05, %v1879_v35 }
 0x245   : > { %9033 = vrsqrt.f32 %v1880_v38 }
 0x24f   : > { %v10969_v49 = vpop.eup %9033 }
 0x250   : > { %v1918_v50 = vmul.f32 %v10969_v49, %v10774_v27  ;;  %v1919_v14 = vmul.f32 %v10969_v49, %v10786_v1  ;;  %v1902_v27 = vmul.f32 %v10969_v49, %v10597_v22  ;;  %v1903_v1 = vmul.f32 %v10969_v49, %v10608_v6 }
 0x251   : > { %v1904_v35 = vmul.f32 %v10969_v49, %v10617_v59  ;;  %v1905_v38 = vmul.f32 %v10969_v49, %v10628_v9  ;;  %v1906_v48 = vmul.f32 %v10969_v49, %v10637_v8  ;;  %v1907_v53 = vmul.f32 %v10969_v49, %v10648_v29 }
 0x252   : > { %v1976_v16 = vmul.f32 %v10967_v11, %v1918_v50  ;;  %v1977_v23 = vmul.f32 %v10967_v11, %v1919_v14  ;;  %v1908_v60 = vmul.f32 %v10969_v49, %v10657_v13  ;;  %v1909_v22 = vmul.f32 %v10969_v49, %v10668_v56 }
 0x253   : > { %v1910_v6 = vmul.f32 %v10969_v49, %v10680_v37  ;;  %v1911_v59 = vmul.f32 %v10969_v49, %v10691_v57  ;;  %v1912_v9 = vmul.f32 %v10969_v49, %v10704_v33  ;;  %v1913_v8 = vmul.f32 %v10969_v49, %v10715_v47 }
 0x254   : > { %v2034_v62 = vadd.f32 %v10971_v17, %v1976_v16  ;;  %v2035_v43 = vadd.f32 %v10971_v17, %v1977_v23  ;;  %v1914_v29 = vmul.f32 %v10969_v49, %v10728_v63  ;;  %v1915_v13 = vmul.f32 %v10969_v49, %v10737_v42 }
 0x255   : > { %v1916_v56 = vmul.f32 %v10969_v49, %v10748_v21  ;;  %v1917_v37 = vmul.f32 %v10969_v49, %v10760_v51  ;;  %v1920_v57 = vmul.f32 %v10969_v49, %v10800_v15  ;;  %v1921_v33 = vmul.f32 %v10969_v49, %v10812_v55 }
 0x256   : > { %v2088_v31 = vsel %vm15966_vm12, %v2034_v62, 0.0  ;;  %v2089_v28 = vsel %vm16495_vm8, %v2035_v43, 0.0  ;;  %v1922_v47 = vmul.f32 %v10969_v49, %v10826_v24  ;;  %v1923_v63 = vmul.f32 %v10969_v49, %v10841_v45 }
 0x257   : > { %v10985_v46 = vpack.c.bf16 %v2089_v28, %v2088_v31  ;;  %v1924_v42 = vmul.f32 %v10969_v49, %v10855_v5  ;;  %v1925_v21 = vmul.f32 %v10969_v49, %v10864_v0  ;;  %v1926_v51 = vmul.f32 %v10969_v49, %v10875_v30 }
 0x258   : > { %v1927_v15 = vmul.f32 %v10969_v49, %v10884_v52  ;;  %v1928_v55 = vmul.f32 %v10969_v49, %v10896_v3  ;;  %v1929_v24 = vmul.f32 %v10969_v49, %v10906_v36  ;;  %v1930_v45 = vmul.f32 %v10969_v49, %v10915_v19 }
 0x259   : > { %16496 = vst [vmem:[#allocation46_spill] sm:$0xff] %v10985_v46  ;;  %v1931_v5 = vmul.f32 %v10969_v49, %v10924_v20  ;;  %v1932_v0 = vmul.f32 %v10969_v49, %v10933_v26  ;;  %v1933_v30 = vmul.f32 %v10969_v49, %v10942_v2  ;;  %v1934_v52 = vmul.f32 %v10969_v49, %v10951_v61 }
 0x25a   : > { %v1935_v3 = vmul.f32 %v10969_v49, %v1765_v32  ;;  %v1960_v50 = vmul.f32 %v10967_v11, %v1902_v27  ;;  %v1961_v36 = vmul.f32 %v10967_v11, %v1903_v1  ;;  %v1962_v19 = vmul.f32 %v10967_v11, %v1904_v35 }
 0x25b   : > { %v1963_v14 = vmul.f32 %v10967_v11, %v1905_v38  ;;  %v1964_v20 = vmul.f32 %v10967_v11, %v1906_v48  ;;  %v1965_v26 = vmul.f32 %v10967_v11, %v1907_v53  ;;  %v1966_v16 = vmul.f32 %v10967_v11, %v1908_v60 }
 0x25c   : > { %v1967_v2 = vmul.f32 %v10967_v11, %v1909_v22  ;;  %v1968_v61 = vmul.f32 %v10967_v11, %v1910_v6  ;;  %v1969_v32 = vmul.f32 %v10967_v11, %v1911_v59  ;;  %v1970_v23 = vmul.f32 %v10967_v11, %v1912_v9 }
 0x25d   : > { %v1971_v62 = vmul.f32 %v10967_v11, %v1913_v8  ;;  %v1972_v43 = vmul.f32 %v10967_v11, %v1914_v29  ;;  %v1973_v31 = vmul.f32 %v10967_v11, %v1915_v13  ;;  %v1974_v28 = vmul.f32 %v10967_v11, %v1916_v56 }
 0x25e   : > { %v1975_v27 = vmul.f32 %v10967_v11, %v1917_v37  ;;  %v1978_v1 = vmul.f32 %v10967_v11, %v1920_v57  ;;  %v1979_v35 = vmul.f32 %v10967_v11, %v1921_v33  ;;  %v1980_v38 = vmul.f32 %v10967_v11, %v1922_v47  ;;  %v16497_v57 = vld [vmem:[#allocation81_spill] sm:$0xff] }
 0x25f   : > { %v1981_v48 = vmul.f32 %v10967_v11, %v1923_v63  ;;  %v1982_v53 = vmul.f32 %v10967_v11, %v1924_v42  ;;  %v1983_v60 = vmul.f32 %v10967_v11, %v1925_v21  ;;  %v1984_v22 = vmul.f32 %v10967_v11, %v1926_v51  ;;  %v16498_v63 = vld [vmem:[#allocation16_spill] sm:$0xff]  ;;  %v16499_v21 = vld [vmem:[#allocation79_spill] sm:$0xff] }
 0x260   : > { %v1985_v6 = vmul.f32 %v10967_v11, %v1927_v15  ;;  %v1986_v59 = vmul.f32 %v10967_v11, %v1928_v55  ;;  %v1987_v9 = vmul.f32 %v10967_v11, %v1929_v24  ;;  %v1988_v8 = vmul.f32 %v10967_v11, %v1930_v45  ;;  %v16500_v15 = vld [vmem:[#allocation80_spill] sm:$0xff]  ;;  %v16501_v24 = vld [vmem:[#allocation18_spill] sm:$0xff] }
 0x261   : > { %v1989_v29 = vmul.f32 %v10967_v11, %v1931_v5  ;;  %v1990_v13 = vmul.f32 %v10967_v11, %v1932_v0  ;;  %v1991_v56 = vmul.f32 %v10967_v11, %v1933_v30  ;;  %v1992_v37 = vmul.f32 %v10967_v11, %v1934_v52  ;;  %v16502_v5 = vld [vmem:[#allocation82_spill] sm:$0xff] }
 0x262   : > { %v1884_v33 = vmul.f32 %v10969_v49, %v16497_v57  ;;  %v1993_v47 = vmul.f32 %v10967_v11, %v1935_v3  ;;  %v1885_v42 = vmul.f32 %v10969_v49, %v16498_v63  ;;  %v1882_v51 = vmul.f32 %v10969_v49, %v16499_v21 }
 0x263   : > { %v1883_v55 = vmul.f32 %v10969_v49, %v16500_v15  ;;  %v1886_v45 = vmul.f32 %v10969_v49, %v16501_v24  ;;  %v1887_v0 = vmul.f32 %v10969_v49, %v16502_v5  ;;  %v2018_v3 = vadd.f32 %v10971_v17, %v1960_v50 }
 0x264   : > { %v1942_v30 = vmul.f32 %v10967_v11, %v1884_v33  ;;  %v1943_v52 = vmul.f32 %v10967_v11, %v1885_v42  ;;  %v2019_v57 = vadd.f32 %v10971_v17, %v1961_v36  ;;  %v2020_v63 = vadd.f32 %v10971_v17, %v1962_v19 }
 0x265   : > { %v2021_v21 = vadd.f32 %v10971_v17, %v1963_v14  ;;  %v2022_v15 = vadd.f32 %v10971_v17, %v1964_v20  ;;  %v2023_v25 = vadd.f32 %v10971_v17, %v1965_v26  ;;  %v2024_v24 = vadd.f32 %v10971_v17, %v1966_v16 }
 0x266   : > { %v2025_v5 = vadd.f32 %v10971_v17, %v1967_v2  ;;  %v2026_v33 = vadd.f32 %v10971_v17, %v1968_v61  ;;  %v2027_v42 = vadd.f32 %v10971_v17, %v1969_v32  ;;  %v2028_v50 = vadd.f32 %v10971_v17, %v1970_v23 }
 0x267   : > { %v2029_v36 = vadd.f32 %v10971_v17, %v1971_v62  ;;  %v2030_v19 = vadd.f32 %v10971_v17, %v1972_v43  ;;  %v2031_v14 = vadd.f32 %v10971_v17, %v1973_v31  ;;  %v2032_v20 = vadd.f32 %v10971_v17, %v1974_v28 }
 0x268   : > { %v2033_v26 = vadd.f32 %v10971_v17, %v1975_v27  ;;  %v2036_v16 = vadd.f32 %v10971_v17, %v1978_v1  ;;  %v2037_v2 = vadd.f32 %v10971_v17, %v1979_v35  ;;  %v2038_v61 = vadd.f32 %v10971_v17, %v1980_v38 }
 0x269   : > { %v2039_v32 = vadd.f32 %v10971_v17, %v1981_v48  ;;  %v2040_v23 = vadd.f32 %v10971_v17, %v1982_v53  ;;  %v2041_v62 = vadd.f32 %v10971_v17, %v1983_v60  ;;  %v2042_v43 = vadd.f32 %v10971_v17, %v1984_v22 }
 0x26a   : > { %v2043_v31 = vadd.f32 %v10971_v17, %v1985_v6  ;;  %v2044_v28 = vadd.f32 %v10971_v17, %v1986_v59  ;;  %v2045_v27 = vadd.f32 %v10971_v17, %v1987_v9  ;;  %v2046_v1 = vadd.f32 %v10971_v17, %v1988_v8  ;;  %v16504_v6 = vld [vmem:[#allocation23_spill] sm:$0xff] }
 0x26b   : > { %v2047_v35 = vadd.f32 %v10971_v17, %v1989_v29  ;;  %v2048_v38 = vadd.f32 %v10971_v17, %v1990_v13  ;;  %v2049_v48 = vadd.f32 %v10971_v17, %v1991_v56  ;;  %v2050_v53 = vadd.f32 %v10971_v17, %v1992_v37  ;;  %v16506_v8 = vld [vmem:[#allocation83_spill] sm:$0xff] }
 0x26c   : > { %v2051_v60 = vadd.f32 %v10971_v17, %v1993_v47  ;;  %v1888_v22 = vmul.f32 %v10969_v49, %v16503_v4  ;;  %v1889_v59 = vmul.f32 %v10969_v49, %v16504_v6  ;;  %v1890_v9 = vmul.f32 %v10969_v49, %v16505_v34  ;;  %v16508_v34 = vld [vmem:[#allocation30_spill] sm:$0xff] }
 0x26d   : > { %v1891_v29 = vmul.f32 %v10969_v49, %v16506_v8  ;;  %v1940_v13 = vmul.f32 %v10967_v11, %v1882_v51  ;;  %v1941_v56 = vmul.f32 %v10967_v11, %v1883_v55  ;;  %v1944_v37 = vmul.f32 %v10967_v11, %v1886_v45  ;;  %v16526_v8 = vld [vmem:[#allocation38_spill] sm:$0xff] }
 0x26e   : > { %v1945_v47 = vmul.f32 %v10967_v11, %v1887_v0  ;;  %v2000_v46 = vadd.f32 %v10971_v17, %v1942_v30  ;;  %v2001_v4 = vadd.f32 %v10971_v17, %v1943_v52  ;;  %v11144_v6 = vmul.f32 %v10969_v49, %v16507_v18 }
 0x26f   : > { %v11148_v39 = vmul.f32 %v10969_v49, %v16508_v34  ;;  %v11151_v51 = vmul.f32 %v10967_v11, %v1888_v22  ;;  %v11154_v55 = vmul.f32 %v10967_v11, %v1889_v59  ;;  %v11157_v45 = vmul.f32 %v10967_v11, %v1890_v9  ;;  %v16528_v34 = vld [vmem:[#allocation40_spill] sm:$0xff] }
 0x270   : > { %v11160_v0 = vmul.f32 %v10967_v11, %v1891_v29  ;;  %v11163_v30 = vadd.f32 %v10971_v17, %v1940_v13  ;;  %v11166_v18 = vadd.f32 %v10971_v17, %v1941_v56  ;;  %v2002_v52 = vadd.f32 %v10971_v17, %v1944_v37 }
 0x271   : > { %16509 = vst [vmem:[#allocation48_spill] sm:$0xff] %v11154_v55  ;;  %16510 = vst [vmem:[#allocation51_spill] sm:$0xff] %v11157_v45  ;;  %v2003_v22 = vadd.f32 %v10971_v17, %v1945_v47  ;;  %v2054_v59 = vsel %vm15969_vm1, %v2000_v46, 0.0  ;;  %v2055_v9 = vsel %vm15970_vm2, %v2001_v4, 0.0  ;;  %v16516_v45 = vld [vmem:[#allocation29_spill] sm:$0xff]  ;;  %v16524_v55 = vld [vmem:[#allocation36_spill] sm:$0xff] }
 0x272   : > { %16511 = vst [vmem:[#allocation53_spill] sm:$0xff] %v11160_v0  ;;  %16512 = vst [vmem:[#allocation55_spill] sm:$0xff] %v11163_v30  ;;  %vm16517_vm9 = vcmp.eq.s32.totalorder %v16516_v45, 1  ;;  %v16518_v0 = vld [vmem:[#allocation31_spill] sm:$0xff]  ;;  %v16520_v30 = vld [vmem:[#allocation33_spill] sm:$0xff]  ;;  %vm16525_vm5 = vcmp.eq.s32.totalorder %v16524_v55, 1 }
 0x273   : > { %16513 = vst [vmem:[#allocation57_spill] sm:$0xff] %v11166_v18  ;;  %v2072_v29 = vsel %vm16517_vm9, %v2018_v3, 0.0  ;;  %vm16519_vm8 = vcmp.eq.s32.totalorder %v16518_v0, 1  ;;  %vm16521_vm12 = vcmp.eq.s32.totalorder %v16520_v30, 1  ;;  %v16522_v18 = vld [vmem:[#allocation34_spill] sm:$0xff]  ;;  %v2076_v47 = vsel %vm16525_vm5, %v2022_v15, 0.0 }
 0x274   : > { %v2073_v13 = vsel %vm16519_vm8, %v2019_v57, 0.0  ;;  %v2074_v56 = vsel %vm16521_vm12, %v2020_v63, 0.0  ;;  %vm16523_vm7 = vcmp.eq.s32.totalorder %v16522_v18, 1  ;;  %vm16527_vm1 = vcmp.eq.s32.totalorder %v16526_v8, 1  ;;  %v16530_v45 = vld [vmem:[#allocation41_spill] sm:$0xff]  ;;  %v16532_v0 = vld [vmem:[#allocation43_spill] sm:$0xff] }
 0x275   : > { %v2075_v37 = vsel %vm16523_vm7, %v2021_v21, 0.0  ;;  %v2077_v46 = vsel %vm16527_vm1, %v2023_v25, 0.0  ;;  %vm16529_vm2 = vcmp.eq.s32.totalorder %v16528_v34, 1  ;;  %vm16531_vm9 = vcmp.eq.s32.totalorder %v16530_v45, 1  ;;  %v16534_v30 = vld [vmem:[#allocation44_spill] sm:$0xff]  ;;  %v16536_v18 = vld [vmem:[#allocation45_spill] sm:$0xff] }
 0x276   : > { %v2078_v4 = vsel %vm16529_vm2, %v2024_v24, 0.0  ;;  %v2079_v3 = vsel %vm16531_vm9, %v2025_v5, 0.0  ;;  %vm16533_vm8 = vcmp.eq.s32.totalorder %v16532_v0, 1  ;;  %vm16535_vm12 = vcmp.eq.s32.totalorder %v16534_v30, 1  ;;  %v16538_v55 = vld [vmem:[#allocation47_spill] sm:$0xff]  ;;  %v16540_v8 = vld [vmem:[#allocation49_spill] sm:$0xff] }
 0x277   : > { %v2080_v57 = vsel %vm16533_vm8, %v2026_v33, 0.0  ;;  %v2081_v63 = vsel %vm16535_vm12, %v2027_v42, 0.0  ;;  %vm16537_vm7 = vcmp.eq.s32.totalorder %v16536_v18, 1  ;;  %vm16539_vm5 = vcmp.eq.s32.totalorder %v16538_v55, 1  ;;  %v16543_v45 = vld [vmem:[#allocation52_spill] sm:$0xff]  ;;  %v16547_v18 = vld [vmem:[#allocation61_spill] sm:$0xff] }
 0x278   : > { %v2082_v21 = vsel %vm16537_vm7, %v2028_v50, 0.0  ;;  %v2083_v15 = vsel %vm16539_vm5, %v2029_v36, 0.0  ;;  %vm16541_vm1 = vcmp.eq.s32.totalorder %v16540_v8, 1  ;;  %vm16542_vm2 = vcmp.eq.s32.totalorder %v16454_v44, 1  ;;  %v16549_v55 = vld [vmem:[#allocation63_spill] sm:$0xff]  ;;  %v16551_v8 = vld [vmem:[#allocation65_spill] sm:$0xff] }
 0x279   : > { %v2084_v25 = vsel %vm16541_vm1, %v2030_v19, 0.0  ;;  %v2085_v24 = vsel %vm16542_vm2, %v2031_v14, 0.0  ;;  %vm16544_vm9 = vcmp.eq.s32.totalorder %v16543_v45, 1  ;;  %v2087_v33 = vsel %vm1525_vm14, %v2033_v26, 0.0 }
 0x27a   : > { %v2086_v5 = vsel %vm16544_vm9, %v2032_v20, 0.0  ;;  %vm16546_vm8 = vcmp.eq.s32.totalorder %v10144_v54, 1  ;;  %vm16548_vm12 = vcmp.eq.s32.totalorder %v16547_v18, 1  ;;  %vm16550_vm7 = vcmp.eq.s32.totalorder %v16549_v55, 1  ;;  %v16598_v54 = vld [vmem:[#allocation14_spill] sm:$0xff] }
 0x27b   : > { %v2090_v42 = vsel %vm16546_vm8, %v2036_v16, 0.0  ;;  %v2091_v50 = vsel %vm16548_vm12, %v2037_v2, 0.0  ;;  %v2092_v36 = vsel %vm16550_vm7, %v2038_v61, 0.0  ;;  %vm16552_vm5 = vcmp.eq.s32.totalorder %v16551_v8, 1  ;;  %v16559_v8 = vld [vmem:[#allocation73_spill] sm:$0xff] }
 0x27c   : > { %v2093_v19 = vsel %vm16552_vm5, %v2039_v32, 0.0  ;;  %vm16553_vm1 = vcmp.eq.s32.totalorder %v16473_v58, 1  ;;  %vm16554_vm2 = vcmp.eq.s32.totalorder %v16476_v10, 1  ;;  %vm16555_vm9 = vcmp.eq.s32.totalorder %v10247_v40, 1  ;;  %v16561_v58 = vld [vmem:[#allocation74_spill] sm:$0xff] }
 0x27d   : > { %v2094_v14 = vsel %vm16553_vm1, %v2040_v23, 0.0  ;;  %v2095_v20 = vsel %vm16554_vm2, %v2041_v62, 0.0  ;;  %v2096_v26 = vsel %vm16555_vm9, %v2042_v43, 0.0  ;;  %vm16556_vm8 = vcmp.eq.s32.totalorder %v10260_v7, 1 }
 0x27e   : > { %v2097_v16 = vsel %vm16556_vm8, %v2043_v31, 0.0  ;;  %vm16557_vm12 = vcmp.eq.s32.totalorder %v10276_v41, 1  ;;  %vm16558_vm7 = vcmp.eq.s32.totalorder %v10285_v12, 1  ;;  %vm16560_vm5 = vcmp.eq.s32.totalorder %v16559_v8, 1 }
 0x27f   : > { %v2098_v2 = vsel %vm16557_vm12, %v2044_v28, 0.0  ;;  %v2099_v61 = vsel %vm16558_vm7, %v2045_v27, 0.0  ;;  %v2100_v32 = vsel %vm16560_vm5, %v2046_v1, 0.0  ;;  %vm16562_vm1 = vcmp.eq.s32.totalorder %v16561_v58, 1 }
 0x280   : > { %v2101_v23 = vsel %vm16562_vm1, %v2047_v35, 0.0  ;;  %v2102_v62 = vsel %vm1540_vm0, %v2048_v38, 0.0  ;;  %v2103_v43 = vsel %vm1541_vm11, %v2049_v48, 0.0  ;;  %v2104_v31 = vsel %vm1542_vm13, %v2050_v53, 0.0 }
 0x281   : > { %v2105_v28 = vsel %vm1543_vm10, %v2051_v60, 0.0  ;;  %v11238_v12 = vpack.c.bf16 %v2073_v13, %v2072_v29  ;;  %v11240_v27 = vpack.c.bf16 %v2075_v37, %v2074_v56  ;;  %v11242_v1 = vpack.c.bf16 %v2077_v46, %v2076_v47 }
 0x282   : > { %v11244_v58 = vpack.c.bf16 %v2079_v3, %v2078_v4  ;;  %v11246_v35 = vpack.c.bf16 %v2081_v63, %v2080_v57  ;;  %v11248_v38 = vpack.c.bf16 %v2083_v15, %v2082_v21  ;;  %v11250_v40 = vpack.c.bf16 %v2085_v24, %v2084_v25  ;;  %v16569_v63 = vld [vmem:[#allocation32_spill] sm:$0xff] }
 0x283   : > { %v11252_v48 = vpack.c.bf16 %v2087_v33, %v2086_v5  ;;  %v11254_v53 = vpack.c.bf16 %v2091_v50, %v2090_v42  ;;  %v11256_v41 = vpack.c.bf16 %v2093_v19, %v2092_v36  ;;  %v11258_v60 = vpack.c.bf16 %v2095_v20, %v2094_v14  ;;  %v16570_v15 = vld [vmem:[#allocation84_spill] sm:$0xff]  ;;  %v16571_v5 = vld [vmem:[#allocation35_spill] sm:$0xff] }
 0x284   : > { %v11260_v29 = vpack.c.bf16 %v2097_v16, %v2096_v26  ;;  %v11262_v13 = vpack.c.bf16 %v2099_v61, %v2098_v2  ;;  %v11264_v56 = vpack.c.bf16 %v2101_v23, %v2100_v32  ;;  %v2056_v47 = vsel %vm1494_vm3, %v2002_v52, 0.0  ;;  %v16572_v50 = vld [vmem:[#allocation48_spill] sm:$0xff]  ;;  %v16573_v19 = vld [vmem:[#allocation55_spill] sm:$0xff]  ;;  %v16575_v26 = vld [vmem:[#allocation57_spill] sm:$0xff] }
 0x285   : > { %v2057_v4 = vsel %vm1495_vm4, %v2003_v22, 0.0  ;;  %v11270_v3 = vpack.c.bf16 %v2103_v43, %v2102_v62  ;;  %v11272_v57 = vpack.c.bf16 %v2105_v28, %v2104_v31  ;;  %v1894_v21 = vmul.f32 %v10969_v49, %v16569_v63  ;;  %v16577_v61 = vld [vmem:[#allocation51_spill] sm:$0xff]  ;;  %v16578_v32 = vld [vmem:[#allocation53_spill] sm:$0xff] }
 0x286   : > { %v1895_v25 = vmul.f32 %v10969_v49, %v16570_v15  ;;  %v1950_v24 = vmul.f32 %v10967_v11, %v11144_v6  ;;  %vm2377_vm2 = vcmask 1046528   ;;  %v1896_v52 = vmul.f32 %v10969_v49, %v16571_v5  ;;  %v16580_v23 = vld [vmem:[#allocation37_spill] sm:$0xff] }
 0x287   : > { %v1951_v22 = vmul.f32 %v10967_v11, %v11148_v39  ;;  %v2004_v33 = vadd.f32 %v10971_v17, %v11151_v51  ;;  %v2107_v42 = vpack.c.bf16 %v2055_v9, %v2054_v59  ;;  %v2005_v36 = vadd.f32 %v10971_v17, %v16572_v50  ;;  %v16581_v5 = vld [vmem:[#allocation9_spill] sm:$0xff] }
 0x288   : > { %v2052_v20 = vsel %vm1490_vm15, %v16573_v19, 0.0  ;;  %v2053_v16 = vsel %vm1491_vm6, %v16575_v26, 0.0  ;;  %v11294_v2 = vpack.c.bf16 %v2057_v4, %v2056_v47  ;;  %v2006_v39 = vadd.f32 %v10971_v17, %v16577_v61  ;;  %v16583_v19 = vld [vmem:[#allocation10_spill] sm:$0xff] }
 0x289   : > { %v2007_v51 = vadd.f32 %v10971_v17, %v16578_v32  ;;  %vm2133_vm9 = vsmask.f32 7424  ;;  %v16579_v59 = vmov 0   ;;  %v11305_v62 = vmul.f32 %v10969_v49, %v16580_v23 }
 0x28a   : > { %v11301_v9 = vrot.slane %v16579_v59, 7  ;;  %v11308_v43 = vmul.f32 %v10967_v11, %v1894_v21  ;;  %v1953_v31 = vmul.f32 %v10967_v11, %v1895_v25  ;;  %v2008_v28 = vadd.f32 %v10971_v17, %v1950_v24  ;;  %v16587_v25 = vld [vmem:[#allocation11_spill] sm:$0xff] }
 0x28b   : > { %v11313_v47 = vmul.f32 %v10967_v11, %v1896_v52  ;;  %v2009_v4 = vadd.f32 %v10971_v17, %v1951_v22  ;;  %v2106_v63 = vpack.c.bf16 %v2053_v16, %v2052_v20  ;;  %v2382_v15 = vrot.slane %v2107_v42, 1  ;;  %v16589_v52 = vld [vmem:[#allocation12_spill] sm:$0xff] }
 0x28c   : > { %vm16582_vm8 = vcmp.eq.s32.totalorder %v16581_v5, 1  ;;  %vm16584_vm12 = vcmp.eq.s32.totalorder %v16583_v19, 1  ;;  %v11320_v61 = vshll.u32 %v2107_v42, 16  ;;  %v11323_v21 = vshll.u32 %v11294_v2, 16 }
 0x28d   : > { %v2058_v50 = vsel %vm16582_vm8, %v2004_v33, 0.0  ;;  %v2059_v26 = vsel %vm16584_vm12, %v2005_v36, 0.0  ;;  %vm16588_vm7 = vcmp.eq.s32.totalorder %v16587_v25, 1  ;;  %vm16590_vm5 = vcmp.eq.s32.totalorder %v16589_v52, 1  ;;  %v16592_v33 = vld [vmem:[#allocation13_spill] sm:$0xff] }
 0x28e   : > { %16585 = vst [vmem:[#allocation59_spill] sm:$0xff] %v11320_v61  ;;  %16586 = vst [vmem:[#allocation62_spill] sm:$0xff] %v11323_v21  ;;  %v2060_v24 = vsel %vm16588_vm7, %v2006_v39, 0.0  ;;  %v2061_v32 = vsel %vm16590_vm5, %v2007_v51, 0.0  ;;  %v11329_v22 = vrot.slane %v2106_v63, 1  ;;  %v11331_v20 = vshll.u32 %v2106_v63, 16 }
 0x28f   : > { %vm2541_vm1 = vsmask.f32 256  ;;  %vm16593_vm8 = vcmp.eq.s32.totalorder %v16592_v33, 1  ;;  %v2153_v36 = vrot.slane %v11320_v61, 1  ;;  %v11336_v23 = vshrl.u32 %v2107_v42, 16 }
 0x290   : > { %16591 = vst [vmem:[#allocation64_spill] sm:$0xff] %v11331_v20  ;;  %v2062_v16 = vsel %vm16593_vm8, %v2008_v28, 0.0  ;;  %v2384_v7 = vrot.slane %v11294_v2, 1  ;;  %v11341_v39 = vsel %vm2377_vm2, %v11329_v22, %v2382_v15  ;;  %v11344_v51 = vrot.slane %v11331_v20, 1 }
 0x291   : > { %16594 = vst [vmem:[#allocation66_spill] sm:$0xff] %v11336_v23  ;;  %16595 = vst [vmem:[#allocation81_spill] sm:$0xff] %v11341_v39  ;;  %v11346_v10 = vshrl.u32 %v2106_v63, 16  ;;  %v2161_v8 = vrot.slane %v11323_v21, 1  ;;  %v2559_v55 = vshrl.u32 %v11329_v22, 16  ;;  %v15984_v28 = vshrl.u32 %v11341_v39, 16 }
 0x292   : > { %v2157_v42 = vor.u32 %v11336_v23, %v2153_v36  ;;  %v11353_v18 = vsel %vm2377_vm2, %v2382_v15, %v2384_v7  ;;  %vm16599_vm12 = vcmp.eq.s32.totalorder %v16598_v54, 1  ;;  %v11357_v45 = vpack.c.bf16 %v2059_v26, %v2058_v50 }
 0x293   : > { %16596 = vst [vmem:[#allocation16_spill] sm:$0xff] %v11346_v10  ;;  %16597 = vst [vmem:[#allocation79_spill] sm:$0xff] %v11353_v18  ;;  %v2063_v0 = vsel %vm16599_vm12, %v2009_v4, 0.0  ;;  %v11359_v44 = vpack.c.bf16 %v2061_v32, %v2060_v24  ;;  %v2149_v63 = vor.u32 %v11346_v10, %v11344_v51  ;;  %v2565_v30 = vrot.slane %v15984_v28, 7 }
 0x294   : > { %v15985_v34 = vshll.u32 %v11341_v39, 16  ;;  %v11367_v33 = vsel %vm2133_vm9, %v2157_v42, %v2161_v8  ;;  %v2547_v4 = vshrl.u32 %v11344_v51, 16  ;;  %v2561_v24 = vrot.slane %v2559_v55, 7 }
 0x295   : > { %16600 = vst [vmem:[#allocation80_spill] sm:$0xff] %v11367_v33  ;;  %v11371_v54 = vsel %vm2133_vm9, %v2149_v63, %v2153_v36  ;;  %v15986_v26 = vshrl.u32 %v11367_v33, 16  ;;  %v16602_v63 = vshrl.u32 %v11353_v18, 16  ;;  %v11390_v50 = vshrl.u32 %v11294_v2, 16 }
 0x296   : > { %16601 = vst [vmem:[#allocation18_spill] sm:$0xff] %v11371_v54  ;;  %v2568_v32 = vor.u32 %v15985_v34, %v2565_v30  ;;  %v15987_v28 = vshrl.u32 %v11371_v54, 16  ;;  %v11396_v42 = vshll.u32 %v11357_v45, 16  ;;  %v2549_v25 = vrot.slane %v2547_v4, 7 }
 0x297   : > { %v11382_v15 = vrot.slane %v15986_v26, 7  ;;  %v11387_v52 = vrot.slane %v16602_v63, 7  ;;  %16603 = vst [vmem:[#allocation82_spill] sm:$0xff] %v11390_v50  ;;  %v2386_v26 = vrot.slane %v11357_v45, 1  ;;  %v16605_v36 = vrot.slane %v11346_v10, 7 }
 0x298   : > { %v2569_v55 = vsel %vm2541_vm1, %v2561_v24, %v2568_v32  ;;  %v2553_v34 = vrot.slane %v15987_v28, 7  ;;  %16604 = vst [vmem:[#allocation21_spill] sm:$0xff] %v11396_v42  ;;  %v15990_v19 = vshll.u32 %v11353_v18, 16  ;;  %v2165_v2 = vor.u32 %v11390_v50, %v2161_v8 }
 0x299   : > { %8424 = vmatmul.mubr.bf16.vlgmr.msra.gmra.mrb[76].mxu0 %v2569_v55  ;;  %v2544_v63 = vor.u32 %v16605_v36, %v11331_v20  ;;  %v16606_v24 = vshll.u32 %v11371_v54, 16  ;;  %v16607_v28 = vshll.u32 %v11367_v33, 16  ;;  %v16608_v46 = vmov 0.0   ;;  %v16626_v20 = vld [vmem:[#allocation86_spill] sm:$0xff] }
 0x29a   : > { %vm16609_vm7 = vmmov 0   ;;  %v2169_v4 = vrot.slane %v11396_v42, 1  ;;  %v11413_v55 = vsel %vm2377_vm2, %v2384_v7, %v2386_v26  ;;  %v2010_v36 = vadd.f32 %v10971_v17, %v11308_v43 }
 0x29b   : > { %v2556_v32 = vor.u32 %v16606_v24, %v2553_v34  ;;  %v2579_v5 = vor.u32 %v16607_v28, %v11382_v15  ;;  %8427 = vmatprep.mubr.msk.bf16.mxu0 %vm16609_vm7, %v16608_v46  ;;  %16610 = vst [vmem:[#allocation23_spill] sm:$0xff] %v11413_v55  ;;  %v2011_v8 = vadd.f32 %v10971_v17, %v1953_v31  ;;  %v15993_v37 = vrot.slane %v11336_v23, 7 }
 0x29c   : > { %v2587_v24 = vor.u32 %v15990_v19, %v11387_v52  ;;  %v11424_v14 = vsel %vm2133_vm9, %v2165_v2, %v2169_v4  ;;  %v15992_v6 = vshrl.u32 %v11413_v55, 16  ;;  %v11428_v7 = vshrl.u32 %v11357_v45, 16 }
 0x29d   : > { %v2557_v28 = vsel %vm2541_vm1, %v2549_v25, %v2556_v32  ;;  %16611 = vst [vmem:[#allocation25_spill] sm:$0xff] %v11424_v14  ;;  %v11430_v33 = vpack.c.bf16 %v2063_v0, %v2062_v16  ;;  %v2545_v43 = vsel %vm2541_vm1, %v11301_v9, %v2544_v63  ;;  %v15991_v31 = vshrl.u32 %v11424_v14, 16  ;;  %v16614_v16 = vld [vmem:[#allocation15_spill] sm:$0xff] }
 0x29e   : > { %16612 = vst [vmem:[#allocation83_spill] sm:$0xff] %v11428_v7  ;;  %3321 = vmatprep.mubr.bf16.mxu1 %v2557_v28  ;;  %v11436_v19 = vshll.u32 %v11359_v44, 16  ;;  %v1955_v25 = vmul.f32 %v10967_v11, %v11305_v62  ;;  %v2580_v2 = vsel %vm2541_vm1, %v2553_v34, %v2579_v5  ;;  %v2173_v45 = vor.u32 %v11428_v7, %v2169_v4  ;;  %v16616_v28 = vld [vmem:[#allocation17_spill] sm:$0xff] }
 0x29f   : > { %3322 = vmatmul.mubr.bf16.vlgmr.msra.gmra.mrb[32].mxu1 %v2545_v43  ;;  %v2388_v0 = vrot.slane %v11359_v44, 1  ;;  %vm16615_vm5 = vcmp.eq.s32.totalorder %v16614_v16, 1  ;;  %vm16617_vm8 = vcmp.eq.s32.totalorder %v16616_v28, 1  ;;  %v11449_v63 = vrot.slane %v15991_v31, 7 }
 0x2a0   : > { %16613 = vst [vmem:[#allocation28_spill] sm:$0xff] %v11436_v19  ;;  %v2064_v32 = vsel %vm16615_vm5, %v2010_v36, 0.0  ;;  %v2065_v9 = vsel %vm16617_vm8, %v2011_v8, 0.0  ;;  %3329 = vmatprep.mubr.bf16.mxu1 %v2580_v2  ;;  %v2177_v62 = vrot.slane %v11436_v19, 1  ;;  %v2588_v43 = vsel %vm2541_vm1, %v2565_v30, %v2587_v24  ;;  %v16622_v24 = vld [vmem:[#allocation39_spill] sm:$0xff] }
 0x2a1   : > { %v2571_v34 = vor.u32 %v15993_v37, %v11320_v61  ;;  %v15994_v5 = vshll.u32 %v11424_v14, 16  ;;  %v11459_v4 = vrot.slane %v15992_v6, 7  ;;  %8428 = vmatmul.mubr.bf16.gmra.mrb[80].mxu0 %v2588_v43  ;;  %v11465_v8 = vsel %vm2377_vm2, %v2386_v26, %v2388_v0  ;;  %v16623_v43 = vld [vmem:[#allocation85_spill] sm:$0xff]  ;;  %v16624_v37 = vld [vmem:[#allocation42_spill] sm:$0xff] }
 0x2a2   : > { %v11462_v36 = vsel %vm2133_vm9, %v2173_v45, %v2177_v62  ;;  %16619 = vst [vmem:[#allocation32_spill] sm:$0xff] %v11465_v8  ;;  %v11468_v2 = vshrl.u32 %v11359_v44, 16  ;;  %v11471_v30 = vshll.u32 %v11430_v33, 16  ;;  %v1898_v31 = vmul.f32 %v10969_v49, %v16622_v24  ;;  %8431 = vmatprep.mubr.msk.bf16.mxu0 %vm16609_vm7, %v16608_v46 }
 0x2a3   : > { %16618 = vst [vmem:[#allocation30_spill] sm:$0xff] %v11462_v36  ;;  %v2598_v6 = vor.u32 %v15994_v5, %v11449_v63  ;;  %v16001_v45 = vshll.u32 %v11413_v55, 16  ;;  %v1899_v44 = vmul.f32 %v10969_v49, %v16623_v43  ;;  %v1900_v28 = vmul.f32 %v10969_v49, %v16624_v37  ;;  %v16628_v37 = vld [vmem:[#allocation19_spill] sm:$0xff] }
 0x2a4   : > { %16620 = vst [vmem:[#allocation84_spill] sm:$0xff] %v11468_v2  ;;  %16621 = vst [vmem:[#allocation35_spill] sm:$0xff] %v11471_v30  ;;  %v2012_v24 = vadd.f32 %v10971_v17, %v11313_v47  ;;  %v2181_v16 = vor.u32 %v11468_v2, %v2177_v62  ;;  %v2013_v5 = vadd.f32 %v10971_v17, %v1955_v25  ;;  %v16625_v43 = vrot.slane %v11346_v10, 7 }
 0x2a5   : > { %v11490_v14 = vpack.c.bf16 %v2065_v9, %v2064_v32  ;;  %v2606_v61 = vor.u32 %v16001_v45, %v11459_v4  ;;  %v2185_v47 = vrot.slane %v11471_v30, 1  ;;  %v2390_v62 = vrot.slane %v11430_v33, 1 }
 0x2a6   : > { %v2572_v18 = vsel %vm2541_vm1, %v16625_v43, %v2571_v34  ;;  %v1901_v25 = vmul.f32 %v10969_v49, %v16626_v20  ;;  %v1956_v32 = vmul.f32 %v10967_v11, %v1898_v31  ;;  %v2599_v9 = vsel %vm2541_vm1, %v11382_v15, %v2598_v6  ;;  %v16631_v20 = vld [vmem:[#allocation20_spill] sm:$0xff] }
 0x2a7   : > { %3330 = vmatmul.mubr.bf16.gmra.mrb[36].mxu1 %v2572_v18  ;;  %v16627_v45 = vshrl.u32 %v11462_v36, 16  ;;  %v1957_v34 = vmul.f32 %v10967_v11, %v1899_v44  ;;  %v1958_v43 = vmul.f32 %v10967_v11, %v1900_v28  ;;  %vm16629_vm12 = vcmp.eq.s32.totalorder %v16628_v37, 1 }
 0x2a8   : > { %v2066_v55 = vsel %vm16629_vm12, %v2012_v24, 0.0  ;;  %3337 = vmatprep.mubr.bf16.mxu1 %v2599_v9  ;;  %v11516_v49 = vsel %vm2133_vm9, %v2181_v16, %v2185_v47  ;;  %vm16632_vm5 = vcmp.eq.s32.totalorder %v16631_v20, 1  ;;  %v2607_v6 = vsel %vm2541_vm1, %v11387_v52, %v2606_v61 }
 0x2a9   : > { %v11509_v26 = vrot.slane %v16627_v45, 7  ;;  %16630 = vst [vmem:[#allocation48_spill] sm:$0xff] %v11516_v49  ;;  %v2067_v18 = vsel %vm16632_vm5, %v2013_v5, 0.0  ;;  %v16004_v15 = vshll.u32 %v11462_v36, 16  ;;  %v16633_v31 = vshrl.u32 %v11465_v8, 16  ;;  %8432 = vmatmul.mubr.bf16.gmra.mrb[84].mxu0 %v2607_v6 }
 0x2aa   : > { %v16634_v28 = vrot.slane %v11390_v50, 7  ;;  %v11529_v24 = vsel %vm2377_vm2, %v2388_v0, %v2390_v62  ;;  %v11532_v16 = vshrl.u32 %v11430_v33, 16  ;;  %v11535_v5 = vshll.u32 %v11490_v14, 16  ;;  %8435 = vmatprep.mubr.msk.bf16.mxu0 %vm16609_vm7, %v16608_v46 }
 0x2ab   : > { %v2622_v45 = vrot.slane %v16633_v31, 7  ;;  %16635 = vst [vmem:[#allocation55_spill] sm:$0xff] %v11529_v24  ;;  %v1959_v61 = vmul.f32 %v10967_v11, %v1901_v25  ;;  %v2617_v52 = vor.u32 %v16004_v15, %v11509_v26  ;;  %v16005_v9 = vshll.u32 %v11465_v8, 16  ;;  %v16642_v8 = vld [vmem:[#allocation24_spill] sm:$0xff] }
 0x2ac   : > { %v2590_v44 = vor.u32 %v16634_v28, %v11323_v21  ;;  %16636 = vst [vmem:[#allocation57_spill] sm:$0xff] %v11532_v16  ;;  %16637 = vst [vmem:[#allocation51_spill] sm:$0xff] %v11535_v5  ;;  %v2014_v6 = vadd.f32 %v10971_v17, %v1956_v32  ;;  %v2015_v33 = vadd.f32 %v10971_v17, %v1957_v34  ;;  %v16638_v20 = vrot.slane %v11336_v23, 7 }
 0x2ad   : > { %v2189_v31 = vor.u32 %v11532_v16, %v2185_v47  ;;  %v2016_v28 = vadd.f32 %v10971_v17, %v1958_v43  ;;  %v11549_v11 = vpack.c.bf16 %v2067_v18, %v2066_v55  ;;  %v2625_v25 = vor.u32 %v16005_v9, %v2622_v45  ;;  %v16640_v9 = vld [vmem:[#allocation22_spill] sm:$0xff] }
 0x2ae   : > { %v2591_v37 = vsel %vm2541_vm1, %v16638_v20, %v2590_v44  ;;  %v2608_v0 = vrot.slane %v11428_v7, 7  ;;  %v2193_v32 = vrot.slane %v11535_v5, 1  ;;  %v2392_v34 = vrot.slane %v11490_v14, 1  ;;  %v16645_v7 = vld [vmem:[#allocation26_spill] sm:$0xff] }
 0x2af   : > { %v2017_v47 = vadd.f32 %v10971_v17, %v1959_v61  ;;  %3338 = vmatmul.mubr.bf16.gmra.mrb[40].mxu1 %v2591_v37  ;;  %v2618_v55 = vsel %vm2541_vm1, %v11449_v63, %v2617_v52  ;;  %v16639_v43 = vshrl.u32 %v11516_v49, 16  ;;  %vm16641_vm8 = vcmp.eq.s32.totalorder %v16640_v9, 1 }
 0x2b0   : > { %v2068_v15 = vsel %vm16641_vm8, %v2014_v6, 0.0  ;;  %vm16643_vm12 = vcmp.eq.s32.totalorder %v16642_v8, 1  ;;  %3345 = vmatprep.mubr.bf16.mxu1 %v2618_v55  ;;  %v11570_v44 = vsel %vm2133_vm9, %v2189_v31, %v2193_v32  ;;  %vm16646_vm5 = vcmp.eq.s32.totalorder %v16645_v7, 1 }
 0x2b1   : > { %v2633_v18 = vrot.slane %v16639_v43, 7  ;;  %v2069_v20 = vsel %vm16643_vm12, %v2015_v33, 0.0  ;;  %16644 = vst [vmem:[#allocation53_spill] sm:$0xff] %v11570_v44  ;;  %v2070_v17 = vsel %vm16646_vm5, %v2016_v28, 0.0  ;;  %v2626_v37 = vsel %vm2541_vm1, %v11459_v4, %v2625_v25  ;;  %v16651_v28 = vld [vmem:[#allocation27_spill] sm:$0xff] }
 0x2b2   : > { %v16009_v63 = vshll.u32 %v11516_v49, 16  ;;  %v16647_v61 = vshrl.u32 %v11529_v24, 16  ;;  %8436 = vmatmul.mubr.bf16.gmra.mrb[88].mxu0 %v2626_v37  ;;  %v2609_v6 = vor.u32 %v2608_v0, %v11396_v42  ;;  %v11581_v33 = vsel %vm2377_vm2, %v2390_v62, %v2392_v34 }
 0x2b3   : > { %16648 = vst [vmem:[#allocation37_spill] sm:$0xff] %v11581_v33  ;;  %v11584_v31 = vshrl.u32 %v11490_v14, 16  ;;  %v11587_v55 = vshll.u32 %v11549_v11, 16  ;;  %vm16652_vm8 = vcmp.eq.s32.totalorder %v16651_v28, 1  ;;  %8439 = vmatprep.mubr.msk.bf16.mxu0 %vm16609_vm7, %v16608_v46  ;;  %v16010_v43 = vshll.u32 %v11529_v24, 16 }
 0x2b4   : > { %v2641_v52 = vrot.slane %v16647_v61, 7  ;;  %v2071_v4 = vsel %vm16652_vm8, %v2017_v47, 0.0  ;;  %v2636_v25 = vor.u32 %v16009_v63, %v2633_v18  ;;  %v16011_v28 = vshrl.u32 %v11581_v33, 16 }
 0x2b5   : > { %16649 = vst [vmem:[#allocation39_spill] sm:$0xff] %v11584_v31  ;;  %16650 = vst [vmem:[#allocation85_spill] sm:$0xff] %v11587_v55  ;;  %v2197_v14 = vor.u32 %v11584_v31, %v2193_v32  ;;  %v2394_v47 = vrot.slane %v11549_v11, 1  ;;  %v11603_v7 = vpack.c.bf16 %v2069_v20, %v2068_v15  ;;  %v11605_v63 = vpack.c.bf16 %v2071_v4, %v2070_v17 }
 0x2b6   : > { %v2644_v61 = vor.u32 %v16010_v43, %v2641_v52  ;;  %v16653_v8 = vrot.slane %v11390_v50, 7  ;;  %v2201_v62 = vrot.slane %v11587_v55, 1  ;;  %v2637_v32 = vsel %vm2541_vm1, %v11509_v26, %v2636_v25 }
 0x2b7   : > { %v16654_v43 = vshrl.u32 %v11570_v44, 16  ;;  %v16655_v15 = vrot.slane %v11468_v2, 7  ;;  %v16012_v26 = vshll.u32 %v11570_v44, 16  ;;  %v11633_v4 = vsel %vm2377_vm2, %v2392_v34, %v2394_v47 }
 0x2b8   : > { %v2610_v9 = vsel %vm2541_vm1, %v16653_v8, %v2609_v6  ;;  %v11621_v17 = vsel %vm2133_vm9, %v2197_v14, %v2201_v62  ;;  %v8853_v8 = vld [vmem:[%s15768_s3] sm:$0xff]   ;;  %v11630_v6 = vrot.slane %v16011_v28, 7  ;;  %16657 = vst [vmem:[#allocation86_spill] sm:$0xff] %v11633_v4  ;;  %v11636_v25 = vshrl.u32 %v11549_v11, 16 }
 0x2b9   : > { %3346 = vmatmul.mubr.bf16.gmra.mrb[44].mxu1 %v2610_v9  ;;  %v11615_v37 = vrot.slane %v16654_v43, 7  ;;  %v2628_v20 = vor.u32 %v16655_v15, %v11436_v19  ;;  %16656 = vst [vmem:[#allocation42_spill] sm:$0xff] %v11621_v17  ;;  %v2645_v9 = vsel %vm2541_vm1, %v2622_v45, %v2644_v61  ;;  %v11639_v43 = vshll.u32 %v11603_v7, 16  ;;  %v8854_v61 = vld [vmem:[%s15768_s3 + $0x8] sm:$0xff]  }
 0x2ba   : > { %3353 = vmatprep.mubr.bf16.mxu1 %v2637_v32  ;;  %8440 = vmatmul.mubr.bf16.gmra.mrb[92].mxu0 %v2645_v9  ;;  %16658 = vst [vmem:[#allocation87_spill] sm:$0xff] %v11636_v25  ;;  %v2400_v45 = vrot.slane %v11238_v12, 1  ;;  %v16016_v11 = vshll.u32 %v11581_v33, 16  ;;  %v2205_v15 = vor.u32 %v11636_v25, %v2201_v62  ;;  %v16017_v28 = vshrl.u32 %v11633_v4, 16 }
 0x2bb   : > { %16659 = vst [vmem:[#allocation88_spill] sm:$0xff] %v11639_v43  ;;  %4374 = vmatpush1.bf16.msra.mxu1 %v8853_v8  ;;  %v2655_v34 = vor.u32 %v16012_v26, %v11615_v37  ;;  %8443 = vmatprep.mubr.msk.bf16.mxu0 %vm16609_vm7, %v16608_v46  ;;  %v2629_v26 = vsel %vm2541_vm1, %v2608_v0, %v2628_v20  ;;  %v2209_v14 = vrot.slane %v11639_v43, 1  ;;  %v2396_v44 = vrot.slane %v11603_v7, 1  ;;  %v8855_v20 = vld [vmem:[%s15768_s3 + $0x10] sm:$0xff]  }
 0x2bc   : > { %4375 = vmatprep.subr.bf16.mxu1 %v16579_v59  ;;  %v2663_v8 = vor.u32 %v16016_v11, %v11630_v6  ;;  %v16660_v32 = vrot.slane %v11605_v63, 1  ;;  %v16662_v11 = vshrl.u32 %v11621_v17, 16  ;;  %vm3787_vm12 = vsmask.f32 4352 }
 0x2bd   : > { %v2656_v62 = vsel %vm2541_vm1, %v2633_v18, %v2655_v34  ;;  %v11675_v0 = vsel %vm2133_vm9, %v2205_v15, %v2209_v14  ;;  %v2679_v34 = vrot.slane %v16017_v28, 7  ;;  %v11691_v15 = vshrl.u32 %v11603_v7, 16 }
 0x2be   : > { %v11666_v19 = vsel %vm2377_vm2, %v16660_v32, %v2400_v45  ;;  %v11671_v9 = vrot.slane %v16662_v11, 7  ;;  %16663 = vst [vmem:[#allocation90_spill] sm:$0xff] %v11675_v0  ;;  %v2664_v32 = vsel %vm2541_vm1, %v2641_v52, %v2663_v8  ;;  %v11688_v11 = vsel %vm2377_vm2, %v2394_v47, %v2396_v44  ;;  %v8856_v8 = vld [vmem:[%s15768_s3 + $0x18] sm:$0xff]  }
 0x2bf   : > { %16661 = vst [vmem:[#allocation89_spill] sm:$0xff] %v11666_v19  ;;  %4376 = vmatpush1.bf16.msra.mxu1 %v8854_v61  ;;  %v16020_v61 = vshll.u32 %v11621_v17, 16  ;;  %16665 = vst [vmem:[#allocation91_spill] sm:$0xff] %v11688_v11  ;;  %v2402_v52 = vrot.slane %v11240_v27, 1  ;;  %v16028_v7 = vshll.u32 %v11633_v4, 16  ;;  %v2404_v28 = vrot.slane %v11242_v1, 1 }
 0x2c0   : > { %4377 = vmatprep.subr.bf16.mxu1 %v16579_v59  ;;  %16666 = vst [vmem:[#allocation92_spill] sm:$0xff] %v11691_v15  ;;  %v16031_v47 = vrot.slane %v11584_v31, 7 }
 0x2c1   : > { %3354 = vmatmul.mubr.bf16.gmra.mrb[48].mxu1 %v2629_v26  ;;  %v16664_v26 = vrot.slane %v11532_v16, 7  ;;  %v2682_v17 = vor.u32 %v16028_v7, %v2679_v34 }
 0x2c2   : > { %3361 = vmatprep.mubr.bf16.mxu1 %v2656_v62  ;;  %8444 = vmatmul.mubr.bf16.gmra.mrb[96].mxu0 %v2664_v32  ;;  %v11694_v62 = vshll.u32 %v11605_v63, 16  ;;  %v2674_v32 = vor.u32 %v16020_v61, %v11671_v9  ;;  %v16029_v61 = vshrl.u32 %v11688_v11, 16 }
 0x2c3   : > { %v2647_v18 = vor.u32 %v16664_v26, %v11471_v30  ;;  %4378 = vmatpush1.bf16.msra.mxu1 %v8855_v20  ;;  %8447 = vmatprep.mubr.msk.bf16.mxu0 %vm16609_vm7, %v16608_v46  ;;  %v2213_v26 = vor.u32 %v11691_v15, %v2209_v14  ;;  %v11710_v20 = vsel %vm2377_vm2, %v2400_v45, %v2402_v52  ;;  %v16669_v30 = vrot.slane %v11468_v2, 7 }
 0x2c4   : > { %16667 = vst [vmem:[#allocation93_spill] sm:$0xff] %v11694_v62  ;;  %4379 = vmatprep.subr.bf16.mxu1 %v16579_v59  ;;  %16668 = vst [vmem:[#allocation94_spill] sm:$0xff] %v11710_v20  ;;  %v2217_v24 = vrot.slane %v11694_v62, 1  ;;  %v2675_v14 = vsel %vm2541_vm1, %v11615_v37, %v2674_v32  ;;  %v16670_v45 = vshrl.u32 %v11675_v0, 16  ;;  %v2683_v37 = vsel %vm2541_vm1, %v11630_v6, %v2682_v17  ;;  %v8858_v6 = vld [vmem:[%s15768_s3 + $0x28] sm:$0xff]  }
 0x2c5   : > { %v2648_v33 = vsel %vm2541_vm1, %v16669_v30, %v2647_v18  ;;  %v11732_v30 = vsel %vm2377_vm2, %v2402_v52, %v2404_v28  ;;  %v16030_v18 = vshll.u32 %v11675_v0, 16  ;;  %v2666_v32 = vor.u32 %v16031_v47, %v11535_v5 }
 0x2c6   : > { %v11725_v49 = vrot.slane %v16670_v45, 7  ;;  %v11729_v7 = vsel %vm2133_vm9, %v2213_v26, %v2217_v24  ;;  %16672 = vst [vmem:[#allocation96_spill] sm:$0xff] %v11732_v30  ;;  %v16673_v52 = vrot.slane %v11605_v63, 1  ;;  %v11756_v17 = vshll.u32 %v11238_v12, 16 }
 0x2c7   : > { %4380 = vmatpush1.bf16.msra.mxu1 %v8856_v8  ;;  %16671 = vst [vmem:[#allocation95_spill] sm:$0xff] %v11729_v7  ;;  %v11742_v8 = vrot.slane %v16029_v61, 7  ;;  %v16039_v0 = vrot.slane %v11636_v25, 7 }
 0x2c8   : > { %4381 = vmatprep.subr.bf16.mxu1 %v16579_v59  ;;  %v11750_v26 = vsel %vm2377_vm2, %v2396_v44, %v16673_v52  ;;  %16676 = vst [vmem:[#allocation99_spill] sm:$0xff] %v11756_v17  ;;  %v2693_v45 = vor.u32 %v16030_v18, %v11725_v49  ;;  %v16035_v44 = vshll.u32 %v11688_v11, 16  ;;  %v16677_v18 = vrot.slane %v11532_v16, 7 }
 0x2c9   : > { %3362 = vmatmul.mubr.bf16.gmra.mrb[52].mxu1 %v2648_v33  ;;  %v8857_v33 = vld [vmem:[%s15768_s3 + $0x20] sm:$0xff]   ;;  %16674 = vst [vmem:[#allocation97_spill] sm:$0xff] %v11750_v26  ;;  %v16038_v61 = vshrl.u32 %v11750_v26, 16 }
 0x2ca   : > { %3369 = vmatprep.mubr.bf16.mxu1 %v2675_v14  ;;  %8448 = vmatmul.mubr.bf16.gmra.mrb[100].mxu0 %v2683_v37  ;;  %v11753_v14 = vshrl.u32 %v11605_v63, 16  ;;  %v2701_v52 = vor.u32 %v16035_v44, %v11742_v8  ;;  %v2667_v47 = vsel %vm2541_vm1, %v16677_v18, %v2666_v32  ;;  %v2225_v63 = vrot.slane %v11756_v17, 1 }
 0x2cb   : > { %4382 = vmatpush1.bf16.msra.mxu1 %v8857_v33  ;;  %8451 = vmatprep.mubr.msk.bf16.mxu0 %vm16609_vm7, %v16608_v46  ;;  %v2406_v33 = vrot.slane %v11244_v58, 1  ;;  %v16679_v44 = vshrl.u32 %v11729_v7, 16 }
 0x2cc   : > { %16675 = vst [vmem:[#allocation98_spill] sm:$0xff] %v11753_v14  ;;  %4383 = vmatprep.subr.bf16.mxu1 %v16579_v59  ;;  %v2221_v37 = vor.u32 %v11753_v14, %v2217_v24  ;;  %v2694_v24 = vsel %vm2541_vm1, %v11671_v9, %v2693_v45  ;;  %v2702_v32 = vsel %vm2541_vm1, %v2679_v34, %v2701_v52  ;;  %v11800_v9 = vrot.slane %v16038_v61, 7  ;;  %v8860_v52 = vld [vmem:[%s15768_s3 + $0x80] sm:$0xff]  }
 0x2cd   : > { %v11781_v5 = vsel %vm2377_vm2, %v2404_v28, %v2406_v33  ;;  %v11787_v11 = vrot.slane %v16679_v44, 7  ;;  %v8859_v28 = vld [vmem:[%s15768_s3 + $0x30] sm:$0xff]   ;;  %v2685_v45 = vor.u32 %v16039_v0, %v11587_v55  ;;  %v11811_v34 = vshll.u32 %v11240_v27, 16  ;;  %8532 = vmatpush3.bf16.msra.mxu0 %v8860_v52 }
 0x2ce   : > { %16678 = vst [vmem:[#allocation100_spill] sm:$0xff] %v11781_v5  ;;  %v11791_v18 = vsel %vm2133_vm9, %v2221_v37, %v2225_v63  ;;  %v11808_v37 = vshrl.u32 %v11238_v12, 16  ;;  %8533 = vmatprep.subr.bf16.mxu0 %v16608_v46  ;;  %v16685_v12 = vrot.slane %v11584_v31, 7  ;;  %v16048_v55 = vrot.slane %v11691_v15, 7 }
 0x2cf   : > { %4384 = vmatpush1.bf16.msra.mxu1 %v8858_v6  ;;  %16680 = vst [vmem:[#allocation101_spill] sm:$0xff] %v11791_v18  ;;  %v2408_v6 = vrot.slane %v11246_v35, 1  ;;  %16682 = vst [vmem:[#allocation103_spill] sm:$0xff] %v11811_v34  ;;  %v2233_v4 = vrot.slane %v11811_v34, 1  ;;  %v16686_v52 = vshrl.u32 %v11791_v18, 16  ;;  %v16057_v31 = vrot.slane %v11753_v14, 7 }
 0x2d0   : > { %4385 = vmatprep.subr.bf16.mxu1 %v16579_v59  ;;  %16681 = vst [vmem:[#allocation102_spill] sm:$0xff] %v11808_v37  ;;  %v2229_v44 = vor.u32 %v11808_v37, %v2225_v63 }
 0x2d1   : > { %3370 = vmatmul.mubr.bf16.gmra.mrb[56].mxu1 %v2667_v47  ;;  %v16040_v47 = vshll.u32 %v11729_v7, 16  ;;  %v11826_v61 = vsel %vm2377_vm2, %v2406_v33, %v2408_v6  ;;  %v2686_v33 = vsel %vm2541_vm1, %v16685_v12, %v2685_v45  ;;  %v11845_v0 = vrot.slane %v16686_v52, 7  ;;  %v8862_v45 = vld [vmem:[%s15768_s3 + $0x88] sm:$0xff]  }
 0x2d2   : > { %3377 = vmatprep.mubr.bf16.mxu1 %v2694_v24  ;;  %8452 = vmatmul.mubr.bf16.gmra.mrb[104].mxu0 %v2702_v32  ;;  %v8861_v24 = vld [vmem:[%s15768_s3 + $0x38] sm:$0xff]   ;;  %16683 = vst [vmem:[#allocation104_spill] sm:$0xff] %v11826_v61  ;;  %v16049_v52 = vshll.u32 %v11791_v18, 16  ;;  %v2414_v18 = vrot.slane %v11252_v48, 1 }
 0x2d3   : > { %4386 = vmatpush1.bf16.msra.mxu1 %v8859_v28  ;;  %v2712_v32 = vor.u32 %v16040_v47, %v11787_v11  ;;  %8455 = vmatprep.mubr.msk.bf16.mxu0 %vm16609_vm7, %v16608_v46  ;;  %v2410_v28 = vrot.slane %v11248_v38, 1  ;;  %v16684_v47 = vshll.u32 %v11750_v26, 16  ;;  %v8864_v26 = vld [vmem:[%s15768_s3 + $0x90] sm:$0xff]  }
 0x2d4   : > { %4387 = vmatprep.subr.bf16.mxu1 %v16579_v59  ;;  %8534 = vmatpush3.bf16.msra.mxu0 %v8862_v45  ;;  %v16693_v45 = vrot.slane %v11636_v25, 7  ;;  %v16700_v25 = vld [vmem:[#allocation46_spill] sm:$0xff] }
 0x2d5   : > { %v2720_v7 = vor.u32 %v16684_v47, %v11800_v9  ;;  %v2713_v63 = vsel %vm2541_vm1, %v11725_v49, %v2712_v32  ;;  %v11848_v47 = vsel %vm2377_vm2, %v2408_v6, %v2410_v28  ;;  %v11859_v49 = vsel %vm2133_vm9, %v2229_v44, %v2233_v4  ;;  %8535 = vmatprep.subr.bf16.mxu0 %v16608_v46 }
 0x2d6   : > { %16687 = vst [vmem:[#allocation105_spill] sm:$0xff] %v11848_v47  ;;  %16689 = vst [vmem:[#allocation106_spill] sm:$0xff] %v11859_v49  ;;  %v11862_v32 = vshrl.u32 %v11240_v27, 16  ;;  %v11865_v6 = vshll.u32 %v11242_v1, 16  ;;  %v2704_v44 = vor.u32 %v16048_v55, %v11639_v43  ;;  %v16054_v27 = vshll.u32 %v11666_v19, 16 }
 0x2d7   : > { %4388 = vmatpush1.bf16.msra.mxu1 %v8861_v24  ;;  %v16688_v24 = vshrl.u32 %v11666_v19, 16  ;;  %v16695_v55 = vshrl.u32 %v11859_v49, 16 }
 0x2d8   : > { %4389 = vmatprep.subr.bf16.mxu1 %v16579_v59  ;;  %16690 = vst [vmem:[#allocation107_spill] sm:$0xff] %v11862_v32  ;;  %16691 = vst [vmem:[#allocation108_spill] sm:$0xff] %v11865_v6  ;;  %8536 = vmatpush3.bf16.msra.mxu0 %v8864_v26  ;;  %v2705_v43 = vsel %vm2541_vm1, %v16693_v45, %v2704_v44  ;;  %v8866_v26 = vld [vmem:[%s15768_s3 + $0x98] sm:$0xff]   ;;  %v11943_v44 = vshll.u32 %v11244_v58, 16 }
 0x2d9   : > { %3378 = vmatmul.mubr.bf16.gmra.mrb[60].mxu1 %v2686_v33  ;;  %v11856_v12 = vrot.slane %v16688_v24, 7  ;;  %v8863_v33 = vld [vmem:[%s15768_s3 + $0x40] sm:$0xff]   ;;  %v2237_v24 = vor.u32 %v11862_v32, %v2233_v4  ;;  %v2412_v4 = vrot.slane %v11250_v40, 1  ;;  %8537 = vmatprep.subr.bf16.mxu0 %v16608_v46  ;;  %v11914_v19 = vrot.slane %v16695_v55, 7 }
 0x2da   : > { %3385 = vmatprep.mubr.bf16.mxu1 %v2713_v63  ;;  %v2721_v63 = vsel %vm2541_vm1, %v11742_v8, %v2720_v7  ;;  %v8865_v7 = vld [vmem:[%s15768_s3 + $0x48] sm:$0xff]   ;;  %v2731_v8 = vor.u32 %v16049_v52, %v11845_v0  ;;  %v16696_v55 = vshrl.u32 %v11710_v20, 16  ;;  %16698 = vst [vmem:[#allocation112_spill] sm:$0xff] %v11943_v44 }
 0x2db   : > { %8456 = vmatmul.mubr.bf16.gmra.mrb[108].mxu0 %v2721_v63  ;;  %4390 = vmatpush1.bf16.msra.mxu1 %v8863_v33  ;;  %v2739_v33 = vor.u32 %v16054_v27, %v11856_v12  ;;  %v2241_v63 = vrot.slane %v11865_v6, 1  ;;  %v11899_v52 = vsel %vm2377_vm2, %v2410_v28, %v2412_v4  ;;  %v11933_v45 = vsel %vm2377_vm2, %v2412_v4, %v2414_v18  ;;  %v8868_v4 = vld [vmem:[%s15768_s3 + $0xa0] sm:$0xff]  }
 0x2dc   : > { %8459 = vmatprep.mubr.msk.bf16.mxu0 %vm16609_vm7, %v16608_v46  ;;  %4391 = vmatprep.subr.bf16.mxu1 %v16579_v59  ;;  %16692 = vst [vmem:[#allocation109_spill] sm:$0xff] %v11899_v52  ;;  %v2732_v28 = vsel %vm2541_vm1, %v11787_v11, %v2731_v8  ;;  %v16058_v11 = vshll.u32 %v11859_v49, 16 }
 0x2dd   : > { %v11907_v27 = vsel %vm2133_vm9, %v2237_v24, %v2241_v63  ;;  %v2740_v24 = vsel %vm2541_vm1, %v11800_v9, %v2739_v33  ;;  %8538 = vmatpush3.bf16.msra.mxu0 %v8866_v26  ;;  %v2723_v9 = vor.u32 %v16057_v31, %v11694_v62  ;;  %v8869_v26 = vld [vmem:[%s15768_s3 + $0x58] sm:$0xff]   ;;  %v2416_v31 = vrot.slane %v16700_v25, 1 }
 0x2de   : > { %16694 = vst [vmem:[#allocation110_spill] sm:$0xff] %v11907_v27  ;;  %8539 = vmatprep.subr.bf16.mxu0 %v16608_v46  ;;  %v11975_v33 = vrot.slane %v11270_v3, 1 }
 0x2df   : > { %4392 = vmatpush1.bf16.msra.mxu1 %v8865_v7  ;;  %v11929_v7 = vrot.slane %v16696_v55, 7  ;;  %v2750_v55 = vor.u32 %v16058_v11, %v11914_v19  ;;  %v16703_v11 = vrot.slane %v11808_v37, 7 }
 0x2e0   : > { %4393 = vmatprep.subr.bf16.mxu1 %v16579_v59  ;;  %16701 = vst [vmem:[#allocation46_spill] sm:$0xff] %v11975_v33 }
 0x2e1   : > { %3386 = vmatmul.mubr.bf16.gmra.mrb[64].mxu1 %v2705_v43  ;;  %v8867_v43 = vld [vmem:[%s15768_s3 + $0x50] sm:$0xff]   ;;  %8540 = vmatpush3.bf16.msra.mxu0 %v8868_v4  ;;  %v2742_v16 = vor.u32 %v16703_v11, %v11756_v17  ;;  %v2751_v4 = vsel %vm2541_vm1, %v11845_v0, %v2750_v55  ;;  %v8870_v11 = vld [vmem:[%s15768_s3 + $0xa8] sm:$0xff]  }
 0x2e2   : > { %3393 = vmatprep.mubr.bf16.mxu1 %v2732_v28  ;;  %v11940_v28 = vshrl.u32 %v11242_v1, 16  ;;  %v16064_v1 = vshll.u32 %v11710_v20, 16  ;;  %8541 = vmatprep.subr.bf16.mxu0 %v16608_v46  ;;  %v16704_v20 = vshrl.u32 %v11732_v30, 16 }
 0x2e3   : > { %8460 = vmatmul.mubr.bf16.gmra.mrb[112].mxu0 %v2740_v24  ;;  %4394 = vmatpush1.bf16.msra.mxu1 %v8867_v43  ;;  %v16699_v43 = vshrl.u32 %v11907_v27, 16 }
 0x2e4   : > { %16697 = vst [vmem:[#allocation111_spill] sm:$0xff] %v11940_v28  ;;  %8463 = vmatprep.mubr.msk.bf16.mxu0 %vm16609_vm7, %v16608_v46  ;;  %v2245_v24 = vor.u32 %v11940_v28, %v2241_v63  ;;  %4395 = vmatprep.subr.bf16.mxu1 %v16579_v59  ;;  %v2758_v49 = vor.u32 %v16064_v1, %v11929_v7  ;;  %v16702_v63 = vrot.slane %v11691_v15, 7  ;;  %v2249_v1 = vrot.slane %v11943_v44, 1 }
 0x2e5   : > { %v11971_v62 = vrot.slane %v16699_v43, 7  ;;  %v16070_v43 = vshll.u32 %v11907_v27, 16  ;;  %v11990_v15 = vrot.slane %v16704_v20, 7  ;;  %8542 = vmatpush3.bf16.msra.mxu0 %v8870_v11  ;;  %v12019_v20 = vshll.u32 %v11246_v35, 16  ;;  %v8873_v11 = vld [vmem:[%s15768_s3 + $0x68] sm:$0xff]  }
 0x2e6   : > { %v2724_v8 = vsel %vm2541_vm1, %v16702_v63, %v2723_v9  ;;  %v11993_v9 = vsel %vm2377_vm2, %v2414_v18, %v2416_v31  ;;  %v12001_v0 = vsel %vm2133_vm9, %v2245_v24, %v2249_v1  ;;  %v8871_v18 = vld [vmem:[%s15768_s3 + $0x60] sm:$0xff]   ;;  %v2759_v55 = vsel %vm2541_vm1, %v11856_v12, %v2758_v49  ;;  %v8872_v49 = vld [vmem:[%s15768_s3 + $0xb0] sm:$0xff]   ;;  %8543 = vmatprep.subr.bf16.mxu0 %v16608_v46 }
 0x2e7   : > { %4396 = vmatpush1.bf16.msra.mxu1 %v8869_v26  ;;  %16705 = vst [vmem:[#allocation113_spill] sm:$0xff] %v12001_v0  ;;  %v2886_v26 = vshrl.u32 %v11993_v9, 16  ;;  %v2769_v63 = vor.u32 %v16070_v43, %v11971_v62  ;;  %16706 = vst [vmem:[#allocation114_spill] sm:$0xff] %v12019_v20  ;;  %v16707_v2 = vshll.u32 %v11993_v9, 16  ;;  %v16709_v24 = vrot.slane %v11753_v14, 7 }
 0x2e8   : > { %4397 = vmatprep.subr.bf16.mxu1 %v16579_v59 }
 0x2e9   : > { %3394 = vmatmul.mubr.bf16.gmra.mrb[68].mxu1 %v2724_v8  ;;  %v12016_v8 = vshrl.u32 %v11244_v58, 16  ;;  %v4038_v17 = vrot.slane %v2886_v26, 3  ;;  %v4039_v12 = vrot.slane %v16707_v2, 4  ;;  %v2743_v27 = vsel %vm2541_vm1, %v16709_v24, %v2742_v16  ;;  %8544 = vmatpush3.bf16.msra.mxu0 %v8872_v49 }
 0x2ea   : > { %3401 = vmatprep.mubr.bf16.mxu1 %v2751_v4  ;;  %v16076_v4 = vshll.u32 %v11732_v30, 16  ;;  %v2770_v16 = vsel %vm2541_vm1, %v11914_v19, %v2769_v63  ;;  %8545 = vmatprep.subr.bf16.mxu0 %v16608_v46  ;;  %v8874_v19 = vld [vmem:[%s15768_s3 + $0xb8] sm:$0xff]   ;;  %v16714_v63 = vrot.slane %v11256_v41, 1 }
 0x2eb   : > { %8464 = vmatmul.mubr.bf16.gmra.mrb[116].mxu0 %v2759_v55  ;;  %4398 = vmatpush1.bf16.msra.mxu1 %v8871_v18  ;;  %v16708_v18 = vrot.slane %v11254_v53, 1  ;;  %v2253_v55 = vor.u32 %v12016_v8, %v2249_v1  ;;  %v12044_v42 = vor.u32 %v4039_v12, %v4038_v17  ;;  %v2257_v17 = vrot.slane %v12019_v20, 1 }
 0x2ec   : > { %8467 = vmatprep.mubr.msk.bf16.mxu0 %vm16609_vm7, %v16608_v46  ;;  %v2777_v58 = vor.u32 %v16076_v4, %v11990_v15  ;;  %4399 = vmatprep.subr.bf16.mxu1 %v16579_v59  ;;  %v16710_v4 = vrot.slane %v11862_v32, 7  ;;  %v16712_v12 = vshrl.u32 %v12001_v0, 16 }
 0x2ed   : > { %v2419_v43 = vsel %vm2377_vm2, %v2416_v31, %v16708_v18  ;;  %v16711_v31 = vrot.slane %v11940_v28, 7  ;;  %8546 = vmatpush3.bf16.msra.mxu0 %v8874_v19  ;;  %v16719_v19 = vrot.slane %v11808_v37, 7 }
 0x2ee   : > { %v2905_v36 = vshrl.u32 %v2419_v43, 16  ;;  %v2761_v2 = vor.u32 %v16710_v4, %v11811_v34  ;;  %v2908_v14 = vshll.u32 %v2419_v43, 16  ;;  %v2778_v4 = vsel %vm2541_vm1, %v11929_v7, %v2777_v58  ;;  %8655 = vmatprep.subr.bf16.mxu0 %v16608_v46 }
 0x2ef   : > { %v2780_v18 = vor.u32 %v16711_v31, %v11865_v6  ;;  %4400 = vmatpush1.bf16.msra.mxu1 %v8873_v11  ;;  %v12062_v30 = vrot.slane %v16712_v12, 7  ;;  %v16715_v11 = vrot.slane %v11254_v53, 1  ;;  %v8875_v31 = vld [vmem:[%s15768_s3 + $0x70] sm:$0xff]  }
 0x2f0   : > { %v2907_v1 = vrot.slane %v2905_v36, 7  ;;  %v4050_v24 = vrot.slane %v2905_v36, 3  ;;  %v4051_v49 = vrot.slane %v2908_v14, 4  ;;  %4401 = vmatprep.subr.bf16.mxu1 %v16579_v59  ;;  %v12070_v36 = vsel %vm2133_vm9, %v2253_v55, %v2257_v17 }
 0x2f1   : > { %3402 = vmatmul.mubr.bf16.gmra.mrb[72].mxu1 %v2743_v27  ;;  %16713 = vst [vmem:[#allocation115_spill] sm:$0xff] %v12070_v36  ;;  %v12072_v27 = vrot.slane %v2886_v26, 7  ;;  %v2421_v58 = vsel %vm2377_vm2, %v16715_v11, %v16714_v63  ;;  %v12093_v63 = vshll.u32 %v11248_v38, 16 }
 0x2f2   : > { %3409 = vmatprep.mubr.bf16.mxu1 %v2770_v16  ;;  %v2910_v7 = vor.u32 %v2908_v14, %v2907_v1  ;;  %v16716_v16 = vshrl.u32 %v11781_v5, 16  ;;  %v12087_v55 = vor.u32 %v4051_v49, %v4050_v24  ;;  %v2924_v26 = vshrl.u32 %v2421_v58, 16 }
 0x2f3   : > { %8468 = vmatmul.mubr.bf16.gmra.mrb[120].mxu0 %v2778_v4  ;;  %v12090_v14 = vshrl.u32 %v11246_v35, 16  ;;  %16717 = vst [vmem:[#allocation116_spill] sm:$0xff] %v12093_v63  ;;  %v2927_v12 = vshll.u32 %v2421_v58, 16  ;;  %4402 = vmatpush1.bf16.msra.mxu1 %v8875_v31  ;;  %v16720_v58 = vrot.slane %v11862_v32, 7  ;;  %v2265_v32 = vrot.slane %v12093_v63, 1 }
 0x2f4   : > { %v12085_v43 = vrot.slane %v16716_v16, 7  ;;  %v12097_v11 = vsel %vm2541_vm1, %v12072_v27, %v2910_v7  ;;  %v16718_v16 = vshll.u32 %v12001_v0, 16  ;;  %8471 = vmatprep.mubr.msk.bf16.mxu0 %vm16609_vm7, %v16608_v46  ;;  %v2926_v35 = vrot.slane %v2924_v26, 7  ;;  %4403 = vmatprep.subr.bf16.mxu1 %v16579_v59  ;;  %v8876_v0 = vld [vmem:[%s15768_s3 + $0x78] sm:$0xff]  }
 0x2f5   : > { %v4062_v49 = vrot.slane %v2924_v26, 3  ;;  %v2762_v7 = vsel %vm2541_vm1, %v16719_v19, %v2761_v2  ;;  %v2781_v31 = vsel %vm2541_vm1, %v16720_v58, %v2780_v18  ;;  %v2261_v6 = vor.u32 %v12090_v14, %v2257_v17 }
 0x2f6   : > { %v2788_v24 = vor.u32 %v16718_v16, %v12062_v30  ;;  %v4063_v16 = vrot.slane %v2927_v12, 4  ;;  %v16721_v26 = vshll.u32 %v11781_v5, 16  ;;  %v2929_v2 = vor.u32 %v2927_v12, %v2926_v35 }
 0x2f7   : > { %v16722_v19 = vrot.slane %v11258_v60, 1  ;;  %v16723_v18 = vrot.slane %v11256_v41, 1  ;;  %4404 = vmatpush1.bf16.msra.mxu1 %v8876_v0  ;;  %v16724_v12 = vshrl.u32 %v12070_v36, 16 }
 0x2f8   : > { %v2796_v4 = vor.u32 %v16721_v26, %v12085_v43  ;;  %v12128_v37 = vor.u32 %v4063_v16, %v4062_v49  ;;  %v2789_v26 = vsel %vm2541_vm1, %v11971_v62, %v2788_v24  ;;  %v12137_v5 = vsel %vm2541_vm1, %v2907_v1, %v2929_v2  ;;  %5121 = vmatprep.subr.bf16.mxu1 %v16579_v59 }
 0x2f9   : > { %v2423_v17 = vsel %vm2377_vm2, %v16723_v18, %v16722_v19  ;;  %3410 = vmatmul.mubr.bf16.gmra.mrb[76].mxu1 %v2762_v7  ;;  %v12134_v34 = vrot.slane %v16724_v12, 7  ;;  %v16089_v49 = vshll.u32 %v12070_v36, 16  ;;  %v12142_v16 = vsel %vm2133_vm9, %v2261_v6, %v2265_v32 }
 0x2fa   : > { %v2943_v21 = vshrl.u32 %v2423_v17, 16  ;;  %v2946_v19 = vshll.u32 %v2423_v17, 16  ;;  %3417 = vmatprep.mubr.bf16.mxu1 %v2789_v26  ;;  %16725 = vst [vmem:[#allocation117_spill] sm:$0xff] %v12142_v16  ;;  %v2797_v62 = vsel %vm2541_vm1, %v11990_v15, %v2796_v4  ;;  %v16726_v24 = vshrl.u32 %v11826_v61, 16 }
 0x2fb   : > { %8472 = vmatmul.mubr.bf16.gmra.mrb[124].mxu0 %v2797_v62  ;;  %v12152_v17 = vshrl.u32 %v11248_v38, 16  ;;  %v12155_v26 = vshll.u32 %v11250_v40, 16  ;;  %v16728_v12 = vrot.slane %v11258_v60, 1  ;;  %v2807_v4 = vor.u32 %v16089_v49, %v12134_v34 }
 0x2fc   : > { %v2945_v0 = vrot.slane %v2943_v21, 7  ;;  %v4074_v7 = vrot.slane %v2943_v21, 3  ;;  %v12148_v18 = vrot.slane %v16726_v24, 7  ;;  %v4075_v2 = vrot.slane %v2946_v19, 4  ;;  %8475 = vmatprep.mubr.msk.bf16.mxu0 %vm16609_vm7, %v16608_v46 }
 0x2fd   : > { %v16727_v21 = vrot.slane %v11260_v29, 1  ;;  %v2269_v58 = vor.u32 %v12152_v17, %v2265_v32  ;;  %v16730_v36 = vrot.slane %v12016_v8, 7  ;;  %v2273_v32 = vrot.slane %v12155_v26, 1 }
 0x2fe   : > { %v2948_v6 = vor.u32 %v2946_v19, %v2945_v0  ;;  %v12168_v62 = vor.u32 %v4075_v2, %v4074_v7  ;;  %v16734_v19 = vshrl.u32 %v11848_v47, 16 }
 0x2ff   : > { %v2425_v15 = vsel %vm2377_vm2, %v16728_v12, %v16727_v21  ;;  %v16729_v12 = vshll.u32 %v11826_v61, 16  ;;  %v2799_v50 = vor.u32 %v16730_v36, %v11943_v44  ;;  %v16732_v36 = vrot.slane %v11262_v13, 1 }
 0x300   : > { %v2962_v24 = vshrl.u32 %v2425_v15, 16  ;;  %v12173_v1 = vsel %vm2541_vm1, %v2926_v35, %v2948_v6  ;;  %v2965_v21 = vshll.u32 %v2425_v15, 16  ;;  %v2808_v35 = vsel %vm2541_vm1, %v12062_v30, %v2807_v4 }
 0x301   : > { %v2815_v49 = vor.u32 %v16729_v12, %v12148_v18  ;;  %3418 = vmatmul.mubr.bf16.gmra.mrb[80].mxu1 %v2781_v31  ;;  %v16731_v6 = vshrl.u32 %v12142_v16, 16  ;;  %v12197_v44 = vrot.slane %v16734_v19, 7  ;;  %v12200_v31 = vsel %vm2133_vm9, %v2269_v58, %v2273_v32 }
 0x302   : > { %v2964_v38 = vrot.slane %v2962_v24, 7  ;;  %v4086_v7 = vrot.slane %v2962_v24, 3  ;;  %v4087_v23 = vrot.slane %v2965_v21, 4  ;;  %v16733_v24 = vrot.slane %v11260_v29, 1  ;;  %3425 = vmatprep.mubr.bf16.mxu1 %v2808_v35  ;;  %16735 = vst [vmem:[#allocation118_spill] sm:$0xff] %v12200_v31 }
 0x303   : > { %v12188_v15 = vrot.slane %v16731_v6, 7  ;;  %v16101_v6 = vshll.u32 %v11848_v47, 16  ;;  %v12211_v35 = vshrl.u32 %v11250_v40, 16  ;;  %v12214_v19 = vshll.u32 %v11252_v48, 16 }
 0x304   : > { %v2967_v12 = vor.u32 %v2965_v21, %v2964_v38  ;;  %v2427_v2 = vsel %vm2377_vm2, %v16733_v24, %v16732_v36  ;;  %v12202_v30 = vor.u32 %v4087_v23, %v4086_v7  ;;  %v2816_v21 = vsel %vm2541_vm1, %v12085_v43, %v2815_v49 }
 0x305   : > { %v2981_v4 = vshrl.u32 %v2427_v2, 16  ;;  %v2984_v36 = vshll.u32 %v2427_v2, 16  ;;  %8476 = vmatmul.mubr.bf16.gmra.mrb[128].mxu0 %v2816_v21  ;;  %16736 = vst [vmem:[#allocation119_spill] sm:$0xff] %v12211_v35  ;;  %v16737_v7 = vrot.slane %v11940_v28, 7  ;;  %v16738_v43 = vshll.u32 %v12142_v16, 16 }
 0x306   : > { %v12208_v61 = vsel %vm2541_vm1, %v2945_v0, %v2967_v12  ;;  %8479 = vmatprep.mubr.msk.bf16.mxu0 %vm16609_vm7, %v16608_v46  ;;  %v2834_v2 = vor.u32 %v16101_v6, %v12197_v44  ;;  %v2277_v12 = vor.u32 %v12211_v35, %v2273_v32  ;;  %v16739_v21 = vrot.slane %v11264_v56, 1 }
 0x307   : > { %v2983_v58 = vrot.slane %v2981_v4, 7  ;;  %v4098_v23 = vrot.slane %v2981_v4, 3  ;;  %v2800_v24 = vsel %vm2541_vm1, %v16737_v7, %v2799_v50  ;;  %v2826_v49 = vor.u32 %v16738_v43, %v12188_v15 }
 0x308   : > { %v4099_v40 = vrot.slane %v2984_v36, 4  ;;  %v16740_v50 = vrot.slane %v11262_v13, 1  ;;  %v16741_v43 = vrot.slane %v12090_v14, 7  ;;  %v2281_v32 = vrot.slane %v12214_v19, 1 }
 0x309   : > { %v2986_v4 = vor.u32 %v2984_v36, %v2983_v58  ;;  %3426 = vmatmul.mubr.bf16.gmra.mrb[84].mxu1 %v2800_v24  ;;  %v16105_v24 = vshll.u32 %v12200_v31, 16 }
 0x30a   : > { %v2429_v7 = vsel %vm2377_vm2, %v16740_v50, %v16739_v21  ;;  %v2818_v16 = vor.u32 %v16741_v43, %v12019_v20  ;;  %v12238_v28 = vor.u32 %v4099_v40, %v4098_v23  ;;  %v2827_v21 = vsel %vm2541_vm1, %v12134_v34, %v2826_v49 }
 0x30b   : > { %v3000_v10 = vshrl.u32 %v2429_v7, 16  ;;  %v12243_v36 = vsel %vm2541_vm1, %v2964_v38, %v2986_v4  ;;  %v3003_v47 = vshll.u32 %v2429_v7, 16  ;;  %v16742_v50 = vshrl.u32 %v12200_v31, 16  ;;  %3433 = vmatprep.mubr.bf16.mxu1 %v2827_v21 }
 0x30c   : > { %v2835_v40 = vsel %vm2541_vm1, %v12148_v18, %v2834_v2  ;;  %v12255_v38 = vsel %vm2133_vm9, %v2277_v12, %v2281_v32  ;;  %v16744_v34 = vshrl.u32 %v11899_v52, 16  ;;  %v12267_v18 = vshrl.u32 %v11252_v48, 16 }
 0x30d   : > { %v12249_v43 = vrot.slane %v16742_v50, 7  ;;  %v3002_v0 = vrot.slane %v3000_v10, 7  ;;  %v4110_v23 = vrot.slane %v3000_v10, 3  ;;  %16743 = vst [vmem:[#allocation120_spill] sm:$0xff] %v12255_v38  ;;  %v4111_v4 = vrot.slane %v3003_v47, 4  ;;  %8480 = vmatmul.mubr.bf16.gmra.mrb[132].mxu0 %v2835_v40 }
 0x30e   : > { %v12260_v49 = vrot.slane %v16744_v34, 7  ;;  %v16745_v10 = vrot.slane %v11264_v56, 1  ;;  %v12270_v2 = vshll.u32 %v16700_v25, 16  ;;  %8483 = vmatprep.mubr.msk.bf16.mxu0 %vm16609_vm7, %v16608_v46 }
 0x30f   : > { %v3005_v7 = vor.u32 %v3003_v47, %v3002_v0  ;;  %v12272_v12 = vor.u32 %v4111_v4, %v4110_v23  ;;  %v2845_v34 = vor.u32 %v16105_v24, %v12249_v43  ;;  %v16747_v23 = vrot.slane %v12016_v8, 7 }
 0x310   : > { %v2431_v21 = vsel %vm2377_vm2, %v16745_v10, %v11975_v33  ;;  %16746 = vst [vmem:[#allocation121_spill] sm:$0xff] %v12270_v2  ;;  %v2285_v10 = vor.u32 %v12267_v18, %v2281_v32  ;;  %v16748_v24 = vshll.u32 %v11899_v52, 16 }
 0x311   : > { %v3019_v50 = vshrl.u32 %v2431_v21, 16  ;;  %v12281_v40 = vsel %vm2541_vm1, %v2983_v58, %v3005_v7  ;;  %v3022_v48 = vshll.u32 %v2431_v21, 16  ;;  %v2819_v4 = vsel %vm2541_vm1, %v16747_v23, %v2818_v16 }
 0x312   : > { %v2853_v31 = vor.u32 %v16748_v24, %v12260_v49  ;;  %v16749_v58 = vrot.slane %v12152_v17, 7  ;;  %v2289_v21 = vrot.slane %v12270_v2, 1  ;;  %3434 = vmatmul.mubr.bf16.gmra.mrb[88].mxu1 %v2819_v4  ;;  %v2846_v16 = vsel %vm2541_vm1, %v12188_v15, %v2845_v34 }
 0x313   : > { %v3021_v6 = vrot.slane %v3019_v50, 7  ;;  %v4122_v20 = vrot.slane %v3019_v50, 3  ;;  %v4123_v54 = vrot.slane %v3022_v48, 4  ;;  %v16750_v50 = vrot.slane %v11272_v57, 1  ;;  %3441 = vmatprep.mubr.bf16.mxu1 %v2846_v16 }
 0x314   : > { %v2837_v7 = vor.u32 %v16749_v58, %v12093_v63  ;;  %v16751_v24 = vshrl.u32 %v12255_v38, 16  ;;  %v16115_v58 = vshll.u32 %v12255_v38, 16  ;;  %v2854_v4 = vsel %vm2541_vm1, %v12197_v44, %v2853_v31 }
 0x315   : > { %v3024_v32 = vor.u32 %v3022_v48, %v3021_v6  ;;  %v2490_v47 = vsel %vm2377_vm2, %v11975_v33, %v16750_v50  ;;  %v12303_v39 = vor.u32 %v4123_v54, %v4122_v20  ;;  %v12307_v48 = vsel %vm2133_vm9, %v2285_v10, %v2289_v21  ;;  %8484 = vmatmul.mubr.bf16.gmra.mrb[136].mxu0 %v2854_v4 }
 0x316   : > { %v2861_v23 = vrot.slane %v16751_v24, 7  ;;  %v3038_v52 = vshrl.u32 %v2490_v47, 16  ;;  %16753 = vst [vmem:[#allocation123_spill] sm:$0xff] %v12307_v48  ;;  %v3041_v50 = vshll.u32 %v2490_v47, 16  ;;  %v16754_v15 = vshrl.u32 %v11933_v45, 16  ;;  %8487 = vmatprep.mubr.msk.bf16.mxu0 %vm16609_vm7, %v16608_v46 }
 0x317   : > { %16752 = vst [vmem:[#allocation122_spill] sm:$0xff] %v12303_v39  ;;  %v12310_v63 = vsel %vm2541_vm1, %v3002_v0, %v3024_v32  ;;  %v12319_v20 = vshll.u32 %v11254_v53, 16  ;;  %v12322_v10 = vshrl.u32 %v16700_v25, 16  ;;  %v12325_v0 = vrot.slane %v16579_v59, 1 }
 0x318   : > { %v2869_v34 = vrot.slane %v16754_v15, 7  ;;  %v12316_v24 = vrot.slane %v3038_v52, 7  ;;  %v4925_v54 = vrot.slane %v3038_v52, 3  ;;  %v4926_v16 = vrot.slane %v3041_v50, 4 }
 0x319   : > { %16755 = vst [vmem:[#allocation124_spill] sm:$0xff] %v12319_v20  ;;  %16756 = vst [vmem:[#allocation125_spill] sm:$0xff] %v12325_v0  ;;  %v2864_v44 = vor.u32 %v16115_v58, %v2861_v23  ;;  %v16120_v31 = vshll.u32 %v11933_v45, 16  ;;  %v2293_v32 = vor.u32 %v12322_v10, %v2289_v21  ;;  %v16757_v4 = vrot.slane %v12090_v14, 7 }
 0x31a   : > { %v3043_v47 = vor.u32 %v3041_v50, %v12316_v24  ;;  %v12335_v25 = vor.u32 %v4926_v16, %v4925_v54  ;;  %v16758_v38 = vrot.slane %v11272_v57, 1  ;;  %v2855_v21 = vrot.slane %v12211_v35, 7 }
 0x31b   : > { %v2838_v15 = vsel %vm2541_vm1, %v16757_v4, %v2837_v7  ;;  %v2872_v58 = vor.u32 %v16120_v31, %v2869_v34  ;;  %v2297_v50 = vrot.slane %v12319_v20, 1  ;;  %v2865_v16 = vsel %vm2541_vm1, %v12249_v43, %v2864_v44 }
 0x31c   : > { %v12343_v33 = vsel %vm2541_vm1, %v3021_v6, %v3043_v47  ;;  %v12349_v52 = vsel %vm2377_vm2, %v16758_v38, %v12325_v0  ;;  %3442 = vmatmul.mubr.bf16.gmra.mrb[92].mxu1 %v2838_v15  ;;  %v16759_v6 = vshrl.u32 %v12307_v48, 16  ;;  %v16124_v15 = vshll.u32 %v12307_v48, 16 }
 0x31d   : > { %v16123_v54 = vshrl.u32 %v12349_v52, 16  ;;  %v16122_v7 = vshll.u32 %v12349_v52, 16  ;;  %3449 = vmatprep.mubr.bf16.mxu1 %v2865_v16  ;;  %v12360_v4 = vsel %vm2133_vm9, %v2293_v32, %v2297_v50  ;;  %v2873_v35 = vsel %vm2541_vm1, %v12260_v49, %v2872_v58 }
 0x31e   : > { %v2880_v47 = vrot.slane %v16759_v6, 7  ;;  %v12370_v43 = vshrl.u32 %v11254_v53, 16  ;;  %v12373_v44 = vshll.u32 %v11256_v41, 16  ;;  %8488 = vmatmul.mubr.bf16.gmra.mrb[140].mxu0 %v2873_v35  ;;  %v2856_v32 = vor.u32 %v2855_v21, %v12155_v26 }
 0x31f   : > { %v4942_v38 = vrot.slane %v16123_v54, 3  ;;  %v4943_v31 = vrot.slane %v16122_v7, 4  ;;  %8491 = vmatprep.mubr.msk.bf16.mxu0 %vm16609_vm7, %v16608_v46  ;;  %v16130_v49 = vshrl.u32 %v12360_v4, 16  ;;  %v16763_v53 = vshll.u32 %v11993_v9, 16 }
 0x320   : > { %16760 = vst [vmem:[#allocation126_spill] sm:$0xff] %v12370_v43  ;;  %16761 = vst [vmem:[#allocation127_spill] sm:$0xff] %v12373_v44  ;;  %v2883_v6 = vor.u32 %v16124_v15, %v2880_v47  ;;  %v2301_v58 = vor.u32 %v12370_v43, %v2297_v50  ;;  %v16764_v35 = vrot.slane %v12152_v17, 7 }
 0x321   : > { %v12376_v16 = vor.u32 %v4943_v31, %v4942_v38  ;;  %v2891_v7 = vor.u32 %v16763_v53, %v12072_v27  ;;  %v2874_v31 = vrot.slane %v12267_v18, 7  ;;  %v2305_v38 = vrot.slane %v12373_v44, 1 }
 0x322   : > { %v2857_v54 = vsel %vm2541_vm1, %v16764_v35, %v2856_v32  ;;  %v2884_v15 = vsel %vm2541_vm1, %v2861_v23, %v2883_v6  ;;  %v2899_v48 = vrot.slane %v16130_v49, 7  ;;  %v16127_v27 = vshll.u32 %v12360_v4, 16 }
 0x323   : > { %16762 = vst [vmem:[#allocation128_spill] sm:$0xff] %v12376_v16  ;;  %v12396_v50 = vsel %vm2133_vm9, %v2301_v58, %v2305_v38  ;;  %v2892_v9 = vsel %vm2541_vm1, %v2869_v34, %v2891_v7  ;;  %v12401_v32 = vshrl.u32 %v11256_v41, 16  ;;  %v12404_v53 = vshll.u32 %v11258_v60, 16 }
 0x324   : > { %3450 = vmatmul.mubr.bf16.gmra.mrb[96].mxu1 %v2857_v54  ;;  %16765 = vst [vmem:[#allocation129_spill] sm:$0xff] %v12396_v50  ;;  %v2875_v23 = vor.u32 %v2874_v31, %v12214_v19  ;;  %v2902_v54 = vor.u32 %v16127_v27, %v2899_v48  ;;  %v2893_v41 = vrot.slane %v12322_v10, 7  ;;  %v16129_v27 = vshll.u32 %v12396_v50, 16 }
 0x325   : > { %3457 = vmatprep.mubr.bf16.mxu1 %v2884_v15  ;;  %16766 = vst [vmem:[#allocation130_spill] sm:$0xff] %v12401_v32  ;;  %16767 = vst [vmem:[#allocation131_spill] sm:$0xff] %v12404_v53  ;;  %v16128_v15 = vshrl.u32 %v12396_v50, 16  ;;  %v2309_v34 = vor.u32 %v12401_v32, %v2305_v38  ;;  %v2313_v6 = vrot.slane %v12404_v53, 1  ;;  %v12424_v38 = vshrl.u32 %v11258_v60, 16 }
 0x326   : > { %8492 = vmatmul.mubr.bf16.gmra.mrb[144].mxu0 %v2892_v9  ;;  %v2876_v7 = vsel %vm2541_vm1, %v2855_v21, %v2875_v23  ;;  %v2903_v58 = vsel %vm2541_vm1, %v2880_v47, %v2902_v54  ;;  %v12427_v21 = vshll.u32 %v11260_v29, 16  ;;  %v2894_v23 = vor.u32 %v2893_v41, %v12270_v2 }
 0x327   : > { %8495 = vmatprep.mubr.msk.bf16.mxu0 %vm16609_vm7, %v16608_v46  ;;  %v2918_v35 = vrot.slane %v16128_v15, 7  ;;  %v12420_v9 = vsel %vm2133_vm9, %v2309_v34, %v2313_v6  ;;  %16769 = vst [vmem:[#allocation133_spill] sm:$0xff] %v12424_v38  ;;  %v2317_v34 = vor.u32 %v12424_v38, %v2313_v6  ;;  %v12448_v6 = vshrl.u32 %v11260_v29, 16 }
 0x328   : > { %16768 = vst [vmem:[#allocation132_spill] sm:$0xff] %v12420_v9  ;;  %16770 = vst [vmem:[#allocation134_spill] sm:$0xff] %v12427_v21  ;;  %v16131_v54 = vshrl.u32 %v12420_v9, 16  ;;  %v2895_v60 = vsel %vm2541_vm1, %v2874_v31, %v2894_v23  ;;  %v16132_v49 = vshll.u32 %v12420_v9, 16  ;;  %v12451_v31 = vshll.u32 %v11262_v13, 16 }
 0x329   : > { %v2921_v47 = vor.u32 %v16129_v27, %v2918_v35  ;;  %16772 = vst [vmem:[#allocation136_spill] sm:$0xff] %v12448_v6 }
 0x32a   : > { %v2937_v15 = vrot.slane %v16131_v54, 7  ;;  %16773 = vst [vmem:[#allocation137_spill] sm:$0xff] %v12451_v31 }
 0x32c   : > { %3458 = vmatmul.mubr.bf16.gmra.mrb[100].mxu1 %v2876_v7  ;;  %v2912_v7 = vrot.slane %v12370_v43, 7 }
 0x32d   : > { %3465 = vmatprep.mubr.bf16.mxu1 %v2903_v58  ;;  %v2321_v58 = vrot.slane %v12427_v21, 1 }
 0x32e   : > { %8496 = vmatmul.mubr.bf16.gmra.mrb[148].mxu0 %v12097_v11  ;;  %v2922_v11 = vsel %vm2541_vm1, %v2899_v48, %v2921_v47  ;;  %v2913_v23 = vor.u32 %v2912_v7, %v12319_v20  ;;  %v2940_v48 = vor.u32 %v16132_v49, %v2937_v15 }
 0x32f   : > { %8499 = vmatprep.mubr.msk.bf16.mxu0 %vm16609_vm7, %v16608_v46  ;;  %v12444_v27 = vsel %vm2133_vm9, %v2317_v34, %v2321_v58  ;;  %v2325_v34 = vor.u32 %v12448_v6, %v2321_v58  ;;  %v12472_v58 = vshrl.u32 %v11262_v13, 16 }
 0x330   : > { %16771 = vst [vmem:[#allocation135_spill] sm:$0xff] %v12444_v27  ;;  %v16135_v47 = vshrl.u32 %v12444_v27, 16  ;;  %v2914_v29 = vsel %vm2541_vm1, %v2893_v41, %v2913_v23  ;;  %v16136_v9 = vshll.u32 %v12444_v27, 16  ;;  %v12475_v41 = vshll.u32 %v11264_v56, 16 }
 0x331   : > { %16775 = vst [vmem:[#allocation139_spill] sm:$0xff] %v12472_v58 }
 0x332   : > { %v2956_v54 = vrot.slane %v16135_v47, 7  ;;  %16776 = vst [vmem:[#allocation140_spill] sm:$0xff] %v12475_v41 }
 0x334   : > { %3466 = vmatmul.mubr.bf16.gmra.mrb[104].mxu1 %v2895_v60  ;;  %v2931_v60 = vrot.slane %v12401_v32, 7 }
 0x335   : > { %3473 = vmatprep.mubr.bf16.mxu1 %v2922_v11  ;;  %v2329_v11 = vrot.slane %v12451_v31, 1 }
 0x336   : > { %8500 = vmatmul.mubr.bf16.gmra.mrb[152].mxu0 %v12137_v5  ;;  %v2941_v5 = vsel %vm2541_vm1, %v2918_v35, %v2940_v48  ;;  %v2932_v23 = vor.u32 %v2931_v60, %v12373_v44  ;;  %v2959_v35 = vor.u32 %v16136_v9, %v2956_v54 }
 0x337   : > { %8503 = vmatprep.mubr.msk.bf16.mxu0 %vm16609_vm7, %v16608_v46  ;;  %v12468_v49 = vsel %vm2133_vm9, %v2325_v34, %v2329_v11  ;;  %v2333_v34 = vor.u32 %v12472_v58, %v2329_v11  ;;  %v12496_v11 = vshrl.u32 %v11264_v56, 16 }
 0x338   : > { %16774 = vst [vmem:[#allocation138_spill] sm:$0xff] %v12468_v49  ;;  %v16139_v48 = vshrl.u32 %v12468_v49, 16  ;;  %v2933_v13 = vsel %vm2541_vm1, %v2912_v7, %v2932_v23  ;;  %v16140_v27 = vshll.u32 %v12468_v49, 16  ;;  %v12499_v7 = vshll.u32 %v11270_v3, 16 }
 0x339   : > { %16778 = vst [vmem:[#allocation142_spill] sm:$0xff] %v12496_v11 }
 0x33a   : > { %v2975_v47 = vrot.slane %v16139_v48, 7  ;;  %16779 = vst [vmem:[#allocation143_spill] sm:$0xff] %v12499_v7 }
 0x33c   : > { %3474 = vmatmul.mubr.bf16.gmra.mrb[108].mxu1 %v2914_v29  ;;  %v2950_v29 = vrot.slane %v12424_v38, 7 }
 0x33d   : > { %3481 = vmatprep.mubr.bf16.mxu1 %v2941_v5  ;;  %v2337_v5 = vrot.slane %v12475_v41, 1 }
 0x33e   : > { %8504 = vmatmul.mubr.bf16.gmra.mrb[156].mxu0 %v12173_v1  ;;  %v2960_v1 = vsel %vm2541_vm1, %v2937_v15, %v2959_v35  ;;  %v2951_v23 = vor.u32 %v2950_v29, %v12404_v53  ;;  %v2978_v15 = vor.u32 %v16140_v27, %v2975_v47 }
 0x33f   : > { %8507 = vmatprep.mubr.msk.bf16.mxu0 %vm16609_vm7, %v16608_v46  ;;  %v12492_v9 = vsel %vm2133_vm9, %v2333_v34, %v2337_v5  ;;  %v2341_v34 = vor.u32 %v12496_v11, %v2337_v5  ;;  %v12520_v5 = vshrl.u32 %v11270_v3, 16 }
 0x340   : > { %16777 = vst [vmem:[#allocation141_spill] sm:$0xff] %v12492_v9  ;;  %v16144_v35 = vshrl.u32 %v12492_v9, 16  ;;  %v2952_v56 = vsel %vm2541_vm1, %v2931_v60, %v2951_v23  ;;  %v16143_v49 = vshll.u32 %v12492_v9, 16  ;;  %v12523_v60 = vshll.u32 %v11272_v57, 16 }
 0x341   : > { %16781 = vst [vmem:[#allocation145_spill] sm:$0xff] %v12520_v5 }
 0x342   : > { %v2994_v48 = vrot.slane %v16144_v35, 7  ;;  %16782 = vst [vmem:[#allocation146_spill] sm:$0xff] %v12523_v60 }
 0x344   : > { %3482 = vmatmul.mubr.bf16.gmra.mrb[112].mxu1 %v2933_v13  ;;  %v2969_v13 = vrot.slane %v12448_v6, 7 }
 0x345   : > { %3489 = vmatprep.mubr.bf16.mxu1 %v2960_v1  ;;  %v2345_v1 = vrot.slane %v12499_v7, 1 }
 0x346   : > { %8508 = vmatmul.mubr.bf16.gmra.mrb[160].mxu0 %v12208_v61  ;;  %v2979_v61 = vsel %vm2541_vm1, %v2956_v54, %v2978_v15  ;;  %v2970_v23 = vor.u32 %v2969_v13, %v12427_v21  ;;  %v2997_v54 = vor.u32 %v16143_v49, %v2994_v48 }
 0x347   : > { %8511 = vmatprep.mubr.msk.bf16.mxu0 %vm16609_vm7, %v16608_v46  ;;  %v12516_v27 = vsel %vm2133_vm9, %v2341_v34, %v2345_v1  ;;  %v12533_v34 = vor.u32 %v12520_v5, %v2345_v1 }
 0x348   : > { %16780 = vst [vmem:[#allocation144_spill] sm:$0xff] %v12516_v27  ;;  %v16146_v15 = vshrl.u32 %v12516_v27, 16  ;;  %v2971_v3 = vsel %vm2541_vm1, %v2950_v29, %v2970_v23  ;;  %v16145_v1 = vshll.u32 %v12516_v27, 16 }
 0x349   : > { %16783 = vst [vmem:[#allocation147_spill] sm:$0xff] %v12533_v34 }
 0x34a   : > { %v3013_v49 = vrot.slane %v16146_v15, 7 }
 0x34c   : > { %3490 = vmatmul.mubr.bf16.gmra.mrb[116].mxu1 %v2952_v56  ;;  %v2988_v56 = vrot.slane %v12472_v58, 7  ;;  %v3016_v23 = vor.u32 %v16145_v1, %v3013_v49  ;;  %v3007_v1 = vrot.slane %v12496_v11, 7 }
 0x34d   : > { %3497 = vmatprep.mubr.bf16.mxu1 %v2979_v61  ;;  %v2483_v61 = vrot.slane %v12523_v60, 1 }
 0x34e   : > { %8512 = vmatmul.mubr.bf16.gmra.mrb[164].mxu0 %v12243_v36  ;;  %v2998_v36 = vsel %vm2541_vm1, %v2975_v47, %v2997_v54  ;;  %v2989_v29 = vor.u32 %v2988_v56, %v12451_v31  ;;  %v12556_v54 = vsel %vm3787_vm12, %v12044_v42, %v12087_v55  ;;  %v3017_v15 = vsel %vm2541_vm1, %v2994_v48, %v3016_v23 }
 0x34f   : > { %8515 = vmatprep.mubr.msk.bf16.mxu0 %vm16609_vm7, %v16608_v46  ;;  %v12543_v35 = vsel %vm2133_vm9, %v12533_v34, %v2483_v61  ;;  %16785 = vst [vmem:[#allocation149_spill] sm:$0xff] %v12556_v54  ;;  %v12585_v48 = vsel %vm3787_vm12, %v12168_v62, %v12202_v30 }
 0x350   : > { %16784 = vst [vmem:[#allocation148_spill] sm:$0xff] %v12543_v35  ;;  %v16152_v47 = vshrl.u32 %v12543_v35, 16  ;;  %16790 = vst [vmem:[#allocation154_spill] sm:$0xff] %v12585_v48 }
 0x352   : > { %v3032_v34 = vrot.slane %v16152_v47, 7 }
 0x354   : > { %3498 = vmatmul.mubr.bf16.gmra.mrb[120].mxu1 %v2971_v3  ;;  %v12559_v3 = vshrl.u32 %v11272_v57, 16  ;;  %v12577_v57 = vsel %vm3787_vm12, %v12128_v37, %v12168_v62  ;;  %v12602_v62 = vsel %vm3787_vm12, %v12238_v28, %v12272_v12 }
 0x355   : > { %3505 = vmatprep.mubr.bf16.mxu1 %v2998_v36  ;;  %v2990_v36 = vsel %vm2541_vm1, %v2969_v13, %v2989_v29  ;;  %16789 = vst [vmem:[#allocation153_spill] sm:$0xff] %v12577_v57  ;;  %v3008_v13 = vor.u32 %v3007_v1, %v12475_v41  ;;  %v3026_v29 = vrot.slane %v12520_v5, 7  ;;  %16792 = vst [vmem:[#allocation156_spill] sm:$0xff] %v12602_v62 }
 0x356   : > { %8516 = vmatmul.mubr.bf16.gmra.mrb[168].mxu0 %v12281_v40  ;;  %16786 = vst [vmem:[#allocation150_spill] sm:$0xff] %v12559_v3  ;;  %v12564_v40 = vsel %vm3787_vm12, %v12087_v55, %v12128_v37  ;;  %v12572_v27 = vor.u32 %v12559_v3, %v2483_v61  ;;  %v16151_v55 = vshll.u32 %v12543_v35, 16 }
 0x357   : > { %8519 = vmatprep.mubr.msk.bf16.mxu0 %vm16609_vm7, %v16608_v46  ;;  %16787 = vst [vmem:[#allocation151_spill] sm:$0xff] %v12564_v40 }
 0x358   : > { %16788 = vst [vmem:[#allocation152_spill] sm:$0xff] %v12572_v27  ;;  %v3035_v61 = vor.u32 %v16151_v55, %v3032_v34  ;;  %v3049_v37 = vshrl.u32 %v12572_v27, 16  ;;  %v2146_v55 = vsel %vm2133_vm9, %v12325_v0, %v11344_v51 }
 0x359   : > { %v3801_v51 = vshrl.u32 %v2146_v55, 16 }
 0x35a   : > { %v3036_v23 = vsel %vm2541_vm1, %v3013_v49, %v3035_v61  ;;  %v3027_v49 = vor.u32 %v3026_v29, %v12499_v7  ;;  %v2381_v61 = vsel %vm2377_vm2, %v12325_v0, %v11329_v22  ;;  %v3045_v7 = vrot.slane %v12559_v3, 7 }
 0x35c   : > { %3506 = vmatmul.mubr.bf16.gmra.mrb[124].mxu1 %v2990_v36  ;;  %v3051_v36 = vrot.slane %v3049_v37, 7  ;;  %v3028_v35 = vsel %vm2541_vm1, %v3007_v1, %v3027_v49 }
 0x35d   : > { %3513 = vmatprep.mubr.bf16.mxu1 %v3017_v15  ;;  %v12595_v15 = vsel %vm3787_vm12, %v12202_v30, %v12238_v28  ;;  %v12611_v30 = vsel %vm3787_vm12, %v12272_v12, %v12303_v39  ;;  %v3804_v12 = vshll.u32 %v2146_v55, 16  ;;  %v12633_v55 = vsel %vm3787_vm12, %v12303_v39, %v12335_v25 }
 0x35e   : > { %8520 = vmatmul.mubr.bf16.gmra.mrb[172].mxu0 %v12310_v63  ;;  %16791 = vst [vmem:[#allocation155_spill] sm:$0xff] %v12595_v15  ;;  %v3009_v63 = vsel %vm2541_vm1, %v2988_v56, %v3008_v13  ;;  %16793 = vst [vmem:[#allocation157_spill] sm:$0xff] %v12611_v30  ;;  %v3052_v56 = vshll.u32 %v12572_v27, 16  ;;  %v16794_v13 = vshrl.u32 %v12349_v52, 16  ;;  %v3821_v27 = vshll.u32 %v2381_v61, 16  ;;  %v16834_v15 = vld [vmem:[#allocation21_spill] sm:$0xff] }
 0x35f   : > { %8523 = vmatprep.mubr.msk.bf16.mxu0 %vm16609_vm7, %v16608_v46  ;;  %16796 = vst [vmem:[#allocation158_spill] sm:$0xff] %v12633_v55 }
 0x360   : > { %v3059_v28 = vrot.slane %v16794_v13, 7  ;;  %v3054_v37 = vor.u32 %v3052_v56, %v3051_v36  ;;  %v16795_v13 = vshll.u32 %v12349_v52, 16  ;;  %v3803_v36 = vrot.slane %v3801_v51, 3 }
 0x361   : > { %v3806_v56 = vrot.slane %v3804_v12, 4  ;;  %v3823_v1 = vrot.slane %v3821_v27, 4 }
 0x362   : > { %v3062_v47 = vor.u32 %v16795_v13, %v3059_v28  ;;  %v3055_v22 = vsel %vm2541_vm1, %v3032_v34, %v3054_v37  ;;  %v3046_v34 = vor.u32 %v3045_v7, %v12523_v60 }
 0x363   : > { %v3807_v49 = vor.u32 %v3806_v56, %v3803_v36  ;;  %v16802_v56 = vld [vmem:[#allocation81_spill] sm:$0xff] }
 0x364   : > { %3514 = vmatmul.mubr.bf16.gmra.mrb[128].mxu1 %v3009_v63  ;;  %v3793_v63 = vshrl.u32 %v12325_v0, 16  ;;  %v3063_v28 = vsel %vm2541_vm1, %v12316_v24, %v3062_v47  ;;  %v3047_v27 = vsel %vm2541_vm1, %v3026_v29, %v3046_v34  ;;  %v3789_v29 = vrot.slane %v16579_v59, 4 }
 0x365   : > { %3521 = vmatprep.mubr.bf16.mxu1 %v3036_v23  ;;  %v3796_v23 = vshll.u32 %v12325_v0, 16 }
 0x366   : > { %8524 = vmatmul.mubr.bf16.gmra.mrb[176].mxu0 %v12343_v33  ;;  %v3818_v33 = vshrl.u32 %v2381_v61, 16  ;;  %v3795_v0 = vrot.slane %v3793_v63, 3  ;;  %v16799_v63 = vld [vmem:[#allocation18_spill] sm:$0xff] }
 0x367   : > { %8527 = vmatprep.mubr.msk.bf16.mxu0 %vm16609_vm7, %v16608_v46  ;;  %v3798_v52 = vrot.slane %v3796_v23, 4  ;;  %v16800_v7 = vshrl.u32 %v16799_v63, 16  ;;  %v16801_v13 = vshll.u32 %v16799_v63, 16 }
 0x368   : > { %v3820_v61 = vrot.slane %v3818_v33, 3 }
 0x369   : > { %v12647_v51 = vor.u32 %v3798_v52, %v3795_v0  ;;  %v3830_v23 = vrot.slane %v16800_v7, 3  ;;  %v3831_v33 = vrot.slane %v16801_v13, 4  ;;  %v3788_v0 = vrot.slane %v16579_v59, 3 }
 0x36a   : > { %v3824_v12 = vor.u32 %v3823_v1, %v3820_v61  ;;  %v16803_v52 = vshrl.u32 %v16802_v56, 16  ;;  %v16804_v61 = vshll.u32 %v16802_v56, 16 }
 0x36b   : > { %16798 = vst [vmem:[#allocation160_spill] sm:$0xff] %v12647_v51  ;;  %v12674_v13 = vor.u32 %v3789_v29, %v3788_v0 }
 0x36c   : > { %3522 = vmatmul.mubr.bf16.gmra.mrb[132].mxu1 %v3028_v35  ;;  %v12640_v35 = vsel %vm3787_vm12, %v12335_v25, %v12376_v16  ;;  %v12645_v37 = vpop.f32.mrb[76].mxu0  ;;  %v3808_v25 = vsel %vm3787_vm12, %v12647_v51, %v3807_v49  ;;  %v3825_v36 = vsel %vm3787_vm12, %v12647_v51, %v3824_v12  ;;  %v3835_v1 = vrot.slane %v16804_v61, 4  ;;  %v16806_v16 = vld [vmem:[#allocation16_spill] sm:$0xff] }
 0x36d   : > { %3529 = vmatprep.mubr.bf16.mxu1 %v3055_v22  ;;  %16797 = vst [vmem:[#allocation159_spill] sm:$0xff] %v12640_v35  ;;  %v8425_v24 = vpop.f32.mrb[77].mxu0  ;;  %16805 = vst [vmem:[#allocation18_spill] sm:$0xff] %v12674_v13  ;;  %v3826_v56 = vrot.slane %v16806_v16, 3  ;;  %v16807_v61 = vld [vmem:[#allocation64_spill] sm:$0xff] }
 0x36e   : > { %8528 = vmatmul.mubr.bf16.gmra.mrb[180].mxu0 %v3063_v28  ;;  %v12650_v47 = vpop.f32.mrb[78].mxu0  ;;  %v3834_v28 = vrot.slane %v16803_v52, 3  ;;  %v3827_v51 = vrot.slane %v16807_v61, 4 }
 0x36f   : > { %8547 = vmatprep.mubr.msk.bf16.mxu0 %vm16609_vm7, %v16608_v46  ;;  %v8426_v22 = vpop.f32.mrb[79].mxu0 }
 0x370   : > { %v3836_v22 = vor.u32 %v3835_v1, %v3834_v28  ;;  %v16811_v28 = vld [vmem:[#allocation79_spill] sm:$0xff] }
 0x371   : > { %v16812_v16 = vshrl.u32 %v16811_v28, 16 }
 0x372   : > { %v12666_v34 = vpop.f32.mrb[32].mxu1  ;;  %v3837_v29 = vsel %vm3787_vm12, %v3824_v12, %v3836_v22 }
 0x373   : > { %v3325_v24 = vpop.f32.mrb[33].mxu1  ;;  %v3846_v1 = vrot.slane %v16812_v16, 3 }
 0x374   : > { %3530 = vmatmul.mubr.bf16.gmra.mrb[136].mxu1 %v3047_v27  ;;  %v3832_v27 = vor.u32 %v3831_v33, %v3830_v23  ;;  %v12672_v7 = vpop.f32.mrb[80].mxu0  ;;  %v16808_v33 = vld [vmem:[#allocation80_spill] sm:$0xff] }
 0x375   : > { %4405 = vmatprep.mubr.bf16.mxu1 %v3808_v25  ;;  %v12670_v25 = vpop.f32.mrb[34].mxu1  ;;  %v8429_v52 = vpop.f32.mrb[81].mxu0 }
 0x376   : > { %8548 = vmatmul.mubr.bf16.vlgmr.msra.gmra.mrb[184].mxu0 %v3825_v36  ;;  %v3328_v63 = vpop.f32.mrb[35].mxu1  ;;  %v12678_v35 = vpop.f32.mrb[82].mxu0  ;;  %v3833_v23 = vsel %vm3787_vm12, %v3807_v49, %v3832_v27  ;;  %v16809_v36 = vshrl.u32 %v16808_v33, 16  ;;  %v16813_v52 = vshll.u32 %v16811_v28, 16  ;;  %v3828_v49 = vor.u32 %v3827_v51, %v3826_v56  ;;  %v16814_v28 = vld [vmem:[#allocation66_spill] sm:$0xff] }
 0x377   : > { %8551 = vmatprep.mubr.msk.bf16.mxu0 %vm16609_vm7, %v16608_v46  ;;  %v16810_v63 = vshll.u32 %v16808_v33, 16  ;;  %v8430_v0 = vpop.f32.mrb[83].mxu0  ;;  %v3838_v16 = vrot.slane %v16814_v28, 3 }
 0x378   : > { %v3842_v24 = vrot.slane %v16809_v36, 3  ;;  %v3847_v61 = vrot.slane %v16813_v52, 4  ;;  %v3829_v0 = vsel %vm3787_vm12, %v12674_v13, %v3828_v49  ;;  %v16815_v52 = vld [vmem:[#allocation59_spill] sm:$0xff] }
 0x379   : > { %v3843_v60 = vrot.slane %v16810_v63, 4 }
 0x37a   : > { %v12691_v3 = vpop.f32.mrb[36].mxu1  ;;  %v3848_v12 = vor.u32 %v3847_v61, %v3846_v1 }
 0x37b   : > { %v3333_v55 = vpop.f32.mrb[37].mxu1  ;;  %v3844_v39 = vor.u32 %v3843_v60, %v3842_v24 }
 0x37c   : > { %4406 = vmatmul.mubr.bf16.vlgmr.msra.gmra.mrb[140].mxu1 %v12674_v13  ;;  %v12695_v33 = vpop.f32.mrb[38].mxu1  ;;  %v12697_v36 = vpop.f32.mrb[84].mxu0  ;;  %v16816_v55 = vld [vmem:[#allocation25_spill] sm:$0xff]  ;;  %v3849_v61 = vsel %vm3787_vm12, %v3836_v22, %v3848_v12 }
 0x37d   : > { %4413 = vmatprep.mubr.bf16.mxu1 %v3833_v23  ;;  %v3336_v23 = vpop.f32.mrb[39].mxu1  ;;  %v8433_v63 = vpop.f32.mrb[85].mxu0  ;;  %v3845_v60 = vsel %vm3787_vm12, %v3832_v27, %v3844_v39  ;;  %v16817_v56 = vshrl.u32 %v16816_v55, 16 }
 0x37e   : > { %8552 = vmatmul.mubr.bf16.gmra.mrb[188].mxu0 %v3837_v29  ;;  %v3839_v29 = vrot.slane %v16815_v52, 4  ;;  %v12703_v51 = vpop.f32.mrb[86].mxu0  ;;  %v16818_v23 = vshll.u32 %v16816_v55, 16  ;;  %v16819_v63 = vld [vmem:[#allocation23_spill] sm:$0xff] }
 0x37f   : > { %8555 = vmatprep.mubr.msk.bf16.mxu0 %vm16609_vm7, %v16608_v46  ;;  %v3854_v24 = vrot.slane %v16817_v56, 3  ;;  %v8434_v1 = vpop.f32.mrb[87].mxu0  ;;  %v16820_v13 = vshrl.u32 %v16819_v63, 16  ;;  %v16821_v52 = vshll.u32 %v16819_v63, 16 }
 0x380   : > { %v3855_v5 = vrot.slane %v16818_v23, 4  ;;  %v3840_v27 = vor.u32 %v3839_v29, %v3838_v16  ;;  %v16822_v1 = vld [vmem:[#allocation82_spill] sm:$0xff] }
 0x381   : > { %v3858_v28 = vrot.slane %v16820_v13, 3  ;;  %v3859_v30 = vrot.slane %v16821_v52, 4  ;;  %v3850_v63 = vrot.slane %v16822_v1, 3  ;;  %v16823_v52 = vld [vmem:[#allocation62_spill] sm:$0xff] }
 0x382   : > { %v12715_v41 = vpop.f32.mrb[40].mxu1  ;;  %v3856_v11 = vor.u32 %v3855_v5, %v3854_v24  ;;  %v3841_v13 = vsel %vm3787_vm12, %v3828_v49, %v3840_v27  ;;  %v3851_v62 = vrot.slane %v16823_v52, 4  ;;  %v16825_v16 = vld [vmem:[#allocation30_spill] sm:$0xff] }
 0x383   : > { %v3860_v22 = vor.u32 %v3859_v30, %v3858_v28  ;;  %v16826_v29 = vshrl.u32 %v16825_v16, 16  ;;  %v16829_v28 = vld [vmem:[#allocation32_spill] sm:$0xff] }
 0x384   : > { %4414 = vmatmul.mubr.bf16.gmra.mrb[144].mxu1 %v3829_v0  ;;  %v3341_v0 = vpop.f32.mrb[41].mxu1  ;;  %v12729_v5 = vsel %vm3787_vm12, %v3844_v39, %v3856_v11 }
 0x385   : > { %4421 = vmatprep.mubr.bf16.mxu1 %v3845_v60  ;;  %v12719_v55 = vpop.f32.mrb[42].mxu1  ;;  %v12721_v56 = vpop.f32.mrb[88].mxu0  ;;  %16824 = vst [vmem:[#allocation81_spill] sm:$0xff] %v12729_v5  ;;  %v3866_v24 = vrot.slane %v16826_v29, 3  ;;  %v16827_v0 = vshll.u32 %v16825_v16, 16  ;;  %v12737_v49 = vsel %vm3787_vm12, %v3848_v12, %v3860_v22  ;;  %v3852_v29 = vor.u32 %v3851_v62, %v3850_v63  ;;  %v16836_v63 = vld [vmem:[#allocation48_spill] sm:$0xff] }
 0x386   : > { %8556 = vmatmul.mubr.bf16.gmra.mrb[192].mxu0 %v3849_v61  ;;  %v3344_v60 = vpop.f32.mrb[43].mxu1  ;;  %v8437_v23 = vpop.f32.mrb[89].mxu0  ;;  %16828 = vst [vmem:[#allocation16_spill] sm:$0xff] %v12737_v49 }
 0x387   : > { %8559 = vmatprep.mubr.msk.bf16.mxu0 %vm16609_vm7, %v16608_v46  ;;  %v12726_v61 = vpop.f32.mrb[90].mxu0  ;;  %v3867_v60 = vrot.slane %v16827_v0, 4  ;;  %v16830_v23 = vshrl.u32 %v16829_v28, 16 }
 0x388   : > { %v8438_v30 = vpop.f32.mrb[91].mxu0 }
 0x389   : > { %v3870_v1 = vrot.slane %v16830_v23, 3  ;;  %v3868_v16 = vor.u32 %v3867_v60, %v3866_v24  ;;  %v16837_v24 = vshrl.u32 %v16836_v63, 16 }
 0x38b   : > { %v3878_v60 = vrot.slane %v16837_v24, 3 }
 0x38c   : > { %4422 = vmatmul.mubr.bf16.gmra.mrb[148].mxu1 %v3841_v13  ;;  %v16831_v13 = vshll.u32 %v16829_v28, 16  ;;  %v12743_v39 = vpop.f32.mrb[44].mxu1  ;;  %v12753_v28 = vsel %vm3787_vm12, %v3840_v27, %v3852_v29 }
 0x38d   : > { %4429 = vmatprep.mubr.bf16.mxu1 %v12729_v5  ;;  %v3349_v31 = vpop.f32.mrb[45].mxu1  ;;  %v12750_v30 = vpop.f32.mrb[92].mxu0  ;;  %16832 = vst [vmem:[#allocation64_spill] sm:$0xff] %v12753_v28 }
 0x38e   : > { %v3871_v52 = vrot.slane %v16831_v13, 4  ;;  %8560 = vmatmul.mubr.bf16.gmra.mrb[196].mxu0 %v12737_v49  ;;  %v12748_v0 = vpop.f32.mrb[46].mxu1  ;;  %v8441_v23 = vpop.f32.mrb[93].mxu0  ;;  %v16833_v13 = vld [vmem:[#allocation83_spill] sm:$0xff]  ;;  %v3863_v49 = vrot.slane %v16834_v15, 4  ;;  %v12761_v31 = vsel %vm3787_vm12, %v3856_v11, %v3868_v16  ;;  %v8877_v15 = vld [vmem:[%s15768_s3 + $0x180] sm:$0xff]  }
 0x38f   : > { %8563 = vmatprep.mubr.msk.bf16.mxu0 %vm16609_vm7, %v16608_v46  ;;  %v3352_v12 = vpop.f32.mrb[47].mxu1  ;;  %v3862_v58 = vrot.slane %v16833_v13, 3  ;;  %v12757_v62 = vpop.f32.mrb[94].mxu0  ;;  %16835 = vst [vmem:[#allocation80_spill] sm:$0xff] %v12761_v31  ;;  %v16840_v23 = vld [vmem:[#allocation55_spill] sm:$0xff]  ;;  %5122 = vmatpush1.bf16.msra.mxu1 %v8877_v15 }
 0x390   : > { %v3872_v5 = vor.u32 %v3871_v52, %v3870_v1  ;;  %v16838_v1 = vshll.u32 %v16836_v63, 16  ;;  %v8442_v12 = vpop.f32.mrb[95].mxu0  ;;  %v16841_v13 = vshrl.u32 %v16840_v23, 16  ;;  %5123 = vmatprep.subr.bf16.mxu1 %v16579_v59 }
 0x391   : > { %v3864_v63 = vor.u32 %v3863_v49, %v3862_v58  ;;  %v16844_v49 = vld [vmem:[#allocation84_spill] sm:$0xff] }
 0x392   : > { %v3879_v52 = vrot.slane %v16838_v1, 4  ;;  %v12772_v27 = vsel %vm3787_vm12, %v3860_v22, %v3872_v5  ;;  %v3882_v11 = vrot.slane %v16841_v13, 3 }
 0x393   : > { %16839 = vst [vmem:[#allocation79_spill] sm:$0xff] %v12772_v27  ;;  %v12792_v58 = vsel %vm3787_vm12, %v3852_v29, %v3864_v63 }
 0x394   : > { %4430 = vmatmul.mubr.bf16.gmra.mrb[152].mxu1 %v12753_v28  ;;  %v16842_v28 = vshll.u32 %v16840_v23, 16  ;;  %v12778_v24 = vpop.f32.mrb[48].mxu1  ;;  %v3880_v12 = vor.u32 %v3879_v52, %v3878_v60  ;;  %v8878_v23 = vld [vmem:[%s15768_s3 + $0x188] sm:$0xff]   ;;  %16843 = vst [vmem:[#allocation66_spill] sm:$0xff] %v12792_v58  ;;  %v3874_v60 = vrot.slane %v16844_v49, 3  ;;  %v16845_v52 = vld [vmem:[#allocation28_spill] sm:$0xff] }
 0x395   : > { %4437 = vmatprep.mubr.bf16.mxu1 %v12761_v31  ;;  %v3357_v1 = vpop.f32.mrb[49].mxu1  ;;  %v12789_v13 = vpop.f32.mrb[96].mxu0  ;;  %v3875_v15 = vrot.slane %v16845_v52, 4  ;;  %5124 = vmatpush1.bf16.msra.mxu1 %v8878_v23 }
 0x396   : > { %v3883_v9 = vrot.slane %v16842_v28, 4  ;;  %8564 = vmatmul.mubr.bf16.gmra.mrb[200].mxu0 %v12772_v27  ;;  %v12784_v22 = vpop.f32.mrb[50].mxu1  ;;  %v8445_v27 = vpop.f32.mrb[97].mxu0  ;;  %v12800_v21 = vsel %vm3787_vm12, %v3868_v16, %v3880_v12  ;;  %5125 = vmatprep.subr.bf16.mxu1 %v16579_v59  ;;  %v16851_v16 = vld [vmem:[#allocation37_spill] sm:$0xff] }
 0x397   : > { %8567 = vmatprep.mubr.msk.bf16.mxu0 %vm16609_vm7, %v16608_v46  ;;  %v3360_v28 = vpop.f32.mrb[51].mxu1  ;;  %v12796_v1 = vpop.f32.mrb[98].mxu0  ;;  %16846 = vst [vmem:[#allocation59_spill] sm:$0xff] %v12800_v21  ;;  %v16852_v49 = vshrl.u32 %v16851_v16, 16 }
 0x398   : > { %v3884_v31 = vor.u32 %v3883_v9, %v3882_v11  ;;  %v16847_v28 = vld [vmem:[#allocation53_spill] sm:$0xff]  ;;  %v8446_v29 = vpop.f32.mrb[99].mxu0  ;;  %v8879_v11 = vld [vmem:[%s15768_s3 + $0x190] sm:$0xff]  }
 0x399   : > { %v16848_v6 = vshrl.u32 %v16847_v28, 16  ;;  %v16849_v9 = vshll.u32 %v16847_v28, 16  ;;  %v3894_v52 = vrot.slane %v16852_v49, 3  ;;  %5126 = vmatpush1.bf16.msra.mxu1 %v8879_v11 }
 0x39a   : > { %v12812_v23 = vsel %vm3787_vm12, %v3872_v5, %v3884_v31  ;;  %5127 = vmatprep.subr.bf16.mxu1 %v16579_v59 }
 0x39b   : > { %v3890_v48 = vrot.slane %v16848_v6, 3  ;;  %v3891_v27 = vrot.slane %v16849_v9, 4  ;;  %16850 = vst [vmem:[#allocation25_spill] sm:$0xff] %v12812_v23  ;;  %v16853_v6 = vshll.u32 %v16851_v16, 16  ;;  %v3876_v9 = vor.u32 %v3875_v15, %v3874_v60  ;;  %v8880_v16 = vld [vmem:[%s15768_s3 + $0x198] sm:$0xff]  }
 0x39c   : > { %4438 = vmatmul.mubr.bf16.gmra.mrb[156].mxu1 %v12792_v58  ;;  %v12818_v28 = vpop.f32.mrb[52].mxu1 }
 0x39d   : > { %4445 = vmatprep.mubr.bf16.mxu1 %v12800_v21  ;;  %v3895_v58 = vrot.slane %v16853_v6, 4  ;;  %v3365_v29 = vpop.f32.mrb[53].mxu1  ;;  %v3892_v21 = vor.u32 %v3891_v27, %v3890_v48  ;;  %v12829_v6 = vpop.f32.mrb[100].mxu0  ;;  %v12832_v60 = vsel %vm3787_vm12, %v3864_v63, %v3876_v9  ;;  %v16855_v48 = vld [vmem:[#allocation57_spill] sm:$0xff]  ;;  %v16856_v27 = vld [vmem:[#allocation35_spill] sm:$0xff]  ;;  %5128 = vmatpush1.bf16.msra.mxu1 %v8880_v16 }
 0x39e   : > { %8568 = vmatmul.mubr.bf16.gmra.mrb[204].mxu0 %v12812_v23  ;;  %v12824_v5 = vpop.f32.mrb[54].mxu1  ;;  %v8449_v23 = vpop.f32.mrb[101].mxu0  ;;  %16854 = vst [vmem:[#allocation23_spill] sm:$0xff] %v12832_v60  ;;  %v3886_v15 = vrot.slane %v16855_v48, 3  ;;  %v3887_v11 = vrot.slane %v16856_v27, 4  ;;  %5129 = vmatprep.subr.bf16.mxu1 %v16579_v59 }
 0x39f   : > { %8571 = vmatprep.mubr.msk.bf16.mxu0 %vm16609_vm7, %v16608_v46  ;;  %v3368_v49 = vpop.f32.mrb[55].mxu1  ;;  %v3896_v53 = vor.u32 %v3895_v58, %v3894_v52  ;;  %v12836_v29 = vpop.f32.mrb[102].mxu0  ;;  %v12840_v38 = vsel %vm3787_vm12, %v3880_v12, %v3892_v21  ;;  %v8881_v52 = vld [vmem:[%s15768_s3 + $0x1a0] sm:$0xff]  }
 0x3a0   : > { %16857 = vst [vmem:[#allocation82_spill] sm:$0xff] %v12840_v38  ;;  %v16858_v49 = vld [vmem:[#allocation42_spill] sm:$0xff]  ;;  %v8450_v63 = vpop.f32.mrb[103].mxu0 }
 0x3a1   : > { %v16859_v57 = vshrl.u32 %v16858_v49, 16  ;;  %v16860_v58 = vshll.u32 %v16858_v49, 16  ;;  %v12852_v16 = vsel %vm3787_vm12, %v3884_v31, %v3896_v53  ;;  %v16862_v12 = vld [vmem:[#allocation86_spill] sm:$0xff]  ;;  %5130 = vmatpush1.bf16.msra.mxu1 %v8881_v52 }
 0x3a2   : > { %16861 = vst [vmem:[#allocation62_spill] sm:$0xff] %v12852_v16  ;;  %v16863_v48 = vshrl.u32 %v16862_v12, 16  ;;  %5131 = vmatprep.subr.bf16.mxu1 %v16579_v59 }
 0x3a3   : > { %v3902_v44 = vrot.slane %v16859_v57, 3  ;;  %v3903_v23 = vrot.slane %v16860_v58, 4  ;;  %v16864_v57 = vshll.u32 %v16862_v12, 16  ;;  %v3888_v58 = vor.u32 %v3887_v11, %v3886_v15  ;;  %v8882_v12 = vld [vmem:[%s15768_s3 + $0x1a8] sm:$0xff]  }
 0x3a4   : > { %4446 = vmatmul.mubr.bf16.gmra.mrb[160].mxu1 %v12832_v60  ;;  %v3906_v27 = vrot.slane %v16863_v48, 3  ;;  %v12858_v49 = vpop.f32.mrb[56].mxu1 }
 0x3a5   : > { %4453 = vmatprep.mubr.bf16.mxu1 %v12840_v38  ;;  %v3907_v60 = vrot.slane %v16864_v57, 4  ;;  %v3373_v63 = vpop.f32.mrb[57].mxu1  ;;  %v3904_v38 = vor.u32 %v3903_v23, %v3902_v44  ;;  %v12869_v57 = vpop.f32.mrb[104].mxu0  ;;  %v12872_v15 = vsel %vm3787_vm12, %v3876_v9, %v3888_v58  ;;  %v16866_v44 = vld [vmem:[#allocation39_spill] sm:$0xff]  ;;  %5132 = vmatpush1.bf16.msra.mxu1 %v8882_v12 }
 0x3a6   : > { %8572 = vmatmul.mubr.bf16.gmra.mrb[208].mxu0 %v12852_v16  ;;  %v12864_v31 = vpop.f32.mrb[58].mxu1  ;;  %v8453_v16 = vpop.f32.mrb[105].mxu0  ;;  %16865 = vst [vmem:[#allocation30_spill] sm:$0xff] %v12872_v15  ;;  %v3898_v11 = vrot.slane %v16866_v44, 3  ;;  %v16867_v23 = vld [vmem:[#allocation51_spill] sm:$0xff]  ;;  %5133 = vmatprep.subr.bf16.mxu1 %v16579_v59 }
 0x3a7   : > { %8575 = vmatprep.mubr.msk.bf16.mxu0 %vm16609_vm7, %v16608_v46  ;;  %v3376_v48 = vpop.f32.mrb[59].mxu1  ;;  %v3908_v32 = vor.u32 %v3907_v60, %v3906_v27  ;;  %v3899_v52 = vrot.slane %v16867_v23, 4  ;;  %v12876_v63 = vpop.f32.mrb[106].mxu0  ;;  %v12880_v40 = vsel %vm3787_vm12, %v3892_v21, %v3904_v38  ;;  %v8883_v27 = vld [vmem:[%s15768_s3 + $0x1b0] sm:$0xff]   ;;  %v16873_v21 = vld [vmem:[#allocation91_spill] sm:$0xff] }
 0x3a8   : > { %16868 = vst [vmem:[#allocation32_spill] sm:$0xff] %v12880_v40  ;;  %v16869_v48 = vld [vmem:[#allocation90_spill] sm:$0xff]  ;;  %v8454_v9 = vpop.f32.mrb[107].mxu0  ;;  %v16874_v44 = vshrl.u32 %v16873_v21, 16 }
 0x3a9   : > { %v16870_v20 = vshrl.u32 %v16869_v48, 16  ;;  %v16871_v60 = vshll.u32 %v16869_v48, 16  ;;  %v12892_v12 = vsel %vm3787_vm12, %v3896_v53, %v3908_v32  ;;  %5134 = vmatpush1.bf16.msra.mxu1 %v8883_v27  ;;  %v8884_v53 = vld [vmem:[%s15768_s3 + $0x200] sm:$0xff]   ;;  %v16878_v27 = vld [vmem:[#allocation87_spill] sm:$0xff] }
 0x3aa   : > { %16872 = vst [vmem:[#allocation83_spill] sm:$0xff] %v12892_v12  ;;  %v3918_v23 = vrot.slane %v16874_v44, 3  ;;  %5135 = vmatprep.subr.bf16.mxu1 %v16579_v59  ;;  %8656 = vmatpush3.bf16.msra.mxu0 %v8884_v53 }
 0x3ab   : > { %v3914_v43 = vrot.slane %v16870_v20, 3  ;;  %v3915_v16 = vrot.slane %v16871_v60, 4  ;;  %v16875_v20 = vshll.u32 %v16873_v21, 16  ;;  %v3900_v60 = vor.u32 %v3899_v52, %v3898_v11  ;;  %v8885_v21 = vld [vmem:[%s15768_s3 + $0x1b8] sm:$0xff]   ;;  %8657 = vmatprep.subr.bf16.mxu0 %v16608_v46 }
 0x3ac   : > { %4454 = vmatmul.mubr.bf16.gmra.mrb[164].mxu1 %v12872_v15  ;;  %v12898_v48 = vpop.f32.mrb[60].mxu1 }
 0x3ad   : > { %4461 = vmatprep.mubr.bf16.mxu1 %v12880_v40  ;;  %v3919_v15 = vrot.slane %v16875_v20, 4  ;;  %v3381_v9 = vpop.f32.mrb[61].mxu1  ;;  %v3916_v40 = vor.u32 %v3915_v16, %v3914_v43  ;;  %v12915_v16 = vsel %vm3787_vm12, %v3888_v58, %v3900_v60  ;;  %5136 = vmatpush1.bf16.msra.mxu1 %v8885_v21 }
 0x3ae   : > { %8576 = vmatmul.mubr.bf16.gmra.mrb[212].mxu0 %v12892_v12  ;;  %v12907_v44 = vpop.f32.mrb[62].mxu1  ;;  %v12912_v11 = vpop.f32.mrb[108].mxu0  ;;  %16877 = vst [vmem:[#allocation48_spill] sm:$0xff] %v12915_v16  ;;  %v3910_v9 = vrot.slane %v16878_v27, 3  ;;  %v16879_v12 = vld [vmem:[#allocation85_spill] sm:$0xff]  ;;  %5137 = vmatprep.subr.bf16.mxu1 %v16579_v59 }
 0x3af   : > { %8579 = vmatprep.mubr.msk.bf16.mxu0 %vm16609_vm7, %v16608_v46  ;;  %v3384_v20 = vpop.f32.mrb[63].mxu1  ;;  %16876 = vst [vmem:[#allocation21_spill] sm:$0xff] %v12912_v11  ;;  %v3920_v52 = vor.u32 %v3919_v15, %v3918_v23  ;;  %v8457_v43 = vpop.f32.mrb[109].mxu0  ;;  %v3911_v54 = vrot.slane %v16879_v12, 4  ;;  %v16882_v15 = vld [vmem:[#allocation95_spill] sm:$0xff] }
 0x3b0   : > { %v12920_v50 = vpop.f32.mrb[110].mxu0  ;;  %v12924_v20 = vsel %vm3787_vm12, %v3904_v38, %v3916_v40  ;;  %v16883_v23 = vshrl.u32 %v16882_v15, 16  ;;  %v16884_v58 = vshll.u32 %v16882_v15, 16  ;;  %v8886_v12 = vld [vmem:[%s15768_s3 + $0x208] sm:$0xff]   ;;  %v8887_v38 = vld [vmem:[%s15768_s3 + $0x1c0] sm:$0xff]  }
 0x3b1   : > { %16880 = vst [vmem:[#allocation55_spill] sm:$0xff] %v12920_v50  ;;  %16881 = vst [vmem:[#allocation84_spill] sm:$0xff] %v12924_v20  ;;  %v8458_v21 = vpop.f32.mrb[111].mxu0  ;;  %v12939_v27 = vsel %vm3787_vm12, %v3908_v32, %v3920_v52  ;;  %8658 = vmatpush3.bf16.msra.mxu0 %v8886_v12  ;;  %5138 = vmatpush1.bf16.msra.mxu1 %v8887_v38  ;;  %v8888_v32 = vld [vmem:[%s15768_s3 + $0x210] sm:$0xff]  }
 0x3b2   : > { %v3926_v53 = vrot.slane %v16883_v23, 3  ;;  %v3927_v43 = vrot.slane %v16884_v58, 4  ;;  %16885 = vst [vmem:[#allocation28_spill] sm:$0xff] %v12939_v27  ;;  %v16886_v23 = vld [vmem:[#allocation97_spill] sm:$0xff]  ;;  %v3912_v21 = vor.u32 %v3911_v54, %v3910_v9  ;;  %8659 = vmatprep.subr.bf16.mxu0 %v16608_v46  ;;  %5139 = vmatprep.subr.bf16.mxu1 %v16579_v59  ;;  %v8889_v54 = vld [vmem:[%s15768_s3 + $0x1c8] sm:$0xff]   ;;  %v16893_v38 = vld [vmem:[#allocation92_spill] sm:$0xff] }
 0x3b3   : > { %v16888_v58 = vshll.u32 %v16886_v23, 16 }
 0x3b4   : > { %4462 = vmatmul.mubr.bf16.gmra.mrb[168].mxu1 %v12915_v16  ;;  %v16887_v16 = vshrl.u32 %v16886_v23, 16  ;;  %v12945_v11 = vpop.f32.mrb[64].mxu1  ;;  %v3928_v2 = vor.u32 %v3927_v43, %v3926_v53  ;;  %v12963_v12 = vsel %vm3787_vm12, %v3900_v60, %v3912_v21  ;;  %v3922_v23 = vrot.slane %v16893_v38, 3 }
 0x3b5   : > { %4469 = vmatprep.mubr.bf16.mxu1 %v12924_v20  ;;  %v3931_v50 = vrot.slane %v16888_v58, 4  ;;  %16889 = vst [vmem:[#allocation53_spill] sm:$0xff] %v12945_v11  ;;  %v3389_v20 = vpop.f32.mrb[65].mxu1  ;;  %8660 = vmatpush3.bf16.msra.mxu0 %v8888_v32  ;;  %16892 = vst [vmem:[#allocation35_spill] sm:$0xff] %v12963_v12  ;;  %v16894_v58 = vld [vmem:[#allocation88_spill] sm:$0xff] }
 0x3b6   : > { %v3930_v15 = vrot.slane %v16887_v16, 3  ;;  %8580 = vmatmul.mubr.bf16.gmra.mrb[216].mxu0 %v12939_v27  ;;  %v12954_v16 = vpop.f32.mrb[66].mxu1  ;;  %v12960_v20 = vpop.f32.mrb[112].mxu0  ;;  %v3923_v27 = vrot.slane %v16894_v58, 4  ;;  %5140 = vmatpush1.bf16.msra.mxu1 %v8889_v54  ;;  %v8890_v54 = vld [vmem:[%s15768_s3 + $0x218] sm:$0xff]  }
 0x3b7   : > { %8583 = vmatprep.mubr.msk.bf16.mxu0 %vm16609_vm7, %v16608_v46  ;;  %16890 = vst [vmem:[#allocation37_spill] sm:$0xff] %v12954_v16  ;;  %v3392_v9 = vpop.f32.mrb[67].mxu1  ;;  %16891 = vst [vmem:[#allocation57_spill] sm:$0xff] %v12960_v20  ;;  %v8461_v43 = vpop.f32.mrb[113].mxu0  ;;  %8661 = vmatprep.subr.bf16.mxu0 %v16608_v46 }
 0x3b8   : > { %v3932_v53 = vor.u32 %v3931_v50, %v3930_v15  ;;  %v12968_v16 = vpop.f32.mrb[114].mxu0  ;;  %v12972_v9 = vsel %vm3787_vm12, %v3916_v40, %v3928_v2  ;;  %v16897_v50 = vld [vmem:[#allocation101_spill] sm:$0xff]  ;;  %5141 = vmatprep.subr.bf16.mxu1 %v16579_v59  ;;  %v8891_v40 = vld [vmem:[%s15768_s3 + $0x1d0] sm:$0xff]  }
 0x3b9   : > { %16895 = vst [vmem:[#allocation42_spill] sm:$0xff] %v12968_v16  ;;  %16896 = vst [vmem:[#allocation86_spill] sm:$0xff] %v12972_v9  ;;  %v16898_v15 = vshrl.u32 %v16897_v50, 16  ;;  %v16899_v60 = vshll.u32 %v16897_v50, 16  ;;  %v8462_v38 = vpop.f32.mrb[115].mxu0  ;;  %8662 = vmatpush3.bf16.msra.mxu0 %v8890_v54 }
 0x3ba   : > { %v12987_v58 = vsel %vm3787_vm12, %v3920_v52, %v3932_v53  ;;  %v3924_v38 = vor.u32 %v3923_v27, %v3922_v23  ;;  %5142 = vmatpush1.bf16.msra.mxu1 %v8891_v40  ;;  %8663 = vmatprep.subr.bf16.mxu0 %v16608_v46  ;;  %v8892_v52 = vld [vmem:[%s15768_s3 + $0x220] sm:$0xff]   ;;  %v8893_v23 = vld [vmem:[%s15768_s3 + $0x1d8] sm:$0xff]  }
 0x3bb   : > { %v3938_v32 = vrot.slane %v16898_v15, 3  ;;  %v3939_v43 = vrot.slane %v16899_v60, 4  ;;  %16900 = vst [vmem:[#allocation39_spill] sm:$0xff] %v12987_v58  ;;  %v16901_v15 = vld [vmem:[#allocation89_spill] sm:$0xff]  ;;  %5143 = vmatprep.subr.bf16.mxu1 %v16579_v59 }
 0x3bc   : > { %4470 = vmatmul.mubr.bf16.gmra.mrb[172].mxu1 %v12963_v12  ;;  %v16902_v12 = vshrl.u32 %v16901_v15, 16  ;;  %v16903_v60 = vshll.u32 %v16901_v15, 16  ;;  %v12993_v20 = vpop.f32.mrb[68].mxu1 }
 0x3bd   : > { %4477 = vmatprep.mubr.bf16.mxu1 %v12972_v9  ;;  %16904 = vst [vmem:[#allocation51_spill] sm:$0xff] %v12993_v20  ;;  %v3397_v9 = vpop.f32.mrb[69].mxu1  ;;  %v3940_v11 = vor.u32 %v3939_v43, %v3938_v32  ;;  %8664 = vmatpush3.bf16.msra.mxu0 %v8892_v52  ;;  %v13011_v32 = vsel %vm3787_vm12, %v3912_v21, %v3924_v38  ;;  %v16908_v43 = vld [vmem:[#allocation98_spill] sm:$0xff] }
 0x3be   : > { %v3942_v50 = vrot.slane %v16902_v12, 3  ;;  %v3943_v16 = vrot.slane %v16903_v60, 4  ;;  %8584 = vmatmul.mubr.bf16.gmra.mrb[220].mxu0 %v12987_v58  ;;  %v13002_v12 = vpop.f32.mrb[70].mxu1  ;;  %v13005_v15 = vpop.f32.mrb[116].mxu0  ;;  %16907 = vst [vmem:[#allocation87_spill] sm:$0xff] %v13011_v32  ;;  %v3934_v40 = vrot.slane %v16908_v43, 3  ;;  %8665 = vmatprep.subr.bf16.mxu0 %v16608_v46 }
 0x3bf   : > { %8587 = vmatprep.mubr.msk.bf16.mxu0 %vm16609_vm7, %v16608_v46  ;;  %16905 = vst [vmem:[#allocation90_spill] sm:$0xff] %v13002_v12  ;;  %v3400_v54 = vpop.f32.mrb[71].mxu1  ;;  %16906 = vst [vmem:[#allocation91_spill] sm:$0xff] %v13005_v15  ;;  %v8465_v9 = vpop.f32.mrb[117].mxu0  ;;  %v16909_v60 = vld [vmem:[#allocation93_spill] sm:$0xff]  ;;  %v8894_v43 = vld [vmem:[%s15768_s3 + $0x228] sm:$0xff]   ;;  %5144 = vmatpush1.bf16.msra.mxu1 %v8893_v23 }
 0x3c0   : > { %v3944_v27 = vor.u32 %v3943_v16, %v3942_v50  ;;  %v3935_v58 = vrot.slane %v16909_v60, 4  ;;  %v13016_v12 = vpop.f32.mrb[118].mxu0  ;;  %v13020_v16 = vsel %vm3787_vm12, %v3928_v2, %v3940_v11  ;;  %v16912_v50 = vld [vmem:[#allocation106_spill] sm:$0xff]  ;;  %5145 = vmatprep.subr.bf16.mxu1 %v16579_v59 }
 0x3c1   : > { %16910 = vst [vmem:[#allocation85_spill] sm:$0xff] %v13016_v12  ;;  %16911 = vst [vmem:[#allocation95_spill] sm:$0xff] %v13020_v16  ;;  %v16913_v52 = vshrl.u32 %v16912_v50, 16  ;;  %v16914_v9 = vshll.u32 %v16912_v50, 16  ;;  %v8466_v60 = vpop.f32.mrb[119].mxu0  ;;  %v16916_v12 = vld [vmem:[#allocation94_spill] sm:$0xff]  ;;  %8666 = vmatpush3.bf16.msra.mxu0 %v8894_v43 }
 0x3c2   : > { %v13034_v2 = vsel %vm3787_vm12, %v3932_v53, %v3944_v27  ;;  %v16918_v50 = vshll.u32 %v16916_v12, 16  ;;  %v3936_v23 = vor.u32 %v3935_v58, %v3934_v40  ;;  %8667 = vmatprep.subr.bf16.mxu0 %v16608_v46  ;;  %v8896_v53 = vld [vmem:[%s15768_s3 + $0x230] sm:$0xff]   ;;  %v8897_v58 = vld [vmem:[%s15768_s3 + $0x1e8] sm:$0xff]  }
 0x3c3   : > { %v3950_v54 = vrot.slane %v16913_v52, 3  ;;  %v3951_v21 = vrot.slane %v16914_v9, 4  ;;  %16915 = vst [vmem:[#allocation97_spill] sm:$0xff] %v13034_v2  ;;  %v16917_v52 = vshrl.u32 %v16916_v12, 16 }
 0x3c4   : > { %4478 = vmatmul.mubr.bf16.gmra.mrb[176].mxu1 %v13011_v32  ;;  %v8895_v32 = vld [vmem:[%s15768_s3 + $0x1e0] sm:$0xff]   ;;  %v3955_v9 = vrot.slane %v16918_v50, 4  ;;  %v13041_v60 = vpop.f32.mrb[72].mxu1 }
 0x3c5   : > { %4485 = vmatprep.mubr.bf16.mxu1 %v13020_v16  ;;  %v3954_v15 = vrot.slane %v16917_v52, 3  ;;  %v3405_v16 = vpop.f32.mrb[73].mxu1  ;;  %v3952_v20 = vor.u32 %v3951_v21, %v3950_v54  ;;  %5146 = vmatpush1.bf16.msra.mxu1 %v8895_v32  ;;  %v16922_v54 = vld [vmem:[#allocation102_spill] sm:$0xff] }
 0x3c6   : > { %8588 = vmatmul.mubr.bf16.gmra.mrb[224].mxu0 %v13034_v2  ;;  %v13050_v12 = vpop.f32.mrb[74].mxu1  ;;  %v13052_v52 = vpop.f32.mrb[120].mxu0  ;;  %5147 = vmatprep.subr.bf16.mxu1 %v16579_v59  ;;  %v13059_v16 = vsel %vm3787_vm12, %v3924_v38, %v3936_v23  ;;  %v3946_v21 = vrot.slane %v16922_v54, 3  ;;  %v16923_v2 = vld [vmem:[#allocation99_spill] sm:$0xff] }
 0x3c7   : > { %8591 = vmatprep.mubr.msk.bf16.mxu0 %vm16609_vm7, %v16608_v46  ;;  %16919 = vst [vmem:[#allocation92_spill] sm:$0xff] %v13050_v12  ;;  %v3408_v43 = vpop.f32.mrb[75].mxu1  ;;  %16920 = vst [vmem:[#allocation88_spill] sm:$0xff] %v13052_v52  ;;  %v3956_v50 = vor.u32 %v3955_v9, %v3954_v15  ;;  %8668 = vmatpush3.bf16.msra.mxu0 %v8896_v53  ;;  %v8469_v40 = vpop.f32.mrb[121].mxu0  ;;  %v3947_v12 = vrot.slane %v16923_v2, 4  ;;  %v13066_v15 = vadd.f32 %v12645_v37, %v12666_v34  ;;  %v16926_v53 = vld [vmem:[#allocation110_spill] sm:$0xff] }
 0x3c8   : > { %16921 = vst [vmem:[#allocation101_spill] sm:$0xff] %v13059_v16  ;;  %8669 = vmatprep.subr.bf16.mxu0 %v16608_v46  ;;  %v13068_v32 = vpop.f32.mrb[122].mxu0  ;;  %v13072_v9 = vsel %vm3787_vm12, %v3940_v11, %v3952_v20  ;;  %v16927_v38 = vshrl.u32 %v16926_v53, 16  ;;  %v16928_v40 = vshll.u32 %v16926_v53, 16  ;;  %v8898_v2 = vld [vmem:[%s15768_s3 + $0x238] sm:$0xff]   ;;  %v8899_v37 = vld [vmem:[%s15768_s3 + $0x1f0] sm:$0xff]   ;;  %v13087_v34 = vadd.f32 %v12650_v47, %v12670_v25 }
 0x3c9   : > { %16924 = vst [vmem:[#allocation89_spill] sm:$0xff] %v13066_v15  ;;  %16925 = vst [vmem:[#allocation98_spill] sm:$0xff] %v13072_v9  ;;  %v8470_v52 = vpop.f32.mrb[123].mxu0  ;;  %5148 = vmatpush1.bf16.msra.mxu1 %v8897_v58  ;;  %v13090_v11 = vsel %vm3787_vm12, %v3944_v27, %v3956_v50  ;;  %v16931_v53 = vld [vmem:[#allocation96_spill] sm:$0xff] }
 0x3ca   : > { %v3962_v43 = vrot.slane %v16927_v38, 3  ;;  %v3963_v54 = vrot.slane %v16928_v40, 4  ;;  %16929 = vst [vmem:[#allocation93_spill] sm:$0xff] %v13087_v34  ;;  %16930 = vst [vmem:[#allocation106_spill] sm:$0xff] %v13090_v11  ;;  %v16932_v38 = vshrl.u32 %v16931_v53, 16  ;;  %5149 = vmatprep.subr.bf16.mxu1 %v16579_v59  ;;  %v16949_v34 = vld [vmem:[#allocation108_spill] sm:$0xff] }
 0x3cb   : > { %8670 = vmatpush3.bf16.msra.mxu0 %v8898_v2 }
 0x3cc   : > { %4486 = vmatmul.mubr.bf16.gmra.mrb[180].mxu1 %v13059_v16  ;;  %v3966_v40 = vrot.slane %v16932_v38, 3  ;;  %v16933_v16 = vshll.u32 %v16931_v53, 16  ;;  %v13097_v58 = vpop.f32.mrb[76].mxu1  ;;  %v3964_v47 = vor.u32 %v3963_v54, %v3962_v43  ;;  %v13114_v43 = vadd.f32 %v12672_v7, %v12691_v3 }
 0x3cd   : > { %4493 = vmatprep.mubr.bf16.mxu1 %v13072_v9  ;;  %v3948_v9 = vor.u32 %v3947_v12, %v3946_v21  ;;  %v3413_v15 = vpop.f32.mrb[77].mxu1  ;;  %5150 = vmatpush1.bf16.msra.mxu1 %v8899_v37  ;;  %v16936_v21 = vld [vmem:[#allocation103_spill] sm:$0xff]  ;;  %v13132_v3 = vadd.f32 %v12678_v35, %v12695_v33 }
 0x3ce   : > { %v3967_v52 = vrot.slane %v16933_v16, 4  ;;  %8592 = vmatmul.mubr.bf16.gmra.mrb[228].mxu0 %v13090_v11  ;;  %v13102_v25 = vpop.f32.mrb[78].mxu1  ;;  %v13104_v38 = vpop.f32.mrb[124].mxu0  ;;  %5151 = vmatprep.subr.bf16.mxu1 %v16579_v59  ;;  %v16935_v11 = vld [vmem:[#allocation107_spill] sm:$0xff]  ;;  %v3959_v15 = vrot.slane %v16936_v21, 4  ;;  %16937 = vst [vmem:[#allocation102_spill] sm:$0xff] %v13114_v43  ;;  %v13120_v37 = vsel %vm3787_vm12, %v3952_v20, %v3964_v47 }
 0x3cf   : > { %8595 = vmatprep.mubr.msk.bf16.mxu0 %vm16609_vm7, %v16608_v46  ;;  %v3416_v27 = vpop.f32.mrb[79].mxu1  ;;  %v8473_v2 = vpop.f32.mrb[125].mxu0  ;;  %v13108_v53 = vsel %vm3787_vm12, %v3936_v23, %v3948_v9  ;;  %v3958_v12 = vrot.slane %v16935_v11, 3  ;;  %16938 = vst [vmem:[#allocation99_spill] sm:$0xff] %v13120_v37  ;;  %v8900_v11 = vld [vmem:[%s15768_s3 + $0x1f8] sm:$0xff]   ;;  %16942 = vst [vmem:[#allocation110_spill] sm:$0xff] %v13132_v3 }
 0x3d0   : > { %v3968_v16 = vor.u32 %v3967_v52, %v3966_v40  ;;  %16934 = vst [vmem:[#allocation94_spill] sm:$0xff] %v13108_v53  ;;  %v13116_v54 = vpop.f32.mrb[126].mxu0  ;;  %v16939_v40 = vld [vmem:[#allocation113_spill] sm:$0xff]  ;;  %v16944_v20 = vld [vmem:[#allocation100_spill] sm:$0xff] }
 0x3d1   : > { %v16940_v52 = vshrl.u32 %v16939_v40, 16  ;;  %v16941_v23 = vshll.u32 %v16939_v40, 16  ;;  %v8474_v21 = vpop.f32.mrb[127].mxu0  ;;  %v16945_v59 = vshrl.u32 %v16944_v20, 16  ;;  %v16946_v40 = vshll.u32 %v16944_v20, 16  ;;  %5152 = vmatpush1.bf16.msra.mxu1 %v8900_v11  ;;  %v16948_v11 = vld [vmem:[#allocation111_spill] sm:$0xff] }
 0x3d2   : > { %v13135_v7 = vsel %vm3787_vm12, %v3956_v50, %v3968_v16  ;;  %v3960_v21 = vor.u32 %v3959_v15, %v3958_v12  ;;  %v13157_v12 = vadd.f32 %v12697_v36, %v12715_v41  ;;  %v13172_v41 = vadd.f32 %v12703_v51, %v12719_v55 }
 0x3d3   : > { %v3974_v27 = vrot.slane %v16940_v52, 3  ;;  %v3975_v2 = vrot.slane %v16941_v23, 4  ;;  %16943 = vst [vmem:[#allocation96_spill] sm:$0xff] %v13135_v7  ;;  %v3978_v52 = vrot.slane %v16945_v59, 3  ;;  %v3979_v23 = vrot.slane %v16946_v40, 4 }
 0x3d4   : > { %4494 = vmatmul.mubr.bf16.gmra.mrb[184].mxu1 %v13108_v53  ;;  %v13141_v53 = vpop.f32.mrb[80].mxu1  ;;  %v13151_v20 = vsel %vm3787_vm12, %v3948_v9, %v3960_v21  ;;  %v3970_v40 = vrot.slane %v16948_v11, 3  ;;  %16954 = vst [vmem:[#allocation113_spill] sm:$0xff] %v13172_v41  ;;  %v16960_v41 = vld [vmem:[#allocation112_spill] sm:$0xff] }
 0x3d5   : > { %4501 = vmatprep.mubr.bf16.mxu1 %v13120_v37  ;;  %v3421_v37 = vpop.f32.mrb[81].mxu1  ;;  %v3976_v43 = vor.u32 %v3975_v2, %v3974_v27  ;;  %v3980_v59 = vor.u32 %v3979_v23, %v3978_v52  ;;  %16947 = vst [vmem:[#allocation107_spill] sm:$0xff] %v13151_v20  ;;  %v16951_v27 = vld [vmem:[#allocation115_spill] sm:$0xff] }
 0x3d6   : > { %8596 = vmatmul.mubr.bf16.gmra.mrb[232].mxu0 %v13135_v7  ;;  %v13146_v35 = vpop.f32.mrb[82].mxu1  ;;  %v3971_v7 = vrot.slane %v16949_v34, 4  ;;  %v16952_v2 = vshrl.u32 %v16951_v27, 16  ;;  %v16953_v9 = vshll.u32 %v16951_v27, 16  ;;  %v16956_v34 = vld [vmem:[#allocation104_spill] sm:$0xff] }
 0x3d7   : > { %8599 = vmatprep.mubr.msk.bf16.mxu0 %vm16609_vm7, %v16608_v46  ;;  %v3424_v33 = vpop.f32.mrb[83].mxu1  ;;  %v13163_v37 = vsel %vm3787_vm12, %v3964_v47, %v3976_v43  ;;  %v13175_v36 = vsel %vm3787_vm12, %v3968_v16, %v3980_v59  ;;  %v16958_v11 = vshll.u32 %v16956_v34, 16 }
 0x3d8   : > { %v13148_v50 = vpop.f32.mrb[128].mxu0  ;;  %16950 = vst [vmem:[#allocation103_spill] sm:$0xff] %v13163_v37  ;;  %v3987_v52 = vrot.slane %v16953_v9, 4  ;;  %16955 = vst [vmem:[#allocation100_spill] sm:$0xff] %v13175_v36  ;;  %v16957_v33 = vshrl.u32 %v16956_v34, 16  ;;  %v3972_v27 = vor.u32 %v3971_v7, %v3970_v40  ;;  %v13197_v7 = vadd.f32 %v12721_v56, %v12743_v39 }
 0x3d9   : > { %v8477_v3 = vpop.f32.mrb[129].mxu0  ;;  %v13212_v56 = vadd.f32 %v12726_v61, %v12748_v0 }
 0x3da   : > { %v13159_v15 = vpop.f32.mrb[130].mxu0  ;;  %v3986_v3 = vrot.slane %v16952_v2, 3  ;;  %v3990_v47 = vrot.slane %v16957_v33, 3  ;;  %v13191_v34 = vsel %vm3787_vm12, %v3960_v21, %v3972_v27 }
 0x3db   : > { %v8478_v23 = vpop.f32.mrb[131].mxu0  ;;  %16959 = vst [vmem:[#allocation111_spill] sm:$0xff] %v13191_v34  ;;  %16965 = vst [vmem:[#allocation115_spill] sm:$0xff] %v13212_v56  ;;  %v16971_v56 = vld [vmem:[#allocation114_spill] sm:$0xff] }
 0x3dc   : > { %4502 = vmatmul.mubr.bf16.gmra.mrb[188].mxu1 %v13151_v20  ;;  %v3991_v20 = vrot.slane %v16958_v11, 4  ;;  %v13181_v2 = vpop.f32.mrb[84].mxu1  ;;  %v3988_v23 = vor.u32 %v3987_v52, %v3986_v3  ;;  %v3982_v11 = vrot.slane %v12016_v8, 3 }
 0x3dd   : > { %4509 = vmatprep.mubr.bf16.mxu1 %v13163_v37  ;;  %v3429_v9 = vpop.f32.mrb[85].mxu1 }
 0x3de   : > { %8600 = vmatmul.mubr.bf16.gmra.mrb[236].mxu0 %v13175_v36  ;;  %v13186_v51 = vpop.f32.mrb[86].mxu1  ;;  %v3992_v37 = vor.u32 %v3991_v20, %v3990_v47  ;;  %v3983_v36 = vrot.slane %v16960_v41, 4  ;;  %v13203_v3 = vsel %vm3787_vm12, %v3976_v43, %v3988_v23  ;;  %v16962_v20 = vld [vmem:[#allocation117_spill] sm:$0xff] }
 0x3df   : > { %8603 = vmatprep.mubr.msk.bf16.mxu0 %vm16609_vm7, %v16608_v46  ;;  %v3432_v55 = vpop.f32.mrb[87].mxu1  ;;  %16961 = vst [vmem:[#allocation108_spill] sm:$0xff] %v13203_v3  ;;  %v16963_v52 = vshrl.u32 %v16962_v20, 16  ;;  %v16964_v21 = vshll.u32 %v16962_v20, 16  ;;  %v16967_v41 = vld [vmem:[#allocation105_spill] sm:$0xff] }
 0x3e0   : > { %v13188_v16 = vpop.f32.mrb[132].mxu0  ;;  %v13215_v39 = vsel %vm3787_vm12, %v3980_v59, %v3992_v37  ;;  %v16968_v55 = vshrl.u32 %v16967_v41, 16  ;;  %v3984_v20 = vor.u32 %v3983_v36, %v3982_v11  ;;  %v13237_v36 = vadd.f32 %v12750_v30, %v12778_v24 }
 0x3e1   : > { %v8481_v33 = vpop.f32.mrb[133].mxu0  ;;  %v3998_v47 = vrot.slane %v16963_v52, 3  ;;  %v3999_v9 = vrot.slane %v16964_v21, 4  ;;  %16966 = vst [vmem:[#allocation104_spill] sm:$0xff] %v13215_v39  ;;  %v13252_v30 = vadd.f32 %v12757_v62, %v12784_v22 }
 0x3e2   : > { %v13199_v40 = vpop.f32.mrb[134].mxu0  ;;  %v4002_v43 = vrot.slane %v16968_v55, 3  ;;  %v16969_v33 = vshll.u32 %v16967_v41, 16  ;;  %v13231_v41 = vsel %vm3787_vm12, %v3972_v27, %v3984_v20 }
 0x3e3   : > { %v8482_v8 = vpop.f32.mrb[135].mxu0  ;;  %16970 = vst [vmem:[#allocation112_spill] sm:$0xff] %v13231_v41  ;;  %16976 = vst [vmem:[#allocation105_spill] sm:$0xff] %v13252_v30  ;;  %v16982_v30 = vld [vmem:[#allocation116_spill] sm:$0xff] }
 0x3e4   : > { %4510 = vmatmul.mubr.bf16.gmra.mrb[192].mxu1 %v13191_v34  ;;  %v4003_v34 = vrot.slane %v16969_v33, 4  ;;  %v4000_v8 = vor.u32 %v3999_v9, %v3998_v47  ;;  %v3994_v33 = vrot.slane %v12090_v14, 3 }
 0x3e5   : > { %4517 = vmatprep.mubr.bf16.mxu1 %v13203_v3  ;;  %v13221_v52 = vpop.f32.mrb[88].mxu1 }
 0x3e6   : > { %8604 = vmatmul.mubr.bf16.gmra.mrb[240].mxu0 %v13215_v39  ;;  %v3437_v21 = vpop.f32.mrb[89].mxu1  ;;  %v4004_v3 = vor.u32 %v4003_v34, %v4002_v43  ;;  %v3995_v39 = vrot.slane %v16971_v56, 4  ;;  %v13243_v47 = vsel %vm3787_vm12, %v3988_v23, %v4000_v8  ;;  %v16973_v34 = vld [vmem:[#allocation118_spill] sm:$0xff]  ;;  %v16978_v56 = vld [vmem:[#allocation109_spill] sm:$0xff] }
 0x3e7   : > { %8607 = vmatprep.mubr.msk.bf16.mxu0 %vm16609_vm7, %v16608_v46  ;;  %v13226_v61 = vpop.f32.mrb[90].mxu1  ;;  %16972 = vst [vmem:[#allocation117_spill] sm:$0xff] %v13243_v47  ;;  %v16974_v9 = vshrl.u32 %v16973_v34, 16  ;;  %v16975_v27 = vshll.u32 %v16973_v34, 16 }
 0x3e8   : > { %v3440_v0 = vpop.f32.mrb[91].mxu1  ;;  %v13228_v59 = vpop.f32.mrb[136].mxu0  ;;  %v13255_v24 = vsel %vm3787_vm12, %v3992_v37, %v4004_v3  ;;  %v3996_v34 = vor.u32 %v3995_v39, %v3994_v33  ;;  %v13277_v39 = vadd.f32 %v12789_v13, %v12818_v28  ;;  %v13292_v13 = vadd.f32 %v12796_v1, %v12824_v5 }
 0x3e9   : > { %v8485_v55 = vpop.f32.mrb[137].mxu0  ;;  %v4010_v43 = vrot.slane %v16974_v9, 3  ;;  %v4011_v21 = vrot.slane %v16975_v27, 4  ;;  %16977 = vst [vmem:[#allocation114_spill] sm:$0xff] %v13255_v24  ;;  %v16979_v0 = vshrl.u32 %v16978_v56, 16 }
 0x3ea   : > { %v13239_v11 = vpop.f32.mrb[138].mxu0  ;;  %v16980_v55 = vshll.u32 %v16978_v56, 16  ;;  %v13271_v56 = vsel %vm3787_vm12, %v3984_v20, %v3996_v34  ;;  %16983 = vst [vmem:[#allocation109_spill] sm:$0xff] %v13277_v39 }
 0x3eb   : > { %v8486_v14 = vpop.f32.mrb[139].mxu0  ;;  %v4014_v23 = vrot.slane %v16979_v0, 3  ;;  %16981 = vst [vmem:[#allocation118_spill] sm:$0xff] %v13271_v56 }
 0x3ec   : > { %4518 = vmatmul.mubr.bf16.gmra.mrb[196].mxu1 %v13231_v41  ;;  %v4015_v41 = vrot.slane %v16980_v55, 4  ;;  %v4012_v14 = vor.u32 %v4011_v21, %v4010_v43  ;;  %v4006_v55 = vrot.slane %v12152_v17, 3 }
 0x3ed   : > { %4525 = vmatprep.mubr.bf16.mxu1 %v13243_v47 }
 0x3ee   : > { %8608 = vmatmul.mubr.bf16.gmra.mrb[244].mxu0 %v13255_v24  ;;  %v4016_v47 = vor.u32 %v4015_v41, %v4014_v23  ;;  %v4007_v24 = vrot.slane %v16982_v30, 4  ;;  %v13283_v43 = vsel %vm3787_vm12, %v4000_v8, %v4012_v14  ;;  %v16985_v41 = vld [vmem:[#allocation120_spill] sm:$0xff]  ;;  %v16990_v30 = vshrl.u32 %v11933_v45, 16 }
 0x3ef   : > { %v13261_v9 = vpop.f32.mrb[92].mxu1  ;;  %8611 = vmatprep.mubr.msk.bf16.mxu0 %vm16609_vm7, %v16608_v46  ;;  %16984 = vst [vmem:[#allocation116_spill] sm:$0xff] %v13283_v43  ;;  %v16986_v21 = vshrl.u32 %v16985_v41, 16  ;;  %v16987_v20 = vshll.u32 %v16985_v41, 16  ;;  %16988 = vst [vmem:[#allocation120_spill] sm:$0xff] %v13292_v13  ;;  %v17046_v13 = vld [vmem:[#allocation85_spill] sm:$0xff] }
 0x3f0   : > { %v3445_v27 = vpop.f32.mrb[93].mxu1  ;;  %v13295_v28 = vsel %vm3787_vm12, %v4004_v3, %v4016_v47  ;;  %v4026_v8 = vrot.slane %v16990_v30, 3  ;;  %v4008_v41 = vor.u32 %v4007_v24, %v4006_v55  ;;  %v13317_v24 = vadd.f32 %v12829_v6, %v12858_v49 }
 0x3f1   : > { %v13266_v62 = vpop.f32.mrb[94].mxu1  ;;  %v13268_v37 = vpop.f32.mrb[140].mxu0  ;;  %v4022_v23 = vrot.slane %v16986_v21, 3  ;;  %v4023_v27 = vrot.slane %v16987_v20, 4  ;;  %16989 = vst [vmem:[#allocation161_spill] sm:$0xff] %v13295_v28 }
 0x3f2   : > { %v3448_v22 = vpop.f32.mrb[95].mxu1  ;;  %v8489_v0 = vpop.f32.mrb[141].mxu0 }
 0x3f3   : > { %v13279_v33 = vpop.f32.mrb[142].mxu0  ;;  %v16991_v22 = vshll.u32 %v11933_v45, 16  ;;  %v13311_v45 = vsel %vm3787_vm12, %v3996_v34, %v4008_v41 }
 0x3f4   : > { %4526 = vmatmul.mubr.bf16.gmra.mrb[200].mxu1 %v13271_v56  ;;  %v8490_v17 = vpop.f32.mrb[143].mxu0  ;;  %16992 = vst [vmem:[#allocation162_spill] sm:$0xff] %v13311_v45 }
 0x3f5   : > { %4533 = vmatprep.mubr.bf16.mxu1 %v13283_v43  ;;  %v4027_v0 = vrot.slane %v16991_v22, 4  ;;  %v4024_v17 = vor.u32 %v4023_v27, %v4022_v23  ;;  %v16993_v22 = vld [vmem:[#allocation119_spill] sm:$0xff] }
 0x3f6   : > { %8612 = vmatmul.mubr.bf16.gmra.mrb[248].mxu0 %v13295_v28  ;;  %v4018_v56 = vrot.slane %v16993_v22, 3  ;;  %v4019_v28 = vrot.slane %v12155_v26, 4  ;;  %16994 = vst [vmem:[#allocation119_spill] sm:$0xff] %v13317_v24  ;;  %v16996_v27 = vld [vmem:[#allocation123_spill] sm:$0xff]  ;;  %v13332_v26 = vadd.f32 %v12836_v29, %v12864_v31 }
 0x3f7   : > { %v13301_v21 = vpop.f32.mrb[96].mxu1  ;;  %8615 = vmatprep.mubr.msk.bf16.mxu0 %vm16609_vm7, %v16608_v46  ;;  %v4028_v43 = vor.u32 %v4027_v0, %v4026_v8  ;;  %v13323_v23 = vsel %vm3787_vm12, %v4012_v14, %v4024_v17  ;;  %v16997_v8 = vshrl.u32 %v16996_v27, 16  ;;  %v16998_v34 = vshll.u32 %v16996_v27, 16 }
 0x3f8   : > { %v3453_v20 = vpop.f32.mrb[97].mxu1  ;;  %16995 = vst [vmem:[#allocation163_spill] sm:$0xff] %v13323_v23  ;;  %16999 = vst [vmem:[#allocation123_spill] sm:$0xff] %v13332_v26  ;;  %v4020_v14 = vor.u32 %v4019_v28, %v4018_v56  ;;  %v13353_v56 = vadd.f32 %v12869_v57, %v12898_v48 }
 0x3f9   : > { %v13306_v1 = vpop.f32.mrb[98].mxu1  ;;  %v13308_v3 = vpop.f32.mrb[144].mxu0  ;;  %v4034_v0 = vrot.slane %v16997_v8, 3  ;;  %v4035_v20 = vrot.slane %v16998_v34, 4  ;;  %v13335_v6 = vsel %vm3787_vm12, %v4016_v47, %v4028_v43  ;;  %v4030_v47 = vrot.slane %v12267_v18, 3 }
 0x3fa   : > { %v3456_v5 = vpop.f32.mrb[99].mxu1  ;;  %v8493_v30 = vpop.f32.mrb[145].mxu0  ;;  %17000 = vst [vmem:[#allocation164_spill] sm:$0xff] %v13335_v6  ;;  %v13347_v31 = vsel %vm3787_vm12, %v4008_v41, %v4020_v14  ;;  %17002 = vst [vmem:[#allocation166_spill] sm:$0xff] %v13353_v56  ;;  %v17005_v41 = vshll.u32 %v12360_v4, 16  ;;  %v13372_v57 = vsel %vm3787_vm12, %v4028_v43, %v12044_v42  ;;  %v4042_v42 = vrot.slane %v12322_v10, 3 }
 0x3fb   : > { %v13319_v55 = vpop.f32.mrb[146].mxu0  ;;  %v4036_v22 = vor.u32 %v4035_v20, %v4034_v0  ;;  %17001 = vst [vmem:[#allocation165_spill] sm:$0xff] %v13347_v31  ;;  %v17004_v20 = vshrl.u32 %v12360_v4, 16  ;;  %17007 = vst [vmem:[#allocation169_spill] sm:$0xff] %v13372_v57  ;;  %v17009_v43 = vld [vmem:[#allocation121_spill] sm:$0xff]  ;;  %v17032_v56 = vld [vmem:[#allocation42_spill] sm:$0xff] }
 0x3fc   : > { %4534 = vmatmul.mubr.bf16.gmra.mrb[204].mxu1 %v13311_v45  ;;  %v8494_v5 = vpop.f32.mrb[147].mxu0 }
 0x3fd   : > { %4541 = vmatprep.mubr.bf16.mxu1 %v13323_v23  ;;  %v4031_v5 = vrot.slane %v12214_v19, 4  ;;  %v13359_v0 = vsel %vm3787_vm12, %v4024_v17, %v4036_v22  ;;  %v13368_v19 = vadd.f32 %v12876_v63, %v12907_v44  ;;  %v17020_v23 = vld [vmem:[#allocation149_spill] sm:$0xff] }
 0x3fe   : > { %8616 = vmatmul.mubr.bf16.gmra.mrb[252].mxu0 %v13335_v6  ;;  %17003 = vst [vmem:[#allocation167_spill] sm:$0xff] %v13359_v0  ;;  %v17018_v6 = vld [vmem:[#allocation55_spill] sm:$0xff] }
 0x3ff   : > { %v13337_v49 = vpop.f32.mrb[100].mxu1  ;;  %8619 = vmatprep.mubr.msk.bf16.mxu0 %vm16609_vm7, %v16608_v46  ;;  %17006 = vst [vmem:[#allocation168_spill] sm:$0xff] %v13368_v19  ;;  %v4032_v17 = vor.u32 %v4031_v5, %v4030_v47  ;;  %v17011_v47 = vld [vmem:[#allocation21_spill] sm:$0xff] }
 0x400   : > { %v3461_v30 = vpop.f32.mrb[101].mxu1 }
 0x401   : > { %v13342_v27 = vpop.f32.mrb[102].mxu1  ;;  %v13344_v34 = vpop.f32.mrb[148].mxu0  ;;  %v4046_v30 = vrot.slane %v17004_v20, 3  ;;  %v13384_v44 = vsel %vm3787_vm12, %v4020_v14, %v4032_v17 }
 0x402   : > { %v3464_v8 = vpop.f32.mrb[103].mxu1  ;;  %v8497_v29 = vpop.f32.mrb[149].mxu0  ;;  %17008 = vst [vmem:[#allocation170_spill] sm:$0xff] %v13384_v44 }
 0x403   : > { %v13355_v28 = vpop.f32.mrb[150].mxu0  ;;  %v4047_v8 = vrot.slane %v17005_v41, 4 }
 0x404   : > { %4542 = vmatmul.mubr.bf16.gmra.mrb[208].mxu1 %v13347_v31  ;;  %v8498_v18 = vpop.f32.mrb[151].mxu0 }
 0x405   : > { %4549 = vmatprep.mubr.bf16.mxu1 %v13359_v0  ;;  %v4048_v20 = vor.u32 %v4047_v8, %v4046_v30  ;;  %v4043_v0 = vrot.slane %v17009_v43, 4  ;;  %v17017_v43 = vld [vmem:[#allocation37_spill] sm:$0xff] }
 0x406   : > { %8620 = vmatmul.mubr.bf16.gmra.mrb[0].mxu0 %v13372_v57  ;;  %v17010_v57 = vld [vmem:[#allocation53_spill] sm:$0xff] }
 0x407   : > { %v13374_v48 = vpop.f32.mrb[104].mxu1  ;;  %8623 = vmatprep.mubr.msk.bf16.mxu0 %vm16609_vm7, %v16608_v46  ;;  %v13390_v5 = vadd.f32 %v17011_v47, %v17010_v57  ;;  %v13396_v8 = vsel %vm3787_vm12, %v4036_v22, %v4048_v20  ;;  %v13405_v57 = vadd.f32 %v17018_v6, %v17017_v43  ;;  %v17022_v6 = vld [vmem:[#allocation126_spill] sm:$0xff] }
 0x408   : > { %v3469_v29 = vpop.f32.mrb[105].mxu1  ;;  %17013 = vst [vmem:[#allocation53_spill] sm:$0xff] %v13396_v8  ;;  %v4054_v43 = vrot.slane %v17022_v6, 3 }
 0x409   : > { %v13379_v4 = vpop.f32.mrb[106].mxu1  ;;  %v13381_v18 = vpop.f32.mrb[152].mxu0  ;;  %17012 = vst [vmem:[#allocation121_spill] sm:$0xff] %v13390_v5  ;;  %v17014_v29 = vld [vmem:[#allocation129_spill] sm:$0xff]  ;;  %17019 = vst [vmem:[#allocation21_spill] sm:$0xff] %v13405_v57  ;;  %v17023_v57 = vld [vmem:[#allocation124_spill] sm:$0xff] }
 0x40a   : > { %v3472_v41 = vpop.f32.mrb[107].mxu1  ;;  %v8501_v63 = vpop.f32.mrb[153].mxu0  ;;  %v17016_v14 = vshll.u32 %v17014_v29, 16  ;;  %v4055_v5 = vrot.slane %v17023_v57, 4  ;;  %v17031_v57 = vld [vmem:[#allocation90_spill] sm:$0xff] }
 0x40b   : > { %v13392_v30 = vpop.f32.mrb[154].mxu0  ;;  %v17015_v41 = vshrl.u32 %v17014_v29, 16 }
 0x40c   : > { %4550 = vmatmul.mubr.bf16.gmra.mrb[212].mxu1 %v13384_v44  ;;  %v4059_v31 = vrot.slane %v17016_v14, 4  ;;  %v8502_v10 = vpop.f32.mrb[155].mxu0  ;;  %v4044_v44 = vor.u32 %v4043_v0, %v4042_v42  ;;  %v17025_v0 = vld [vmem:[#allocation57_spill] sm:$0xff] }
 0x40d   : > { %v4058_v63 = vrot.slane %v17015_v41, 3  ;;  %4557 = vmatprep.mubr.bf16.mxu1 %v13396_v8 }
 0x40e   : > { %8624 = vmatmul.mubr.bf16.gmra.mrb[4].mxu0 %v17020_v23  ;;  %v13417_v8 = vsel %vm3787_vm12, %v4032_v17, %v4044_v44  ;;  %v17024_v23 = vld [vmem:[#allocation51_spill] sm:$0xff] }
 0x40f   : > { %v13407_v47 = vpop.f32.mrb[108].mxu1  ;;  %v4060_v45 = vor.u32 %v4059_v31, %v4058_v63  ;;  %8627 = vmatprep.mubr.msk.bf16.mxu0 %vm16609_vm7, %v16608_v46  ;;  %17021 = vst [vmem:[#allocation129_spill] sm:$0xff] %v13417_v8  ;;  %v13423_v42 = vadd.f32 %v17025_v0, %v17024_v23  ;;  %v13438_v23 = vadd.f32 %v17032_v56, %v17031_v57  ;;  %v17036_v56 = vld [vmem:[#allocation130_spill] sm:$0xff] }
 0x410   : > { %v3477_v22 = vpop.f32.mrb[109].mxu1  ;;  %v4066_v57 = vrot.slane %v17036_v56, 3 }
 0x411   : > { %v13412_v41 = vpop.f32.mrb[110].mxu1  ;;  %v13414_v14 = vpop.f32.mrb[156].mxu0  ;;  %17026 = vst [vmem:[#allocation37_spill] sm:$0xff] %v13423_v42  ;;  %v13429_v63 = vsel %vm3787_vm12, %v4048_v20, %v4060_v45  ;;  %v17028_v22 = vld [vmem:[#allocation132_spill] sm:$0xff]  ;;  %17033 = vst [vmem:[#allocation126_spill] sm:$0xff] %v13438_v23  ;;  %v17034_v42 = vld [vmem:[#allocation151_spill] sm:$0xff] }
 0x412   : > { %v3480_v29 = vpop.f32.mrb[111].mxu1  ;;  %v8505_v10 = vpop.f32.mrb[157].mxu0  ;;  %17027 = vst [vmem:[#allocation55_spill] sm:$0xff] %v13429_v63  ;;  %v17030_v17 = vshll.u32 %v17028_v22, 16  ;;  %v17037_v23 = vld [vmem:[#allocation127_spill] sm:$0xff] }
 0x413   : > { %v13425_v31 = vpop.f32.mrb[158].mxu0  ;;  %v17029_v29 = vshrl.u32 %v17028_v22, 16  ;;  %v4067_v24 = vrot.slane %v17037_v23, 4  ;;  %v17045_v23 = vld [vmem:[#allocation92_spill] sm:$0xff] }
 0x414   : > { %4558 = vmatmul.mubr.bf16.gmra.mrb[216].mxu1 %v13417_v8  ;;  %v4071_v19 = vrot.slane %v17030_v17, 4  ;;  %v8506_v6 = vpop.f32.mrb[159].mxu0  ;;  %v4056_v8 = vor.u32 %v4055_v5, %v4054_v43  ;;  %v17038_v5 = vld [vmem:[#allocation91_spill] sm:$0xff] }
 0x415   : > { %v4070_v10 = vrot.slane %v17029_v29, 3  ;;  %4565 = vmatprep.mubr.bf16.mxu1 %v13429_v63  ;;  %v13456_v43 = vadd.f32 %v17038_v5, %v13041_v60  ;;  %v13471_v60 = vadd.f32 %v17046_v13, %v17045_v23  ;;  %v17050_v13 = vld [vmem:[#allocation133_spill] sm:$0xff] }
 0x416   : > { %8628 = vmatmul.mubr.bf16.gmra.mrb[8].mxu0 %v17034_v42  ;;  %v13450_v63 = vsel %vm3787_vm12, %v4044_v44, %v4056_v8  ;;  %v4078_v23 = vrot.slane %v17050_v13, 3 }
 0x417   : > { %v13440_v0 = vpop.f32.mrb[112].mxu1  ;;  %v4072_v26 = vor.u32 %v4071_v19, %v4070_v10  ;;  %8631 = vmatprep.mubr.msk.bf16.mxu0 %vm16609_vm7, %v16608_v46  ;;  %17035 = vst [vmem:[#allocation124_spill] sm:$0xff] %v13450_v63  ;;  %17039 = vst [vmem:[#allocation51_spill] sm:$0xff] %v13456_v43  ;;  %v17048_v43 = vld [vmem:[#allocation153_spill] sm:$0xff] }
 0x418   : > { %v3485_v20 = vpop.f32.mrb[113].mxu1  ;;  %17047 = vst [vmem:[#allocation90_spill] sm:$0xff] %v13471_v60  ;;  %v17051_v60 = vld [vmem:[#allocation131_spill] sm:$0xff] }
 0x419   : > { %v13445_v29 = vpop.f32.mrb[114].mxu1  ;;  %v13447_v17 = vpop.f32.mrb[160].mxu0  ;;  %v13462_v10 = vsel %vm3787_vm12, %v4060_v45, %v4072_v26  ;;  %v17042_v20 = vld [vmem:[#allocation135_spill] sm:$0xff] }
 0x41a   : > { %v3488_v22 = vpop.f32.mrb[115].mxu1  ;;  %v8509_v6 = vpop.f32.mrb[161].mxu0  ;;  %17041 = vst [vmem:[#allocation132_spill] sm:$0xff] %v13462_v10  ;;  %v17044_v44 = vshll.u32 %v17042_v20, 16 }
 0x41b   : > { %v13458_v19 = vpop.f32.mrb[162].mxu0  ;;  %v17043_v22 = vshrl.u32 %v17042_v20, 16 }
 0x41c   : > { %17040 = vst [vmem:[#allocation57_spill] sm:$0xff] %v13458_v19  ;;  %4566 = vmatmul.mubr.bf16.gmra.mrb[220].mxu1 %v13450_v63  ;;  %v4083_v42 = vrot.slane %v17044_v44, 4  ;;  %v8510_v56 = vpop.f32.mrb[163].mxu0  ;;  %v4068_v63 = vor.u32 %v4067_v24, %v4066_v57  ;;  %v4079_v19 = vrot.slane %v17051_v60, 4  ;;  %v17052_v24 = vld [vmem:[#allocation88_spill] sm:$0xff] }
 0x41d   : > { %v4082_v6 = vrot.slane %v17043_v22, 3  ;;  %4573 = vmatprep.mubr.bf16.mxu1 %v13462_v10  ;;  %v13489_v57 = vadd.f32 %v17052_v24, %v13097_v58  ;;  %v13504_v58 = vadd.f32 %v13068_v32, %v13102_v25  ;;  %v17060_v24 = vld [vmem:[#allocation154_spill] sm:$0xff]  ;;  %v17062_v32 = vld [vmem:[#allocation136_spill] sm:$0xff] }
 0x41e   : > { %8632 = vmatmul.mubr.bf16.gmra.mrb[12].mxu0 %v17048_v43  ;;  %v13483_v10 = vsel %vm3787_vm12, %v4056_v8, %v4068_v63  ;;  %v4090_v25 = vrot.slane %v17062_v32, 3 }
 0x41f   : > { %v13473_v5 = vpop.f32.mrb[116].mxu1  ;;  %v4084_v39 = vor.u32 %v4083_v42, %v4082_v6  ;;  %8635 = vmatprep.mubr.msk.bf16.mxu0 %vm16609_vm7, %v16608_v46  ;;  %17049 = vst [vmem:[#allocation42_spill] sm:$0xff] %v13483_v10  ;;  %17053 = vst [vmem:[#allocation130_spill] sm:$0xff] %v13489_v57 }
 0x420   : > { %v3493_v45 = vpop.f32.mrb[117].mxu1  ;;  %17059 = vst [vmem:[#allocation135_spill] sm:$0xff] %v13504_v58  ;;  %v17063_v58 = vld [vmem:[#allocation134_spill] sm:$0xff] }
 0x421   : > { %v13478_v22 = vpop.f32.mrb[118].mxu1  ;;  %v13480_v44 = vpop.f32.mrb[164].mxu0  ;;  %v13495_v6 = vsel %vm3787_vm12, %v4072_v26, %v4084_v39  ;;  %v17056_v45 = vld [vmem:[#allocation138_spill] sm:$0xff] }
 0x422   : > { %v3496_v20 = vpop.f32.mrb[119].mxu1  ;;  %v8513_v56 = vpop.f32.mrb[165].mxu0  ;;  %17055 = vst [vmem:[#allocation91_spill] sm:$0xff] %v13495_v6  ;;  %v17058_v8 = vshll.u32 %v17056_v45, 16 }
 0x423   : > { %v13491_v42 = vpop.f32.mrb[166].mxu0  ;;  %v17057_v20 = vshrl.u32 %v17056_v45, 16 }
 0x424   : > { %17054 = vst [vmem:[#allocation127_spill] sm:$0xff] %v13491_v42  ;;  %4574 = vmatmul.mubr.bf16.gmra.mrb[224].mxu1 %v13483_v10  ;;  %v4095_v43 = vrot.slane %v17058_v8, 4  ;;  %v8514_v13 = vpop.f32.mrb[167].mxu0  ;;  %v4080_v10 = vor.u32 %v4079_v19, %v4078_v23  ;;  %v4091_v42 = vrot.slane %v17063_v58, 4  ;;  %v13522_v19 = vadd.f32 %v13104_v38, %v13141_v53  ;;  %v17070_v58 = vld [vmem:[#allocation155_spill] sm:$0xff] }
 0x425   : > { %v4094_v56 = vrot.slane %v17057_v20, 3  ;;  %4581 = vmatprep.mubr.bf16.mxu1 %v13495_v6  ;;  %v13537_v38 = vadd.f32 %v13116_v54, %v13146_v35  ;;  %v17073_v54 = vld [vmem:[#allocation139_spill] sm:$0xff] }
 0x426   : > { %8636 = vmatmul.mubr.bf16.gmra.mrb[16].mxu0 %v17060_v24  ;;  %v13516_v6 = vsel %vm3787_vm12, %v4068_v63, %v4080_v10  ;;  %17064 = vst [vmem:[#allocation85_spill] sm:$0xff] %v13522_v19  ;;  %v4102_v35 = vrot.slane %v17073_v54, 3 }
 0x427   : > { %v13506_v60 = vpop.f32.mrb[120].mxu1  ;;  %v4096_v57 = vor.u32 %v4095_v43, %v4094_v56  ;;  %8639 = vmatprep.mubr.msk.bf16.mxu0 %vm16609_vm7, %v16608_v46  ;;  %17061 = vst [vmem:[#allocation92_spill] sm:$0xff] %v13516_v6  ;;  %v17066_v56 = vld [vmem:[#allocation141_spill] sm:$0xff]  ;;  %17069 = vst [vmem:[#allocation131_spill] sm:$0xff] %v13537_v38 }
 0x428   : > { %v3501_v26 = vpop.f32.mrb[121].mxu1  ;;  %v17068_v63 = vshll.u32 %v17066_v56, 16  ;;  %v17074_v38 = vld [vmem:[#allocation137_spill] sm:$0xff] }
 0x429   : > { %v13511_v20 = vpop.f32.mrb[122].mxu1  ;;  %v13513_v8 = vpop.f32.mrb[168].mxu0  ;;  %v13528_v23 = vsel %vm3787_vm12, %v4084_v39, %v4096_v57  ;;  %v17067_v26 = vshrl.u32 %v17066_v56, 16  ;;  %v4103_v19 = vrot.slane %v17074_v38, 4  ;;  %v17082_v38 = vld [vmem:[#allocation156_spill] sm:$0xff] }
 0x42a   : > { %v3504_v45 = vpop.f32.mrb[123].mxu1  ;;  %v8517_v13 = vpop.f32.mrb[169].mxu0  ;;  %17065 = vst [vmem:[#allocation133_spill] sm:$0xff] %v13528_v23 }
 0x42b   : > { %v13524_v43 = vpop.f32.mrb[170].mxu0  ;;  %v4106_v45 = vrot.slane %v17067_v26, 3  ;;  %v4107_v13 = vrot.slane %v17068_v63, 4 }
 0x42c   : > { %4582 = vmatmul.mubr.bf16.gmra.mrb[228].mxu1 %v13516_v6  ;;  %v8518_v32 = vpop.f32.mrb[171].mxu0  ;;  %v4092_v6 = vor.u32 %v4091_v42, %v4090_v25  ;;  %v13555_v42 = vadd.f32 %v13148_v50, %v13181_v2  ;;  %v13570_v50 = vadd.f32 %v13159_v15, %v13186_v51  ;;  %v17085_v51 = vld [vmem:[#allocation46_spill] sm:$0xff] }
 0x42d   : > { %4589 = vmatprep.mubr.bf16.mxu1 %v13528_v23  ;;  %v4108_v24 = vor.u32 %v4107_v13, %v4106_v45  ;;  %v17078_v13 = vld [vmem:[#allocation144_spill] sm:$0xff] }
 0x42e   : > { %8640 = vmatmul.mubr.bf16.gmra.mrb[20].mxu0 %v17070_v58  ;;  %v13549_v23 = vsel %vm3787_vm12, %v4080_v10, %v4092_v6  ;;  %17075 = vst [vmem:[#allocation136_spill] sm:$0xff] %v13555_v42  ;;  %v17080_v10 = vshll.u32 %v17078_v13, 16  ;;  %17081 = vst [vmem:[#allocation139_spill] sm:$0xff] %v13570_v50  ;;  %v4140_v50 = vshrl.u32 %v17085_v51, 16  ;;  %v4143_v42 = vshll.u32 %v17085_v51, 16 }
 0x42f   : > { %v13539_v53 = vpop.f32.mrb[124].mxu1  ;;  %8643 = vmatprep.mubr.msk.bf16.mxu0 %vm16609_vm7, %v16608_v46  ;;  %17072 = vst [vmem:[#allocation138_spill] sm:$0xff] %v13549_v23  ;;  %v13561_v45 = vsel %vm3787_vm12, %v4096_v57, %v4108_v24 }
 0x430   : > { %v3509_v39 = vpop.f32.mrb[125].mxu1  ;;  %17077 = vst [vmem:[#allocation141_spill] sm:$0xff] %v13561_v45 }
 0x431   : > { %v13544_v26 = vpop.f32.mrb[126].mxu1  ;;  %v13546_v63 = vpop.f32.mrb[172].mxu0  ;;  %v17079_v39 = vshrl.u32 %v17078_v13, 16  ;;  %v17083_v13 = vld [vmem:[#allocation147_spill] sm:$0xff] }
 0x432   : > { %v3512_v56 = vpop.f32.mrb[127].mxu1  ;;  %17071 = vst [vmem:[#allocation88_spill] sm:$0xff] %v13546_v63  ;;  %v8521_v32 = vpop.f32.mrb[173].mxu0 }
 0x433   : > { %v13557_v25 = vpop.f32.mrb[174].mxu0  ;;  %v4118_v56 = vrot.slane %v17079_v39, 3  ;;  %v4119_v32 = vrot.slane %v17080_v10, 4  ;;  %v4131_v39 = vshrl.u32 %v17083_v13, 16  ;;  %v4134_v10 = vshll.u32 %v17083_v13, 16 }
 0x434   : > { %17076 = vst [vmem:[#allocation134_spill] sm:$0xff] %v13557_v25  ;;  %4590 = vmatmul.mubr.bf16.gmra.mrb[232].mxu1 %v13549_v23  ;;  %v8522_v54 = vpop.f32.mrb[175].mxu0  ;;  %v4104_v23 = vor.u32 %v4103_v19, %v4102_v35  ;;  %v17087_v35 = vld [vmem:[#allocation142_spill] sm:$0xff]  ;;  %v13592_v25 = vadd.f32 %v13188_v16, %v13221_v52  ;;  %v17091_v52 = vld [vmem:[#allocation157_spill] sm:$0xff] }
 0x435   : > { %4597 = vmatprep.mubr.bf16.mxu1 %v13561_v45  ;;  %v13575_v58 = vor.u32 %v4119_v32, %v4118_v56  ;;  %v4114_v56 = vrot.slane %v17087_v35, 3  ;;  %v17088_v32 = vld [vmem:[#allocation140_spill] sm:$0xff]  ;;  %v4133_v51 = vrot.slane %v4131_v39, 3  ;;  %v4142_v35 = vrot.slane %v4140_v50, 3  ;;  %v17092_v50 = vld [vmem:[#allocation145_spill] sm:$0xff] }
 0x436   : > { %8644 = vmatmul.mubr.bf16.gmra.mrb[24].mxu0 %v17082_v38  ;;  %v13586_v19 = vsel %vm3787_vm12, %v4092_v6, %v4104_v23  ;;  %17089 = vst [vmem:[#allocation147_spill] sm:$0xff] %v13592_v25  ;;  %v13602_v6 = vadd.f32 %v13199_v40, %v13226_v61 }
 0x437   : > { %v13572_v2 = vpop.f32.mrb[128].mxu1  ;;  %8647 = vmatprep.mubr.msk.bf16.mxu0 %vm16609_vm7, %v16608_v46  ;;  %17086 = vst [vmem:[#allocation144_spill] sm:$0xff] %v13586_v19 }
 0x438   : > { %v3517_v57 = vpop.f32.mrb[129].mxu1 }
 0x439   : > { %v13581_v54 = vpop.f32.mrb[130].mxu1  ;;  %v3772_v15 = vpop.f32.mrb[176].mxu0  ;;  %v4115_v57 = vrot.slane %v17088_v32, 4  ;;  %v4145_v32 = vrot.slane %v4143_v42, 4 }
 0x43a   : > { %17084 = vst [vmem:[#allocation137_spill] sm:$0xff] %v13581_v54  ;;  %v3520_v45 = vpop.f32.mrb[131].mxu1  ;;  %v8525_v38 = vpop.f32.mrb[177].mxu0 }
 0x43b   : > { %v3775_v13 = vpop.f32.mrb[178].mxu0  ;;  %v13597_v45 = vsel %vm3787_vm12, %v4108_v24, %v13575_v58  ;;  %v4136_v38 = vrot.slane %v4134_v10, 4  ;;  %v4116_v25 = vor.u32 %v4115_v57, %v4114_v56  ;;  %v4146_v40 = vor.u32 %v4145_v32, %v4142_v35  ;;  %v17093_v56 = vld [vmem:[#allocation143_spill] sm:$0xff] }
 0x43c   : > { %4598 = vmatmul.mubr.bf16.gmra.mrb[236].mxu1 %v13586_v19  ;;  %17090 = vst [vmem:[#allocation46_spill] sm:$0xff] %v13597_v45  ;;  %v8526_v54 = vpop.f32.mrb[179].mxu0 }
 0x43d   : > { %4605 = vmatprep.mubr.bf16.mxu1 %v13597_v45  ;;  %v4137_v24 = vor.u32 %v4136_v38, %v4133_v51  ;;  %v13612_v42 = vsel %vm3787_vm12, %v4104_v23, %v4116_v25  ;;  %v13625_v23 = vadd.f32 %v13239_v11, %v13266_v62  ;;  %v17094_v38 = vld [vmem:[#allocation122_spill] sm:$0xff] }
 0x43e   : > { %8648 = vmatmul.mubr.bf16.gmra.mrb[28].mxu0 %v17091_v52  ;;  %v4126_v52 = vrot.slane %v17092_v50, 3  ;;  %v4147_v35 = vsel %vm3787_vm12, %v17094_v38, %v4146_v40  ;;  %v17095_v50 = vld [vmem:[#allocation81_spill] sm:$0xff] }
 0x43f   : > { %v3523_v16 = vpop.f32.mrb[132].mxu1  ;;  %8651 = vmatprep.mubr.msk.bf16.mxu0 %vm16609_vm7, %v16608_v46  ;;  %v17098_v38 = vld [vmem:[#allocation93_spill] sm:$0xff] }
 0x440   : > { %v13605_v19 = vadd.f32 %v3772_v15, %v3523_v16  ;;  %v3525_v63 = vpop.f32.mrb[133].mxu1  ;;  %v4127_v15 = vrot.slane %v17093_v56, 4  ;;  %v13649_v56 = vadd.f32 %v13279_v33, %v13306_v1  ;;  %v13660_v33 = vadd.f32 %v13308_v3, %v13337_v49 }
 0x441   : > { %v3526_v39 = vpop.f32.mrb[134].mxu1  ;;  %v3780_v45 = vpop.f32.mrb[180].mxu0  ;;  %v13618_v63 = vadd.f32 %v13228_v59, %v13261_v9 }
 0x442   : > { %v13609_v10 = vadd.f32 %v3775_v13, %v3526_v39  ;;  %v3528_v54 = vpop.f32.mrb[135].mxu1  ;;  %v8529_v61 = vpop.f32.mrb[181].mxu0  ;;  %v4138_v13 = vsel %vm3787_vm12, %v13575_v58, %v4137_v24  ;;  %v13629_v16 = vor.u32 %v4127_v15, %v4126_v52  ;;  %v13643_v52 = vadd.f32 %v13268_v37, %v13301_v21 }
 0x443   : > { %v3783_v57 = vpop.f32.mrb[182].mxu0 }
 0x444   : > { %4606 = vmatmul.mubr.bf16.gmra.mrb[240].mxu1 %v13612_v42  ;;  %v8530_v51 = vpop.f32.mrb[183].mxu0  ;;  %v13639_v62 = vsel %vm3787_vm12, %v4116_v25, %v13629_v16 }
 0x445   : > { %4613 = vmatprep.mubr.bf16.mxu1 %v4138_v13  ;;  %v17097_v13 = vld [vmem:[#allocation89_spill] sm:$0xff] }
 0x446   : > { %8652 = vmatmul.mubr.bf16.gmra.mrb[32].mxu0 %v4147_v35 }
 0x447   : > { %v3531_v32 = vpop.f32.mrb[136].mxu1  ;;  %8671 = vmatprep.mubr.msk.bf16.mxu0 %vm16609_vm7, %v16608_v46 }
 0x448   : > { %v13631_v59 = vadd.f32 %v3780_v45, %v3531_v32  ;;  %v3533_v9 = vpop.f32.mrb[137].mxu1 }
 0x449   : > { %v3534_v24 = vpop.f32.mrb[138].mxu1  ;;  %v4656_v61 = vpop.f32.mrb[184].mxu0 }
 0x44a   : > { %v13635_v39 = vadd.f32 %v3783_v57, %v3534_v24  ;;  %v3536_v54 = vpop.f32.mrb[139].mxu1  ;;  %v8549_v11 = vpop.f32.mrb[185].mxu0  ;;  %v17096_v57 = vld [vmem:[#allocation16_spill] sm:$0xff] }
 0x44b   : > { %v4659_v45 = vpop.f32.mrb[186].mxu0  ;;  %v17099_v11 = vld [vmem:[#allocation64_spill] sm:$0xff] }
 0x44c   : > { %4614 = vmatmul.mubr.bf16.gmra.mrb[244].mxu1 %v13639_v62  ;;  %v8550_v40 = vpop.f32.mrb[187].mxu0 }
 0x44d   : > { %5153 = vmatprep.mubr.bf16.mxu1 %v17095_v50  ;;  %v17100_v50 = vld [vmem:[#allocation80_spill] sm:$0xff] }
 0x44e   : > { %8672 = vmatmul.mubr.bf16.vlgmr.msra.gmra.mrb[36].mxu0 %v17096_v57  ;;  %v17101_v57 = vld [vmem:[#allocation79_spill] sm:$0xff] }
 0x44f   : > { %v4407_v15 = vpop.f32.mrb[140].mxu1  ;;  %8675 = vmatprep.mubr.msk.bf16.mxu0 %vm16609_vm7, %v16608_v46 }
 0x450   : > { %v4408_v25 = vadd.f32 %v4407_v15, %v17097_v13  ;;  %v4409_v51 = vpop.f32.mrb[141].mxu1  ;;  %v17102_v13 = vld [vmem:[#allocation102_spill] sm:$0xff] }
 0x451   : > { %v4410_v37 = vpop.f32.mrb[142].mxu1  ;;  %v4664_v9 = vpop.f32.mrb[188].mxu0 }
 0x452   : > { %v13655_v21 = vadd.f32 %v4656_v61, %v4408_v25  ;;  %v4411_v35 = vadd.f32 %v4410_v37, %v17098_v38  ;;  %v4412_v32 = vpop.f32.mrb[143].mxu1  ;;  %v8553_v24 = vpop.f32.mrb[189].mxu0  ;;  %v13668_v61 = vadd.f32 %v13319_v55, %v13342_v27  ;;  %v13679_v55 = vadd.f32 %v13344_v34, %v13374_v48 }
 0x453   : > { %v4667_v54 = vpop.f32.mrb[190].mxu0 }
 0x454   : > { %v13662_v1 = vadd.f32 %v4659_v45, %v4411_v35  ;;  %5154 = vmatmul.mubr.bf16.vlgmr.msra.gmra.mrb[248].mxu1 %v17099_v11  ;;  %v8554_v40 = vpop.f32.mrb[191].mxu0  ;;  %v17103_v45 = vld [vmem:[#allocation110_spill] sm:$0xff] }
 0x455   : > { %5161 = vmatprep.mubr.bf16.mxu1 %v17100_v50  ;;  %v17104_v11 = vld [vmem:[#allocation66_spill] sm:$0xff]  ;;  %v17105_v50 = vld [vmem:[#allocation59_spill] sm:$0xff] }
 0x456   : > { %8676 = vmatmul.mubr.bf16.gmra.mrb[40].mxu0 %v17101_v57  ;;  %v17106_v57 = vld [vmem:[#allocation25_spill] sm:$0xff] }
 0x457   : > { %v4415_v15 = vpop.f32.mrb[144].mxu1  ;;  %8679 = vmatprep.mubr.msk.bf16.mxu0 %vm16609_vm7, %v16608_v46 }
 0x458   : > { %v4416_v25 = vadd.f32 %v4415_v15, %v17102_v13  ;;  %v4417_v51 = vpop.f32.mrb[145].mxu1 }
 0x459   : > { %v4418_v3 = vpop.f32.mrb[146].mxu1  ;;  %v4672_v35 = vpop.f32.mrb[192].mxu0 }
 0x45a   : > { %v13674_v49 = vadd.f32 %v4664_v9, %v4416_v25  ;;  %v4419_v37 = vadd.f32 %v4418_v3, %v17103_v45  ;;  %v4420_v38 = vpop.f32.mrb[147].mxu1  ;;  %v8557_v32 = vpop.f32.mrb[193].mxu0  ;;  %v13687_v9 = vadd.f32 %v13355_v28, %v13379_v4  ;;  %v13698_v28 = vadd.f32 %v13381_v18, %v13407_v47 }
 0x45b   : > { %v4675_v24 = vpop.f32.mrb[194].mxu0 }
 0x45c   : > { %v13681_v27 = vadd.f32 %v4667_v54, %v4419_v37  ;;  %5162 = vmatmul.mubr.bf16.gmra.mrb[252].mxu1 %v17104_v11  ;;  %v8558_v40 = vpop.f32.mrb[195].mxu0  ;;  %v17107_v54 = vld [vmem:[#allocation113_spill] sm:$0xff]  ;;  %v17109_v11 = vld [vmem:[#allocation82_spill] sm:$0xff] }
 0x45d   : > { %5169 = vmatprep.mubr.bf16.mxu1 %v17105_v50  ;;  %v17110_v50 = vld [vmem:[#allocation62_spill] sm:$0xff] }
 0x45e   : > { %8680 = vmatmul.mubr.bf16.gmra.mrb[44].mxu0 %v17106_v57 }
 0x45f   : > { %v4423_v15 = vpop.f32.mrb[148].mxu1  ;;  %8683 = vmatprep.mubr.msk.bf16.mxu0 %vm16609_vm7, %v16608_v46 }
 0x460   : > { %v4424_v13 = vadd.f32 %v4423_v15, %v13157_v12  ;;  %v4425_v25 = vpop.f32.mrb[149].mxu1  ;;  %v17108_v12 = vld [vmem:[#allocation23_spill] sm:$0xff] }
 0x461   : > { %v4426_v34 = vpop.f32.mrb[150].mxu1  ;;  %v4680_v45 = vpop.f32.mrb[196].mxu0 }
 0x462   : > { %v13693_v48 = vadd.f32 %v4672_v35, %v4424_v13  ;;  %v4427_v51 = vadd.f32 %v4426_v34, %v17107_v54  ;;  %v4428_v3 = vpop.f32.mrb[151].mxu1  ;;  %v8561_v37 = vpop.f32.mrb[197].mxu0  ;;  %v13706_v35 = vadd.f32 %v13392_v30, %v13412_v41  ;;  %v13717_v30 = vadd.f32 %v13414_v14, %v13440_v0 }
 0x463   : > { %v4683_v38 = vpop.f32.mrb[198].mxu0  ;;  %v17113_v37 = vld [vmem:[#allocation32_spill] sm:$0xff] }
 0x464   : > { %v13700_v4 = vadd.f32 %v4675_v24, %v4427_v51  ;;  %5170 = vmatmul.mubr.bf16.gmra.mrb[0].mxu1 %v17108_v12  ;;  %v8562_v32 = vpop.f32.mrb[199].mxu0  ;;  %v17111_v24 = vld [vmem:[#allocation115_spill] sm:$0xff] }
 0x465   : > { %5177 = vmatprep.mubr.bf16.mxu1 %v17109_v11  ;;  %v17114_v32 = vld [vmem:[#allocation83_spill] sm:$0xff] }
 0x466   : > { %8684 = vmatmul.mubr.bf16.gmra.mrb[48].mxu0 %v17110_v50 }
 0x467   : > { %v4431_v40 = vpop.f32.mrb[152].mxu1  ;;  %8687 = vmatprep.mubr.msk.bf16.mxu0 %vm16609_vm7, %v16608_v46 }
 0x468   : > { %v4432_v15 = vadd.f32 %v4431_v40, %v13197_v7  ;;  %v4433_v57 = vpop.f32.mrb[153].mxu1  ;;  %v17112_v7 = vld [vmem:[#allocation30_spill] sm:$0xff] }
 0x469   : > { %v4434_v18 = vpop.f32.mrb[154].mxu1  ;;  %v4688_v34 = vpop.f32.mrb[200].mxu0 }
 0x46a   : > { %v13712_v47 = vadd.f32 %v4680_v45, %v4432_v15  ;;  %v4435_v13 = vadd.f32 %v4434_v18, %v17111_v24  ;;  %v4436_v25 = vpop.f32.mrb[155].mxu1  ;;  %v8565_v54 = vpop.f32.mrb[201].mxu0  ;;  %v13725_v45 = vadd.f32 %v13425_v31, %v13445_v29  ;;  %v13736_v31 = vadd.f32 %v13447_v17, %v13473_v5 }
 0x46b   : > { %v4691_v51 = vpop.f32.mrb[202].mxu0  ;;  %v17117_v25 = vld [vmem:[#allocation84_spill] sm:$0xff] }
 0x46c   : > { %v13719_v41 = vadd.f32 %v4683_v38, %v4435_v13  ;;  %5178 = vmatmul.mubr.bf16.gmra.mrb[4].mxu1 %v17112_v7  ;;  %v8566_v3 = vpop.f32.mrb[203].mxu0  ;;  %v17115_v38 = vld [vmem:[#allocation105_spill] sm:$0xff] }
 0x46d   : > { %5185 = vmatprep.mubr.bf16.mxu1 %v17113_v37  ;;  %v17119_v3 = vld [vmem:[#allocation28_spill] sm:$0xff]  ;;  %v17120_v37 = vld [vmem:[#allocation109_spill] sm:$0xff] }
 0x46e   : > { %8688 = vmatmul.mubr.bf16.gmra.mrb[52].mxu0 %v17114_v32 }
 0x46f   : > { %v4439_v12 = vpop.f32.mrb[156].mxu1  ;;  %8691 = vmatprep.mubr.msk.bf16.mxu0 %vm16609_vm7, %v16608_v46 }
 0x470   : > { %v4440_v11 = vadd.f32 %v4439_v12, %v13237_v36  ;;  %v4441_v40 = vpop.f32.mrb[157].mxu1  ;;  %v17116_v36 = vld [vmem:[#allocation48_spill] sm:$0xff] }
 0x471   : > { %v4442_v14 = vpop.f32.mrb[158].mxu1  ;;  %v4696_v57 = vpop.f32.mrb[204].mxu0 }
 0x472   : > { %v13731_v0 = vadd.f32 %v4688_v34, %v4440_v11  ;;  %v4443_v50 = vadd.f32 %v4442_v14, %v17115_v38  ;;  %v4444_v15 = vpop.f32.mrb[159].mxu1  ;;  %v8569_v18 = vpop.f32.mrb[205].mxu0  ;;  %v17118_v34 = vld [vmem:[#allocation57_spill] sm:$0xff] }
 0x473   : > { %v4699_v24 = vpop.f32.mrb[206].mxu0  ;;  %v13744_v54 = vadd.f32 %v17118_v34, %v13478_v22  ;;  %v13755_v22 = vadd.f32 %v13480_v44, %v13506_v60  ;;  %v17122_v18 = vld [vmem:[#allocation35_spill] sm:$0xff] }
 0x474   : > { %v13738_v29 = vadd.f32 %v4691_v51, %v4443_v50  ;;  %5186 = vmatmul.mubr.bf16.gmra.mrb[8].mxu1 %v17116_v36  ;;  %v8570_v13 = vpop.f32.mrb[207].mxu0  ;;  %v17121_v51 = vld [vmem:[#allocation120_spill] sm:$0xff] }
 0x475   : > { %5193 = vmatprep.mubr.bf16.mxu1 %v17117_v25  ;;  %v17123_v13 = vld [vmem:[#allocation86_spill] sm:$0xff] }
 0x476   : > { %8692 = vmatmul.mubr.bf16.gmra.mrb[56].mxu0 %v17119_v3  ;;  %v17126_v3 = vld [vmem:[#allocation119_spill] sm:$0xff] }
 0x477   : > { %v4447_v7 = vpop.f32.mrb[160].mxu1  ;;  %8695 = vmatprep.mubr.msk.bf16.mxu0 %vm16609_vm7, %v16608_v46 }
 0x478   : > { %v4448_v12 = vadd.f32 %v4447_v7, %v17120_v37  ;;  %v4449_v32 = vpop.f32.mrb[161].mxu1  ;;  %v17125_v7 = vld [vmem:[#allocation39_spill] sm:$0xff] }
 0x479   : > { %v4450_v17 = vpop.f32.mrb[162].mxu1  ;;  %v4704_v14 = vpop.f32.mrb[208].mxu0 }
 0x47a   : > { %v13750_v5 = vadd.f32 %v4696_v57, %v4448_v12  ;;  %v4451_v11 = vadd.f32 %v4450_v17, %v17121_v51  ;;  %v4452_v40 = vpop.f32.mrb[163].mxu1  ;;  %v8573_v38 = vpop.f32.mrb[209].mxu0  ;;  %v17124_v57 = vld [vmem:[#allocation127_spill] sm:$0xff] }
 0x47b   : > { %v4707_v15 = vpop.f32.mrb[210].mxu0  ;;  %v13763_v25 = vadd.f32 %v17124_v57, %v13511_v20  ;;  %v13774_v20 = vadd.f32 %v13513_v8, %v13539_v53 }
 0x47c   : > { %v13757_v50 = vadd.f32 %v4699_v24, %v4451_v11  ;;  %5194 = vmatmul.mubr.bf16.gmra.mrb[12].mxu1 %v17122_v18  ;;  %v8574_v36 = vpop.f32.mrb[211].mxu0  ;;  %v17127_v24 = vld [vmem:[#allocation123_spill] sm:$0xff] }
 0x47d   : > { %5201 = vmatprep.mubr.bf16.mxu1 %v17123_v13  ;;  %v17128_v18 = vld [vmem:[#allocation87_spill] sm:$0xff] }
 0x47e   : > { %8696 = vmatmul.mubr.bf16.gmra.mrb[60].mxu0 %v17125_v7  ;;  %v17129_v13 = vld [vmem:[#allocation95_spill] sm:$0xff]  ;;  %v17131_v7 = vld [vmem:[#allocation166_spill] sm:$0xff] }
 0x47f   : > { %v4455_v34 = vpop.f32.mrb[164].mxu1  ;;  %8699 = vmatprep.mubr.msk.bf16.mxu0 %vm16609_vm7, %v16608_v46 }
 0x480   : > { %v4456_v37 = vadd.f32 %v4455_v34, %v17126_v3  ;;  %v4457_v12 = vpop.f32.mrb[165].mxu1  ;;  %v17130_v34 = vld [vmem:[#allocation97_spill] sm:$0xff] }
 0x481   : > { %v4458_v44 = vpop.f32.mrb[166].mxu1  ;;  %v4712_v51 = vpop.f32.mrb[212].mxu0 }
 0x482   : > { %v13769_v60 = vadd.f32 %v4704_v14, %v4456_v37  ;;  %v4459_v32 = vadd.f32 %v4458_v44, %v17127_v24  ;;  %v4460_v17 = vpop.f32.mrb[167].mxu1  ;;  %v8577_v11 = vpop.f32.mrb[213].mxu0  ;;  %v13782_v14 = vadd.f32 %v13524_v43, %v13544_v26  ;;  %v17133_v43 = vld [vmem:[#allocation88_spill] sm:$0xff] }
 0x483   : > { %v4715_v38 = vpop.f32.mrb[214].mxu0  ;;  %v13793_v26 = vadd.f32 %v17133_v43, %v13572_v2 }
 0x484   : > { %v13776_v40 = vadd.f32 %v4707_v15, %v4459_v32  ;;  %5202 = vmatmul.mubr.bf16.gmra.mrb[16].mxu1 %v17128_v18  ;;  %v8578_v36 = vpop.f32.mrb[215].mxu0  ;;  %v17132_v15 = vld [vmem:[#allocation168_spill] sm:$0xff]  ;;  %v17135_v18 = vld [vmem:[#allocation101_spill] sm:$0xff] }
 0x485   : > { %5209 = vmatprep.mubr.bf16.mxu1 %v17129_v13  ;;  %v17136_v13 = vld [vmem:[#allocation98_spill] sm:$0xff] }
 0x486   : > { %8700 = vmatmul.mubr.bf16.gmra.mrb[64].mxu0 %v17130_v34 }
 0x487   : > { %v4463_v57 = vpop.f32.mrb[168].mxu1  ;;  %8703 = vmatprep.mubr.msk.bf16.mxu0 %vm16609_vm7, %v16608_v46 }
 0x488   : > { %v4464_v3 = vadd.f32 %v4463_v57, %v17131_v7  ;;  %v4465_v37 = vpop.f32.mrb[169].mxu1  ;;  %v17137_v57 = vld [vmem:[#allocation137_spill] sm:$0xff] }
 0x489   : > { %v4466_v8 = vpop.f32.mrb[170].mxu1  ;;  %v4720_v24 = vpop.f32.mrb[216].mxu0  ;;  %v17140_v37 = vld [vmem:[#allocation121_spill] sm:$0xff] }
 0x48a   : > { %v13788_v53 = vadd.f32 %v4712_v51, %v4464_v3  ;;  %v4467_v12 = vadd.f32 %v4466_v8, %v17132_v15  ;;  %v4468_v44 = vpop.f32.mrb[171].mxu1  ;;  %v8581_v32 = vpop.f32.mrb[217].mxu0  ;;  %v17138_v51 = vld [vmem:[#allocation134_spill] sm:$0xff] }
 0x48b   : > { %v4723_v11 = vpop.f32.mrb[218].mxu0  ;;  %v13801_v34 = vadd.f32 %v17138_v51, %v17137_v57  ;;  %v17139_v3 = vld [vmem:[#allocation106_spill] sm:$0xff] }
 0x48c   : > { %v13795_v17 = vadd.f32 %v4715_v38, %v4467_v12  ;;  %5210 = vmatmul.mubr.bf16.gmra.mrb[20].mxu1 %v17135_v18  ;;  %v8582_v36 = vpop.f32.mrb[219].mxu0  ;;  %v17142_v12 = vld [vmem:[#allocation21_spill] sm:$0xff]  ;;  %v17144_v57 = vld [vmem:[#allocation94_spill] sm:$0xff] }
 0x48d   : > { %5217 = vmatprep.mubr.bf16.mxu1 %v17136_v13 }
 0x48e   : > { %17134 = vst [vmem:[#allocation142_spill] sm:$0xff] %v13795_v17  ;;  %8704 = vmatmul.mubr.bf16.gmra.mrb[68].mxu0 %v17139_v3  ;;  %v17145_v3 = vld [vmem:[#allocation99_spill] sm:$0xff] }
 0x48f   : > { %v4471_v7 = vpop.f32.mrb[172].mxu1  ;;  %8707 = vmatprep.mubr.msk.bf16.mxu0 %vm16609_vm7, %v16608_v46 }
 0x490   : > { %v4472_v8 = vadd.f32 %v4471_v7, %v17140_v37  ;;  %v4473_v15 = vpop.f32.mrb[173].mxu1  ;;  %v17146_v37 = vld [vmem:[#allocation96_spill] sm:$0xff] }
 0x491   : > { %v4474_v2 = vpop.f32.mrb[174].mxu1  ;;  %v4728_v43 = vpop.f32.mrb[220].mxu0  ;;  %v17147_v15 = vld [vmem:[#allocation37_spill] sm:$0xff] }
 0x492   : > { %v13807_v38 = vadd.f32 %v4720_v24, %v4472_v8  ;;  %v4475_v44 = vadd.f32 %v4474_v2, %v17142_v12  ;;  %v4476_v32 = vpop.f32.mrb[175].mxu1  ;;  %v8585_v18 = vpop.f32.mrb[221].mxu0 }
 0x493   : > { %v4731_v13 = vpop.f32.mrb[222].mxu0 }
 0x494   : > { %17141 = vst [vmem:[#allocation140_spill] sm:$0xff] %v13807_v38  ;;  %v13810_v36 = vadd.f32 %v4723_v11, %v4475_v44  ;;  %5218 = vmatmul.mubr.bf16.gmra.mrb[24].mxu1 %v17144_v57  ;;  %v8586_v51 = vpop.f32.mrb[223].mxu0  ;;  %v17149_v11 = vld [vmem:[#allocation126_spill] sm:$0xff] }
 0x495   : > { %5225 = vmatprep.mubr.bf16.mxu1 %v17145_v3  ;;  %v17151_v3 = vld [vmem:[#allocation107_spill] sm:$0xff] }
 0x496   : > { %17143 = vst [vmem:[#allocation145_spill] sm:$0xff] %v13810_v36  ;;  %8708 = vmatmul.mubr.bf16.gmra.mrb[72].mxu0 %v17146_v37  ;;  %v17152_v36 = vld [vmem:[#allocation103_spill] sm:$0xff] }
 0x497   : > { %v4479_v7 = vpop.f32.mrb[176].mxu1  ;;  %8711 = vmatprep.mubr.msk.bf16.mxu0 %vm16609_vm7, %v16608_v46 }
 0x498   : > { %v4480_v17 = vadd.f32 %v4479_v7, %v17147_v15  ;;  %v4481_v24 = vpop.f32.mrb[177].mxu1  ;;  %v17153_v15 = vld [vmem:[#allocation100_spill] sm:$0xff] }
 0x499   : > { %v4482_v8 = vpop.f32.mrb[178].mxu1  ;;  %v4736_v32 = vpop.f32.mrb[224].mxu0  ;;  %v17154_v24 = vld [vmem:[#allocation51_spill] sm:$0xff] }
 0x49a   : > { %v13818_v2 = vadd.f32 %v4728_v43, %v4480_v17  ;;  %v4483_v12 = vadd.f32 %v4482_v8, %v17149_v11  ;;  %v4484_v44 = vpop.f32.mrb[179].mxu1  ;;  %v8589_v18 = vpop.f32.mrb[225].mxu0 }
 0x49b   : > { %v4739_v51 = vpop.f32.mrb[226].mxu0 }
 0x49c   : > { %17148 = vst [vmem:[#allocation143_spill] sm:$0xff] %v13818_v2  ;;  %v13821_v57 = vadd.f32 %v4731_v13, %v4483_v12  ;;  %5226 = vmatmul.mubr.bf16.gmra.mrb[28].mxu1 %v17151_v3  ;;  %v8590_v37 = vpop.f32.mrb[227].mxu0  ;;  %v17156_v13 = vld [vmem:[#allocation90_spill] sm:$0xff] }
 0x49d   : > { %5233 = vmatprep.mubr.bf16.mxu1 %v17152_v36  ;;  %v17158_v37 = vld [vmem:[#allocation111_spill] sm:$0xff] }
 0x49e   : > { %17150 = vst [vmem:[#allocation122_spill] sm:$0xff] %v13821_v57  ;;  %8712 = vmatmul.mubr.bf16.gmra.mrb[76].mxu0 %v17153_v15  ;;  %v17159_v57 = vld [vmem:[#allocation108_spill] sm:$0xff] }
 0x49f   : > { %v4487_v7 = vpop.f32.mrb[180].mxu1  ;;  %8715 = vmatprep.mubr.msk.bf16.mxu0 %vm16609_vm7, %v16608_v46 }
 0x4a0   : > { %v4488_v38 = vadd.f32 %v4487_v7, %v17154_v24  ;;  %v4489_v17 = vpop.f32.mrb[181].mxu1  ;;  %v17160_v24 = vld [vmem:[#allocation104_spill] sm:$0xff] }
 0x4a1   : > { %v4490_v43 = vpop.f32.mrb[182].mxu1  ;;  %v4744_v44 = vpop.f32.mrb[228].mxu0  ;;  %v17161_v17 = vld [vmem:[#allocation130_spill] sm:$0xff] }
 0x4a2   : > { %v13829_v8 = vadd.f32 %v4736_v32, %v4488_v38  ;;  %v4491_v11 = vadd.f32 %v4490_v43, %v17156_v13  ;;  %v4492_v12 = vpop.f32.mrb[183].mxu1  ;;  %v8593_v18 = vpop.f32.mrb[229].mxu0 }
 0x4a3   : > { %v4747_v36 = vpop.f32.mrb[230].mxu0 }
 0x4a4   : > { %17155 = vst [vmem:[#allocation81_spill] sm:$0xff] %v13829_v8  ;;  %v13832_v3 = vadd.f32 %v4739_v51, %v4491_v11  ;;  %5234 = vmatmul.mubr.bf16.gmra.mrb[32].mxu1 %v17158_v37  ;;  %v8594_v15 = vpop.f32.mrb[231].mxu0  ;;  %v17163_v51 = vld [vmem:[#allocation135_spill] sm:$0xff] }
 0x4a5   : > { %5241 = vmatprep.mubr.bf16.mxu1 %v17159_v57  ;;  %v17165_v15 = vld [vmem:[#allocation112_spill] sm:$0xff] }
 0x4a6   : > { %17157 = vst [vmem:[#allocation16_spill] sm:$0xff] %v13832_v3  ;;  %8716 = vmatmul.mubr.bf16.gmra.mrb[80].mxu0 %v17160_v24  ;;  %v17166_v3 = vld [vmem:[#allocation117_spill] sm:$0xff] }
 0x4a7   : > { %v4495_v7 = vpop.f32.mrb[184].mxu1  ;;  %8719 = vmatprep.mubr.msk.bf16.mxu0 %vm16609_vm7, %v16608_v46 }
 0x4a8   : > { %v4496_v2 = vadd.f32 %v4495_v7, %v17161_v17  ;;  %v4497_v38 = vpop.f32.mrb[185].mxu1  ;;  %v17167_v17 = vld [vmem:[#allocation114_spill] sm:$0xff] }
 0x4a9   : > { %v4498_v32 = vpop.f32.mrb[186].mxu1  ;;  %v4752_v12 = vpop.f32.mrb[232].mxu0  ;;  %v17168_v38 = vld [vmem:[#allocation85_spill] sm:$0xff] }
 0x4aa   : > { %v13840_v43 = vadd.f32 %v4744_v44, %v4496_v2  ;;  %v4499_v13 = vadd.f32 %v4498_v32, %v17163_v51  ;;  %v4500_v11 = vpop.f32.mrb[187].mxu1  ;;  %v8597_v18 = vpop.f32.mrb[233].mxu0 }
 0x4ab   : > { %v4755_v57 = vpop.f32.mrb[234].mxu0 }
 0x4ac   : > { %17162 = vst [vmem:[#allocation89_spill] sm:$0xff] %v13840_v43  ;;  %v13843_v37 = vadd.f32 %v4747_v36, %v4499_v13  ;;  %5242 = vmatmul.mubr.bf16.gmra.mrb[36].mxu1 %v17165_v15  ;;  %v8598_v24 = vpop.f32.mrb[235].mxu0  ;;  %v17170_v36 = vld [vmem:[#allocation131_spill] sm:$0xff] }
 0x4ad   : > { %5249 = vmatprep.mubr.bf16.mxu1 %v17166_v3  ;;  %v17172_v24 = vld [vmem:[#allocation118_spill] sm:$0xff] }
 0x4ae   : > { %17164 = vst [vmem:[#allocation93_spill] sm:$0xff] %v13843_v37  ;;  %8720 = vmatmul.mubr.bf16.gmra.mrb[84].mxu0 %v17167_v17  ;;  %v17173_v37 = vld [vmem:[#allocation116_spill] sm:$0xff] }
 0x4af   : > { %v4503_v7 = vpop.f32.mrb[188].mxu1  ;;  %8723 = vmatprep.mubr.msk.bf16.mxu0 %vm16609_vm7, %v16608_v46 }
 0x4b0   : > { %v4504_v8 = vadd.f32 %v4503_v7, %v17168_v38  ;;  %v4505_v2 = vpop.f32.mrb[189].mxu1  ;;  %v17174_v38 = vld [vmem:[#allocation161_spill] sm:$0xff] }
 0x4b1   : > { %v4506_v44 = vpop.f32.mrb[190].mxu1  ;;  %v4760_v11 = vpop.f32.mrb[236].mxu0  ;;  %v17175_v2 = vld [vmem:[#allocation136_spill] sm:$0xff] }
 0x4b2   : > { %v13851_v32 = vadd.f32 %v4752_v12, %v4504_v8  ;;  %v4507_v51 = vadd.f32 %v4506_v44, %v17170_v36  ;;  %v4508_v13 = vpop.f32.mrb[191].mxu1  ;;  %v8601_v18 = vpop.f32.mrb[237].mxu0 }
 0x4b3   : > { %v4763_v3 = vpop.f32.mrb[238].mxu0 }
 0x4b4   : > { %17169 = vst [vmem:[#allocation64_spill] sm:$0xff] %v13851_v32  ;;  %v13854_v15 = vadd.f32 %v4755_v57, %v4507_v51  ;;  %5250 = vmatmul.mubr.bf16.gmra.mrb[40].mxu1 %v17172_v24  ;;  %v8602_v17 = vpop.f32.mrb[239].mxu0  ;;  %v17176_v57 = vld [vmem:[#allocation139_spill] sm:$0xff] }
 0x4b5   : > { %5257 = vmatprep.mubr.bf16.mxu1 %v17173_v37  ;;  %v17177_v17 = vld [vmem:[#allocation162_spill] sm:$0xff] }
 0x4b6   : > { %17171 = vst [vmem:[#allocation80_spill] sm:$0xff] %v13854_v15  ;;  %8724 = vmatmul.mubr.bf16.gmra.mrb[88].mxu0 %v17174_v38  ;;  %v17178_v15 = vld [vmem:[#allocation163_spill] sm:$0xff] }
 0x4b7   : > { %v4511_v7 = vpop.f32.mrb[192].mxu1  ;;  %8727 = vmatprep.mubr.msk.bf16.mxu0 %vm16609_vm7, %v16608_v46 }
 0x4b8   : > { %v4512_v43 = vadd.f32 %v4511_v7, %v17175_v2  ;;  %v4513_v8 = vpop.f32.mrb[193].mxu1  ;;  %v17179_v2 = vld [vmem:[#allocation164_spill] sm:$0xff] }
 0x4b9   : > { %v4514_v12 = vpop.f32.mrb[194].mxu1  ;;  %v4768_v13 = vpop.f32.mrb[240].mxu0  ;;  %v17180_v8 = vld [vmem:[#allocation147_spill] sm:$0xff] }
 0x4ba   : > { %v13862_v44 = vadd.f32 %v4760_v11, %v4512_v43  ;;  %v4515_v36 = vadd.f32 %v4514_v12, %v17176_v57  ;;  %v4516_v51 = vpop.f32.mrb[195].mxu1  ;;  %v8605_v18 = vpop.f32.mrb[241].mxu0 }
 0x4bb   : > { %v4771_v37 = vpop.f32.mrb[242].mxu0 }
 0x4bc   : > { %v13865_v24 = vadd.f32 %v4763_v3, %v4515_v36  ;;  %5258 = vmatmul.mubr.bf16.gmra.mrb[44].mxu1 %v17177_v17  ;;  %v8606_v38 = vpop.f32.mrb[243].mxu0  ;;  %v17181_v17 = vld [vmem:[#allocation165_spill] sm:$0xff] }
 0x4bd   : > { %5265 = vmatprep.mubr.bf16.mxu1 %v17178_v15 }
 0x4be   : > { %8728 = vmatmul.mubr.bf16.gmra.mrb[92].mxu0 %v17179_v2  ;;  %v17182_v2 = vld [vmem:[#allocation167_spill] sm:$0xff] }
 0x4bf   : > { %v4519_v7 = vpop.f32.mrb[196].mxu1  ;;  %8731 = vmatprep.mubr.msk.bf16.mxu0 %vm16609_vm7, %v16608_v46 }
 0x4c0   : > { %v4520_v32 = vadd.f32 %v4519_v7, %v17180_v8  ;;  %v4521_v43 = vpop.f32.mrb[197].mxu1  ;;  %v17183_v8 = vld [vmem:[#allocation169_spill] sm:$0xff] }
 0x4c1   : > { %v4522_v11 = vpop.f32.mrb[198].mxu1  ;;  %v4776_v36 = vpop.f32.mrb[244].mxu0 }
 0x4c2   : > { %v13873_v12 = vadd.f32 %v4768_v13, %v4520_v32  ;;  %v4523_v3 = vadd.f32 %v4522_v11, %v13602_v6  ;;  %v4524_v57 = vpop.f32.mrb[199].mxu1  ;;  %v8609_v51 = vpop.f32.mrb[245].mxu0 }
 0x4c3   : > { %v4779_v15 = vpop.f32.mrb[246].mxu0 }
 0x4c4   : > { %v13876_v18 = vadd.f32 %v4771_v37, %v4523_v3  ;;  %5266 = vmatmul.mubr.bf16.gmra.mrb[48].mxu1 %v17181_v17  ;;  %v8610_v38 = vpop.f32.mrb[247].mxu0 }
 0x4c5   : > { %5273 = vmatprep.mubr.bf16.mxu1 %v17182_v2  ;;  %v17184_v38 = vld [vmem:[#allocation170_spill] sm:$0xff] }
 0x4c6   : > { %8732 = vmatmul.mubr.bf16.gmra.mrb[96].mxu0 %v17183_v8  ;;  %v17185_v8 = vld [vmem:[#allocation53_spill] sm:$0xff] }
 0x4c7   : > { %v4527_v7 = vpop.f32.mrb[200].mxu1  ;;  %8735 = vmatprep.mubr.msk.bf16.mxu0 %vm16609_vm7, %v16608_v46 }
 0x4c8   : > { %v4528_v43 = vadd.f32 %v4527_v7, %v13618_v63  ;;  %v4529_v32 = vpop.f32.mrb[201].mxu1  ;;  %v17186_v7 = vld [vmem:[#allocation149_spill] sm:$0xff] }
 0x4c9   : > { %v4530_v6 = vpop.f32.mrb[202].mxu1  ;;  %v4784_v3 = vpop.f32.mrb[248].mxu0 }
 0x4ca   : > { %v13884_v13 = vadd.f32 %v4776_v36, %v4528_v43  ;;  %v4531_v37 = vadd.f32 %v4530_v6, %v13625_v23  ;;  %v4532_v11 = vpop.f32.mrb[203].mxu1  ;;  %v8613_v57 = vpop.f32.mrb[249].mxu0 }
 0x4cb   : > { %v4787_v17 = vpop.f32.mrb[250].mxu0 }
 0x4cc   : > { %v13887_v51 = vadd.f32 %v4779_v15, %v4531_v37  ;;  %5274 = vmatmul.mubr.bf16.gmra.mrb[52].mxu1 %v17184_v38  ;;  %v8614_v2 = vpop.f32.mrb[251].mxu0 }
 0x4cd   : > { %5281 = vmatprep.mubr.bf16.mxu1 %v17185_v8  ;;  %v17187_v2 = vld [vmem:[#allocation129_spill] sm:$0xff] }
 0x4ce   : > { %8736 = vmatmul.mubr.bf16.gmra.mrb[100].mxu0 %v17186_v7  ;;  %v17188_v7 = vld [vmem:[#allocation55_spill] sm:$0xff] }
 0x4cf   : > { %v4535_v63 = vpop.f32.mrb[204].mxu1  ;;  %8739 = vmatprep.mubr.msk.bf16.mxu0 %vm16609_vm7, %v16608_v46 }
 0x4d0   : > { %v4536_v32 = vadd.f32 %v4535_v63, %v13643_v52  ;;  %v4537_v36 = vpop.f32.mrb[205].mxu1  ;;  %v17189_v63 = vld [vmem:[#allocation151_spill] sm:$0xff] }
 0x4d1   : > { %v4538_v23 = vpop.f32.mrb[206].mxu1  ;;  %v4792_v37 = vpop.f32.mrb[252].mxu0 }
 0x4d2   : > { %v13895_v43 = vadd.f32 %v4784_v3, %v4536_v32  ;;  %v4539_v15 = vadd.f32 %v4538_v23, %v13649_v56  ;;  %v4540_v6 = vpop.f32.mrb[207].mxu1  ;;  %v8617_v11 = vpop.f32.mrb[253].mxu0 }
 0x4d3   : > { %v4795_v38 = vpop.f32.mrb[254].mxu0 }
 0x4d4   : > { %v13898_v57 = vadd.f32 %v4787_v17, %v4539_v15  ;;  %5282 = vmatmul.mubr.bf16.gmra.mrb[56].mxu1 %v17187_v2  ;;  %v8618_v8 = vpop.f32.mrb[255].mxu0 }
 0x4d5   : > { %5289 = vmatprep.mubr.bf16.mxu1 %v17188_v7  ;;  %v17190_v8 = vld [vmem:[#allocation124_spill] sm:$0xff] }
 0x4d6   : > { %8740 = vmatmul.mubr.bf16.gmra.mrb[104].mxu0 %v17189_v63  ;;  %v17191_v63 = vld [vmem:[#allocation132_spill] sm:$0xff] }
 0x4d7   : > { %v4543_v52 = vpop.f32.mrb[208].mxu1  ;;  %8743 = vmatprep.mubr.msk.bf16.mxu0 %vm16609_vm7, %v16608_v46 }
 0x4d8   : > { %v4544_v36 = vadd.f32 %v4543_v52, %v13660_v33  ;;  %v4545_v3 = vpop.f32.mrb[209].mxu1  ;;  %v17192_v52 = vld [vmem:[#allocation153_spill] sm:$0xff] }
 0x4d9   : > { %v4546_v56 = vpop.f32.mrb[210].mxu1  ;;  %v4800_v15 = vpop.f32.mrb[0].mxu0 }
 0x4da   : > { %v13906_v32 = vadd.f32 %v4792_v37, %v4544_v36  ;;  %v4547_v17 = vadd.f32 %v4546_v56, %v13668_v61  ;;  %v4548_v23 = vpop.f32.mrb[211].mxu1  ;;  %v8621_v6 = vpop.f32.mrb[1].mxu0 }
 0x4db   : > { %v4803_v2 = vpop.f32.mrb[2].mxu0 }
 0x4dc   : > { %v13909_v11 = vadd.f32 %v4795_v38, %v4547_v17  ;;  %5290 = vmatmul.mubr.bf16.gmra.mrb[60].mxu1 %v17190_v8  ;;  %v8622_v7 = vpop.f32.mrb[3].mxu0 }
 0x4dd   : > { %5297 = vmatprep.mubr.bf16.mxu1 %v17191_v63  ;;  %v17193_v7 = vld [vmem:[#allocation42_spill] sm:$0xff] }
 0x4de   : > { %8744 = vmatmul.mubr.bf16.gmra.mrb[108].mxu0 %v17192_v52  ;;  %v17194_v52 = vld [vmem:[#allocation91_spill] sm:$0xff] }
 0x4df   : > { %v4551_v33 = vpop.f32.mrb[212].mxu1  ;;  %8747 = vmatprep.mubr.msk.bf16.mxu0 %vm16609_vm7, %v16608_v46 }
 0x4e0   : > { %v4552_v3 = vadd.f32 %v4551_v33, %v13679_v55  ;;  %v4553_v37 = vpop.f32.mrb[213].mxu1  ;;  %v17195_v33 = vld [vmem:[#allocation154_spill] sm:$0xff] }
 0x4e1   : > { %v4554_v61 = vpop.f32.mrb[214].mxu1  ;;  %v4808_v17 = vpop.f32.mrb[4].mxu0 }
 0x4e2   : > { %v13917_v36 = vadd.f32 %v4800_v15, %v4552_v3  ;;  %v4555_v38 = vadd.f32 %v4554_v61, %v13687_v9  ;;  %v4556_v56 = vpop.f32.mrb[215].mxu1  ;;  %v8625_v23 = vpop.f32.mrb[5].mxu0 }
 0x4e3   : > { %v4811_v8 = vpop.f32.mrb[6].mxu0 }
 0x4e4   : > { %v13920_v6 = vadd.f32 %v4803_v2, %v4555_v38  ;;  %5298 = vmatmul.mubr.bf16.gmra.mrb[64].mxu1 %v17193_v7  ;;  %v8626_v63 = vpop.f32.mrb[7].mxu0 }
 0x4e5   : > { %5305 = vmatprep.mubr.bf16.mxu1 %v17194_v52  ;;  %v17196_v63 = vld [vmem:[#allocation92_spill] sm:$0xff] }
 0x4e6   : > { %8748 = vmatmul.mubr.bf16.gmra.mrb[112].mxu0 %v17195_v33  ;;  %v17197_v33 = vld [vmem:[#allocation133_spill] sm:$0xff] }
 0x4e7   : > { %v4559_v55 = vpop.f32.mrb[216].mxu1  ;;  %8751 = vmatprep.mubr.msk.bf16.mxu0 %vm16609_vm7, %v16608_v46 }
 0x4e8   : > { %v4560_v37 = vadd.f32 %v4559_v55, %v13698_v28  ;;  %v4561_v15 = vpop.f32.mrb[217].mxu1  ;;  %v17198_v55 = vld [vmem:[#allocation155_spill] sm:$0xff] }
 0x4e9   : > { %v4562_v9 = vpop.f32.mrb[218].mxu1  ;;  %v4816_v38 = vpop.f32.mrb[8].mxu0 }
 0x4ea   : > { %v13928_v3 = vadd.f32 %v4808_v17, %v4560_v37  ;;  %v4563_v2 = vadd.f32 %v4562_v9, %v13706_v35  ;;  %v4564_v61 = vpop.f32.mrb[219].mxu1  ;;  %v8629_v56 = vpop.f32.mrb[9].mxu0 }
 0x4eb   : > { %v4819_v7 = vpop.f32.mrb[10].mxu0 }
 0x4ec   : > { %v13931_v23 = vadd.f32 %v4811_v8, %v4563_v2  ;;  %5306 = vmatmul.mubr.bf16.gmra.mrb[68].mxu1 %v17196_v63  ;;  %v8630_v52 = vpop.f32.mrb[11].mxu0 }
 0x4ed   : > { %5313 = vmatprep.mubr.bf16.mxu1 %v17197_v33  ;;  %v17201_v52 = vld [vmem:[#allocation138_spill] sm:$0xff] }
 0x4ee   : > { %8752 = vmatmul.mubr.bf16.gmra.mrb[116].mxu0 %v17198_v55  ;;  %v17202_v55 = vld [vmem:[#allocation141_spill] sm:$0xff] }
 0x4ef   : > { %v4567_v28 = vpop.f32.mrb[220].mxu1  ;;  %8755 = vmatprep.mubr.msk.bf16.mxu0 %vm16609_vm7, %v16608_v46 }
 0x4f0   : > { %v4568_v15 = vadd.f32 %v4567_v28, %v13717_v30  ;;  %v4569_v17 = vpop.f32.mrb[221].mxu1  ;;  %v17203_v28 = vld [vmem:[#allocation156_spill] sm:$0xff] }
 0x4f1   : > { %v4570_v35 = vpop.f32.mrb[222].mxu1  ;;  %v4824_v2 = vpop.f32.mrb[12].mxu0 }
 0x4f2   : > { %v13939_v37 = vadd.f32 %v4816_v38, %v4568_v15  ;;  %v4571_v8 = vadd.f32 %v4570_v35, %v13725_v45  ;;  %v4572_v9 = vpop.f32.mrb[223].mxu1  ;;  %v8633_v61 = vpop.f32.mrb[13].mxu0 }
 0x4f3   : > { %v4827_v63 = vpop.f32.mrb[14].mxu0 }
 0x4f4   : > { %17199 = vst [vmem:[#allocation79_spill] sm:$0xff] %v13939_v37  ;;  %v13942_v56 = vadd.f32 %v4819_v7, %v4571_v8  ;;  %5314 = vmatmul.mubr.bf16.gmra.mrb[72].mxu1 %v17201_v52  ;;  %v8634_v33 = vpop.f32.mrb[15].mxu0  ;;  %v17209_v37 = vld [vmem:[#allocation46_spill] sm:$0xff] }
 0x4f5   : > { %5321 = vmatprep.mubr.bf16.mxu1 %v17202_v55  ;;  %v17205_v33 = vld [vmem:[#allocation144_spill] sm:$0xff] }
 0x4f6   : > { %17200 = vst [vmem:[#allocation102_spill] sm:$0xff] %v13942_v56  ;;  %8756 = vmatmul.mubr.bf16.gmra.mrb[120].mxu0 %v17203_v28  ;;  %v17206_v55 = vld [vmem:[#allocation148_spill] sm:$0xff] }
 0x4f7   : > { %v4575_v30 = vpop.f32.mrb[224].mxu1  ;;  %8759 = vmatprep.mubr.msk.bf16.mxu0 %vm16609_vm7, %v16608_v46  ;;  %v17207_v28 = vshrl.u32 %v17206_v55, 16 }
 0x4f8   : > { %v4576_v17 = vadd.f32 %v4575_v30, %v13736_v31  ;;  %v4577_v38 = vpop.f32.mrb[225].mxu1  ;;  %v17208_v30 = vshll.u32 %v17206_v55, 16 }
 0x4f9   : > { %v4578_v45 = vpop.f32.mrb[226].mxu1  ;;  %v4832_v8 = vpop.f32.mrb[16].mxu0  ;;  %v4921_v31 = vrot.slane %v17207_v28, 3 }
 0x4fa   : > { %v13950_v15 = vadd.f32 %v4824_v2, %v4576_v17  ;;  %v4579_v7 = vadd.f32 %v4578_v45, %v13744_v54  ;;  %v4580_v35 = vpop.f32.mrb[227].mxu1  ;;  %v8637_v9 = vpop.f32.mrb[17].mxu0  ;;  %v4922_v38 = vrot.slane %v17208_v30, 4  ;;  %v17210_v2 = vld [vmem:[#allocation125_spill] sm:$0xff]  ;;  %v17211_v17 = vld [vmem:[#allocation152_spill] sm:$0xff] }
 0x4fb   : > { %v4835_v52 = vpop.f32.mrb[18].mxu0  ;;  %v4871_v54 = vsel %vm2133_vm9, %v17211_v17, %v17210_v2  ;;  %v17212_v35 = vld [vmem:[#allocation157_spill] sm:$0xff] }
 0x4fc   : > { %v13953_v61 = vadd.f32 %v4827_v63, %v4579_v7  ;;  %5322 = vmatmul.mubr.bf16.gmra.mrb[76].mxu1 %v17205_v33  ;;  %v8638_v56 = vpop.f32.mrb[19].mxu0  ;;  %v4923_v9 = vor.u32 %v4922_v38, %v4921_v31  ;;  %v4934_v33 = vshrl.u32 %v4871_v54, 16  ;;  %v4937_v55 = vshll.u32 %v4871_v54, 16 }
 0x4fd   : > { %5329 = vmatprep.mubr.bf16.mxu1 %v17209_v37 }
 0x4fe   : > { %17204 = vst [vmem:[#allocation110_spill] sm:$0xff] %v13953_v61  ;;  %8760 = vmatmul.mubr.bf16.gmra.mrb[124].mxu0 %v17212_v35  ;;  %v4936_v31 = vrot.slane %v4934_v33, 3  ;;  %v4939_v38 = vrot.slane %v4937_v55, 4  ;;  %v17214_v55 = vld [vmem:[#allocation150_spill] sm:$0xff] }
 0x4ff   : > { %v4583_v45 = vpop.f32.mrb[228].mxu1  ;;  %8763 = vmatprep.mubr.msk.bf16.mxu0 %vm16609_vm7, %v16608_v46 }
 0x500   : > { %v4584_v63 = vadd.f32 %v4583_v45, %v13755_v22  ;;  %v4585_v7 = vpop.f32.mrb[229].mxu1  ;;  %v4924_v22 = vsel %vm3787_vm12, %v13575_v58, %v4923_v9 }
 0x501   : > { %v4586_v28 = vpop.f32.mrb[230].mxu1  ;;  %v4840_v61 = vpop.f32.mrb[20].mxu0  ;;  %v4940_v7 = vor.u32 %v4939_v38, %v4936_v31 }
 0x502   : > { %v13968_v56 = vadd.f32 %v4832_v8, %v4584_v63  ;;  %v4587_v37 = vadd.f32 %v4586_v28, %v13763_v25  ;;  %v4588_v30 = vpop.f32.mrb[231].mxu1  ;;  %v8641_v2 = vpop.f32.mrb[21].mxu0  ;;  %v17213_v8 = vld [vmem:[#allocation158_spill] sm:$0xff] }
 0x503   : > { %v4843_v35 = vpop.f32.mrb[22].mxu0  ;;  %v17215_v30 = vld [vmem:[#allocation146_spill] sm:$0xff]  ;;  %v4941_v31 = vsel %vm3787_vm12, %v4923_v9, %v4940_v7 }
 0x504   : > { %v13971_v17 = vadd.f32 %v4835_v52, %v4587_v37  ;;  %5330 = vmatmul.mubr.bf16.gmra.mrb[80].mxu1 %v13612_v42  ;;  %v8642_v45 = vpop.f32.mrb[23].mxu0  ;;  %v4929_v37 = vrot.slane %v17214_v55, 3  ;;  %v4930_v2 = vrot.slane %v17215_v30, 4 }
 0x505   : > { %5337 = vmatprep.mubr.bf16.mxu1 %v4924_v22 }
 0x506   : > { %8764 = vmatmul.mubr.bf16.gmra.mrb[128].mxu0 %v17213_v8  ;;  %v17216_v8 = vld [vmem:[#allocation159_spill] sm:$0xff] }
 0x507   : > { %v4591_v54 = vpop.f32.mrb[232].mxu1  ;;  %8767 = vmatprep.mubr.msk.bf16.mxu0 %vm16609_vm7, %v16608_v46 }
 0x508   : > { %v4592_v25 = vadd.f32 %v4591_v54, %v13774_v20  ;;  %v4593_v63 = vpop.f32.mrb[233].mxu1 }
 0x509   : > { %v4594_v52 = vpop.f32.mrb[234].mxu1  ;;  %v4848_v33 = vpop.f32.mrb[24].mxu0 }
 0x50a   : > { %v13980_v28 = vadd.f32 %v4840_v61, %v4592_v25  ;;  %v4595_v42 = vadd.f32 %v4594_v52, %v13782_v14  ;;  %v4596_v58 = vpop.f32.mrb[235].mxu1  ;;  %v8645_v22 = vpop.f32.mrb[25].mxu0  ;;  %v4931_v61 = vor.u32 %v4930_v2, %v4929_v37 }
 0x50b   : > { %v4851_v20 = vpop.f32.mrb[26].mxu0 }
 0x50c   : > { %v13985_v45 = vadd.f32 %v4843_v35, %v4595_v42  ;;  %5338 = vmatmul.mubr.bf16.gmra.mrb[84].mxu1 %v13639_v62  ;;  %v8646_v38 = vpop.f32.mrb[27].mxu0  ;;  %v4932_v9 = vsel %vm3787_vm12, %v13629_v16, %v4931_v61 }
 0x50d   : > { %5345 = vmatprep.mubr.bf16.mxu1 %v4941_v31 }
 0x50e   : > { %8768 = vmatmul.mubr.bf16.gmra.mrb[132].mxu0 %v17216_v8 }
 0x50f   : > { %v4599_v54 = vpop.f32.mrb[236].mxu1  ;;  %8771 = vmatprep.mubr.msk.bf16.mxu0 %vm16609_vm7, %v16608_v46 }
 0x510   : > { %v4600_v14 = vadd.f32 %v4599_v54, %v13793_v26  ;;  %v4601_v25 = vpop.f32.mrb[237].mxu1  ;;  %v17217_v26 = vld [vmem:[#allocation160_spill] sm:$0xff] }
 0x511   : > { %v4602_v63 = vpop.f32.mrb[238].mxu1  ;;  %v4856_v42 = vpop.f32.mrb[28].mxu0  ;;  %v4947_v30 = vsel %vm3787_vm12, %v4940_v7, %v17217_v26  ;;  %v17219_v25 = vld [vmem:[#allocation18_spill] sm:$0xff] }
 0x512   : > { %v13993_v35 = vadd.f32 %v4848_v33, %v4600_v14  ;;  %v4603_v52 = vadd.f32 %v4602_v63, %v13801_v34  ;;  %v4604_v62 = vpop.f32.mrb[239].mxu1  ;;  %v8649_v58 = vpop.f32.mrb[29].mxu0  ;;  %v17218_v33 = vld [vmem:[#allocation128_spill] sm:$0xff]  ;;  %v4946_v63 = vsel %vm3787_vm12, %v4931_v61, %v17219_v25 }
 0x513   : > { %v4859_v37 = vpop.f32.mrb[30].mxu0  ;;  %v4948_v22 = vsel %vm3787_vm12, %v17218_v33, %v17217_v26 }
 0x514   : > { %v13998_v55 = vadd.f32 %v4851_v20, %v4603_v52  ;;  %5346 = vmatmul.mubr.bf16.gmra.mrb[88].mxu1 %v4932_v9  ;;  %v8650_v2 = vpop.f32.mrb[31].mxu0 }
 0x515   : > { %5353 = vmatprep.mubr.bf16.mxu1 %v4947_v30 }
 0x516   : > { %8772 = vmatmul.mubr.bf16.gmra.mrb[136].mxu0 %v4948_v22 }
 0x517   : > { %v4607_v34 = vpop.f32.mrb[240].mxu1  ;;  %8775 = vmatprep.mubr.msk.bf16.mxu0 %vm16609_vm7, %v16608_v46  ;;  %v17223_v46 = vld [vmem:[#allocation142_spill] sm:$0xff] }
 0x518   : > { %v4608_v31 = vadd.f32 %v4607_v34, %v13605_v19  ;;  %v4609_v38 = vpop.f32.mrb[241].mxu1 }
 0x519   : > { %v4610_v16 = vpop.f32.mrb[242].mxu1  ;;  %v4864_v8 = vpop.f32.mrb[32].mxu0 }
 0x51a   : > { %v14008_v20 = vadd.f32 %v4856_v42, %v4608_v31  ;;  %v4611_v54 = vadd.f32 %v4610_v16, %v13609_v10  ;;  %v4612_v7 = vpop.f32.mrb[243].mxu1  ;;  %v8653_v14 = vpop.f32.mrb[33].mxu0 }
 0x51b   : > { %v4867_v62 = vpop.f32.mrb[34].mxu0 }
 0x51c   : > { %v14013_v52 = vadd.f32 %v4859_v37, %v4611_v54  ;;  %5354 = vmatmul.mubr.bf16.gmra.mrb[92].mxu1 %v4946_v63  ;;  %v8654_v19 = vpop.f32.mrb[35].mxu0 }
 0x51d   : > { %5361 = vmatprep.mubr.bf16.mxu1 %v17217_v26 }
 0x51e   : > { %8776 = vmatmul.mubr.bf16.gmra.mrb[140].mxu0 %v17217_v26 }
 0x51f   : > { %v4615_v9 = vpop.f32.mrb[244].mxu1 }
 0x520   : > { %v4616_v42 = vadd.f32 %v4615_v9, %v13631_v59  ;;  %v4617_v58 = vpop.f32.mrb[245].mxu1 }
 0x521   : > { %v4618_v10 = vpop.f32.mrb[246].mxu1  ;;  %v5404_v61 = vpop.f32.mrb[36].mxu0 }
 0x522   : > { %v14018_v30 = vadd.f32 %v4864_v8, %v4616_v42  ;;  %v4619_v2 = vadd.f32 %v4618_v10, %v13635_v39  ;;  %v4620_v33 = vpop.f32.mrb[247].mxu1  ;;  %v8673_v37 = vpop.f32.mrb[37].mxu0 }
 0x523   : > { %v5407_v34 = vpop.f32.mrb[38].mxu0 }
 0x524   : > { %17220 = vst [vmem:[#allocation66_spill] sm:$0xff] %v14018_v30  ;;  %v14021_v22 = vadd.f32 %v4867_v62, %v4619_v2  ;;  %5362 = vmatmul.mubr.bf16.gmra.mrb[96].mxu1 %v17219_v25  ;;  %v8674_v31 = vpop.f32.mrb[39].mxu0  ;;  %v17234_v30 = vld [vmem:[#allocation6_spill] sm:$0xff] }
 0x525   : > { %vm17235_vm1 = vcmp.eq.s32.totalorder %v17234_v30, 1 }
 0x526   : > { %17221 = vst [vmem:[#allocation59_spill] sm:$0xff] %v14021_v22 }
 0x527   : > { %v5155_v38 = vpop.f32.mrb[248].mxu1 }
 0x528   : > { %v5405_v16 = vadd.f32 %v5404_v61, %v5155_v38  ;;  %v5157_v26 = vpop.f32.mrb[249].mxu1 }
 0x529   : > { %v5158_v54 = vpop.f32.mrb[250].mxu1  ;;  %v5412_v14 = vpop.f32.mrb[40].mxu0 }
 0x52a   : > { %v5619_v59 = vadd.f32 %v5405_v16, %v13655_v21  ;;  %v5408_v7 = vadd.f32 %v5407_v34, %v5158_v54  ;;  %v5160_v8 = vpop.f32.mrb[251].mxu1  ;;  %v8677_v63 = vpop.f32.mrb[41].mxu0 }
 0x52b   : > { %v5415_v19 = vpop.f32.mrb[42].mxu0 }
 0x52c   : > { %v5620_v39 = vadd.f32 %v5408_v7, %v13662_v1  ;;  %v8678_v9 = vpop.f32.mrb[43].mxu0 }
 0x52f   : > { %v5163_v62 = vpop.f32.mrb[252].mxu1 }
 0x530   : > { %v5413_v42 = vadd.f32 %v5412_v14, %v5163_v62  ;;  %v5165_v58 = vpop.f32.mrb[253].mxu1 }
 0x531   : > { %v5166_v25 = vpop.f32.mrb[254].mxu1  ;;  %v5420_v61 = vpop.f32.mrb[44].mxu0 }
 0x532   : > { %v5621_v10 = vadd.f32 %v5413_v42, %v13674_v49  ;;  %v5416_v2 = vadd.f32 %v5415_v19, %v5166_v25  ;;  %v5168_v33 = vpop.f32.mrb[255].mxu1  ;;  %v8681_v37 = vpop.f32.mrb[45].mxu0  ;;  %v17222_v25 = vld [vmem:[#allocation2_spill] sm:$0xff] }
 0x533   : > { %v5423_v34 = vpop.f32.mrb[46].mxu0 }
 0x534   : > { %v5622_v21 = vadd.f32 %v5416_v2, %v13681_v27  ;;  %v8682_v31 = vpop.f32.mrb[47].mxu0  ;;  %v5675_v2 = vsub.s32 3, %v17222_v25 }
 0x537   : > { %v5171_v38 = vpop.f32.mrb[0].mxu1 }
 0x538   : > { %v5421_v16 = vadd.f32 %v5420_v61, %v5171_v38  ;;  %v5173_v26 = vpop.f32.mrb[1].mxu1 }
 0x539   : > { %v5174_v1 = vpop.f32.mrb[2].mxu1  ;;  %v5428_v14 = vpop.f32.mrb[48].mxu0 }
 0x53a   : > { %v5623_v54 = vadd.f32 %v5421_v16, %v13693_v48  ;;  %v5424_v7 = vadd.f32 %v5423_v34, %v5174_v1  ;;  %v5176_v8 = vpop.f32.mrb[3].mxu1  ;;  %v8685_v63 = vpop.f32.mrb[49].mxu0 }
 0x53b   : > { %v5431_v19 = vpop.f32.mrb[50].mxu0 }
 0x53c   : > { %v5624_v49 = vadd.f32 %v5424_v7, %v13700_v4  ;;  %v8686_v9 = vpop.f32.mrb[51].mxu0  ;;  %v9146_v4 = vld [vmem:[%s15769_s4] sm:$0x3f] }
 0x53d   : > { %v14038_v26 = vrot.slane %v9146_v4, %v5675_v2 }
 0x53f   : > { %v5179_v62 = vpop.f32.mrb[4].mxu1 }
 0x540   : > { %v5429_v42 = vadd.f32 %v5428_v14, %v5179_v62  ;;  %v5181_v58 = vpop.f32.mrb[5].mxu1  ;;  %v14045_v62 = vadd.f32 %v14038_v26, %v5620_v39 }
 0x541   : > { %v5182_v27 = vpop.f32.mrb[6].mxu1  ;;  %v5436_v31 = vpop.f32.mrb[52].mxu0  ;;  %v14048_v58 = vadd.f32 %v14038_v26, %v5621_v10 }
 0x542   : > { %v5625_v33 = vadd.f32 %v5429_v42, %v13712_v47  ;;  %v5432_v61 = vadd.f32 %v5431_v19, %v5182_v27  ;;  %v5184_v37 = vpop.f32.mrb[7].mxu1  ;;  %v8689_v48 = vpop.f32.mrb[53].mxu0  ;;  %v14041_v47 = vadd.f32 %v14038_v26, %v5619_v59 }
 0x543   : > { %v5439_v38 = vpop.f32.mrb[54].mxu0  ;;  %v5786_v37 = vmul.f32 0.5, %v14045_v62 }
 0x544   : > { %v14033_v34 = vadd.f32 %v5432_v61, %v13719_v41  ;;  %v8690_v16 = vpop.f32.mrb[55].mxu0  ;;  %v5785_v59 = vmul.f32 0.5, %v14041_v47 }
 0x545   : > { %v14057_v16 = vadd.f32 %v14038_v26, %v5622_v21 }
 0x546   : > { %9035 = vtanh.f32 %v5785_v59 }
 0x547   : > { %v5187_v1 = vpop.f32.mrb[8].mxu1  ;;  %9037 = vtanh.f32 %v5786_v37  ;;  %v5788_v21 = vmul.f32 0.5, %v14057_v16 }
 0x548   : > { %v5437_v7 = vadd.f32 %v5436_v31, %v5187_v1  ;;  %v5189_v8 = vpop.f32.mrb[9].mxu1  ;;  %v5787_v31 = vmul.f32 0.5, %v14048_v58 }
 0x549   : > { %v5190_v14 = vpop.f32.mrb[10].mxu1  ;;  %v5444_v9 = vpop.f32.mrb[56].mxu0  ;;  %v14063_v8 = vadd.f32 %v14038_v26, %v5623_v54  ;;  %v14074_v54 = vadd.f32 %v14038_v26, %v5625_v33 }
 0x54a   : > { %v5627_v63 = vadd.f32 %v5437_v7, %v13731_v0  ;;  %v5440_v19 = vadd.f32 %v5439_v38, %v5190_v14  ;;  %v5192_v41 = vpop.f32.mrb[11].mxu1  ;;  %v8693_v42 = vpop.f32.mrb[57].mxu0  ;;  %9039 = vtanh.f32 %v5787_v31 }
 0x54b   : > { %v5447_v2 = vpop.f32.mrb[58].mxu0  ;;  %v14071_v42 = vadd.f32 %v14038_v26, %v5624_v49  ;;  %9041 = vtanh.f32 %v5788_v21  ;;  %v5791_v33 = vmul.f32 0.5, %v14074_v54 }
 0x54c   : > { %v14051_v27 = vadd.f32 %v5440_v19, %v13738_v29  ;;  %v8694_v61 = vpop.f32.mrb[59].mxu0  ;;  %v14089_v21 = vadd.f32 %v14038_v26, %v5627_v63 }
 0x54e   : > { %v5793_v63 = vmul.f32 0.5, %v14089_v21 }
 0x54f   : > { %v5195_v0 = vpop.f32.mrb[12].mxu1 }
 0x550   : > { %v5445_v48 = vadd.f32 %v5444_v9, %v5195_v0  ;;  %v5197_v38 = vpop.f32.mrb[13].mxu1 }
 0x551   : > { %v5198_v39 = vpop.f32.mrb[14].mxu1  ;;  %v5452_v1 = vpop.f32.mrb[60].mxu0 }
 0x552   : > { %v14060_v10 = vadd.f32 %v5445_v48, %v13750_v5  ;;  %v5448_v29 = vadd.f32 %v5447_v2, %v5198_v39  ;;  %v5200_v4 = vpop.f32.mrb[15].mxu1  ;;  %v8697_v7 = vpop.f32.mrb[61].mxu0  ;;  %v5789_v5 = vmul.f32 0.5, %v14063_v8  ;;  %v5790_v39 = vmul.f32 0.5, %v14071_v42 }
 0x553   : > { %v5455_v19 = vpop.f32.mrb[62].mxu0  ;;  %v9036_v38 = vpop.eup %9035 }
 0x554   : > { %v14066_v14 = vadd.f32 %v5448_v29, %v13757_v50  ;;  %v8698_v41 = vpop.f32.mrb[63].mxu0  ;;  %9043 = vtanh.f32 %v5789_v5  ;;  %v9038_v4 = vpop.eup %9037 }
 0x555   : > { %v9040_v7 = vpop.eup %9039  ;;  %v5894_v41 = vmul.f32 0.5, %v9038_v4  ;;  %9045 = vtanh.f32 %v5790_v39 }
 0x556   : > { %9047 = vtanh.f32 %v5791_v33  ;;  %v9042_v4 = vpop.eup %9041  ;;  %v14101_v33 = vadd.f32 %v14038_v26, %v14051_v27 }
 0x557   : > { %v5203_v9 = vpop.f32.mrb[16].mxu1  ;;  %v5948_v39 = vadd.f32 0.5, %v5894_v41  ;;  %v14106_v41 = vadd.f32 %v14038_v26, %v14060_v10 }
 0x558   : > { %v5453_v2 = vadd.f32 %v5452_v1, %v5203_v9  ;;  %v5205_v61 = vpop.f32.mrb[17].mxu1 }
 0x559   : > { %v5206_v59 = vpop.f32.mrb[18].mxu1  ;;  %v5460_v31 = vpop.f32.mrb[64].mxu0  ;;  %v5795_v10 = vmul.f32 0.5, %v14106_v41 }
 0x55a   : > { %v14077_v50 = vadd.f32 %v5453_v2, %v13769_v60  ;;  %v5456_v37 = vadd.f32 %v5455_v19, %v5206_v59  ;;  %v5208_v0 = vpop.f32.mrb[19].mxu1  ;;  %v8701_v48 = vpop.f32.mrb[65].mxu0  ;;  %v14086_v60 = vadd.f32 %v14038_v26, %v14033_v34  ;;  %v5895_v2 = vmul.f32 0.5, %v9040_v7 }
 0x55b   : > { %v5463_v29 = vpop.f32.mrb[66].mxu0 }
 0x55c   : > { %v14081_v49 = vadd.f32 %v5456_v37, %v13776_v40  ;;  %v8702_v1 = vpop.f32.mrb[67].mxu0  ;;  %v5893_v40 = vmul.f32 0.5, %v9036_v38  ;;  %v5792_v59 = vmul.f32 0.5, %v14086_v60 }
 0x55e   : > { %v5947_v7 = vadd.f32 0.5, %v5893_v40  ;;  %9049 = vtanh.f32 %v5792_v59 }
 0x55f   : > { %v5211_v19 = vpop.f32.mrb[20].mxu1  ;;  %9051 = vtanh.f32 %v5793_v63 }
 0x560   : > { %v5461_v9 = vadd.f32 %v5460_v31, %v5211_v19  ;;  %v5213_v5 = vpop.f32.mrb[21].mxu1  ;;  %v5949_v19 = vadd.f32 0.5, %v5895_v2 }
 0x561   : > { %v5214_v61 = vpop.f32.mrb[22].mxu1  ;;  %v5468_v48 = vpop.f32.mrb[68].mxu0  ;;  %v5731_v5 = vmax.f32 %v14041_v47, 0.0  ;;  %v14114_v47 = vadd.f32 %v14038_v26, %v14066_v14 }
 0x562   : > { %v14093_v37 = vadd.f32 %v5461_v9, %v13788_v53  ;;  %v5464_v0 = vadd.f32 %v5463_v29, %v5214_v61  ;;  %v5216_v34 = vpop.f32.mrb[23].mxu1  ;;  %v8705_v1 = vpop.f32.mrb[69].mxu0  ;;  %v5732_v29 = vmax.f32 %v14045_v62, 0.0  ;;  %v5896_v61 = vmul.f32 0.5, %v9042_v4 }
 0x563   : > { %v5471_v38 = vpop.f32.mrb[70].mxu0  ;;  %v9044_v9 = vpop.eup %9043  ;;  %v6001_v34 = vmul.f32 %v5947_v7, %v5731_v5  ;;  %v5794_v62 = vmul.f32 0.5, %v14101_v33 }
 0x564   : > { %v14097_v31 = vadd.f32 %v5464_v0, %v17223_v46  ;;  %v8706_v53 = vpop.f32.mrb[71].mxu0  ;;  %v5733_v46 = vmax.f32 %v14048_v58, 0.0  ;;  %v6002_v2 = vmul.f32 %v5948_v39, %v5732_v29  ;;  %v9046_v25 = vpop.eup %9045  ;;  %v17224_v58 = vld [vmem:[#allocation140_spill] sm:$0xff]  ;;  %v5950_v29 = vadd.f32 0.5, %v5896_v61 }
 0x565   : > { %v5897_v53 = vmul.f32 0.5, %v9044_v9  ;;  %9053 = vtanh.f32 %v5794_v62 }
 0x566   : > { %v6003_v1 = vmul.f32 %v5949_v19, %v5733_v46  ;;  %v9048_v19 = vpop.eup %9047  ;;  %v14121_v5 = vsel %vm1491_vm6, %v6002_v2, 0.0  ;;  %v14125_v46 = vadd.f32 %v14038_v26, %v14077_v50  ;;  %v17230_v2 = vld [vmem:[#allocation4_spill] sm:$0xff]  ;;  %9055 = vtanh.f32 %v5795_v10 }
 0x567   : > { %v5219_v40 = vpop.f32.mrb[24].mxu1  ;;  %17226 = vst [vmem:[#allocation25_spill] sm:$0xff] %v14121_v5  ;;  %vm17231_vm9 = vcmp.eq.s32.totalorder %v17230_v2, 1  ;;  %v5796_v50 = vmul.f32 0.5, %v14114_v47 }
 0x568   : > { %v5469_v0 = vadd.f32 %v5468_v48, %v5219_v40  ;;  %v5221_v27 = vpop.f32.mrb[25].mxu1  ;;  %v17227_v40 = vld [vmem:[#allocation145_spill] sm:$0xff]  ;;  %v9050_v62 = vpop.eup %9049 }
 0x569   : > { %v5222_v59 = vpop.f32.mrb[26].mxu1  ;;  %v5476_v48 = vpop.f32.mrb[72].mxu0  ;;  %9057 = vtanh.f32 %v5796_v50 }
 0x56a   : > { %v14117_v4 = vadd.f32 %v5469_v0, %v17224_v58  ;;  %v5472_v39 = vadd.f32 %v5471_v38, %v5222_v59  ;;  %v5224_v63 = vpop.f32.mrb[27].mxu1  ;;  %v8709_v7 = vpop.f32.mrb[73].mxu0  ;;  %v5734_v0 = vmax.f32 %v14057_v16, 0.0  ;;  %v5951_v38 = vadd.f32 0.5, %v5897_v53 }
 0x56b   : > { %v5479_v27 = vpop.f32.mrb[74].mxu0  ;;  %v5898_v59 = vmul.f32 0.5, %v9046_v25  ;;  %v14133_v63 = vsel %vm1490_vm15, %v6001_v34, 0.0  ;;  %v14137_v7 = vsel %vm17231_vm9, %v6003_v1, 0.0  ;;  %v5735_v16 = vmax.f32 %v14063_v8, 0.0 }
 0x56c   : > { %v14128_v14 = vadd.f32 %v5472_v39, %v17227_v40  ;;  %v8710_v61 = vpop.f32.mrb[75].mxu0  ;;  %17229 = vst [vmem:[#allocation113_spill] sm:$0xff] %v14133_v63  ;;  %17232 = vst [vmem:[#allocation23_spill] sm:$0xff] %v14137_v7  ;;  %v6109_v39 = vadd.f32 %v14121_v5, %v14133_v63  ;;  %v6004_v40 = vmul.f32 %v5950_v29, %v5734_v0  ;;  %v5899_v25 = vmul.f32 0.5, %v9048_v19  ;;  %v9052_v5 = vpop.eup %9051  ;;  %v17233_v29 = vld [vmem:[#allocation143_spill] sm:$0xff] }
 0x56d   : > { %v5797_v61 = vmul.f32 0.5, %v14125_v46  ;;  %v14146_v34 = vadd.f32 %v14038_v26, %v14081_v49  ;;  %v6005_v9 = vmul.f32 %v5951_v38, %v5735_v16  ;;  %v5952_v58 = vadd.f32 0.5, %v5898_v59 }
 0x56e   : > { %v6110_v10 = vadd.f32 %v6109_v39, %v14137_v7  ;;  %v14151_v8 = vadd.f32 %v14038_v26, %v14093_v37  ;;  %v5736_v38 = vmax.f32 %v14071_v42, 0.0  ;;  %v5953_v59 = vadd.f32 0.5, %v5899_v25  ;;  %v17237_v37 = vld [vmem:[#allocation122_spill] sm:$0xff] }
 0x56f   : > { %v5227_v53 = vpop.f32.mrb[28].mxu1  ;;  %9059 = vtanh.f32 %v5797_v61  ;;  %v5798_v50 = vmul.f32 0.5, %v14146_v34 }
 0x570   : > { %v5477_v1 = vadd.f32 %v5476_v48, %v5227_v53  ;;  %v5229_v2 = vpop.f32.mrb[29].mxu1  ;;  %v14158_v48 = vsel %vm17235_vm1, %v6004_v40, 0.0  ;;  %v5901_v40 = vmul.f32 0.5, %v9052_v5  ;;  %v5799_v25 = vmul.f32 0.5, %v14151_v8 }
 0x571   : > { %v5230_v22 = vpop.f32.mrb[30].mxu1  ;;  %v5484_v49 = vpop.f32.mrb[76].mxu0  ;;  %17236 = vst [vmem:[#allocation82_spill] sm:$0xff] %v14158_v48  ;;  %v5900_v2 = vmul.f32 0.5, %v9050_v62  ;;  %v6111_v42 = vadd.f32 %v6110_v10, %v14158_v48  ;;  %9061 = vtanh.f32 %v5798_v50  ;;  %v17243_v48 = vld [vmem:[#allocation9_spill] sm:$0xff] }
 0x572   : > { %v14154_v19 = vadd.f32 %v5477_v1, %v17233_v29  ;;  %v5480_v0 = vadd.f32 %v5479_v27, %v5230_v22  ;;  %v5232_v63 = vpop.f32.mrb[31].mxu1  ;;  %v8713_v39 = vpop.f32.mrb[77].mxu0  ;;  %v14167_v22 = vsel %vm1494_vm3, %v6005_v9, 0.0  ;;  %v6006_v27 = vmul.f32 %v5952_v58, %v5736_v38 }
 0x573   : > { %v5487_v53 = vpop.f32.mrb[78].mxu0  ;;  %17239 = vst [vmem:[#allocation62_spill] sm:$0xff] %v14167_v22  ;;  %v5737_v63 = vmax.f32 %v14074_v54, 0.0  ;;  %v9054_v62 = vpop.eup %9053  ;;  %v5954_v39 = vadd.f32 0.5, %v5900_v2  ;;  %v6112_v9 = vadd.f32 %v6111_v42, %v14167_v22  ;;  %v14179_v54 = vadd.f32 %v14038_v26, %v14117_v4  ;;  %v17242_v42 = vld [vmem:[#allocation81_spill] sm:$0xff] }
 0x574   : > { %v14163_v16 = vadd.f32 %v5480_v0, %v17237_v37  ;;  %v8714_v29 = vpop.f32.mrb[79].mxu0  ;;  %v14174_v0 = vadd.f32 %v14038_v26, %v14097_v31  ;;  %v9056_v1 = vpop.eup %9055  ;;  %v14183_v38 = vsel %vm1495_vm4, %v6006_v27, 0.0  ;;  %v5739_v31 = vmax.f32 %v14089_v21, 0.0 }
 0x575   : > { %v6007_v61 = vmul.f32 %v5953_v59, %v5737_v63  ;;  %17241 = vst [vmem:[#allocation115_spill] sm:$0xff] %v14183_v38  ;;  %v5738_v59 = vmax.f32 %v14086_v60, 0.0  ;;  %v5955_v2 = vadd.f32 0.5, %v5901_v40  ;;  %v5902_v29 = vmul.f32 0.5, %v9054_v62  ;;  %v9058_v10 = vpop.eup %9057 }
 0x576   : > { %9063 = vtanh.f32 %v5799_v25  ;;  %vm17244_vm7 = vcmp.eq.s32.totalorder %v17243_v48, 1  ;;  %v5903_v27 = vmul.f32 0.5, %v9056_v1  ;;  %v6113_v21 = vadd.f32 %v6112_v9, %v14183_v38 }
 0x577   : > { %v5235_v37 = vpop.f32.mrb[32].mxu1  ;;  %v5801_v40 = vmul.f32 0.5, %v14179_v54  ;;  %v14197_v25 = vadd.f32 %v14038_v26, %v14128_v14  ;;  %v6009_v1 = vmul.f32 %v5955_v2, %v5739_v31  ;;  %v5904_v48 = vmul.f32 0.5, %v9058_v10 }
 0x578   : > { %v5485_v5 = vadd.f32 %v5484_v49, %v5235_v37  ;;  %v5237_v58 = vpop.f32.mrb[33].mxu1  ;;  %v14190_v49 = vsel %vm17244_vm7, %v6007_v61, 0.0  ;;  %v6008_v37 = vmul.f32 %v5954_v39, %v5738_v59  ;;  %v5740_v59 = vmax.f32 %v14101_v33, 0.0 }
 0x579   : > { %v5238_v63 = vpop.f32.mrb[34].mxu1  ;;  %v5492_v4 = vpop.f32.mrb[80].mxu0  ;;  %17245 = vst [vmem:[#allocation30_spill] sm:$0xff] %v14190_v49  ;;  %v5800_v58 = vmul.f32 0.5, %v14174_v0  ;;  %v6114_v39 = vadd.f32 %v6113_v21, %v14190_v49  ;;  %v5741_v33 = vmax.f32 %v14106_v41, 0.0 }
 0x57a   : > { %v5639_v50 = vadd.f32 %v5485_v5, %v17242_v42  ;;  %v5488_v30 = vadd.f32 %v5487_v53, %v5238_v63  ;;  %v5240_v22 = vpop.f32.mrb[35].mxu1  ;;  %v8717_v60 = vpop.f32.mrb[81].mxu0  ;;  %v17246_v53 = vld [vmem:[#allocation16_spill] sm:$0xff]  ;;  %v5956_v63 = vadd.f32 0.5, %v5902_v29  ;;  %v17247_v42 = vld [vmem:[#allocation10_spill] sm:$0xff] }
 0x57b   : > { %v5495_v62 = vpop.f32.mrb[82].mxu0  ;;  %v9060_v61 = vpop.eup %9059  ;;  %vm17248_vm5 = vcmp.eq.s32.totalorder %v17247_v42, 1  ;;  %v5957_v60 = vadd.f32 0.5, %v5903_v27  ;;  %9065 = vtanh.f32 %v5800_v58  ;;  %v17251_v58 = vld [vmem:[#allocation89_spill] sm:$0xff] }
 0x57c   : > { %v5640_v22 = vadd.f32 %v5488_v30, %v17246_v53  ;;  %v8718_v5 = vpop.f32.mrb[83].mxu0  ;;  %v14204_v9 = vsel %vm17248_vm5, %v6008_v37, 0.0  ;;  %9067 = vtanh.f32 %v5801_v40  ;;  %v5802_v30 = vmul.f32 0.5, %v14197_v25  ;;  %v17249_v37 = vld [vmem:[#allocation11_spill] sm:$0xff] }
 0x57d   : > { %v14209_v53 = vadd.f32 %v14038_v26, %v14154_v19  ;;  %v5905_v2 = vmul.f32 0.5, %v9060_v61  ;;  %v9062_v5 = vpop.eup %9061  ;;  %vm17250_vm8 = vcmp.eq.s32.totalorder %v17249_v37, 1  ;;  %v6010_v10 = vmul.f32 %v5956_v63, %v5740_v59 }
 0x57e   : > { %v14214_v27 = vsel %vm17250_vm8, %v6009_v1, 0.0  ;;  %v6115_v19 = vadd.f32 %v6114_v39, %v14204_v9  ;;  %v6011_v7 = vmul.f32 %v5957_v60, %v5741_v33  ;;  %9069 = vtanh.f32 %v5802_v30  ;;  %v17252_v1 = vld [vmem:[#allocation93_spill] sm:$0xff] }
 0x57f   : > { %v5243_v14 = vpop.f32.mrb[36].mxu1  ;;  %v5803_v41 = vmul.f32 0.5, %v14209_v53  ;;  %v14221_v61 = vadd.f32 %v14038_v26, %v14163_v16  ;;  %v5906_v39 = vmul.f32 0.5, %v9062_v5  ;;  %v14231_v30 = vadd.f32 %v14038_v26, %v5639_v50 }
 0x580   : > { %v5493_v21 = vadd.f32 %v5492_v4, %v5243_v14  ;;  %v5245_v31 = vpop.f32.mrb[37].mxu1  ;;  %v5958_v4 = vadd.f32 0.5, %v5904_v48  ;;  %v17253_v48 = vld [vmem:[#allocation12_spill] sm:$0xff]  ;;  %v5743_v16 = vmax.f32 %v14125_v46, 0.0 }
 0x581   : > { %v5246_v29 = vpop.f32.mrb[38].mxu1  ;;  %v5500_v38 = vpop.f32.mrb[84].mxu0  ;;  %vm17254_vm12 = vcmp.eq.s32.totalorder %v17253_v48, 1  ;;  %9071 = vtanh.f32 %v5803_v41  ;;  %v5960_v50 = vadd.f32 0.5, %v5906_v39  ;;  %v5805_v46 = vmul.f32 0.5, %v14231_v30 }
 0x582   : > { %v5641_v40 = vadd.f32 %v5493_v21, %v17251_v58  ;;  %v5496_v42 = vadd.f32 %v5495_v62, %v5246_v29  ;;  %v5248_v49 = vpop.f32.mrb[39].mxu1  ;;  %v8721_v14 = vpop.f32.mrb[85].mxu0  ;;  %v6116_v62 = vadd.f32 %v6115_v19, %v14214_v27  ;;  %v5959_v21 = vadd.f32 0.5, %v5905_v2 }
 0x583   : > { %v9064_v31 = vpop.eup %9063  ;;  %v5503_v63 = vpop.f32.mrb[86].mxu0  ;;  %v5742_v49 = vmax.f32 %v14114_v47, 0.0  ;;  %v14228_v33 = vsel %vm17254_vm12, %v6010_v10, 0.0  ;;  %v17256_v14 = vld [vmem:[#allocation13_spill] sm:$0xff]  ;;  %v5804_v47 = vmul.f32 0.5, %v14221_v61 }
 0x584   : > { %v5642_v59 = vadd.f32 %v5496_v42, %v17252_v1  ;;  %v8722_v60 = vpop.f32.mrb[87].mxu0  ;;  %17255 = vst [vmem:[#allocation32_spill] sm:$0xff] %v14228_v33  ;;  %v5907_v58 = vmul.f32 0.5, %v9064_v31  ;;  %vm17257_vm9 = vcmp.eq.s32.totalorder %v17256_v14, 1  ;;  %v6117_v10 = vadd.f32 %v6116_v62, %v14228_v33  ;;  %v17262_v33 = vld [vmem:[#allocation80_spill] sm:$0xff] }
 0x585   : > { %v6012_v29 = vmul.f32 %v5958_v4, %v5742_v49  ;;  %v14236_v19 = vsel %vm17257_vm9, %v6011_v7, 0.0  ;;  %v9066_v1 = vpop.eup %9065  ;;  %v6013_v60 = vmul.f32 %v5959_v21, %v5743_v16  ;;  %v14242_v31 = vadd.f32 %v14038_v26, %v5640_v22  ;;  %v17259_v49 = vld [vmem:[#allocation64_spill] sm:$0xff] }
 0x586   : > { %17258 = vst [vmem:[#allocation83_spill] sm:$0xff] %v14236_v19  ;;  %v9068_v4 = vpop.eup %9067  ;;  %v5744_v62 = vmax.f32 %v14146_v34, 0.0  ;;  %v5961_v21 = vadd.f32 0.5, %v5907_v58  ;;  %v5908_v16 = vmul.f32 0.5, %v9066_v1  ;;  %9073 = vtanh.f32 %v5804_v47 }
 0x587   : > { %v5251_v42 = vpop.f32.mrb[40].mxu1  ;;  %v14252_v22 = vadd.f32 %v14038_v26, %v5641_v40  ;;  %9075 = vtanh.f32 %v5805_v46  ;;  %v5806_v34 = vmul.f32 0.5, %v14242_v31  ;;  %v5746_v47 = vmax.f32 %v14174_v0, 0.0 }
 0x588   : > { %v5501_v2 = vadd.f32 %v5500_v38, %v5251_v42  ;;  %v5253_v5 = vpop.f32.mrb[41].mxu1  ;;  %v6118_v38 = vadd.f32 %v6117_v10, %v14236_v19  ;;  %v17260_v42 = vld [vmem:[#allocation14_spill] sm:$0xff]  ;;  %v5909_v10 = vmul.f32 0.5, %v9068_v4 }
 0x589   : > { %v5254_v48 = vpop.f32.mrb[42].mxu1  ;;  %v5508_v37 = vpop.f32.mrb[88].mxu0  ;;  %vm17261_vm1 = vcmp.eq.s32.totalorder %v17260_v42, 1  ;;  %v5807_v1 = vmul.f32 0.5, %v14252_v22  ;;  %9077 = vtanh.f32 %v5806_v34 }
 0x58a   : > { %v5643_v7 = vadd.f32 %v5501_v2, %v17259_v49  ;;  %v5504_v14 = vadd.f32 %v5503_v63, %v5254_v48  ;;  %v5256_v41 = vpop.f32.mrb[43].mxu1  ;;  %v14248_v5 = vsel %vm17261_vm1, %v6012_v29, 0.0  ;;  %v8725_v39 = vpop.f32.mrb[89].mxu0  ;;  %v6014_v48 = vmul.f32 %v5960_v50, %v5744_v62  ;;  %v17263_v29 = vld [vmem:[#allocation15_spill] sm:$0xff]  ;;  %v17265_v62 = vld [vmem:[#allocation17_spill] sm:$0xff] }
 0x58b   : > { %v5511_v63 = vpop.f32.mrb[90].mxu0  ;;  %v5745_v49 = vmax.f32 %v14151_v8, 0.0  ;;  %v9070_v42 = vpop.eup %9069  ;;  %vm17264_vm7 = vcmp.eq.s32.totalorder %v17263_v29, 1  ;;  %v6119_v58 = vadd.f32 %v6118_v38, %v14248_v5  ;;  %v14265_v8 = vadd.f32 %v14038_v26, %v5642_v59 }
 0x58c   : > { %v5644_v2 = vadd.f32 %v5504_v14, %v17262_v33  ;;  %v8726_v41 = vpop.f32.mrb[91].mxu0  ;;  %v14258_v19 = vsel %vm17264_vm7, %v6013_v60, 0.0  ;;  %v5962_v14 = vadd.f32 0.5, %v5908_v16  ;;  %vm17266_vm5 = vcmp.eq.s32.totalorder %v17265_v62, 1 }
 0x58d   : > { %v6015_v40 = vmul.f32 %v5961_v21, %v5745_v49  ;;  %v6120_v60 = vadd.f32 %v6119_v58, %v14258_v19  ;;  %v14270_v46 = vsel %vm17266_vm5, %v6014_v48, 0.0  ;;  %v5963_v39 = vadd.f32 0.5, %v5909_v10  ;;  %v9072_v49 = vpop.eup %9071 }
 0x58e   : > { %v5910_v38 = vmul.f32 0.5, %v9070_v42  ;;  %v14273_v0 = vadd.f32 %v14038_v26, %v5643_v7  ;;  %v5747_v48 = vmax.f32 %v14179_v54, 0.0  ;;  %v6016_v10 = vmul.f32 %v5962_v14, %v5746_v47 }
 0x58f   : > { %v5259_v33 = vpop.f32.mrb[44].mxu1  ;;  %9079 = vtanh.f32 %v5807_v1  ;;  %v5808_v42 = vmul.f32 0.5, %v14265_v8  ;;  %v6121_v62 = vadd.f32 %v6120_v60, %v14270_v46  ;;  %v5748_v47 = vmax.f32 %v14197_v25, 0.0 }
 0x590   : > { %v5509_v50 = vadd.f32 %v5508_v37, %v5259_v33  ;;  %v5261_v4 = vpop.f32.mrb[45].mxu1  ;;  %v17267_v33 = vld [vmem:[#allocation19_spill] sm:$0xff] }
 0x591   : > { %v5262_v21 = vpop.f32.mrb[46].mxu1  ;;  %v5516_v37 = vpop.f32.mrb[92].mxu0  ;;  %vm17268_vm8 = vcmp.eq.s32.totalorder %v17267_v33, 1  ;;  %v14286_v33 = vadd.f32 %v14038_v26, %v5644_v2  ;;  %9081 = vtanh.f32 %v5808_v42 }
 0x592   : > { %v5645_v16 = vadd.f32 %v5509_v50, %v13862_v44  ;;  %v5512_v59 = vadd.f32 %v5511_v63, %v5262_v21  ;;  %v5264_v41 = vpop.f32.mrb[47].mxu1  ;;  %v14278_v58 = vsel %vm17268_vm8, %v6015_v40, 0.0  ;;  %v8729_v4 = vpop.f32.mrb[93].mxu0  ;;  %v6017_v44 = vmul.f32 %v5963_v39, %v5747_v48 }
 0x593   : > { %v5519_v7 = vpop.f32.mrb[94].mxu0  ;;  %v5964_v63 = vadd.f32 0.5, %v5910_v38  ;;  %v5911_v50 = vmul.f32 0.5, %v9072_v49  ;;  %v9074_v41 = vpop.eup %9073  ;;  %v5809_v40 = vmul.f32 0.5, %v14273_v0  ;;  %v6122_v54 = vadd.f32 %v6121_v62, %v14278_v58  ;;  %v17271_v49 = vld [vmem:[#allocation22_spill] sm:$0xff] }
 0x594   : > { %v5646_v34 = vadd.f32 %v5512_v59, %v13865_v24  ;;  %v8730_v21 = vpop.f32.mrb[95].mxu0  ;;  %v9076_v1 = vpop.eup %9075  ;;  %v17269_v24 = vld [vmem:[#allocation20_spill] sm:$0xff]  ;;  %v14295_v60 = vadd.f32 %v14038_v26, %v5645_v16  ;;  %vm17272_vm9 = vcmp.eq.s32.totalorder %v17271_v49, 1  ;;  %v5912_v4 = vmul.f32 0.5, %v9074_v41 }
 0x595   : > { %vm17270_vm12 = vcmp.eq.s32.totalorder %v17269_v24, 1  ;;  %v14299_v2 = vsel %vm17272_vm9, %v6017_v44, 0.0  ;;  %v6018_v48 = vmul.f32 %v5964_v63, %v5748_v47  ;;  %v5965_v62 = vadd.f32 0.5, %v5911_v50  ;;  %v9078_v44 = vpop.eup %9077 }
 0x596   : > { %v14292_v59 = vsel %vm17270_vm12, %v6016_v10, 0.0  ;;  %9083 = vtanh.f32 %v5809_v40  ;;  %v5810_v21 = vmul.f32 0.5, %v14286_v33  ;;  %v5811_v63 = vmul.f32 0.5, %v14295_v60 }
 0x597   : > { %v5267_v14 = vpop.f32.mrb[48].mxu1  ;;  %v6123_v16 = vadd.f32 %v6122_v54, %v14292_v59  ;;  %v14307_v50 = vadd.f32 %v14038_v26, %v5646_v34  ;;  %v5966_v47 = vadd.f32 0.5, %v5912_v4  ;;  %v17273_v54 = vld [vmem:[#allocation24_spill] sm:$0xff]  ;;  %v5750_v34 = vmax.f32 %v14221_v61, 0.0 }
 0x598   : > { %v5517_v39 = vadd.f32 %v5516_v37, %v5267_v14  ;;  %v5269_v38 = vpop.f32.mrb[49].mxu1  ;;  %v5749_v37 = vmax.f32 %v14209_v53, 0.0  ;;  %v5913_v14 = vmul.f32 0.5, %v9076_v1  ;;  %vm17274_vm1 = vcmp.eq.s32.totalorder %v17273_v54, 1 }
 0x599   : > { %v5270_v25 = vpop.f32.mrb[50].mxu1  ;;  %v5524_v29 = vpop.f32.mrb[96].mxu0  ;;  %v14313_v53 = vsel %vm17274_vm1, %v6018_v48, 0.0  ;;  %9085 = vtanh.f32 %v5810_v21  ;;  %v17276_v48 = vld [vmem:[#allocation26_spill] sm:$0xff] }
 0x59a   : > { %v5647_v10 = vadd.f32 %v5517_v39, %v13873_v12  ;;  %v5520_v24 = vadd.f32 %v5519_v7, %v5270_v25  ;;  %v5272_v42 = vpop.f32.mrb[51].mxu1  ;;  %v8733_v38 = vpop.f32.mrb[97].mxu0  ;;  %v6124_v12 = vadd.f32 %v6123_v16, %v14299_v2  ;;  %v6019_v7 = vmul.f32 %v5965_v62, %v5749_v37  ;;  %17275 = vst [vmem:[#allocation105_spill] sm:$0xff] %v14313_v53 }
 0x59b   : > { %v5527_v40 = vpop.f32.mrb[98].mxu0  ;;  %v9080_v25 = vpop.eup %9079  ;;  %v5967_v42 = vadd.f32 0.5, %v5913_v14  ;;  %v5914_v38 = vmul.f32 0.5, %v9078_v44  ;;  %9087 = vtanh.f32 %v5811_v63  ;;  %v5812_v62 = vmul.f32 0.5, %v14307_v50 }
 0x59c   : > { %v5648_v41 = vadd.f32 %v5520_v24, %v13876_v18  ;;  %v8734_v39 = vpop.f32.mrb[99].mxu0  ;;  %v14316_v1 = vadd.f32 %v14038_v26, %v5647_v10  ;;  %v5751_v24 = vmax.f32 %v14231_v30, 0.0  ;;  %v6125_v37 = vadd.f32 %v6124_v12, %v14313_v53  ;;  %v9082_v61 = vpop.eup %9081 }
 0x59d   : > { %vm17277_vm7 = vcmp.eq.s32.totalorder %v17276_v48, 1  ;;  %v6020_v10 = vmul.f32 %v5966_v47, %v5750_v34  ;;  %v5915_v39 = vmul.f32 0.5, %v9080_v25  ;;  %v5968_v12 = vadd.f32 0.5, %v5914_v38  ;;  %v17280_v38 = vld [vmem:[#allocation29_spill] sm:$0xff] }
 0x59e   : > { %v14324_v21 = vsel %vm17277_vm7, %v6019_v7, 0.0  ;;  %v5813_v14 = vmul.f32 0.5, %v14316_v1  ;;  %v14328_v44 = vadd.f32 %v14038_v26, %v5648_v41  ;;  %9089 = vtanh.f32 %v5812_v62  ;;  %v17278_v41 = vld [vmem:[#allocation27_spill] sm:$0xff] }
 0x59f   : > { %v5275_v18 = vpop.f32.mrb[52].mxu1  ;;  %v6126_v7 = vadd.f32 %v6125_v37, %v14324_v21  ;;  %vm17279_vm5 = vcmp.eq.s32.totalorder %v17278_v41, 1  ;;  %vm17281_vm8 = vcmp.eq.s32.totalorder %v17280_v38, 1 }
 0x5a0   : > { %v5525_v4 = vadd.f32 %v5524_v29, %v5275_v18  ;;  %v5277_v16 = vpop.f32.mrb[53].mxu1  ;;  %v9084_v48 = vpop.eup %9083  ;;  %v14338_v53 = vsel %vm17279_vm5, %v6020_v10, 0.0  ;;  %9091 = vtanh.f32 %v5813_v14 }
 0x5a1   : > { %v5278_v54 = vpop.f32.mrb[54].mxu1  ;;  %v5532_v18 = vpop.f32.mrb[100].mxu0  ;;  %v6021_v16 = vmul.f32 %v5967_v42, %v5751_v24  ;;  %v6127_v10 = vadd.f32 %v6126_v7, %v14338_v53  ;;  %v17282_v7 = vld [vmem:[#allocation31_spill] sm:$0xff] }
 0x5a2   : > { %v5649_v30 = vadd.f32 %v5525_v4, %v13884_v13  ;;  %v5528_v63 = vadd.f32 %v5527_v40, %v5278_v54  ;;  %v5280_v29 = vpop.f32.mrb[55].mxu1  ;;  %v8737_v49 = vpop.f32.mrb[101].mxu0  ;;  %v5752_v13 = vmax.f32 %v14242_v31, 0.0  ;;  %v5969_v40 = vadd.f32 0.5, %v5915_v39 }
 0x5a3   : > { %v5535_v34 = vpop.f32.mrb[102].mxu0  ;;  %v5916_v54 = vmul.f32 0.5, %v9082_v61  ;;  %v5814_v49 = vmul.f32 0.5, %v14328_v44  ;;  %v14344_v24 = vsel %vm17281_vm8, %v6021_v16, 0.0  ;;  %v5917_v4 = vmul.f32 0.5, %v9084_v48 }
 0x5a4   : > { %v14333_v47 = vadd.f32 %v14038_v26, %v5649_v30  ;;  %v5650_v25 = vadd.f32 %v5528_v63, %v13887_v51  ;;  %v8738_v42 = vpop.f32.mrb[103].mxu0  ;;  %v6022_v62 = vmul.f32 %v5968_v12, %v5752_v13  ;;  %v5753_v51 = vmax.f32 %v14252_v22, 0.0  ;;  %v9086_v30 = vpop.eup %9085 }
 0x5a5   : > { %v5970_v29 = vadd.f32 0.5, %v5916_v54  ;;  %v9088_v16 = vpop.eup %9087  ;;  %v6128_v12 = vadd.f32 %v6127_v10, %v14344_v24  ;;  %9093 = vtanh.f32 %v5814_v49  ;;  %vm17283_vm12 = vcmp.eq.s32.totalorder %v17282_v7, 1  ;;  %v17284_v49 = vld [vmem:[#allocation33_spill] sm:$0xff] }
 0x5a6   : > { %v5815_v31 = vmul.f32 0.5, %v14333_v47  ;;  %v14350_v39 = vadd.f32 %v14038_v26, %v5650_v25  ;;  %v6023_v63 = vmul.f32 %v5969_v40, %v5753_v51  ;;  %v14356_v41 = vsel %vm17283_vm12, %v6022_v62, 0.0 }
 0x5a7   : > { %v5283_v37 = vpop.f32.mrb[56].mxu1  ;;  %v5754_v25 = vmax.f32 %v14265_v8, 0.0  ;;  %vm17285_vm9 = vcmp.eq.s32.totalorder %v17284_v49, 1  ;;  %v5919_v8 = vmul.f32 0.5, %v9088_v16 }
 0x5a8   : > { %v5533_v61 = vadd.f32 %v5532_v18, %v5283_v37  ;;  %v5285_v14 = vpop.f32.mrb[57].mxu1  ;;  %v5971_v18 = vadd.f32 0.5, %v5917_v4  ;;  %v5918_v37 = vmul.f32 0.5, %v9086_v30  ;;  %9095 = vtanh.f32 %v5815_v31  ;;  %v9090_v30 = vpop.eup %9089 }
 0x5a9   : > { %v5286_v42 = vpop.f32.mrb[58].mxu1  ;;  %v5540_v38 = vpop.f32.mrb[104].mxu0  ;;  %v5816_v54 = vmul.f32 0.5, %v14350_v39  ;;  %v14366_v10 = vsel %vm17285_vm9, %v6023_v63, 0.0  ;;  %v6024_v62 = vmul.f32 %v5970_v29, %v5754_v25  ;;  %v6129_v31 = vadd.f32 %v6128_v12, %v14356_v41 }
 0x5aa   : > { %v5651_v22 = vadd.f32 %v5533_v61, %v13895_v43  ;;  %v5536_v48 = vadd.f32 %v5535_v34, %v5286_v42  ;;  %v5288_v13 = vpop.f32.mrb[59].mxu1  ;;  %v8741_v40 = vpop.f32.mrb[105].mxu0  ;;  %v5755_v61 = vmax.f32 %v14273_v0, 0.0  ;;  %v17286_v0 = vld [vmem:[#allocation34_spill] sm:$0xff]  ;;  %v5756_v12 = vmax.f32 %v14286_v33, 0.0 }
 0x5ab   : > { %v5543_v34 = vpop.f32.mrb[106].mxu0  ;;  %v9092_v13 = vpop.eup %9091  ;;  %v6130_v63 = vadd.f32 %v6129_v31, %v14366_v10  ;;  %9097 = vtanh.f32 %v5816_v54  ;;  %vm17287_vm1 = vcmp.eq.s32.totalorder %v17286_v0, 1  ;;  %v5973_v40 = vadd.f32 0.5, %v5919_v8  ;;  %v17288_v54 = vld [vmem:[#allocation36_spill] sm:$0xff] }
 0x5ac   : > { %v14361_v51 = vadd.f32 %v14038_v26, %v5651_v22  ;;  %v5652_v43 = vadd.f32 %v5536_v48, %v13898_v57  ;;  %v8742_v4 = vpop.f32.mrb[107].mxu0  ;;  %v6025_v22 = vmul.f32 %v5971_v18, %v5755_v61  ;;  %v5972_v57 = vadd.f32 0.5, %v5918_v37 }
 0x5ad   : > { %v14377_v16 = vsel %vm17287_vm1, %v6024_v62, 0.0  ;;  %v5920_v4 = vmul.f32 0.5, %v9090_v30  ;;  %vm17289_vm7 = vcmp.eq.s32.totalorder %v17288_v54, 1  ;;  %v5757_v62 = vmax.f32 %v14295_v60, 0.0 }
 0x5ae   : > { %v5817_v14 = vmul.f32 0.5, %v14361_v51  ;;  %v14372_v42 = vadd.f32 %v14038_v26, %v5652_v43  ;;  %v6131_v30 = vadd.f32 %v6130_v63, %v14377_v16 }
 0x5af   : > { %v5291_v48 = vpop.f32.mrb[60].mxu1  ;;  %v9094_v8 = vpop.eup %9093 }
 0x5b0   : > { %v5541_v29 = vadd.f32 %v5540_v38, %v5291_v48  ;;  %v5293_v25 = vpop.f32.mrb[61].mxu1  ;;  %9099 = vtanh.f32 %v5817_v14  ;;  %v5818_v18 = vmul.f32 0.5, %v14372_v42  ;;  %v14384_v38 = vsel %vm17289_vm7, %v6025_v22, 0.0 }
 0x5b1   : > { %v5294_v49 = vpop.f32.mrb[62].mxu1  ;;  %v5548_v31 = vpop.f32.mrb[108].mxu0  ;;  %17290 = vst [vmem:[#allocation48_spill] sm:$0xff] %v14384_v38  ;;  %v6026_v48 = vmul.f32 %v5972_v57, %v5756_v12  ;;  %v5921_v25 = vmul.f32 0.5, %v9092_v13  ;;  %v6132_v22 = vadd.f32 %v6131_v30, %v14384_v38  ;;  %v17291_v13 = vld [vmem:[#allocation38_spill] sm:$0xff]  ;;  %v5758_v12 = vmax.f32 %v14307_v50, 0.0 }
 0x5b2   : > { %v5653_v37 = vadd.f32 %v5541_v29, %v13906_v32  ;;  %v5544_v43 = vadd.f32 %v5543_v34, %v5294_v49  ;;  %v5296_v61 = vpop.f32.mrb[63].mxu1  ;;  %v8745_v33 = vpop.f32.mrb[109].mxu0  ;;  %v6027_v49 = vmul.f32 %v5973_v40, %v5757_v62  ;;  %v5974_v29 = vadd.f32 0.5, %v5920_v4 }
 0x5b3   : > { %v5551_v34 = vpop.f32.mrb[110].mxu0  ;;  %v9096_v54 = vpop.eup %9095  ;;  %9101 = vtanh.f32 %v5818_v18  ;;  %vm17292_vm5 = vcmp.eq.s32.totalorder %v17291_v13, 1  ;;  %v17293_v18 = vld [vmem:[#allocation40_spill] sm:$0xff] }
 0x5b4   : > { %v14389_v14 = vadd.f32 %v14038_v26, %v5653_v37  ;;  %v5654_v32 = vadd.f32 %v5544_v43, %v13909_v11  ;;  %v8746_v61 = vpop.f32.mrb[111].mxu0  ;;  %v14399_v63 = vsel %vm17292_vm5, %v6026_v48, 0.0  ;;  %v5975_v11 = vadd.f32 0.5, %v5921_v25 }
 0x5b5   : > { %v5922_v37 = vmul.f32 0.5, %v9094_v8  ;;  %vm17294_vm8 = vcmp.eq.s32.totalorder %v17293_v18, 1  ;;  %v6028_v30 = vmul.f32 %v5974_v29, %v5758_v12  ;;  %v5923_v61 = vmul.f32 0.5, %v9096_v54  ;;  %v9098_v13 = vpop.eup %9097  ;;  %v17295_v12 = vld [vmem:[#allocation41_spill] sm:$0xff] }
 0x5b6   : > { %v5819_v60 = vmul.f32 0.5, %v14389_v14  ;;  %v14395_v57 = vadd.f32 %v14038_v26, %v5654_v32  ;;  %v14405_v33 = vsel %vm17294_vm8, %v6027_v49, 0.0  ;;  %v5759_v32 = vmax.f32 %v14316_v1, 0.0 }
 0x5b7   : > { %v5299_v40 = vpop.f32.mrb[64].mxu1  ;;  %v6133_v50 = vadd.f32 %v6132_v22, %v14399_v63  ;;  %vm17296_vm12 = vcmp.eq.s32.totalorder %v17295_v12, 1 }
 0x5b8   : > { %9103 = vtanh.f32 %v5819_v60  ;;  %v5820_v4 = vmul.f32 0.5, %v14395_v57  ;;  %v5549_v43 = vadd.f32 %v5548_v31, %v5299_v40  ;;  %v5301_v62 = vpop.f32.mrb[65].mxu1  ;;  %v6029_v38 = vmul.f32 %v5975_v11, %v5759_v32 }
 0x5b9   : > { %v5302_v48 = vpop.f32.mrb[66].mxu1  ;;  %v5556_v0 = vpop.f32.mrb[112].mxu0  ;;  %v5976_v31 = vadd.f32 0.5, %v5922_v37  ;;  %v6134_v49 = vadd.f32 %v6133_v50, %v14405_v33  ;;  %v14417_v22 = vsel %vm17296_vm12, %v6028_v30, 0.0  ;;  %v5924_v11 = vmul.f32 0.5, %v9098_v13 }
 0x5ba   : > { %v5655_v25 = vadd.f32 %v5549_v43, %v13917_v36  ;;  %v5552_v8 = vadd.f32 %v5551_v34, %v5302_v48  ;;  %v5304_v60 = vpop.f32.mrb[67].mxu1  ;;  %v8749_v40 = vpop.f32.mrb[113].mxu0  ;;  %9105 = vtanh.f32 %v5820_v4  ;;  %v5760_v36 = vmax.f32 %v14328_v44, 0.0  ;;  %v17297_v4 = vld [vmem:[#allocation43_spill] sm:$0xff] }
 0x5bb   : > { %v9100_v62 = vpop.eup %9099  ;;  %v5559_v54 = vpop.f32.mrb[114].mxu0  ;;  %v5977_v34 = vadd.f32 0.5, %v5923_v61  ;;  %vm17298_vm9 = vcmp.eq.s32.totalorder %v17297_v4, 1  ;;  %v5761_v50 = vmax.f32 %v14333_v47, 0.0  ;;  %v6135_v44 = vadd.f32 %v6134_v49, %v14417_v22  ;;  %v17299_v4 = vld [vmem:[#allocation44_spill] sm:$0xff] }
 0x5bc   : > { %v14412_v29 = vadd.f32 %v14038_v26, %v5655_v25  ;;  %v5656_v1 = vadd.f32 %v5552_v8, %v13920_v6  ;;  %v8750_v37 = vpop.f32.mrb[115].mxu0  ;;  %v14426_v48 = vsel %vm17298_vm9, %v6029_v38, 0.0  ;;  %v6030_v6 = vmul.f32 %v5976_v31, %v5760_v36 }
 0x5bd   : > { %v5925_v25 = vmul.f32 0.5, %v9100_v62  ;;  %v9102_v8 = vpop.eup %9101  ;;  %v6031_v40 = vmul.f32 %v5977_v34, %v5761_v50  ;;  %v6136_v38 = vadd.f32 %v6135_v44, %v14426_v48  ;;  %vm17300_vm1 = vcmp.eq.s32.totalorder %v17299_v4, 1  ;;  %v17307_v4 = vld [vmem:[#allocation49_spill] sm:$0xff] }
 0x5be   : > { %v5821_v43 = vmul.f32 0.5, %v14412_v29  ;;  %v14422_v32 = vadd.f32 %v14038_v26, %v5656_v1  ;;  %v5978_v1 = vadd.f32 0.5, %v5924_v11  ;;  %v14435_v49 = vsel %vm17300_vm1, %v6030_v6, 0.0 }
 0x5bf   : > { %v5307_v30 = vpop.f32.mrb[68].mxu1  ;;  %vm17308_vm8 = vcmp.eq.s32.totalorder %v17307_v4, 1 }
 0x5c0   : > { %9107 = vtanh.f32 %v5821_v43  ;;  %v5822_v13 = vmul.f32 0.5, %v14422_v32  ;;  %v5557_v61 = vadd.f32 %v5556_v0, %v5307_v30  ;;  %v5309_v60 = vpop.f32.mrb[69].mxu1  ;;  %v5762_v43 = vmax.f32 %v14350_v39, 0.0 }
 0x5c1   : > { %v5310_v37 = vpop.f32.mrb[70].mxu1  ;;  %v5564_v36 = vpop.f32.mrb[116].mxu0  ;;  %v5979_v0 = vadd.f32 0.5, %v5925_v25  ;;  %v5926_v30 = vmul.f32 0.5, %v9102_v8  ;;  %v6137_v39 = vadd.f32 %v6136_v38, %v14435_v49  ;;  %v5764_v38 = vmax.f32 %v14372_v42, 0.0 }
 0x5c2   : > { %v9104_v12 = vpop.eup %9103  ;;  %9109 = vtanh.f32 %v5822_v13  ;;  %v5657_v31 = vadd.f32 %v5557_v61, %v13928_v3  ;;  %v5560_v47 = vadd.f32 %v5559_v54, %v5310_v37  ;;  %v5312_v62 = vpop.f32.mrb[71].mxu1  ;;  %v17301_v13 = vld [vmem:[#allocation45_spill] sm:$0xff]  ;;  %v6032_v54 = vmul.f32 %v5978_v1, %v5762_v43 }
 0x5c3   : > { %v8753_v34 = vpop.f32.mrb[117].mxu0  ;;  %vm17302_vm7 = vcmp.eq.s32.totalorder %v17301_v13, 1  ;;  %v5763_v61 = vmax.f32 %v14361_v51, 0.0  ;;  %v5927_v6 = vmul.f32 0.5, %v9104_v12  ;;  %v17303_v12 = vld [vmem:[#allocation47_spill] sm:$0xff] }
 0x5c4   : > { %v14439_v11 = vadd.f32 %v14038_v26, %v5657_v31  ;;  %v5658_v50 = vadd.f32 %v5560_v47, %v13931_v23  ;;  %v5567_v44 = vpop.f32.mrb[118].mxu0  ;;  %v14444_v3 = vsel %vm17302_vm7, %v6031_v40, 0.0  ;;  %v9106_v37 = vpop.eup %9105  ;;  %v5980_v23 = vadd.f32 0.5, %v5926_v30 }
 0x5c5   : > { %v8754_v60 = vpop.f32.mrb[119].mxu0  ;;  %v6033_v31 = vmul.f32 %v5979_v0, %v5763_v61  ;;  %v6138_v62 = vadd.f32 %v6137_v39, %v14444_v3  ;;  %vm17304_vm5 = vcmp.eq.s32.totalorder %v17303_v12, 1  ;;  %v5981_v34 = vadd.f32 0.5, %v5927_v6  ;;  %v17306_v0 = vld [vmem:[#allocation79_spill] sm:$0xff] }
 0x5c6   : > { %v5823_v25 = vmul.f32 0.5, %v14439_v11  ;;  %v14450_v8 = vadd.f32 %v14038_v26, %v5658_v50  ;;  %v14456_v43 = vsel %vm17304_vm5, %v6032_v54, 0.0  ;;  %v5928_v60 = vmul.f32 0.5, %v9106_v37 }
 0x5c7   : > { %v5315_v47 = vpop.f32.mrb[72].mxu1  ;;  %17305 = vst [vmem:[#allocation84_spill] sm:$0xff] %v14456_v43  ;;  %v5765_v54 = vmax.f32 %v14389_v14, 0.0  ;;  %v6139_v6 = vadd.f32 %v6138_v62, %v14456_v43  ;;  %v5766_v62 = vmax.f32 %v14395_v57, 0.0 }
 0x5c8   : > { %9111 = vtanh.f32 %v5823_v25  ;;  %v5824_v40 = vmul.f32 0.5, %v14450_v8  ;;  %v5565_v1 = vadd.f32 %v5564_v36, %v5315_v47  ;;  %v5317_v51 = vpop.f32.mrb[73].mxu1  ;;  %v14462_v36 = vsel %vm17308_vm8, %v6033_v31, 0.0 }
 0x5c9   : > { %v5318_v50 = vpop.f32.mrb[74].mxu1  ;;  %v5572_v25 = vpop.f32.mrb[120].mxu0  ;;  %17309 = vst [vmem:[#allocation57_spill] sm:$0xff] %v14462_v36  ;;  %v6034_v47 = vmul.f32 %v5980_v23, %v5764_v38  ;;  %v6140_v31 = vadd.f32 %v6139_v6, %v14462_v36  ;;  %v17313_v6 = vld [vmem:[#allocation52_spill] sm:$0xff] }
 0x5ca   : > { %v9108_v13 = vpop.eup %9107  ;;  %9113 = vtanh.f32 %v5824_v40  ;;  %v5659_v30 = vadd.f32 %v5565_v1, %v17306_v0  ;;  %v5568_v61 = vadd.f32 %v5567_v44, %v5318_v50  ;;  %v5320_v39 = vpop.f32.mrb[75].mxu1  ;;  %v17310_v40 = vld [vmem:[#allocation102_spill] sm:$0xff]  ;;  %v6035_v50 = vmul.f32 %v5981_v34, %v5765_v54 }
 0x5cb   : > { %v5929_v51 = vmul.f32 0.5, %v9108_v13  ;;  %v8757_v12 = vpop.f32.mrb[121].mxu0  ;;  %v5982_v0 = vadd.f32 0.5, %v5928_v60  ;;  %v17311_v13 = vld [vmem:[#allocation50_spill] sm:$0xff]  ;;  %vm17314_vm9 = vcmp.eq.s32.totalorder %v17313_v6, 1 }
 0x5cc   : > { %v9110_v42 = vpop.eup %9109  ;;  %v14467_v37 = vadd.f32 %v14038_v26, %v5659_v30  ;;  %v5660_v1 = vadd.f32 %v5568_v61, %v17310_v40  ;;  %v5575_v44 = vpop.f32.mrb[122].mxu0  ;;  %vm17312_vm12 = vcmp.eq.s32.totalorder %v17311_v13, 1  ;;  %v14483_v40 = vsel %vm17314_vm9, %v6035_v50, 0.0 }
 0x5cd   : > { %v8758_v39 = vpop.f32.mrb[123].mxu0  ;;  %v14477_v12 = vsel %vm17312_vm12, %v6034_v47, 0.0  ;;  %v5983_v38 = vadd.f32 0.5, %v5929_v51  ;;  %v5930_v30 = vmul.f32 0.5, %v9110_v42 }
 0x5ce   : > { %v5825_v23 = vmul.f32 0.5, %v14467_v37  ;;  %v14473_v14 = vadd.f32 %v14038_v26, %v5660_v1  ;;  %v6036_v1 = vmul.f32 %v5982_v0, %v5766_v62  ;;  %v5767_v39 = vmax.f32 %v14412_v29, 0.0  ;;  %v17315_v29 = vld [vmem:[#allocation110_spill] sm:$0xff] }
 0x5cf   : > { %v5323_v61 = vpop.f32.mrb[76].mxu1  ;;  %v6141_v4 = vadd.f32 %v6140_v31, %v14477_v12 }
 0x5d0   : > { %9115 = vtanh.f32 %v5825_v23  ;;  %v5826_v34 = vmul.f32 0.5, %v14473_v14  ;;  %v5573_v60 = vadd.f32 %v5572_v25, %v5323_v61  ;;  %v5325_v54 = vpop.f32.mrb[77].mxu1  ;;  %v6037_v36 = vmul.f32 %v5983_v38, %v5767_v39 }
 0x5d1   : > { %v5326_v13 = vpop.f32.mrb[78].mxu1  ;;  %v5580_v23 = vpop.f32.mrb[124].mxu0  ;;  %v5984_v25 = vadd.f32 0.5, %v5930_v30  ;;  %v6142_v50 = vadd.f32 %v6141_v4, %v14483_v40  ;;  %v17317_v4 = vld [vmem:[#allocation56_spill] sm:$0xff] }
 0x5d2   : > { %v9112_v47 = vpop.eup %9111  ;;  %9117 = vtanh.f32 %v5826_v34  ;;  %v5661_v57 = vadd.f32 %v5573_v60, %v13950_v15  ;;  %v5576_v51 = vadd.f32 %v5575_v44, %v5326_v13  ;;  %v5328_v42 = vpop.f32.mrb[79].mxu1  ;;  %v14495_v34 = vsel %vm1525_vm14, %v6036_v1, 0.0 }
 0x5d3   : > { %v5931_v61 = vmul.f32 0.5, %v9112_v47  ;;  %v8761_v54 = vpop.f32.mrb[125].mxu0  ;;  %v5768_v15 = vmax.f32 %v14422_v32, 0.0  ;;  %vm17318_vm1 = vcmp.eq.s32.totalorder %v17317_v4, 1  ;;  %v6143_v1 = vadd.f32 %v6142_v50, %v14495_v34  ;;  %v17319_v4 = vld [vmem:[#allocation58_spill] sm:$0xff] }
 0x5d4   : > { %v9114_v6 = vpop.eup %9113  ;;  %v14490_v0 = vadd.f32 %v14038_v26, %v5661_v57  ;;  %v5662_v62 = vadd.f32 %v5576_v51, %v17315_v29  ;;  %v5583_v43 = vpop.f32.mrb[126].mxu0  ;;  %v14504_v39 = vsel %vm17318_vm1, %v6037_v36, 0.0  ;;  %v5769_v57 = vmax.f32 %v14439_v11, 0.0 }
 0x5d5   : > { %v5985_v44 = vadd.f32 0.5, %v5931_v61  ;;  %v5932_v13 = vmul.f32 0.5, %v9114_v6  ;;  %v8762_v38 = vpop.f32.mrb[127].mxu0  ;;  %v6038_v47 = vmul.f32 %v5984_v25, %v5768_v15  ;;  %vm17320_vm7 = vcmp.eq.s32.totalorder %v17319_v4, 1 }
 0x5d6   : > { %v5827_v30 = vmul.f32 0.5, %v14490_v0  ;;  %v14500_v60 = vadd.f32 %v14038_v26, %v5662_v62  ;;  %v6144_v38 = vadd.f32 %v6143_v1, %v14504_v39 }
 0x5d7   : > { %v5331_v51 = vpop.f32.mrb[80].mxu1  ;;  %v6039_v61 = vmul.f32 %v5985_v44, %v5769_v57  ;;  %v5986_v54 = vadd.f32 0.5, %v5932_v13  ;;  %v14513_v50 = vsel %vm17320_vm7, %v6038_v47, 0.0  ;;  %v5771_v13 = vmax.f32 %v14467_v37, 0.0 }
 0x5d8   : > { %9119 = vtanh.f32 %v5827_v30  ;;  %v5828_v32 = vmul.f32 0.5, %v14500_v60  ;;  %v5581_v6 = vadd.f32 %v5580_v23, %v5331_v51  ;;  %v5333_v42 = vpop.f32.mrb[81].mxu1  ;;  %v5770_v30 = vmax.f32 %v14450_v8, 0.0 }
 0x5d9   : > { %v5334_v29 = vpop.f32.mrb[82].mxu1  ;;  %v5588_v11 = vpop.f32.mrb[128].mxu0  ;;  %v6145_v8 = vadd.f32 %v6144_v38, %v14513_v50  ;;  %v5772_v38 = vmax.f32 %v14473_v14, 0.0 }
 0x5da   : > { %v9116_v62 = vpop.eup %9115  ;;  %9121 = vtanh.f32 %v5828_v32  ;;  %v5663_v36 = vadd.f32 %v5581_v6, %v13968_v56  ;;  %v5584_v25 = vadd.f32 %v5583_v43, %v5334_v29  ;;  %v5336_v15 = vpop.f32.mrb[83].mxu1  ;;  %v17321_v43 = vld [vmem:[#allocation60_spill] sm:$0xff]  ;;  %v6040_v6 = vmul.f32 %v5986_v54, %v5770_v30  ;;  %v17323_v30 = vld [vmem:[#allocation61_spill] sm:$0xff] }
 0x5db   : > { %v5933_v23 = vmul.f32 0.5, %v9116_v62  ;;  %v8765_v51 = vpop.f32.mrb[129].mxu0  ;;  %vm17322_vm5 = vcmp.eq.s32.totalorder %v17321_v43, 1  ;;  %vm17324_vm8 = vcmp.eq.s32.totalorder %v17323_v30, 1 }
 0x5dc   : > { %v9118_v44 = vpop.eup %9117  ;;  %v14518_v57 = vadd.f32 %v14038_v26, %v5663_v36  ;;  %v5664_v1 = vadd.f32 %v5584_v25, %v13971_v17  ;;  %v5591_v56 = vpop.f32.mrb[130].mxu0  ;;  %v14523_v32 = vsel %vm17322_vm5, %v6039_v61, 0.0 }
 0x5dd   : > { %v5987_v47 = vadd.f32 0.5, %v5933_v23  ;;  %v5934_v42 = vmul.f32 0.5, %v9118_v44  ;;  %v8766_v29 = vpop.f32.mrb[131].mxu0  ;;  %v6146_v17 = vadd.f32 %v6145_v8, %v14523_v32  ;;  %v14534_v23 = vsel %vm17324_vm8, %v6040_v6, 0.0  ;;  %v17325_v8 = vld [vmem:[#allocation63_spill] sm:$0xff] }
 0x5de   : > { %v5829_v62 = vmul.f32 0.5, %v14518_v57  ;;  %v14528_v37 = vadd.f32 %v14038_v26, %v5664_v1  ;;  %vm17326_vm12 = vcmp.eq.s32.totalorder %v17325_v8, 1 }
 0x5df   : > { %v6041_v36 = vmul.f32 %v5987_v47, %v5771_v13  ;;  %v5988_v15 = vadd.f32 0.5, %v5934_v42  ;;  %v5339_v51 = vpop.f32.mrb[84].mxu1  ;;  %v6147_v6 = vadd.f32 %v6146_v17, %v14534_v23 }
 0x5e0   : > { %9123 = vtanh.f32 %v5829_v62  ;;  %v5830_v61 = vmul.f32 0.5, %v14528_v37  ;;  %v5589_v25 = vadd.f32 %v5588_v11, %v5339_v51  ;;  %v5341_v54 = vpop.f32.mrb[85].mxu1 }
 0x5e1   : > { %v5342_v44 = vpop.f32.mrb[86].mxu1  ;;  %v5596_v42 = vpop.f32.mrb[132].mxu0  ;;  %v14540_v62 = vsel %vm17326_vm12, %v6041_v36, 0.0  ;;  %v6042_v11 = vmul.f32 %v5988_v15, %v5772_v38 }
 0x5e2   : > { %v9120_v29 = vpop.eup %9119  ;;  %9125 = vtanh.f32 %v5830_v61  ;;  %v5665_v13 = vadd.f32 %v5589_v25, %v13980_v28  ;;  %v5592_v1 = vadd.f32 %v5591_v56, %v5342_v44  ;;  %v5344_v47 = vpop.f32.mrb[87].mxu1  ;;  %17327 = vst [vmem:[#allocation28_spill] sm:$0xff] %v14540_v62  ;;  %v5773_v28 = vmax.f32 %v14490_v0, 0.0 }
 0x5e3   : > { %v5935_v51 = vmul.f32 0.5, %v9120_v29  ;;  %v8769_v54 = vpop.f32.mrb[133].mxu0  ;;  %v6148_v36 = vadd.f32 %v6147_v6, %v14540_v62  ;;  %v17328_v29 = vld [vmem:[#allocation65_spill] sm:$0xff] }
 0x5e4   : > { %v9122_v30 = vpop.eup %9121  ;;  %v14544_v14 = vadd.f32 %v14038_v26, %v5665_v13  ;;  %v5666_v61 = vadd.f32 %v5592_v1, %v13985_v45  ;;  %v5599_v43 = vpop.f32.mrb[134].mxu0  ;;  %vm17329_vm9 = vcmp.eq.s32.totalorder %v17328_v29, 1  ;;  %v5774_v45 = vmax.f32 %v14500_v60, 0.0  ;;  %v17330_v54 = vld [vmem:[#allocation67_spill] sm:$0xff] }
 0x5e5   : > { %v5989_v56 = vadd.f32 0.5, %v5935_v51  ;;  %v5936_v25 = vmul.f32 0.5, %v9122_v30  ;;  %v8770_v44 = vpop.f32.mrb[135].mxu0  ;;  %v14555_v17 = vsel %vm17329_vm9, %v6042_v11, 0.0  ;;  %vm17331_vm1 = vcmp.eq.s32.totalorder %v17330_v54, 1  ;;  %v17338_v54 = vld [vmem:[#allocation71_spill] sm:$0xff] }
 0x5e6   : > { %v5831_v15 = vmul.f32 0.5, %v14544_v14  ;;  %v14551_v38 = vadd.f32 %v14038_v26, %v5666_v61  ;;  %v6149_v11 = vadd.f32 %v6148_v36, %v14555_v17  ;;  %vm17339_vm12 = vcmp.eq.s32.totalorder %v17338_v54, 1 }
 0x5e7   : > { %v6043_v13 = vmul.f32 %v5989_v56, %v5773_v28  ;;  %v5990_v1 = vadd.f32 0.5, %v5936_v25  ;;  %v5347_v47 = vpop.f32.mrb[88].mxu1 }
 0x5e8   : > { %9127 = vtanh.f32 %v5831_v15  ;;  %v5832_v0 = vmul.f32 0.5, %v14551_v38  ;;  %v5597_v30 = vadd.f32 %v5596_v42, %v5347_v47  ;;  %v5349_v51 = vpop.f32.mrb[89].mxu1 }
 0x5e9   : > { %v14561_v6 = vsel %vm17331_vm1, %v6043_v13, 0.0  ;;  %v6044_v61 = vmul.f32 %v5990_v1, %v5774_v45  ;;  %v5350_v44 = vpop.f32.mrb[90].mxu1  ;;  %v5604_v25 = vpop.f32.mrb[136].mxu0  ;;  %v17332_v1 = vld [vmem:[#allocation68_spill] sm:$0xff] }
 0x5ea   : > { %v9124_v8 = vpop.eup %9123  ;;  %9129 = vtanh.f32 %v5832_v0  ;;  %v5667_v28 = vadd.f32 %v5597_v30, %v13993_v35  ;;  %v5600_v60 = vadd.f32 %v5599_v43, %v5350_v44  ;;  %v5352_v56 = vpop.f32.mrb[91].mxu1  ;;  %v6150_v42 = vadd.f32 %v6149_v11, %v14561_v6 }
 0x5eb   : > { %v5937_v15 = vmul.f32 0.5, %v9124_v8  ;;  %v8773_v29 = vpop.f32.mrb[137].mxu0  ;;  %vm17333_vm7 = vcmp.eq.s32.totalorder %v17332_v1, 1  ;;  %v5775_v35 = vmax.f32 %v14518_v57, 0.0  ;;  %v5776_v44 = vmax.f32 %v14528_v37, 0.0  ;;  %v17334_v56 = vld [vmem:[#allocation69_spill] sm:$0xff] }
 0x5ec   : > { %v9126_v62 = vpop.eup %9125  ;;  %v14567_v47 = vadd.f32 %v14038_v26, %v5667_v28  ;;  %v5668_v13 = vadd.f32 %v5600_v60, %v13998_v55  ;;  %v5607_v45 = vpop.f32.mrb[138].mxu0  ;;  %v14572_v36 = vsel %vm17333_vm7, %v6044_v61, 0.0  ;;  %vm17335_vm5 = vcmp.eq.s32.totalorder %v17334_v56, 1 }
 0x5ed   : > { %v5991_v43 = vadd.f32 0.5, %v5937_v15  ;;  %v5938_v0 = vmul.f32 0.5, %v9126_v62  ;;  %v8774_v30 = vpop.f32.mrb[139].mxu0  ;;  %v6151_v28 = vadd.f32 %v6150_v42, %v14572_v36 }
 0x5ee   : > { %v5833_v8 = vmul.f32 0.5, %v14567_v47  ;;  %v14577_v29 = vadd.f32 %v14038_v26, %v5668_v13 }
 0x5ef   : > { %v6045_v51 = vmul.f32 %v5991_v43, %v5775_v35  ;;  %v5992_v11 = vadd.f32 0.5, %v5938_v0  ;;  %v5355_v55 = vpop.f32.mrb[92].mxu1 }
 0x5f0   : > { %9131 = vtanh.f32 %v5833_v8  ;;  %v5834_v61 = vmul.f32 0.5, %v14577_v29  ;;  %v5605_v60 = vadd.f32 %v5604_v25, %v5355_v55  ;;  %v5357_v57 = vpop.f32.mrb[93].mxu1  ;;  %v17336_v8 = vld [vmem:[#allocation70_spill] sm:$0xff] }
 0x5f1   : > { %v14584_v62 = vsel %vm17335_vm5, %v6045_v51, 0.0  ;;  %v6046_v15 = vmul.f32 %v5992_v11, %v5776_v44  ;;  %v5358_v30 = vpop.f32.mrb[94].mxu1  ;;  %v5612_v42 = vpop.f32.mrb[140].mxu0  ;;  %vm17337_vm8 = vcmp.eq.s32.totalorder %v17336_v8, 1 }
 0x5f2   : > { %v9128_v13 = vpop.eup %9127  ;;  %v6152_v35 = vadd.f32 %v6151_v28, %v14584_v62  ;;  %9133 = vtanh.f32 %v5834_v61  ;;  %v5669_v37 = vadd.f32 %v5605_v60, %v14008_v20  ;;  %v5608_v43 = vadd.f32 %v5607_v45, %v5358_v30  ;;  %v5360_v0 = vpop.f32.mrb[95].mxu1 }
 0x5f3   : > { %v14590_v1 = vsel %vm17337_vm8, %v6046_v15, 0.0  ;;  %v5939_v25 = vmul.f32 0.5, %v9128_v13  ;;  %v8777_v55 = vpop.f32.mrb[141].mxu0  ;;  %v5777_v61 = vmax.f32 %v14544_v14, 0.0  ;;  %v5778_v13 = vmax.f32 %v14551_v38, 0.0 }
 0x5f4   : > { %v9130_v57 = vpop.eup %9129  ;;  %v6153_v51 = vadd.f32 %v6152_v35, %v14590_v1  ;;  %v5727_v44 = vadd.f32 %v14038_v26, %v5669_v37  ;;  %v5670_v11 = vadd.f32 %v5608_v43, %v14013_v52  ;;  %v5615_v28 = vpop.f32.mrb[142].mxu0 }
 0x5f5   : > { %v5993_v20 = vadd.f32 0.5, %v5939_v25  ;;  %v5940_v45 = vmul.f32 0.5, %v9130_v57  ;;  %v8778_v60 = vpop.f32.mrb[143].mxu0 }
 0x5f6   : > { %v5835_v30 = vmul.f32 0.5, %v5727_v44  ;;  %v5728_v0 = vadd.f32 %v14038_v26, %v5670_v11  ;;  %v17340_v11 = vld [vmem:[#allocation66_spill] sm:$0xff] }
 0x5f7   : > { %v6047_v15 = vmul.f32 %v5993_v20, %v5777_v61  ;;  %v5994_v55 = vadd.f32 0.5, %v5940_v45  ;;  %v5363_v8 = vpop.f32.mrb[96].mxu1  ;;  %v17341_v45 = vld [vmem:[#allocation72_spill] sm:$0xff] }
 0x5f8   : > { %9135 = vtanh.f32 %v5835_v30  ;;  %v5836_v35 = vmul.f32 0.5, %v5728_v0  ;;  %v5613_v56 = vadd.f32 %v5612_v42, %v5363_v8  ;;  %v5365_v37 = vpop.f32.mrb[97].mxu1  ;;  %vm17342_vm9 = vcmp.eq.s32.totalorder %v17341_v45, 1 }
 0x5f9   : > { %v14600_v52 = vsel %vm17339_vm12, %v6047_v15, 0.0  ;;  %v6048_v14 = vmul.f32 %v5994_v55, %v5778_v13  ;;  %v5366_v43 = vpop.f32.mrb[98].mxu1  ;;  %v17343_v13 = vld [vmem:[#allocation59_spill] sm:$0xff]  ;;  %v5779_v37 = vmax.f32 %v14567_v47, 0.0  ;;  %v17346_v47 = vld [vmem:[#allocation74_spill] sm:$0xff] }
 0x5fa   : > { %v9132_v25 = vpop.eup %9131  ;;  %v6154_v57 = vadd.f32 %v6153_v51, %v14600_v52  ;;  %9137 = vtanh.f32 %v5836_v35  ;;  %v5671_v61 = vadd.f32 %v5613_v56, %v17340_v11  ;;  %v5616_v20 = vadd.f32 %v5615_v28, %v5366_v43  ;;  %v5368_v38 = vpop.f32.mrb[99].mxu1  ;;  %v17344_v11 = vld [vmem:[#allocation73_spill] sm:$0xff] }
 0x5fb   : > { %v14606_v60 = vsel %vm17342_vm9, %v6048_v14, 0.0  ;;  %v5941_v42 = vmul.f32 0.5, %v9132_v25  ;;  %v5780_v43 = vmax.f32 %v14577_v29, 0.0  ;;  %vm17345_vm1 = vcmp.eq.s32.totalorder %v17344_v11, 1 }
 0x5fc   : > { %v9134_v8 = vpop.eup %9133  ;;  %v6155_v30 = vadd.f32 %v6154_v57, %v14606_v60  ;;  %v5729_v15 = vadd.f32 %v14038_v26, %v5671_v61  ;;  %v5672_v55 = vadd.f32 %v5616_v20, %v17343_v13  ;;  %vm17347_vm7 = vcmp.eq.s32.totalorder %v17346_v47, 1 }
 0x5fd   : > { %v5995_v51 = vadd.f32 0.5, %v5941_v42  ;;  %v5942_v35 = vmul.f32 0.5, %v9134_v8  ;;  %v5781_v13 = vmax.f32 %v5727_v44, 0.0 }
 0x5fe   : > { %v5837_v54 = vmul.f32 0.5, %v5729_v15  ;;  %v5730_v56 = vadd.f32 %v14038_v26, %v5672_v55 }
 0x5ff   : > { %v6049_v28 = vmul.f32 %v5995_v51, %v5779_v37  ;;  %v5996_v14 = vadd.f32 0.5, %v5942_v35  ;;  %v5782_v51 = vmax.f32 %v5728_v0, 0.0 }
 0x600   : > { %9139 = vtanh.f32 %v5837_v54  ;;  %v5838_v25 = vmul.f32 0.5, %v5730_v56 }
 0x601   : > { %v14616_v57 = vsel %vm17345_vm1, %v6049_v28, 0.0  ;;  %v6050_v61 = vmul.f32 %v5996_v14, %v5780_v43 }
 0x602   : > { %v9136_v38 = vpop.eup %9135  ;;  %v6156_v20 = vadd.f32 %v6155_v30, %v14616_v57  ;;  %9141 = vtanh.f32 %v5838_v25 }
 0x603   : > { %v14621_v42 = vsel %vm17347_vm7, %v6050_v61, 0.0  ;;  %v5943_v26 = vmul.f32 0.5, %v9136_v38 }
 0x604   : > { %v9138_v8 = vpop.eup %9137  ;;  %v6157_v29 = vadd.f32 %v6156_v20, %v14621_v42 }
 0x605   : > { %v5997_v54 = vadd.f32 0.5, %v5943_v26  ;;  %v5944_v55 = vmul.f32 0.5, %v9138_v8  ;;  %v5783_v26 = vmax.f32 %v5729_v15, 0.0 }
 0x607   : > { %v6051_v37 = vmul.f32 %v5997_v54, %v5781_v13  ;;  %v5998_v35 = vadd.f32 0.5, %v5944_v55  ;;  %v5784_v54 = vmax.f32 %v5730_v56, 0.0 }
 0x609   : > { %v14626_v43 = vsel %vm1540_vm0, %v6051_v37, 0.0  ;;  %v6052_v30 = vmul.f32 %v5998_v35, %v5782_v51 }
 0x60a   : > { %v9140_v14 = vpop.eup %9139  ;;  %v6158_v25 = vadd.f32 %v6157_v29, %v14626_v43 }
 0x60b   : > { %v14631_v38 = vsel %vm1541_vm11, %v6052_v30, 0.0  ;;  %v5945_v47 = vmul.f32 0.5, %v9140_v14 }
 0x60c   : > { %v9142_v20 = vpop.eup %9141  ;;  %v6159_v44 = vadd.f32 %v6158_v25, %v14631_v38 }
 0x60d   : > { %v5999_v8 = vadd.f32 0.5, %v5945_v47  ;;  %v5946_v0 = vmul.f32 0.5, %v9142_v20 }
 0x60f   : > { %v6053_v13 = vmul.f32 %v5999_v8, %v5783_v26  ;;  %v6000_v55 = vadd.f32 0.5, %v5946_v0  ;;  %v17362_v0 = vld [vmem:[#allocation4_spill] sm:$0xff] }
 0x610   : > { %vm17363_vm5 = vcmp.eq.s32.totalorder %v17362_v0, 1 }
 0x611   : > { %v14636_v51 = vsel %vm1542_vm13, %v6053_v13, 0.0  ;;  %v6054_v35 = vmul.f32 %v6000_v55, %v5784_v54 }
 0x612   : > { %v6160_v29 = vadd.f32 %v6159_v44, %v14636_v51  ;;  %v17361_v44 = vld [vmem:[#allocation62_spill] sm:$0xff] }
 0x613   : > { %v14641_v30 = vsel %vm1543_vm10, %v6054_v35, 0.0  ;;  %v17355_v35 = vld [vmem:[#allocation23_spill] sm:$0xff] }
 0x614   : > { %17352 = vst [vmem:[#allocation109_spill] sm:$0xff] %v14641_v30  ;;  %v6161_v14 = vadd.f32 %v6160_v29, %v14641_v30 }
 0x616   : > { %v6162_v25 = vrot.slane %v6161_v14, 4 }
 0x618   : > { %v6163_v15 = vadd.f32 %v6162_v25, %v6161_v14  ;;  %v17360_v25 = vld [vmem:[#allocation82_spill] sm:$0xff]  ;;  %v17364_v14 = vld [vmem:[#allocation115_spill] sm:$0xff] }
 0x61a   : > { %v6164_v47 = vrot.slane %v6163_v15, 2 }
 0x61c   : > { %v6165_v20 = vadd.f32 %v6164_v47, %v6163_v15  ;;  %v17353_v47 = vld [vmem:[#allocation113_spill] sm:$0xff] }
 0x61e   : > { %v6166_v26 = vrot.slane %v6165_v20, 1 }
 0x620   : > { %v6167_v56 = vadd.f32 %v6166_v26, %v6165_v20  ;;  %v17354_v26 = vld [vmem:[#allocation25_spill] sm:$0xff] }
 0x622   : > { %v14644_v8 = vmul.f32 0.00390625, %v6167_v56 }
 0x624   : > { %v6169_v20 = vsub.f32 %v17353_v47, %v14644_v8  ;;  %v6170_v56 = vsub.f32 %v17354_v26, %v14644_v8  ;;  %v6171_v55 = vsub.f32 %v17355_v35, %v14644_v8  ;;  %v6172_v15 = vsub.f32 %v17360_v25, %v14644_v8 }
 0x625   : > { %v6173_v35 = vsub.f32 %v17361_v44, %v14644_v8  ;;  %v6177_v37 = vsub.f32 %v14214_v27, %v14644_v8  ;;  %v17377_v27 = vld [vmem:[#allocation83_spill] sm:$0xff]  ;;  %v6208_v31 = vsub.f32 %v14534_v23, %v14644_v8  ;;  %v17442_v23 = vld [vmem:[#allocation61_spill] sm:$0xff] }
 0x626   : > { %v14674_v29 = vsel %vm1490_vm15, %v6169_v20, 0.0  ;;  %v14678_v13 = vsel %vm1491_vm6, %v6170_v56, 0.0  ;;  %v14690_v54 = vsel %vm17363_vm5, %v6171_v55, 0.0  ;;  %v6174_v20 = vsub.f32 %v17364_v14, %v14644_v8  ;;  %v17365_v56 = vld [vmem:[#allocation6_spill] sm:$0xff] }
 0x627   : > { %17357 = vst [vmem:[#allocation120_spill] sm:$0xff] %v14674_v29  ;;  %17359 = vst [vmem:[#allocation35_spill] sm:$0xff] %v14678_v13  ;;  %v6277_v47 = vmul.f32 %v14674_v29, %v14674_v29  ;;  %v6278_v26 = vmul.f32 %v14678_v13, %v14678_v13  ;;  %vm17366_vm6 = vcmp.eq.s32.totalorder %v17365_v56, 1  ;;  %v6279_v25 = vmul.f32 %v14690_v54, %v14690_v54  ;;  %v17368_v13 = vld [vmem:[#allocation30_spill] sm:$0xff] }
 0x628   : > { %v14696_v61 = vsel %vm17366_vm6, %v6172_v15, 0.0  ;;  %v6175_v30 = vsub.f32 %v17368_v13, %v14644_v8  ;;  %v14704_v44 = vsel %vm1494_vm3, %v6173_v35, 0.0  ;;  %v6176_v14 = vsub.f32 %v14204_v9, %v14644_v8  ;;  %v17372_v13 = vld [vmem:[#allocation9_spill] sm:$0xff]  ;;  %v17374_v9 = vld [vmem:[#allocation32_spill] sm:$0xff] }
 0x629   : > { %17367 = vst [vmem:[#allocation86_spill] sm:$0xff] %v14696_v61  ;;  %v6331_v29 = vadd.f32 %v6278_v26, %v6277_v47  ;;  %17370 = vst [vmem:[#allocation127_spill] sm:$0xff] %v14704_v44  ;;  %v6280_v0 = vmul.f32 %v14696_v61, %v14696_v61  ;;  %v14712_v56 = vsel %vm1495_vm4, %v6174_v20, 0.0  ;;  %v6281_v47 = vmul.f32 %v14704_v44, %v14704_v44  ;;  %v17375_v20 = vld [vmem:[#allocation10_spill] sm:$0xff] }
 0x62a   : > { %vm17373_vm15 = vcmp.eq.s32.totalorder %v17372_v13, 1  ;;  %v6178_v15 = vsub.f32 %v17374_v9, %v14644_v8  ;;  %vm17376_vm3 = vcmp.eq.s32.totalorder %v17375_v20, 1  ;;  %v6179_v13 = vsub.f32 %v17377_v27, %v14644_v8 }
 0x62b   : > { %v6332_v55 = vadd.f32 %v6331_v29, %v6279_v25  ;;  %v14720_v35 = vsel %vm17373_vm15, %v6175_v30, 0.0  ;;  %v6282_v29 = vmul.f32 %v14712_v56, %v14712_v56  ;;  %v14728_v61 = vsel %vm17376_vm3, %v6176_v14, 0.0  ;;  %v17378_v30 = vld [vmem:[#allocation11_spill] sm:$0xff]  ;;  %v17380_v14 = vld [vmem:[#allocation12_spill] sm:$0xff] }
 0x62c   : > { %vm17379_vm4 = vcmp.eq.s32.totalorder %v17378_v30, 1  ;;  %v6180_v9 = vsub.f32 %v14248_v5, %v14644_v8  ;;  %vm17381_vm8 = vcmp.eq.s32.totalorder %v17380_v14, 1  ;;  %v6181_v27 = vsub.f32 %v14258_v19, %v14644_v8 }
 0x62d   : > { %v6333_v26 = vadd.f32 %v6332_v55, %v6280_v0  ;;  %v6283_v0 = vmul.f32 %v14720_v35, %v14720_v35  ;;  %v14736_v44 = vsel %vm17379_vm4, %v6177_v37, 0.0  ;;  %v14744_v20 = vsel %vm17381_vm8, %v6178_v15, 0.0  ;;  %v17382_v37 = vld [vmem:[#allocation13_spill] sm:$0xff]  ;;  %v17384_v15 = vld [vmem:[#allocation14_spill] sm:$0xff] }
 0x62e   : > { %vm17383_vm12 = vcmp.eq.s32.totalorder %v17382_v37, 1  ;;  %v6182_v5 = vsub.f32 %v14270_v46, %v14644_v8  ;;  %vm17385_vm9 = vcmp.eq.s32.totalorder %v17384_v15, 1  ;;  %v6183_v19 = vsub.f32 %v14278_v58, %v14644_v8 }
 0x62f   : > { %v6334_v25 = vadd.f32 %v6333_v26, %v6281_v47  ;;  %v6284_v47 = vmul.f32 %v14728_v61, %v14728_v61  ;;  %v14752_v30 = vsel %vm17383_vm12, %v6179_v13, 0.0  ;;  %v14760_v14 = vsel %vm17385_vm9, %v6180_v9, 0.0  ;;  %v17387_v13 = vld [vmem:[#allocation15_spill] sm:$0xff]  ;;  %v17389_v9 = vld [vmem:[#allocation17_spill] sm:$0xff] }
 0x630   : > { %17386 = vst [vmem:[#allocation39_spill] sm:$0xff] %v14760_v14  ;;  %vm17388_vm1 = vcmp.eq.s32.totalorder %v17387_v13, 1  ;;  %v6184_v46 = vsub.f32 %v14292_v59, %v14644_v8  ;;  %vm17390_vm7 = vcmp.eq.s32.totalorder %v17389_v9, 1  ;;  %v6185_v58 = vsub.f32 %v14299_v2, %v14644_v8  ;;  %v17393_v59 = vld [vmem:[#allocation105_spill] sm:$0xff] }
 0x631   : > { %v6335_v55 = vadd.f32 %v6334_v25, %v6282_v29  ;;  %v6285_v29 = vmul.f32 %v14736_v44, %v14736_v44  ;;  %v14768_v37 = vsel %vm17388_vm1, %v6181_v27, 0.0  ;;  %v14776_v15 = vsel %vm17390_vm7, %v6182_v5, 0.0  ;;  %v17391_v27 = vld [vmem:[#allocation19_spill] sm:$0xff]  ;;  %v17394_v5 = vld [vmem:[#allocation20_spill] sm:$0xff] }
 0x632   : > { %vm17392_vm5 = vcmp.eq.s32.totalorder %v17391_v27, 1  ;;  %v6186_v9 = vsub.f32 %v17393_v59, %v14644_v8  ;;  %vm17395_vm6 = vcmp.eq.s32.totalorder %v17394_v5, 1  ;;  %v6187_v2 = vsub.f32 %v14324_v21, %v14644_v8 }
 0x633   : > { %v6336_v26 = vadd.f32 %v6335_v55, %v6283_v0  ;;  %v6286_v0 = vmul.f32 %v14744_v20, %v14744_v20  ;;  %v14784_v13 = vsel %vm17392_vm5, %v6183_v19, 0.0  ;;  %v17396_v19 = vld [vmem:[#allocation22_spill] sm:$0xff]  ;;  %v6188_v59 = vsub.f32 %v14338_v53, %v14644_v8 }
 0x634   : > { %vm17397_vm15 = vcmp.eq.s32.totalorder %v17396_v19, 1  ;;  %v6189_v21 = vsub.f32 %v14344_v24, %v14644_v8  ;;  %v6190_v53 = vsub.f32 %v14356_v41, %v14644_v8  ;;  %v6191_v24 = vsub.f32 %v14366_v10, %v14644_v8  ;;  %v17407_v10 = vld [vmem:[#allocation48_spill] sm:$0xff] }
 0x635   : > { %v6337_v25 = vadd.f32 %v6336_v26, %v6284_v47  ;;  %v6287_v47 = vmul.f32 %v14752_v30, %v14752_v30  ;;  %v14800_v27 = vsel %vm17397_vm15, %v6185_v58, 0.0  ;;  %v17400_v58 = vld [vmem:[#allocation26_spill] sm:$0xff]  ;;  %v6192_v41 = vsub.f32 %v14377_v16, %v14644_v8 }
 0x636   : > { %vm17401_vm4 = vcmp.eq.s32.totalorder %v17400_v58, 1  ;;  %vm17406_vm9 = vcmp.eq.s32.totalorder %v17282_v7, 1  ;;  %v6194_v7 = vsub.f32 %v14399_v63, %v14644_v8  ;;  %v17410_v16 = vld [vmem:[#allocation34_spill] sm:$0xff]  ;;  %v6196_v63 = vsub.f32 %v14417_v22, %v14644_v8 }
 0x637   : > { %v6338_v55 = vadd.f32 %v6337_v25, %v6285_v29  ;;  %v6288_v29 = vmul.f32 %v14760_v14, %v14760_v14  ;;  %v14792_v14 = vsel %vm17395_vm6, %v6184_v46, 0.0  ;;  %v17398_v46 = vld [vmem:[#allocation24_spill] sm:$0xff]  ;;  %v14816_v19 = vsel %vm17401_vm4, %v6187_v2, 0.0  ;;  %v17404_v2 = vld [vmem:[#allocation29_spill] sm:$0xff] }
 0x638   : > { %vm17399_vm3 = vcmp.eq.s32.totalorder %v17398_v46, 1  ;;  %vm17405_vm12 = vcmp.eq.s32.totalorder %v17404_v2, 1  ;;  %vm17411_vm7 = vcmp.eq.s32.totalorder %v17410_v16, 1  ;;  %vm17416_vm15 = vcmp.eq.s32.totalorder %v17293_v18, 1 }
 0x639   : > { %v6339_v26 = vadd.f32 %v6338_v55, %v6286_v0  ;;  %v6289_v0 = vmul.f32 %v14768_v37, %v14768_v37  ;;  %v14808_v5 = vsel %vm17399_vm3, %v6186_v9, 0.0  ;;  %v17402_v9 = vld [vmem:[#allocation27_spill] sm:$0xff]  ;;  %v14832_v58 = vsel %vm17405_vm12, %v6189_v21, 0.0  ;;  %v17408_v21 = vld [vmem:[#allocation33_spill] sm:$0xff] }
 0x63a   : > { %vm17403_vm8 = vcmp.eq.s32.totalorder %v17402_v9, 1  ;;  %v6193_v9 = vsub.f32 %v17407_v10, %v14644_v8  ;;  %vm17409_vm1 = vcmp.eq.s32.totalorder %v17408_v21, 1  ;;  %v6195_v10 = vsub.f32 %v14405_v33, %v14644_v8 }
 0x63b   : > { %v6340_v25 = vadd.f32 %v6339_v26, %v6287_v47  ;;  %v6290_v47 = vmul.f32 %v14776_v15, %v14776_v15  ;;  %v14824_v46 = vsel %vm17403_vm8, %v6188_v59, 0.0  ;;  %v14840_v59 = vsel %vm17406_vm9, %v6190_v53, 0.0 }
 0x63c   : > { %v14848_v2 = vsel %vm17409_vm1, %v6191_v24, 0.0  ;;  %v14856_v53 = vsel %vm17411_vm7, %v6192_v41, 0.0  ;;  %v17412_v24 = vld [vmem:[#allocation36_spill] sm:$0xff]  ;;  %v17414_v41 = vld [vmem:[#allocation38_spill] sm:$0xff]  ;;  %v6197_v33 = vsub.f32 %v14426_v48, %v14644_v8  ;;  %v6198_v22 = vsub.f32 %v14435_v49, %v14644_v8  ;;  %v17420_v48 = vld [vmem:[#allocation43_spill] sm:$0xff] }
 0x63d   : > { %v6341_v55 = vadd.f32 %v6340_v25, %v6288_v29  ;;  %v6291_v29 = vmul.f32 %v14784_v13, %v14784_v13  ;;  %vm17413_vm5 = vcmp.eq.s32.totalorder %v17412_v24, 1  ;;  %vm17415_vm6 = vcmp.eq.s32.totalorder %v17414_v41, 1  ;;  %v17422_v49 = vld [vmem:[#allocation84_spill] sm:$0xff] }
 0x63e   : > { %v14864_v21 = vsel %vm17413_vm5, %v6193_v9, 0.0  ;;  %v14872_v16 = vsel %vm17415_vm6, %v6194_v7, 0.0  ;;  %v14880_v9 = vsel %vm17416_vm15, %v6195_v10, 0.0  ;;  %v17418_v7 = vld [vmem:[#allocation41_spill] sm:$0xff]  ;;  %v6199_v18 = vsub.f32 %v14444_v3, %v14644_v8 }
 0x63f   : > { %v6342_v26 = vadd.f32 %v6341_v55, %v6289_v0  ;;  %v6292_v0 = vmul.f32 %v14792_v14, %v14792_v14  ;;  %17417 = vst [vmem:[#allocation119_spill] sm:$0xff] %v14880_v9  ;;  %vm17419_vm3 = vcmp.eq.s32.totalorder %v17418_v7, 1  ;;  %vm17421_vm4 = vcmp.eq.s32.totalorder %v17420_v48, 1  ;;  %v17425_v3 = vld [vmem:[#allocation57_spill] sm:$0xff] }
 0x640   : > { %v14888_v24 = vsel %vm17419_vm3, %v6196_v63, 0.0  ;;  %v14896_v10 = vsel %vm17421_vm4, %v6197_v33, 0.0  ;;  %v17423_v63 = vld [vmem:[#allocation44_spill] sm:$0xff]  ;;  %v6201_v48 = vsub.f32 %v17425_v3, %v14644_v8  ;;  %v17426_v33 = vld [vmem:[#allocation45_spill] sm:$0xff]  ;;  %v6203_v3 = vsub.f32 %v14483_v40, %v14644_v8 }
 0x641   : > { %v6343_v25 = vadd.f32 %v6342_v26, %v6290_v47  ;;  %v6293_v47 = vmul.f32 %v14800_v27, %v14800_v27  ;;  %v6304_v41 = vmul.f32 %v14888_v24, %v14888_v24  ;;  %vm17424_vm8 = vcmp.eq.s32.totalorder %v17423_v63, 1 }
 0x642   : > { %v14904_v7 = vsel %vm17424_vm8, %v6198_v22, 0.0  ;;  %vm17427_vm12 = vcmp.eq.s32.totalorder %v17426_v33, 1  ;;  %v17428_v22 = vld [vmem:[#allocation47_spill] sm:$0xff]  ;;  %v6205_v40 = vsub.f32 %v14504_v39, %v14644_v8  ;;  %v6207_v39 = vsub.f32 %v14523_v32, %v14644_v8  ;;  %v17439_v32 = vld [vmem:[#allocation28_spill] sm:$0xff] }
 0x643   : > { %v6344_v55 = vadd.f32 %v6343_v25, %v6291_v29  ;;  %v6294_v29 = vmul.f32 %v14808_v5, %v14808_v5  ;;  %vm17429_vm9 = vcmp.eq.s32.totalorder %v17428_v22, 1  ;;  %vm17443_vm3 = vcmp.eq.s32.totalorder %v17442_v23, 1 }
 0x645   : > { %v6345_v26 = vadd.f32 %v6344_v55, %v6292_v0  ;;  %v6295_v0 = vmul.f32 %v14816_v19, %v14816_v19 }
 0x647   : > { %v6346_v25 = vadd.f32 %v6345_v26, %v6293_v47  ;;  %v6296_v47 = vmul.f32 %v14824_v46, %v14824_v46 }
 0x649   : > { %v6347_v55 = vadd.f32 %v6346_v25, %v6294_v29  ;;  %v6297_v29 = vmul.f32 %v14832_v58, %v14832_v58 }
 0x64b   : > { %v6348_v26 = vadd.f32 %v6347_v55, %v6295_v0  ;;  %v6298_v0 = vmul.f32 %v14840_v59, %v14840_v59 }
 0x64d   : > { %v6349_v25 = vadd.f32 %v6348_v26, %v6296_v47  ;;  %v6299_v47 = vmul.f32 %v14848_v2, %v14848_v2 }
 0x64f   : > { %v6350_v55 = vadd.f32 %v6349_v25, %v6297_v29  ;;  %v6300_v29 = vmul.f32 %v14856_v53, %v14856_v53 }
 0x651   : > { %v6351_v26 = vadd.f32 %v6350_v55, %v6298_v0  ;;  %v6301_v0 = vmul.f32 %v14864_v21, %v14864_v21 }
 0x653   : > { %v6352_v25 = vadd.f32 %v6351_v26, %v6299_v47  ;;  %v6302_v47 = vmul.f32 %v14872_v16, %v14872_v16 }
 0x655   : > { %v6353_v55 = vadd.f32 %v6352_v25, %v6300_v29  ;;  %v6303_v29 = vmul.f32 %v14880_v9, %v14880_v9  ;;  %v14912_v9 = vsel %vm17427_vm12, %v6199_v18, 0.0  ;;  %v17430_v18 = vld [vmem:[#allocation49_spill] sm:$0xff] }
 0x656   : > { %vm17431_vm1 = vcmp.eq.s32.totalorder %v17430_v18, 1 }
 0x657   : > { %v6354_v26 = vadd.f32 %v6353_v55, %v6301_v0  ;;  %v6200_v55 = vsub.f32 %v17422_v49, %v14644_v8  ;;  %v6202_v49 = vsub.f32 %v14477_v12, %v14644_v8  ;;  %v14928_v33 = vsel %vm17431_vm1, %v6201_v48, 0.0  ;;  %v17434_v48 = vld [vmem:[#allocation52_spill] sm:$0xff] }
 0x658   : > { %v6204_v12 = vsub.f32 %v14495_v34, %v14644_v8  ;;  %vm17435_vm5 = vcmp.eq.s32.totalorder %v17434_v48, 1  ;;  %v6206_v34 = vsub.f32 %v14513_v50, %v14644_v8 }
 0x659   : > { %v6355_v25 = vadd.f32 %v6354_v26, %v6302_v47  ;;  %v6305_v47 = vmul.f32 %v14896_v10, %v14896_v10  ;;  %v14920_v63 = vsel %vm17429_vm9, %v6200_v55, 0.0  ;;  %v17432_v55 = vld [vmem:[#allocation50_spill] sm:$0xff]  ;;  %v14944_v18 = vsel %vm17435_vm5, %v6203_v3, 0.0  ;;  %v17436_v3 = vld [vmem:[#allocation56_spill] sm:$0xff] }
 0x65a   : > { %vm17433_vm7 = vcmp.eq.s32.totalorder %v17432_v55, 1  ;;  %vm17437_vm6 = vcmp.eq.s32.totalorder %v17436_v3, 1 }
 0x65b   : > { %v6356_v0 = vadd.f32 %v6355_v25, %v6303_v29  ;;  %v6306_v29 = vmul.f32 %v14904_v7, %v14904_v7  ;;  %v14936_v22 = vsel %vm17433_vm7, %v6202_v49, 0.0  ;;  %v14952_v49 = vsel %vm1525_vm14, %v6204_v12, 0.0 }
 0x65c   : > { %v14960_v55 = vsel %vm17437_vm6, %v6205_v40, 0.0  ;;  %vm17438_vm14 = vcmp.eq.s32.totalorder %v17319_v4, 1  ;;  %v17440_v40 = vld [vmem:[#allocation60_spill] sm:$0xff]  ;;  %v6210_v4 = vsub.f32 %v14555_v17, %v14644_v8  ;;  %v6212_v17 = vsub.f32 %v14572_v36, %v14644_v8 }
 0x65d   : > { %v6357_v26 = vadd.f32 %v6356_v0, %v6304_v41  ;;  %v6307_v41 = vmul.f32 %v14912_v9, %v14912_v9  ;;  %v14968_v50 = vsel %vm17438_vm14, %v6206_v34, 0.0  ;;  %v6313_v12 = vmul.f32 %v14960_v55, %v14960_v55 }
 0x65e   : > { %vm17441_vm15 = vcmp.eq.s32.totalorder %v17440_v40, 1  ;;  %v14984_v34 = vsel %vm17443_vm3, %v6208_v31, 0.0  ;;  %v17446_v31 = vld [vmem:[#allocation65_spill] sm:$0xff]  ;;  %vm17462_vm6 = vcmp.eq.s32.totalorder %v17341_v45, 1  ;;  %vm17464_vm14 = vcmp.eq.s32.totalorder %v17344_v11, 1 }
 0x65f   : > { %v6358_v25 = vadd.f32 %v6357_v26, %v6305_v47  ;;  %v6308_v47 = vmul.f32 %v14920_v63, %v14920_v63  ;;  %vm17447_vm8 = vcmp.eq.s32.totalorder %v17446_v31, 1  ;;  %v17452_v31 = vsub.f32 %v14584_v62, %v14644_v8 }
 0x660   : > { %v15000_v40 = vsel %vm17447_vm8, %v6210_v4, 0.0  ;;  %v17458_v62 = vsub.f32 %v14600_v52, %v14644_v8  ;;  %v17463_v52 = vsub.f32 %v14616_v57, %v14644_v8  ;;  %v17465_v45 = vsub.f32 %v14621_v42, %v14644_v8 }
 0x661   : > { %v6359_v0 = vadd.f32 %v6358_v25, %v6306_v29  ;;  %v6309_v29 = vmul.f32 %v14928_v33, %v14928_v33  ;;  %v17469_v11 = vsub.f32 %v14626_v43, %v14644_v8  ;;  %v17471_v42 = vsub.f32 %v14631_v38, %v14644_v8 }
 0x663   : > { %v6360_v26 = vadd.f32 %v6359_v0, %v6307_v41  ;;  %v6310_v41 = vmul.f32 %v14936_v22, %v14936_v22  ;;  %v15075_v57 = vsel %vm1540_vm0, %v17469_v11, 0.0  ;;  %vm7282_vm0 = vcmask 392192  }
 0x664   : > { %17470 = vst [vmem:[#allocation87_spill] sm:$0xff] %v15075_v57  ;;  %v6327_v28 = vmul.f32 %v15075_v57, %v15075_v57 }
 0x665   : > { %v6361_v25 = vadd.f32 %v6360_v26, %v6308_v47  ;;  %v6311_v47 = vmul.f32 %v14944_v18, %v14944_v18 }
 0x667   : > { %v6362_v0 = vadd.f32 %v6361_v25, %v6309_v29  ;;  %v6312_v29 = vmul.f32 %v14952_v49, %v14952_v49 }
 0x669   : > { %v6363_v26 = vadd.f32 %v6362_v0, %v6310_v41  ;;  %v6209_v41 = vsub.f32 %v17439_v32, %v14644_v8  ;;  %v14976_v0 = vsel %vm17441_vm15, %v6207_v39, 0.0  ;;  %v17444_v39 = vld [vmem:[#allocation63_spill] sm:$0xff] }
 0x66a   : > { %v6315_v3 = vmul.f32 %v14976_v0, %v14976_v0  ;;  %vm17445_vm4 = vcmp.eq.s32.totalorder %v17444_v39, 1 }
 0x66b   : > { %v6364_v25 = vadd.f32 %v6363_v26, %v6311_v47  ;;  %v6314_v47 = vmul.f32 %v14968_v50, %v14968_v50  ;;  %v14992_v32 = vsel %vm17445_vm4, %v6209_v41, 0.0  ;;  %v6318_v41 = vmul.f32 %v15000_v40, %v15000_v40 }
 0x66d   : > { %v6365_v48 = vadd.f32 %v6364_v25, %v6312_v29  ;;  %v6211_v25 = vsub.f32 %v14561_v6, %v14644_v8  ;;  %v17448_v6 = vld [vmem:[#allocation67_spill] sm:$0xff] }
 0x66e   : > { %vm17449_vm12 = vcmp.eq.s32.totalorder %v17448_v6, 1 }
 0x66f   : > { %v6366_v26 = vadd.f32 %v6365_v48, %v6313_v12  ;;  %v6316_v12 = vmul.f32 %v14984_v34, %v14984_v34  ;;  %v15006_v23 = vsel %vm17449_vm12, %v6211_v25, 0.0 }
 0x670   : > { %v6319_v36 = vmul.f32 %v15006_v23, %v15006_v23 }
 0x671   : > { %v6367_v29 = vadd.f32 %v6366_v26, %v6314_v47  ;;  %v6317_v47 = vmul.f32 %v14992_v32, %v14992_v32 }
 0x673   : > { %v6368_v48 = vadd.f32 %v6367_v29, %v6315_v3  ;;  %v17450_v3 = vld [vmem:[#allocation68_spill] sm:$0xff] }
 0x674   : > { %vm17451_vm9 = vcmp.eq.s32.totalorder %v17450_v3, 1  ;;  %v17459_v3 = vld [vmem:[#allocation71_spill] sm:$0xff] }
 0x675   : > { %v6369_v26 = vadd.f32 %v6368_v48, %v6316_v12  ;;  %v15012_v29 = vsel %vm17451_vm9, %v6212_v17, 0.0  ;;  %v17453_v12 = vld [vmem:[#allocation69_spill] sm:$0xff]  ;;  %v17456_v17 = vld [vmem:[#allocation70_spill] sm:$0xff]  ;;  %vm17460_vm5 = vcmp.eq.s32.totalorder %v17459_v3, 1 }
 0x676   : > { %vm17454_vm1 = vcmp.eq.s32.totalorder %v17453_v12, 1  ;;  %v6320_v25 = vmul.f32 %v15012_v29, %v15012_v29  ;;  %vm17457_vm7 = vcmp.eq.s32.totalorder %v17456_v17, 1 }
 0x677   : > { %v6370_v39 = vadd.f32 %v6369_v26, %v6317_v47  ;;  %v15021_v48 = vsel %vm17454_vm1, %v17452_v31, 0.0  ;;  %v17455_v47 = vsub.f32 %v14590_v1, %v14644_v8  ;;  %v15039_v31 = vsel %vm17460_vm5, %v17458_v62, 0.0 }
 0x678   : > { %v17461_v1 = vsub.f32 %v14606_v60, %v14644_v8  ;;  %v17466_v60 = vld [vmem:[#allocation74_spill] sm:$0xff] }
 0x679   : > { %v6371_v4 = vadd.f32 %v6370_v39, %v6318_v41  ;;  %v15030_v26 = vsel %vm17457_vm7, %v17455_v47, 0.0  ;;  %v6321_v41 = vmul.f32 %v15021_v48, %v15021_v48  ;;  %v15057_v47 = vsel %vm17464_vm14, %v17463_v52, 0.0 }
 0x67a   : > { %v15048_v12 = vsel %vm17462_vm6, %v17461_v1, 0.0  ;;  %vm17467_vm15 = vcmp.eq.s32.totalorder %v17466_v60, 1  ;;  %v6325_v62 = vmul.f32 %v15057_v47, %v15057_v47  ;;  %v17474_v52 = vsub.f32 %v14636_v51, %v14644_v8  ;;  %v17476_v60 = vld [vmem:[#allocation109_spill] sm:$0xff] }
 0x67b   : > { %v6372_v6 = vadd.f32 %v6371_v4, %v6319_v36  ;;  %v6322_v36 = vmul.f32 %v15030_v26, %v15030_v26  ;;  %v6324_v17 = vmul.f32 %v15048_v12, %v15048_v12 }
 0x67d   : > { %v6373_v39 = vadd.f32 %v6372_v6, %v6320_v25  ;;  %v6323_v25 = vmul.f32 %v15039_v31, %v15039_v31 }
 0x67f   : > { %v6374_v4 = vadd.f32 %v6373_v39, %v6321_v41  ;;  %v15066_v39 = vsel %vm17467_vm15, %v17465_v45, 0.0 }
 0x680   : > { %17468 = vst [vmem:[#allocation123_spill] sm:$0xff] %v15066_v39 }
 0x681   : > { %v6375_v6 = vadd.f32 %v6374_v4, %v6322_v36  ;;  %v6326_v36 = vmul.f32 %v15066_v39, %v15066_v39 }
 0x683   : > { %v6376_v41 = vadd.f32 %v6375_v6, %v6323_v25  ;;  %v15084_v25 = vsel %vm1541_vm11, %v17471_v42, 0.0  ;;  %v8903_v6 = vld [vmem:[%s15770_s5 + $0x4] ss:$16 sps:$4 sm:$0xff]  }
 0x684   : > { %17473 = vst [vmem:[#allocation95_spill] sm:$0xff] %v15084_v25  ;;  %7327 = vmatprep.mubr.bf16.mxu1 %v8903_v6  ;;  %v6328_v38 = vmul.f32 %v15084_v25, %v15084_v25 }
 0x685   : > { %v6377_v3 = vadd.f32 %v6376_v41, %v6324_v17  ;;  %v15096_v41 = vsel %vm1542_vm13, %v17474_v52, 0.0 }
 0x687   : > { %v6378_v4 = vadd.f32 %v6377_v3, %v6325_v62  ;;  %v17477_v62 = vsub.f32 %v17476_v60, %v14644_v8  ;;  %v17479_v8 = vld [vmem:[#allocation2_spill] sm:$0xff] }
 0x688   : > { %v6449_v60 = vsub.s32 4, %v17479_v8 }
 0x689   : > { %v6379_v43 = vadd.f32 %v6378_v4, %v6326_v36  ;;  %v6276_v11 = vsel %vm1543_vm10, %v17477_v62, 0.0  ;;  %v6329_v36 = vmul.f32 %v15096_v41, %v15096_v41  ;;  %v6507_v62 = vsub.s32 5, %v17479_v8 }
 0x68a   : > { %v6330_v51 = vmul.f32 %v6276_v11, %v6276_v11 }
 0x68b   : > { %v6380_v45 = vadd.f32 %v6379_v43, %v6327_v28 }
 0x68d   : > { %v6381_v4 = vadd.f32 %v6380_v45, %v6328_v38  ;;  %v9147_v38 = vld [vmem:[%s15769_s4] sm:$0x3f] }
 0x68e   : > { %v15112_v45 = vrot.slane %v9147_v38, %v6449_v60 }
 0x68f   : > { %v6382_v42 = vadd.f32 %v6381_v4, %v6329_v36  ;;  %v15114_v4 = vrot.slane %v9147_v38, %v6507_v62 }
 0x691   : > { %v6383_v1 = vadd.f32 %v6382_v42, %v6330_v51  ;;  %v17480_v51 = vld [vmem:[#allocation120_spill] sm:$0xff] }
 0x693   : > { %v6384_v52 = vrot.slane %v6383_v1, 4 }
 0x695   : > { %v6385_v17 = vadd.f32 %v6384_v52, %v6383_v1  ;;  %v17482_v1 = vld [vmem:[#allocation86_spill] sm:$0xff] }
 0x697   : > { %v6386_v6 = vrot.slane %v6385_v17, 2 }
 0x699   : > { %v6387_v57 = vadd.f32 %v6386_v6, %v6385_v17  ;;  %v17484_v6 = vld [vmem:[#allocation127_spill] sm:$0xff] }
 0x69b   : > { %v6388_v39 = vrot.slane %v6387_v57, 1 }
 0x69d   : > { %v6389_v25 = vadd.f32 %v6388_v39, %v6387_v57  ;;  %v17481_v39 = vld [vmem:[#allocation35_spill] sm:$0xff] }
 0x69f   : > { %v6390_v28 = vmul.f32 0.00390625, %v6389_v25 }
 0x6a1   : > { %v6391_v43 = vadd.f32 1e-05, %v6390_v28 }
 0x6a3   : > { %9143 = vrsqrt.f32 %v6391_v43 }
 0x6ad   : > { %v9144_v3 = vpop.eup %9143 }
 0x6ae   : > { %v6446_v36 = vmul.f32 %v9144_v3, %v6276_v11  ;;  %v6393_v42 = vmul.f32 %v9144_v3, %v17480_v51  ;;  %v6394_v57 = vmul.f32 %v9144_v3, %v17481_v39  ;;  %v6395_v25 = vmul.f32 %v9144_v3, %v14690_v54  ;;  %v17485_v54 = vld [vmem:[#allocation39_spill] sm:$0xff] }
 0x6af   : > { %v6396_v52 = vmul.f32 %v9144_v3, %v17482_v1  ;;  %v6397_v28 = vmul.f32 %v9144_v3, %v17484_v6  ;;  %v6398_v43 = vmul.f32 %v9144_v3, %v14712_v56  ;;  %v6399_v8 = vmul.f32 %v9144_v3, %v14720_v35 }
 0x6b0   : > { %v15121_v17 = vmul.f32 %v15112_v45, %v6446_v36  ;;  %v6400_v11 = vmul.f32 %v9144_v3, %v14728_v61  ;;  %v6401_v60 = vmul.f32 %v9144_v3, %v14736_v44  ;;  %v6402_v62 = vmul.f32 %v9144_v3, %v14744_v20 }
 0x6b1   : > { %v6403_v38 = vmul.f32 %v9144_v3, %v14752_v30  ;;  %v6404_v51 = vmul.f32 %v9144_v3, %v17485_v54  ;;  %v6405_v39 = vmul.f32 %v9144_v3, %v14768_v37  ;;  %v6406_v36 = vmul.f32 %v9144_v3, %v14776_v15 }
 0x6b2   : > { %17483 = vst [vmem:[#allocation97_spill] sm:$0xff] %v15121_v17  ;;  %v6407_v1 = vmul.f32 %v9144_v3, %v14784_v13  ;;  %v6408_v56 = vmul.f32 %v9144_v3, %v14792_v14  ;;  %v15136_v35 = vmul.f32 %v9144_v3, %v14800_v27  ;;  %v15139_v61 = vmul.f32 %v9144_v3, %v14808_v5  ;;  %v17486_v5 = vld [vmem:[#allocation119_spill] sm:$0xff] }
 0x6b3   : > { %v6411_v44 = vmul.f32 %v9144_v3, %v14816_v19  ;;  %v15143_v20 = vmul.f32 %v9144_v3, %v14824_v46  ;;  %v15146_v30 = vmul.f32 %v9144_v3, %v14832_v58  ;;  %v6414_v37 = vmul.f32 %v9144_v3, %v14840_v59 }
 0x6b4   : > { %v15150_v15 = vmul.f32 %v9144_v3, %v14848_v2  ;;  %v6416_v14 = vmul.f32 %v9144_v3, %v14856_v53  ;;  %v15154_v13 = vmul.f32 %v9144_v3, %v14864_v21  ;;  %v6418_v27 = vmul.f32 %v9144_v3, %v14872_v16 }
 0x6b5   : > { %v15158_v19 = vmul.f32 %v9144_v3, %v17486_v5  ;;  %v6420_v46 = vmul.f32 %v9144_v3, %v14888_v24  ;;  %v15162_v58 = vmul.f32 %v9144_v3, %v14896_v10  ;;  %v6422_v59 = vmul.f32 %v9144_v3, %v14904_v7 }
 0x6b6   : > { %v15166_v2 = vmul.f32 %v9144_v3, %v14912_v9  ;;  %v6424_v53 = vmul.f32 %v9144_v3, %v14920_v63  ;;  %v15170_v21 = vmul.f32 %v9144_v3, %v14928_v33  ;;  %v6426_v16 = vmul.f32 %v9144_v3, %v14936_v22 }
 0x6b7   : > { %v15174_v6 = vmul.f32 %v9144_v3, %v14944_v18  ;;  %v6428_v24 = vmul.f32 %v9144_v3, %v14952_v49  ;;  %v6429_v10 = vmul.f32 %v9144_v3, %v14960_v55  ;;  %v6430_v54 = vmul.f32 %v9144_v3, %v14968_v50 }
 0x6b8   : > { %v6431_v7 = vmul.f32 %v9144_v3, %v14976_v0  ;;  %v6432_v9 = vmul.f32 %v9144_v3, %v14984_v34  ;;  %v6433_v63 = vmul.f32 %v9144_v3, %v14992_v32  ;;  %v6434_v33 = vmul.f32 %v9144_v3, %v15000_v40  ;;  %v17489_v34 = vld [vmem:[#allocation123_spill] sm:$0xff] }
 0x6b9   : > { %17487 = vst [vmem:[#allocation166_spill] sm:$0xff] %v15174_v6  ;;  %v6435_v5 = vmul.f32 %v9144_v3, %v15006_v23  ;;  %v6436_v22 = vmul.f32 %v9144_v3, %v15012_v29  ;;  %v6437_v18 = vmul.f32 %v9144_v3, %v15021_v48  ;;  %v6438_v49 = vmul.f32 %v9144_v3, %v15030_v26  ;;  %v17490_v32 = vld [vmem:[#allocation87_spill] sm:$0xff] }
 0x6ba   : > { %v6439_v55 = vmul.f32 %v9144_v3, %v15039_v31  ;;  %v6440_v50 = vmul.f32 %v9144_v3, %v15048_v12  ;;  %v15190_v0 = vmul.f32 %v9144_v3, %v15057_v47  ;;  %v6442_v17 = vmul.f32 %v9144_v3, %v17489_v34  ;;  %v17492_v40 = vld [vmem:[#allocation95_spill] sm:$0xff] }
 0x6bb   : > { %v15194_v6 = vmul.f32 %v9144_v3, %v17490_v32  ;;  %v15197_v23 = vmul.f32 %v9144_v3, %v17492_v40  ;;  %v15200_v29 = vmul.f32 %v9144_v3, %v15096_v41  ;;  %v15203_v48 = vmul.f32 %v15112_v45, %v6393_v42 }
 0x6bc   : > { %17488 = vst [vmem:[#allocation168_spill] sm:$0xff] %v15190_v0  ;;  %v15206_v26 = vmul.f32 %v15112_v45, %v6394_v57  ;;  %v6453_v31 = vmul.f32 %v15112_v45, %v6395_v25  ;;  %v15210_v12 = vmul.f32 %v15112_v45, %v6396_v52  ;;  %v15213_v47 = vmul.f32 %v15112_v45, %v6397_v28 }
 0x6bd   : > { %17491 = vst [vmem:[#allocation88_spill] sm:$0xff] %v15194_v6  ;;  %17493 = vst [vmem:[#allocation101_spill] sm:$0xff] %v15197_v23  ;;  %v6456_v34 = vmul.f32 %v15112_v45, %v6398_v43  ;;  %v15217_v32 = vmul.f32 %v15112_v45, %v6399_v8  ;;  %v6458_v41 = vmul.f32 %v15112_v45, %v6400_v11 }
 0x6be   : > { %17494 = vst [vmem:[#allocation98_spill] sm:$0xff] %v15200_v29  ;;  %v15221_v3 = vmul.f32 %v15112_v45, %v6401_v60  ;;  %v6460_v42 = vmul.f32 %v15112_v45, %v6402_v62  ;;  %v15225_v57 = vmul.f32 %v15112_v45, %v6403_v38  ;;  %v6462_v25 = vmul.f32 %v15112_v45, %v6404_v51 }
 0x6bf   : > { %v15229_v52 = vmul.f32 %v15112_v45, %v6405_v39  ;;  %v6464_v28 = vmul.f32 %v15112_v45, %v6406_v36  ;;  %v15233_v43 = vmul.f32 %v15112_v45, %v6407_v1  ;;  %v6466_v8 = vmul.f32 %v15112_v45, %v6408_v56 }
 0x6c0   : > { %v6469_v11 = vmul.f32 %v15112_v45, %v6411_v44  ;;  %v6472_v60 = vmul.f32 %v15112_v45, %v6414_v37  ;;  %v15239_v62 = vmul.f32 %v15112_v45, %v6416_v14  ;;  %v15242_v38 = vmul.f32 %v15112_v45, %v6418_v27 }
 0x6c1   : > { %v15245_v51 = vmul.f32 %v15112_v45, %v6420_v46  ;;  %v15248_v39 = vmul.f32 %v15112_v45, %v6422_v59  ;;  %v15251_v36 = vmul.f32 %v15112_v45, %v6424_v53  ;;  %v15254_v1 = vmul.f32 %v15112_v45, %v6426_v16 }
 0x6c2   : > { %v15257_v56 = vmul.f32 %v15112_v45, %v6428_v24  ;;  %v15260_v44 = vmul.f32 %v15112_v45, %v6429_v10  ;;  %v6488_v37 = vmul.f32 %v15112_v45, %v6430_v54  ;;  %v15264_v14 = vmul.f32 %v15112_v45, %v6431_v7 }
 0x6c3   : > { %v6490_v27 = vmul.f32 %v15112_v45, %v6432_v9  ;;  %v15268_v46 = vmul.f32 %v15112_v45, %v6433_v63  ;;  %v15271_v59 = vmul.f32 %v15112_v45, %v6434_v33  ;;  %v15274_v53 = vmul.f32 %v15112_v45, %v6435_v5 }
 0x6c4   : > { %17495 = vst [vmem:[#allocation137_spill] sm:$0xff] %v15264_v14  ;;  %v6467_v16 = vmul.f32 %v15112_v45, %v15136_v35  ;;  %v6468_v24 = vmul.f32 %v15112_v45, %v15139_v61  ;;  %v15281_v10 = vmul.f32 %v15112_v45, %v6436_v22  ;;  %v15284_v54 = vmul.f32 %v15112_v45, %v6437_v18 }
 0x6c5   : > { %17496 = vst [vmem:[#allocation134_spill] sm:$0xff] %v15268_v46  ;;  %17497 = vst [vmem:[#allocation106_spill] sm:$0xff] %v15274_v53  ;;  %v6470_v7 = vmul.f32 %v15112_v45, %v15143_v20  ;;  %v6471_v9 = vmul.f32 %v15112_v45, %v15146_v30  ;;  %v15291_v63 = vmul.f32 %v15112_v45, %v6438_v49 }
 0x6c6   : > { %17498 = vst [vmem:[#allocation121_spill] sm:$0xff] %v15284_v54  ;;  %v15294_v35 = vmul.f32 %v15112_v45, %v6439_v55  ;;  %v15297_v61 = vmul.f32 %v15112_v45, %v6440_v50  ;;  %v15300_v33 = vmul.f32 %v15112_v45, %v6442_v17  ;;  %v15303_v5 = vadd.f32 %v15114_v4, %v6453_v31 }
 0x6c7   : > { %17499 = vst [vmem:[#allocation21_spill] sm:$0xff] %v15291_v63  ;;  %v15306_v20 = vadd.f32 %v15114_v4, %v6467_v16  ;;  %v6526_v30 = vadd.f32 %v15114_v4, %v6468_v24  ;;  %v15310_v22 = vadd.f32 %v15114_v4, %v6469_v11  ;;  %v15313_v18 = vadd.f32 %v15114_v4, %v6456_v34 }
 0x6c8   : > { %17500 = vst [vmem:[#allocation94_spill] sm:$0xff] %v15294_v35  ;;  %17501 = vst [vmem:[#allocation99_spill] sm:$0xff] %v15297_v61  ;;  %v15316_v49 = vadd.f32 %v15114_v4, %v6470_v7  ;;  %v6529_v17 = vadd.f32 %v15114_v4, %v6471_v9  ;;  %v15320_v55 = vadd.f32 %v15114_v4, %v6472_v60 }
 0x6c9   : > { %17502 = vst [vmem:[#allocation96_spill] sm:$0xff] %v15300_v33  ;;  %v15330_v50 = vadd.f32 %v15114_v4, %v6458_v41  ;;  %v15333_v40 = vadd.f32 %v15114_v4, %v6460_v42  ;;  %v15336_v31 = vadd.f32 %v15114_v4, %v6462_v25  ;;  %v15339_v34 = vadd.f32 %v15114_v4, %v6464_v28 }
 0x6ca   : > { %v15342_v11 = vadd.f32 %v15114_v4, %v6466_v8  ;;  %v15345_v60 = vadd.f32 %v15114_v4, %v6488_v37  ;;  %v15348_v41 = vadd.f32 %v15114_v4, %v6490_v27  ;;  %v7977_v42 = vpack.c.bf16 %v6526_v30, %v15306_v20 }
 0x6cb   : > { %v7982_v16 = vpack.c.bf16 %v15316_v49, %v15310_v22  ;;  %v7987_v25 = vpack.c.bf16 %v15320_v55, %v6529_v17  ;;  %v16278_v24 = vrot.slane %v15306_v20, 1  ;;  %v6922_v28 = vrot.slane %v6526_v30, 1 }
 0x6cc   : > { %17503 = vst [vmem:[#allocation37_spill] sm:$0xff] %v15348_v41  ;;  %8096 = vst [vmem:[%s15327_s21 + $0x40] sm:$0xff] %v7977_v42   ;;  %v6924_v8 = vrot.slane %v15310_v22, 1  ;;  %v6926_v7 = vrot.slane %v15316_v49, 1  ;;  %v6928_v37 = vrot.slane %v6529_v17, 1  ;;  %v6930_v9 = vrot.slane %v15320_v55, 1 }
 0x6cd   : > { %8097 = vst [vmem:[%s15327_s21 + $0x48] sm:$0xff] %v7982_v16   ;;  %8098 = vst [vmem:[%s15327_s21 + $0x50] sm:$0xff] %v7987_v25   ;;  %v6923_v27 = vsel %vm2377_vm2, %v16278_v24, %v6922_v28  ;;  %v6509_v29 = vadd.f32 %v15114_v4, %v15203_v48  ;;  %v6510_v6 = vadd.f32 %v15114_v4, %v15206_v26 }
 0x6ce   : > { %v6512_v42 = vadd.f32 %v15114_v4, %v15210_v12  ;;  %v6925_v35 = vsel %vm2377_vm2, %v6922_v28, %v6924_v8  ;;  %v6929_v33 = vsel %vm2377_vm2, %v6926_v7, %v6928_v37  ;;  %v6931_v16 = vsel %vm2377_vm2, %v6928_v37, %v6930_v9 }
 0x6cf   : > { %v15374_v25 = vmax.f32 %v15306_v20, %v6923_v27  ;;  %v15376_v24 = vmax.f32 %v6526_v30, %v6925_v35  ;;  %v15379_v48 = vmax.f32 %v15316_v49, %v6929_v33  ;;  %v15381_v26 = vmax.f32 %v6529_v17, %v6931_v16 }
 0x6d0   : > { %v6513_v12 = vadd.f32 %v15114_v4, %v15213_v47  ;;  %v7937_v28 = vpack.c.bf16 %v6510_v6, %v6509_v29  ;;  %v7942_v54 = vpack.c.bf16 %v6512_v42, %v15303_v5  ;;  %v6889_v23 = vrot.slane %v6509_v29, 1 }
 0x6d1   : > { %v6890_v0 = vrot.slane %v6510_v6, 1  ;;  %v7125_v37 = vmax.f32 %v15374_v25, %v15379_v48  ;;  %v7126_v35 = vmax.f32 %v15376_v24, %v15381_v26  ;;  %v6892_v30 = vrot.slane %v15303_v5, 1 }
 0x6d2   : > { %v7947_v33 = vpack.c.bf16 %v15313_v18, %v6513_v12  ;;  %7938 = vst [vmem:[%s15327_s21] sm:$0xff] %v7937_v28   ;;  %8089 = vst [vmem:[%s15327_s21 + $0x8] sm:$0xff] %v7942_v54   ;;  %v6894_v49 = vrot.slane %v6512_v42, 1  ;;  %v6896_v17 = vrot.slane %v6513_v12, 1  ;;  %v6898_v27 = vrot.slane %v15313_v18, 1 }
 0x6d3   : > { %v6891_v47 = vsel %vm2377_vm2, %v6889_v23, %v6890_v0  ;;  %v7187_v16 = vpack.c.bf16 %v7126_v35, %v7125_v37  ;;  %v6893_v61 = vsel %vm2377_vm2, %v6890_v0, %v6892_v30  ;;  %v6473_v53 = vmul.f32 %v15112_v45, %v15150_v15 }
 0x6d4   : > { %8090 = vst [vmem:[%s15327_s21 + $0x10] sm:$0xff] %v7947_v33   ;;  %v7052_v63 = vmax.f32 %v6509_v29, %v6891_v47  ;;  %v6897_v46 = vsel %vm2377_vm2, %v6894_v49, %v6896_v17  ;;  %v6899_v41 = vsel %vm2377_vm2, %v6896_v17, %v6898_v27  ;;  %v7053_v28 = vmax.f32 %v6510_v6, %v6893_v61 }
 0x6d5   : > { %v6532_v23 = vadd.f32 %v15114_v4, %v15239_v62  ;;  %8253 = vmatprep.subr.bf16.mxu1 %v7187_v16  ;;  %v7055_v54 = vmax.f32 %v6512_v42, %v6897_v46  ;;  %v15404_v14 = vmax.f32 %v6513_v12, %v6899_v41  ;;  %v6531_v37 = vadd.f32 %v15114_v4, %v6473_v53 }
 0x6d6   : > { %v6927_v0 = vsel %vm2377_vm2, %v6924_v8, %v6926_v7  ;;  %v6515_v35 = vadd.f32 %v15114_v4, %v15217_v32  ;;  %v6895_v6 = vsel %vm2377_vm2, %v6892_v30, %v6894_v49  ;;  %v6902_v8 = vrot.slane %v15330_v50, 1 }
 0x6d7   : > { %v6934_v29 = vrot.slane %v6532_v23, 1  ;;  %v15409_v15 = vmax.f32 %v15310_v22, %v6927_v0  ;;  %v7109_v62 = vmax.f32 %v7052_v63, %v7055_v54  ;;  %v7110_v46 = vmax.f32 %v7053_v28, %v15404_v14 }
 0x6d8   : > { %v7992_v61 = vpack.c.bf16 %v6532_v23, %v6531_v37  ;;  %v6932_v41 = vrot.slane %v6531_v37, 1  ;;  %v7952_v42 = vpack.c.bf16 %v15330_v50, %v6515_v35  ;;  %v6900_v53 = vrot.slane %v6515_v35, 1 }
 0x6d9   : > { %v7054_v7 = vmax.f32 %v15303_v5, %v6895_v6  ;;  %v7179_v22 = vpack.c.bf16 %v7110_v46, %v7109_v62  ;;  %v6475_v63 = vmul.f32 %v15112_v45, %v15154_v13  ;;  %v6534_v13 = vadd.f32 %v15114_v4, %v15242_v38 }
 0x6da   : > { %8099 = vst [vmem:[%s15327_s21 + $0x58] sm:$0xff] %v7992_v61   ;;  %v6933_v12 = vsel %vm2377_vm2, %v6930_v9, %v6932_v41  ;;  %v6935_v32 = vsel %vm2377_vm2, %v6932_v41, %v6934_v29  ;;  %8091 = vst [vmem:[%s15327_s21 + $0x18] sm:$0xff] %v7952_v42   ;;  %v6901_v47 = vsel %vm2377_vm2, %v6898_v27, %v6900_v53  ;;  %v6906_v28 = vrot.slane %v15333_v40, 1 }
 0x6db   : > { %v7073_v33 = vmax.f32 %v15320_v55, %v6933_v12  ;;  %v15424_v30 = vmax.f32 %v6531_v37, %v6935_v32  ;;  %v6903_v49 = vsel %vm2377_vm2, %v6900_v53, %v6902_v8  ;;  %8254 = vmatpush3.bf16.msra.mxu1 %v7179_v22  ;;  %v7057_v5 = vmax.f32 %v15313_v18, %v6901_v47 }
 0x6dc   : > { %v15430_v17 = vmax.f32 %v6515_v35, %v6903_v49  ;;  %v6533_v9 = vadd.f32 %v15114_v4, %v6475_v63  ;;  %v6517_v27 = vadd.f32 %v15114_v4, %v15221_v3  ;;  %v6938_v62 = vrot.slane %v6534_v13, 1 }
 0x6dd   : > { %v7127_v55 = vmax.f32 %v15409_v15, %v7073_v33  ;;  %v7128_v16 = vmax.f32 %v15379_v48, %v15424_v30  ;;  %v7111_v37 = vmax.f32 %v7054_v7, %v7057_v5  ;;  %v6477_v3 = vmul.f32 %v15112_v45, %v15158_v19 }
 0x6de   : > { %v7112_v18 = vmax.f32 %v7055_v54, %v15430_v17  ;;  %v7997_v0 = vpack.c.bf16 %v6534_v13, %v6533_v9  ;;  %v6936_v35 = vrot.slane %v6533_v9, 1  ;;  %v7957_v38 = vpack.c.bf16 %v15333_v40, %v6517_v27 }
 0x6df   : > { %v7188_v6 = vpack.c.bf16 %v7128_v16, %v7127_v55  ;;  %v6904_v46 = vrot.slane %v6517_v27, 1  ;;  %v15449_v41 = vadd.f32 %v15114_v4, %v15245_v51  ;;  %v6535_v19 = vadd.f32 %v15114_v4, %v6477_v3 }
 0x6e0   : > { %v7180_v61 = vpack.c.bf16 %v7112_v18, %v7111_v37  ;;  %8100 = vst [vmem:[%s15327_s21 + $0x60] sm:$0xff] %v7997_v0   ;;  %v6937_v48 = vsel %vm2377_vm2, %v6934_v29, %v6936_v35  ;;  %v6939_v54 = vsel %vm2377_vm2, %v6936_v35, %v6938_v62  ;;  %8092 = vst [vmem:[%s15327_s21 + $0x20] sm:$0xff] %v7957_v38  }
 0x6e1   : > { %8255 = vmatprep.subr.bf16.mxu1 %v7188_v6  ;;  %v7075_v42 = vmax.f32 %v6532_v23, %v6937_v48  ;;  %v6905_v53 = vsel %vm2377_vm2, %v6902_v8, %v6904_v46  ;;  %v6907_v7 = vsel %vm2377_vm2, %v6904_v46, %v6906_v28  ;;  %v15455_v22 = vmax.f32 %v6533_v9, %v6939_v54 }
 0x6e2   : > { %8256 = vmatpush3.bf16.msra.mxu1 %v7180_v61  ;;  %v7059_v29 = vmax.f32 %v15330_v50, %v6905_v53  ;;  %v15458_v12 = vmax.f32 %v6517_v27, %v6907_v7  ;;  %v6942_v32 = vrot.slane %v15449_v41, 1  ;;  %v6519_v23 = vadd.f32 %v15114_v4, %v15225_v57 }
 0x6e3   : > { %v7129_v51 = vmax.f32 %v15381_v26, %v7075_v42  ;;  %v6910_v8 = vrot.slane %v15336_v31, 1  ;;  %v7130_v63 = vmax.f32 %v7073_v33, %v15455_v22  ;;  %v8002_v49 = vpack.c.bf16 %v15449_v41, %v6535_v19 }
 0x6e4   : > { %v7113_v47 = vmax.f32 %v15404_v14, %v7059_v29  ;;  %v7114_v50 = vmax.f32 %v7057_v5, %v15458_v12  ;;  %v6940_v9 = vrot.slane %v6535_v19, 1  ;;  %v7962_v55 = vpack.c.bf16 %v15336_v31, %v6519_v23 }
 0x6e5   : > { %v6908_v26 = vrot.slane %v6519_v23, 1  ;;  %v6479_v16 = vmul.f32 %v15112_v45, %v15162_v58  ;;  %v7189_v27 = vpack.c.bf16 %v7130_v63, %v7129_v51  ;;  %8101 = vst [vmem:[%s15327_s21 + $0x68] sm:$0xff] %v8002_v49   ;;  %v15476_v37 = vadd.f32 %v15114_v4, %v15248_v39 }
 0x6e6   : > { %v7181_v57 = vpack.c.bf16 %v7114_v50, %v7113_v47  ;;  %v6521_v14 = vadd.f32 %v15114_v4, %v15229_v52  ;;  %v6941_v33 = vsel %vm2377_vm2, %v6938_v62, %v6940_v9  ;;  %v6943_v5 = vsel %vm2377_vm2, %v6940_v9, %v6942_v32  ;;  %8093 = vst [vmem:[%s15327_s21 + $0x28] sm:$0xff] %v7962_v55  }
 0x6e7   : > { %v6909_v18 = vsel %vm2377_vm2, %v6906_v28, %v6908_v26  ;;  %v6911_v0 = vsel %vm2377_vm2, %v6908_v26, %v6910_v8  ;;  %8257 = vmatprep.subr.bf16.mxu1 %v7189_v27  ;;  %v7077_v58 = vmax.f32 %v6534_v13, %v6941_v33  ;;  %v15485_v35 = vmax.f32 %v6535_v19, %v6943_v5 }
 0x6e8   : > { %v7061_v39 = vmax.f32 %v15333_v40, %v6909_v18  ;;  %v15488_v6 = vmax.f32 %v6519_v23, %v6911_v0  ;;  %8258 = vmatpush3.bf16.msra.mxu1 %v7181_v57  ;;  %v6537_v52 = vadd.f32 %v15114_v4, %v6479_v16  ;;  %v6946_v62 = vrot.slane %v15476_v37, 1 }
 0x6e9   : > { %v7967_v38 = vpack.c.bf16 %v15339_v34, %v6521_v14  ;;  %v6912_v28 = vrot.slane %v6521_v14, 1  ;;  %v7131_v46 = vmax.f32 %v15424_v30, %v7077_v58  ;;  %v7132_v61 = vmax.f32 %v7075_v42, %v15485_v35 }
 0x6ea   : > { %v7115_v13 = vmax.f32 %v15430_v17, %v7061_v39  ;;  %v7116_v48 = vmax.f32 %v7059_v29, %v15488_v6  ;;  %v8007_v40 = vpack.c.bf16 %v15476_v37, %v6537_v52  ;;  %v6944_v3 = vrot.slane %v6537_v52, 1 }
 0x6eb   : > { %8094 = vst [vmem:[%s15327_s21 + $0x30] sm:$0xff] %v7967_v38   ;;  %v6913_v54 = vsel %vm2377_vm2, %v6910_v8, %v6912_v28  ;;  %v6914_v53 = vrot.slane %v15339_v34, 1  ;;  %v7190_v7 = vpack.c.bf16 %v7132_v61, %v7131_v46  ;;  %v6481_v30 = vmul.f32 %v15112_v45, %v15166_v2 }
 0x6ec   : > { %v7182_v19 = vpack.c.bf16 %v7116_v48, %v7115_v13  ;;  %v7063_v51 = vmax.f32 %v15336_v31, %v6913_v54  ;;  %8102 = vst [vmem:[%s15327_s21 + $0x70] sm:$0xff] %v8007_v40   ;;  %v6945_v17 = vsel %vm2377_vm2, %v6942_v32, %v6944_v3  ;;  %v6947_v42 = vsel %vm2377_vm2, %v6944_v3, %v6946_v62 }
 0x6ed   : > { %v6915_v29 = vsel %vm2377_vm2, %v6912_v28, %v6914_v53  ;;  %v6540_v23 = vadd.f32 %v15114_v4, %v15251_v36  ;;  %8259 = vmatprep.subr.bf16.mxu1 %v7190_v7  ;;  %v7079_v8 = vmax.f32 %v15449_v41, %v6945_v17  ;;  %v15511_v63 = vmax.f32 %v6537_v52, %v6947_v42 }
 0x6ee   : > { %v15513_v47 = vmax.f32 %v6521_v14, %v6915_v29  ;;  %v7117_v31 = vmax.f32 %v15458_v12, %v7063_v51  ;;  %8260 = vmatpush3.bf16.msra.mxu1 %v7182_v19  ;;  %v6539_v2 = vadd.f32 %v15114_v4, %v6481_v30  ;;  %v6523_v50 = vadd.f32 %v15114_v4, %v15233_v43 }
 0x6ef   : > { %v6950_v32 = vrot.slane %v6540_v23, 1  ;;  %v6918_v49 = vrot.slane %v15342_v11, 1  ;;  %v7133_v36 = vmax.f32 %v15455_v22, %v7079_v8  ;;  %v7134_v41 = vmax.f32 %v7077_v58, %v15511_v63 }
 0x6f0   : > { %v7118_v9 = vmax.f32 %v7061_v39, %v15513_v47  ;;  %v6483_v12 = vmul.f32 %v15112_v45, %v15170_v21  ;;  %v8012_v55 = vpack.c.bf16 %v6540_v23, %v6539_v2  ;;  %v6948_v26 = vrot.slane %v6539_v2, 1 }
 0x6f1   : > { %v7972_v16 = vpack.c.bf16 %v15342_v11, %v6523_v50  ;;  %v6916_v27 = vrot.slane %v6523_v50, 1  ;;  %v7191_v57 = vpack.c.bf16 %v7134_v41, %v7133_v36  ;;  %v15529_v33 = vadd.f32 %v15114_v4, %v15254_v1  ;;  %v17507_v41 = vld [vmem:[#allocation37_spill] sm:$0xff] }
 0x6f2   : > { %v7183_v14 = vpack.c.bf16 %v7118_v9, %v7117_v31  ;;  %v6541_v43 = vadd.f32 %v15114_v4, %v6483_v12  ;;  %8103 = vst [vmem:[%s15327_s21 + $0x78] sm:$0xff] %v8012_v55   ;;  %v6949_v22 = vsel %vm2377_vm2, %v6946_v62, %v6948_v26  ;;  %v6951_v5 = vsel %vm2377_vm2, %v6948_v26, %v6950_v32  ;;  %v17508_v12 = vld [vmem:[#allocation134_spill] sm:$0xff] }
 0x6f3   : > { %8095 = vst [vmem:[%s15327_s21 + $0x38] sm:$0xff] %v7972_v16   ;;  %v6917_v21 = vsel %vm2377_vm2, %v6914_v53, %v6916_v27  ;;  %v6919_v18 = vsel %vm2377_vm2, %v6916_v27, %v6918_v49  ;;  %8261 = vmatprep.subr.bf16.mxu1 %v7191_v57  ;;  %v7081_v0 = vmax.f32 %v15476_v37, %v6949_v22  ;;  %v6954_v38 = vrot.slane %v15529_v33, 1 }
 0x6f4   : > { %v15538_v58 = vmax.f32 %v6539_v2, %v6951_v5  ;;  %v7065_v39 = vmax.f32 %v15339_v34, %v6917_v21  ;;  %v15541_v1 = vmax.f32 %v6523_v50, %v6919_v18  ;;  %8262 = vmatpush3.bf16.msra.mxu1 %v7183_v14  ;;  %v8017_v52 = vpack.c.bf16 %v15529_v33, %v6541_v43 }
 0x6f5   : > { %v6952_v62 = vrot.slane %v6541_v43, 1  ;;  %v17504_v28 = vrot.slane %v15306_v20, 1  ;;  %v7135_v61 = vmax.f32 %v15485_v35, %v7081_v0  ;;  %v15554_v48 = vadd.f32 %v15114_v4, %v15271_v59 }
 0x6f6   : > { %v7136_v37 = vmax.f32 %v7079_v8, %v15538_v58  ;;  %v7119_v13 = vmax.f32 %v15488_v6, %v7065_v39  ;;  %v7120_v34 = vmax.f32 %v7063_v51, %v15541_v1  ;;  %8104 = vst [vmem:[%s15327_s21 + $0x80] sm:$0xff] %v8017_v52   ;;  %v7122_v7 = vmax.f32 %v7065_v39, %v15374_v25  ;;  %v17505_v51 = vld [vmem:[#allocation166_spill] sm:$0xff] }
 0x6f7   : > { %v6921_v46 = vsel %vm2377_vm2, %v6918_v49, %v17504_v28  ;;  %v6953_v40 = vsel %vm2377_vm2, %v6950_v32, %v6952_v62  ;;  %v6955_v3 = vsel %vm2377_vm2, %v6952_v62, %v6954_v38  ;;  %v6485_v59 = vmul.f32 %v15112_v45, %v17505_v51  ;;  %v17511_v28 = vld [vmem:[#allocation99_spill] sm:$0xff] }
 0x6f8   : > { %v7067_v20 = vmax.f32 %v15342_v11, %v6921_v46  ;;  %v7192_v54 = vpack.c.bf16 %v7136_v37, %v7135_v61  ;;  %v7083_v53 = vmax.f32 %v6540_v23, %v6953_v40  ;;  %v15560_v35 = vmax.f32 %v6541_v43, %v6955_v3 }
 0x6f9   : > { %v7184_v6 = vpack.c.bf16 %v7120_v34, %v7119_v13  ;;  %v6544_v30 = vadd.f32 %v15114_v4, %v15257_v56  ;;  %v15570_v17 = vadd.f32 %v15114_v4, %v15281_v10  ;;  %v6545_v25 = vadd.f32 %v15114_v4, %v15260_v44  ;;  %v17506_v44 = vld [vmem:[#allocation137_spill] sm:$0xff] }
 0x6fa   : > { %v7121_v19 = vmax.f32 %v15513_v47, %v7067_v20  ;;  %8263 = vmatprep.subr.bf16.mxu1 %v7192_v54  ;;  %v7137_v11 = vmax.f32 %v15511_v63, %v7083_v53  ;;  %v7138_v42 = vmax.f32 %v7081_v0, %v15560_v35  ;;  %v6543_v29 = vadd.f32 %v15114_v4, %v6485_v59  ;;  %v17509_v0 = vld [vmem:[#allocation106_spill] sm:$0xff] }
 0x6fb   : > { %8264 = vmatpush3.bf16.msra.mxu1 %v7184_v6  ;;  %v6958_v23 = vrot.slane %v6544_v30, 1  ;;  %v7123_v56 = vmax.f32 %v15541_v1, %v15376_v24  ;;  %v6962_v8 = vrot.slane %v15345_v60, 1  ;;  %v7124_v47 = vmax.f32 %v7067_v20, %v15409_v15  ;;  %v17510_v1 = vld [vmem:[#allocation21_spill] sm:$0xff]  ;;  %v17512_v6 = vld [vmem:[#allocation168_spill] sm:$0xff] }
 0x6fc   : > { %v7193_v10 = vpack.c.bf16 %v7138_v42, %v7137_v11  ;;  %v8027_v63 = vpack.c.bf16 %v15345_v60, %v6545_v25  ;;  %v6960_v31 = vrot.slane %v6545_v25, 1  ;;  %v7185_v2 = vpack.c.bf16 %v7122_v7, %v7121_v19  ;;  %v17513_v19 = vld [vmem:[#allocation101_spill] sm:$0xff]  ;;  %v8901_v59 = vld [vmem:[%s15770_s5] ss:$16 sps:$4 sm:$0xff]  }
 0x6fd   : > { %v8022_v32 = vpack.c.bf16 %v6544_v30, %v6543_v29  ;;  %v6956_v50 = vrot.slane %v6543_v29, 1  ;;  %v6547_v49 = vadd.f32 %v15114_v4, %v17506_v44  ;;  %v6966_v9 = vrot.slane %v17507_v41, 1  ;;  %v17514_v11 = vld [vmem:[#allocation121_spill] sm:$0xff]  ;;  %v17515_v42 = vld [vmem:[#allocation96_spill] sm:$0xff] }
 0x6fe   : > { %8265 = vmatprep.subr.bf16.mxu1 %v7193_v10  ;;  %8106 = vst [vmem:[%s15327_s21 + $0x90] sm:$0xff] %v8027_v63   ;;  %v6961_v36 = vsel %vm2377_vm2, %v6958_v23, %v6960_v31  ;;  %v6963_v24 = vsel %vm2377_vm2, %v6960_v31, %v6962_v8  ;;  %v6549_v15 = vadd.f32 %v15114_v4, %v17508_v12  ;;  %v6970_v27 = vrot.slane %v15554_v48, 1  ;;  %v8906_v10 = vld [vmem:[%s15770_s5 + $0x24] ss:$16 sps:$4 sm:$0xff]  }
 0x6ff   : > { %8266 = vmatpush3.bf16.msra.mxu1 %v7185_v2  ;;  %8105 = vst [vmem:[%s15327_s21 + $0x88] sm:$0xff] %v8022_v32   ;;  %v6957_v55 = vsel %vm2377_vm2, %v6954_v38, %v6956_v50  ;;  %v6959_v26 = vsel %vm2377_vm2, %v6956_v50, %v6958_v23  ;;  %v15593_v16 = vmax.f32 %v6544_v30, %v6961_v36  ;;  %v6964_v22 = vrot.slane %v6547_v49, 1 }
 0x700   : > { %v7085_v57 = vmax.f32 %v15529_v33, %v6957_v55  ;;  %v7086_v14 = vmax.f32 %v6543_v29, %v6959_v26  ;;  %v8032_v43 = vpack.c.bf16 %v17507_v41, %v6547_v49  ;;  %v15598_v5 = vmax.f32 %v6545_v25, %v6963_v24  ;;  %v17518_v24 = vld [vmem:[#allocation88_spill] sm:$0xff] }
 0x701   : > { %v8037_v21 = vpack.c.bf16 %v15554_v48, %v6549_v15  ;;  %v6968_v18 = vrot.slane %v6549_v15, 1  ;;  %v6551_v39 = vadd.f32 %v15114_v4, %v17509_v0  ;;  %v15605_v52 = vadd.f32 %v15114_v4, %v17510_v1 }
 0x702   : > { %v7139_v62 = vmax.f32 %v15538_v58, %v7085_v57  ;;  %v7140_v33 = vmax.f32 %v7083_v53, %v7086_v14  ;;  %8107 = vst [vmem:[%s15327_s21 + $0x98] sm:$0xff] %v8032_v43   ;;  %v6965_v38 = vsel %vm2377_vm2, %v6962_v8, %v6964_v22  ;;  %v15612_v46 = vadd.f32 %v15114_v4, %v17511_v28 }
 0x703   : > { %v7186_v61 = vpack.c.bf16 %v7124_v47, %v7123_v56  ;;  %v6967_v37 = vsel %vm2377_vm2, %v6964_v22, %v6966_v9  ;;  %v7089_v13 = vmax.f32 %v15345_v60, %v6965_v38  ;;  %8108 = vst [vmem:[%s15327_s21 + $0xa0] sm:$0xff] %v8037_v21   ;;  %v6969_v3 = vsel %vm2377_vm2, %v6966_v9, %v6968_v18  ;;  %v17516_v56 = vld [vmem:[#allocation94_spill] sm:$0xff] }
 0x704   : > { %v7194_v34 = vpack.c.bf16 %v7140_v33, %v7139_v62  ;;  %v15617_v40 = vmax.f32 %v6547_v49, %v6967_v37  ;;  %v6971_v58 = vsel %vm2377_vm2, %v6968_v18, %v6970_v27  ;;  %v7141_v20 = vmax.f32 %v15560_v35, %v15593_v16  ;;  %v17519_v9 = vld [vmem:[#allocation98_spill] sm:$0xff]  ;;  %v17520_v18 = vld [vmem:[#allocation97_spill] sm:$0xff] }
 0x705   : > { %v7142_v54 = vmax.f32 %v7085_v57, %v15598_v5  ;;  %v8042_v53 = vpack.c.bf16 %v15570_v17, %v6551_v39  ;;  %v6972_v7 = vrot.slane %v6551_v39, 1  ;;  %v6499_v60 = vmul.f32 %v15112_v45, %v17512_v6  ;;  %v8904_v62 = vld [vmem:[%s15770_s5 + $0x20] ss:$16 sps:$4 sm:$0xff]  }
 0x706   : > { %v6502_v51 = vmul.f32 %v15112_v45, %v17513_v19  ;;  %8267 = vmatprep.subr.bf16.mxu1 %v7194_v34  ;;  %v6974_v30 = vrot.slane %v15570_v17, 1  ;;  %v6553_v35 = vadd.f32 %v15114_v4, %v17514_v11  ;;  %v15637_v25 = vadd.f32 %v15114_v4, %v17515_v42 }
 0x707   : > { %8268 = vmatpush3.bf16.msra.mxu1 %v7186_v61  ;;  %v7091_v29 = vmax.f32 %v17507_v41, %v6969_v3  ;;  %v15640_v23 = vmax.f32 %v6549_v15, %v6971_v58  ;;  %8109 = vst [vmem:[%s15327_s21 + $0xa8] sm:$0xff] %v8042_v53   ;;  %v6555_v8 = vadd.f32 %v15114_v4, %v17516_v56  ;;  %v17517_v47 = vmov 0  }
 0x708   : > { %7360 = vmatprep.subr.bf16.mxu1 %v17517_v47  ;;  %v7143_v63 = vmax.f32 %v7086_v14, %v7089_v13  ;;  %v7144_v31 = vmax.f32 %v15593_v16, %v15617_v40  ;;  %v6973_v2 = vsel %vm2377_vm2, %v6970_v27, %v6972_v7  ;;  %v8047_v32 = vpack.c.bf16 %v15605_v52, %v6553_v35 }
 0x709   : > { %v7195_v50 = vpack.c.bf16 %v7142_v54, %v7141_v20  ;;  %v6975_v44 = vsel %vm2377_vm2, %v6972_v7, %v6974_v30  ;;  %v6976_v49 = vrot.slane %v6553_v35, 1  ;;  %v8052_v36 = vpack.c.bf16 %v15612_v46, %v6555_v8 }
 0x70a   : > { %v6501_v41 = vmul.f32 %v15112_v45, %v17518_v24  ;;  %v6503_v12 = vmul.f32 %v15112_v45, %v17519_v9  ;;  %7328 = vmatmul.mubr.bf16.vlgmr.msra.gmra.mrb[100].mxu1 %v8901_v59  ;;  %8110 = vst [vmem:[%s15327_s21 + $0xb0] sm:$0xff] %v8047_v32   ;;  %v6978_v15 = vrot.slane %v15605_v52, 1  ;;  %v6557_v55 = vadd.f32 %v15114_v4, %v6499_v60  ;;  %v8915_v9 = vld [vmem:[%s15770_s5 + $0xc] ss:$16 sps:$4 sm:$0xff]  }
 0x70b   : > { %7361 = vmatpush1.bf16.msra.mxu1 %v7195_v50  ;;  %v7145_v26 = vmax.f32 %v15598_v5, %v7091_v29  ;;  %v7146_v16 = vmax.f32 %v7089_v13, %v15640_v23  ;;  %v7093_v27 = vmax.f32 %v15554_v48, %v6973_v2  ;;  %8111 = vst [vmem:[%s15327_s21 + $0xb8] sm:$0xff] %v8052_v36   ;;  %v6980_v22 = vrot.slane %v6555_v8, 1 }
 0x70c   : > { %7335 = vmatprep.mubr.bf16.mxu1 %v8906_v10  ;;  %v15667_v57 = vadd.f32 %v15114_v4, %v6502_v51  ;;  %7362 = vmatprep.subr.bf16.mxu1 %v17517_v47  ;;  %v7196_v45 = vpack.c.bf16 %v7144_v31, %v7143_v63  ;;  %v7094_v14 = vmax.f32 %v6551_v39, %v6975_v44  ;;  %v6982_v21 = vrot.slane %v15612_v46, 1 }
 0x70d   : > { %v6977_v43 = vsel %vm2377_vm2, %v6974_v30, %v6976_v49  ;;  %v8057_v5 = vpack.c.bf16 %v15637_v25, %v6557_v55  ;;  %v15675_v48 = vadd.f32 %v15114_v4, %v17520_v18  ;;  %v6979_v0 = vsel %vm2377_vm2, %v6976_v49, %v6978_v15  ;;  %v8907_v30 = vld [vmem:[%s15770_s5 + $0x40] ss:$16 sps:$4 sm:$0xff]  }
 0x70e   : > { %v6559_v1 = vadd.f32 %v15114_v4, %v6501_v41  ;;  %v7197_v39 = vpack.c.bf16 %v7146_v16, %v7145_v26  ;;  %v7147_v33 = vmax.f32 %v15617_v40, %v7093_v27  ;;  %v6561_v38 = vadd.f32 %v15114_v4, %v6503_v12  ;;  %v8909_v4 = vld [vmem:[%s15770_s5 + $0x44] ss:$16 sps:$4 sm:$0xff]   ;;  %v8910_v41 = vld [vmem:[%s15770_s5 + $0x60] ss:$16 sps:$4 sm:$0xff]  }
 0x70f   : > { %7363 = vmatpush1.bf16.msra.mxu1 %v7196_v45  ;;  %8112 = vst [vmem:[%s15327_s21 + $0xc0] sm:$0xff] %v8057_v5   ;;  %v7148_v28 = vmax.f32 %v7091_v29, %v7094_v14  ;;  %v7095_v61 = vmax.f32 %v15570_v17, %v6977_v43  ;;  %v6986_v37 = vrot.slane %v15637_v25, 1  ;;  %v7096_v34 = vmax.f32 %v6553_v35, %v6979_v0 }
 0x710   : > { %7364 = vmatprep.subr.bf16.mxu1 %v17517_v47  ;;  %v8062_v13 = vpack.c.bf16 %v15667_v57, %v6559_v1  ;;  %v6981_v3 = vsel %vm2377_vm2, %v6978_v15, %v6980_v22  ;;  %v6983_v58 = vsel %vm2377_vm2, %v6980_v22, %v6982_v21  ;;  %v6984_v20 = vrot.slane %v6557_v55, 1 }
 0x711   : > { %v8067_v40 = vpack.c.bf16 %v15675_v48, %v6561_v38  ;;  %v7198_v17 = vpack.c.bf16 %v7148_v28, %v7147_v33  ;;  %v7097_v54 = vmax.f32 %v15605_v52, %v6981_v3  ;;  %v7098_v53 = vmax.f32 %v6555_v8, %v6983_v58  ;;  %v8912_v52 = vld [vmem:[%s15770_s5 + $0x64] ss:$16 sps:$4 sm:$0xff]   ;;  %v8916_v33 = vld [vmem:[%s15770_s5 + $0x28] ss:$16 sps:$4 sm:$0xff]   ;;  %v8924_v28 = vld [vmem:[%s15770_s5 + $0x6c] ss:$16 sps:$4 sm:$0xff]  }
 0x712   : > { %8113 = vst [vmem:[%s15327_s21 + $0xc8] sm:$0xff] %v8062_v13   ;;  %7336 = vmatmul.mubr.bf16.gmra.mrb[104].mxu1 %v8904_v62  ;;  %v7149_v7 = vmax.f32 %v15640_v23, %v7095_v61  ;;  %v7150_v6 = vmax.f32 %v7093_v27, %v7096_v34  ;;  %v6985_v60 = vsel %vm2377_vm2, %v6982_v21, %v6984_v20  ;;  %v6988_v51 = vrot.slane %v6559_v1, 1 }
 0x713   : > { %7365 = vmatpush1.bf16.msra.mxu1 %v7197_v39  ;;  %8114 = vst [vmem:[%s15327_s21 + $0xd0] sm:$0xff] %v8067_v40   ;;  %v6987_v19 = vsel %vm2377_vm2, %v6984_v20, %v6986_v37  ;;  %7343 = vmatprep.mubr.bf16.mxu1 %v8909_v4  ;;  %v6990_v59 = vrot.slane %v15667_v57, 1  ;;  %v7099_v11 = vmax.f32 %v15612_v46, %v6985_v60  ;;  %v6992_v10 = vrot.slane %v6561_v38, 1  ;;  %v8918_v39 = vld [vmem:[%s15770_s5 + $0x2c] ss:$16 sps:$4 sm:$0xff]  }
 0x714   : > { %7366 = vmatprep.subr.bf16.mxu1 %v17517_v47  ;;  %v7100_v35 = vmax.f32 %v6557_v55, %v6987_v19  ;;  %v7199_v42 = vpack.c.bf16 %v7150_v6, %v7149_v7  ;;  %v7151_v29 = vmax.f32 %v7094_v14, %v7097_v54  ;;  %v7152_v23 = vmax.f32 %v7095_v61, %v7098_v53  ;;  %v8922_v61 = vld [vmem:[%s15770_s5 + $0x68] ss:$16 sps:$4 sm:$0xff]  }
 0x715   : > { %v6989_v56 = vsel %vm2377_vm2, %v6986_v37, %v6988_v51  ;;  %v6991_v8 = vsel %vm2377_vm2, %v6988_v51, %v6990_v59  ;;  %v6994_v63 = vrot.slane %v15675_v48, 1  ;;  %v7153_v31 = vmax.f32 %v7096_v34, %v7099_v11 }
 0x716   : > { %v7154_v2 = vmax.f32 %v7097_v54, %v7100_v35  ;;  %v7200_v32 = vpack.c.bf16 %v7152_v23, %v7151_v29  ;;  %v7101_v46 = vmax.f32 %v15637_v25, %v6989_v56  ;;  %v7102_v50 = vmax.f32 %v6559_v1, %v6991_v8 }
 0x717   : > { %7367 = vmatpush1.bf16.msra.mxu1 %v7198_v17  ;;  %v6993_v44 = vsel %vm2377_vm2, %v6990_v59, %v6992_v10  ;;  %v6995_v49 = vsel %vm2377_vm2, %v6992_v10, %v6994_v63  ;;  %v17521_v36 = vmov 0.0  }
 0x718   : > { %7368 = vmatprep.subr.bf16.mxu1 %v17517_v47  ;;  %v6996_v24 = vrot.slane %v17521_v36, 1  ;;  %v7201_v12 = vpack.c.bf16 %v7154_v2, %v7153_v31  ;;  %v7155_v25 = vmax.f32 %v7098_v53, %v7101_v46  ;;  %v7156_v15 = vmax.f32 %v7099_v11, %v7102_v50 }
 0x719   : > { %v7103_v55 = vmax.f32 %v15667_v57, %v6993_v44  ;;  %v7104_v26 = vmax.f32 %v6561_v38, %v6995_v49  ;;  %v8919_v38 = vld [vmem:[%s15770_s5 + $0x48] ss:$16 sps:$4 sm:$0xff]  }
 0x71a   : > { %7344 = vmatmul.mubr.bf16.gmra.mrb[108].mxu1 %v8907_v30  ;;  %v6997_v16 = vsel %vm2377_vm2, %v6994_v63, %v6996_v24  ;;  %v7108_v27 = vmax.f32 %v6996_v24, 0.0  ;;  %v7202_v45 = vpack.c.bf16 %v7156_v15, %v7155_v25 }
 0x71b   : > { %7369 = vmatpush1.bf16.msra.mxu1 %v7199_v42  ;;  %7351 = vmatprep.mubr.bf16.mxu1 %v8912_v52  ;;  %v7157_v14 = vmax.f32 %v7100_v35, %v7103_v55  ;;  %v7158_v43 = vmax.f32 %v7101_v46, %v7104_v26  ;;  %v7105_v22 = vmax.f32 %v15675_v48, %v6997_v16  ;;  %v8913_v48 = vld [vmem:[%s15770_s5 + $0x8] ss:$16 sps:$4 sm:$0xff]  }
 0x71c   : > { %7370 = vmatprep.subr.bf16.mxu1 %v17517_v47  ;;  %v7160_v5 = vmax.f32 %v7103_v55, %v7108_v27  ;;  %v7161_v0 = vmax.f32 %v7104_v26, %v7108_v27 }
 0x71d   : > { %v7203_v21 = vpack.c.bf16 %v7158_v43, %v7157_v14  ;;  %v7159_v57 = vmax.f32 %v7102_v50, %v7105_v22  ;;  %v7162_v1 = vmax.f32 %v7105_v22, %v7108_v27 }
 0x71f   : > { %7371 = vmatpush1.bf16.msra.mxu1 %v7200_v32  ;;  %v7204_v18 = vpack.c.bf16 %v7160_v5, %v7159_v57  ;;  %v7205_v62 = vpack.c.bf16 %v7162_v1, %v7161_v0 }
 0x720   : > { %7372 = vmatprep.subr.bf16.mxu1 %v17517_v47 }
 0x722   : > { %7352 = vmatmul.mubr.bf16.gmra.mrb[112].mxu1 %v8910_v41 }
 0x723   : > { %7373 = vmatpush1.bf16.msra.mxu1 %v7201_v12  ;;  %7857 = vmatprep.mubr.msk.bf16.mxu1 %vm7282_vm0, %v8915_v9 }
 0x724   : > { %7374 = vmatprep.subr.bf16.mxu1 %v17517_v47 }
 0x727   : > { %7375 = vmatpush1.bf16.msra.mxu1 %v7202_v45 }
 0x728   : > { %7376 = vmatprep.subr.bf16.mxu1 %v17517_v47 }
 0x72b   : > { %7377 = vmatpush1.bf16.msra.mxu1 %v7203_v21 }
 0x72c   : > { %7378 = vmatprep.subr.bf16.mxu1 %v17517_v47 }
 0x72f   : > { %7379 = vmatpush1.bf16.msra.mxu1 %v7204_v18 }
 0x730   : > { %7380 = vmatprep.subr.bf16.mxu1 %v17517_v47  ;;  %v8921_v47 = vld [vmem:[%s15770_s5 + $0x4c] ss:$16 sps:$4 sm:$0xff]  }
 0x733   : > { %7381 = vmatpush1.bf16.msra.mxu1 %v7205_v62 }
 0x736   : > { %7393 = vmatmul.mubr.bf16.vlgmr.msra.gmra.mrb[116].mxu1 %v8913_v48 }
 0x737   : > { %7858 = vmatprep.mubr.msk.bf16.mxu1 %vm7282_vm0, %v8918_v39 }
 0x73e   : > { %7401 = vmatmul.mubr.bf16.gmra.mrb[120].mxu1 %v8916_v33 }
 0x73f   : > { %7859 = vmatprep.mubr.msk.bf16.mxu1 %vm7282_vm0, %v8921_v47 }
 0x746   : > { %7409 = vmatmul.mubr.bf16.gmra.mrb[124].mxu1 %v8919_v38 }
 0x747   : > { %7860 = vmatprep.mubr.msk.bf16.mxu1 %vm7282_vm0, %v8924_v28 }
 0x74e   : > { %7417 = vmatmul.mubr.bf16.gmra.mrb[128].mxu1 %v8922_v61 }
 0x7dd   : > { %v8269_v37 = vpop.f32.mrb[100].mxu1 }
 0x7de   : > { %v8270_v13 = vpop.f32.mrb[101].mxu1 }
 0x7df   : > { %v8271_v34 = vadd.f32 %v8270_v13, %v8269_v37  ;;  %v8272_v3 = vpop.f32.mrb[102].mxu1 }
 0x7e0   : > { %v8273_v58 = vpop.f32.mrb[103].mxu1 }
 0x7e1   : > { %v8274_v20 = vadd.f32 %v8273_v58, %v8272_v3 }
 0x7e5   : > { %v8275_v4 = vpop.f32.mrb[104].mxu1 }
 0x7e6   : > { %v8276_v40 = vpop.f32.mrb[105].mxu1 }
 0x7e7   : > { %v8277_v17 = vadd.f32 %v8276_v40, %v8275_v4  ;;  %v8278_v54 = vpop.f32.mrb[106].mxu1 }
 0x7e8   : > { %v8279_v53 = vpop.f32.mrb[107].mxu1 }
 0x7e9   : > { %v8280_v7 = vadd.f32 %v8279_v53, %v8278_v54 }
 0x7ed   : > { %v8281_v6 = vpop.f32.mrb[108].mxu1 }
 0x7ee   : > { %v8282_v60 = vpop.f32.mrb[109].mxu1 }
 0x7ef   : > { %v8283_v19 = vadd.f32 %v8282_v60, %v8281_v6  ;;  %v8284_v51 = vpop.f32.mrb[110].mxu1 }
 0x7f0   : > { %v8285_v59 = vpop.f32.mrb[111].mxu1 }
 0x7f1   : > { %v8286_v30 = vadd.f32 %v8285_v59, %v8284_v51 }
 0x7f5   : > { %v8287_v52 = vpop.f32.mrb[112].mxu1 }
 0x7f6   : > { %v8288_v11 = vpop.f32.mrb[113].mxu1 }
 0x7f7   : > { %v8289_v35 = vadd.f32 %v8288_v11, %v8287_v52  ;;  %v8290_v42 = vpop.f32.mrb[114].mxu1 }
 0x7f8   : > { %v8291_v29 = vpop.f32.mrb[115].mxu1 }
 0x7f9   : > { %v8292_v23 = vadd.f32 %v8291_v29, %v8290_v42 }
 0x809   : > { %v7394_v56 = vpop.f32.mrb[116].mxu1 }
 0x80a   : > { %v7395_v8 = vadd.f32 %v8271_v34, %v7394_v56  ;;  %v7396_v10 = vpop.f32.mrb[117].mxu1 }
 0x80b   : > { %v7397_v63 = vpop.f32.mrb[118].mxu1 }
 0x80c   : > { %v7398_v31 = vadd.f32 %v8274_v20, %v7397_v63  ;;  %v7399_v2 = vpop.f32.mrb[119].mxu1 }
 0x80e   : > { %v8072_v32 = vpack.c.bf16 %v7398_v31, %v7395_v8 }
 0x810   : > { %8073 = vst [vmem:[%s291_s12] sm:$0xff] %v8072_v32  }
 0x811   : > { %v7402_v46 = vpop.f32.mrb[120].mxu1 }
 0x812   : > { %v7403_v50 = vadd.f32 %v8277_v17, %v7402_v46  ;;  %v7404_v44 = vpop.f32.mrb[121].mxu1 }
 0x813   : > { %v7405_v49 = vpop.f32.mrb[122].mxu1 }
 0x814   : > { %v7406_v36 = vadd.f32 %v8280_v7, %v7405_v49  ;;  %v7407_v24 = vpop.f32.mrb[123].mxu1 }
 0x816   : > { %v8077_v41 = vpack.c.bf16 %v7406_v36, %v7403_v50 }
 0x818   : > { %8115 = vst [vmem:[%s291_s12 + $0x8] sm:$0xff] %v8077_v41  }
 0x819   : > { %v7410_v9 = vpop.f32.mrb[124].mxu1 }
 0x81a   : > { %v7411_v12 = vadd.f32 %v8283_v19, %v7410_v9  ;;  %v7412_v25 = vpop.f32.mrb[125].mxu1 }
 0x81b   : > { %v7413_v15 = vpop.f32.mrb[126].mxu1 }
 0x81c   : > { %v7414_v55 = vadd.f32 %v8286_v30, %v7413_v15  ;;  %v7415_v26 = vpop.f32.mrb[127].mxu1 }
 0x81e   : > { %v8082_v16 = vpack.c.bf16 %v7414_v55, %v7411_v12 }
 0x820   : > { %8116 = vst [vmem:[%s291_s12 + $0x10] sm:$0xff] %v8082_v16  }
 0x821   : > { %v7418_v27 = vpop.f32.mrb[128].mxu1 }
 0x822   : > { %v7419_v45 = vadd.f32 %v8289_v35, %v7418_v27  ;;  %v7420_v14 = vpop.f32.mrb[129].mxu1 }
 0x823   : > { %v7421_v43 = vpop.f32.mrb[130].mxu1 }
 0x824   : > { %v7422_v22 = vadd.f32 %v8292_v23, %v7421_v43  ;;  %v7423_v21 = vpop.f32.mrb[131].mxu1 }
 0x826   : > { %v8087_v57 = vpack.c.bf16 %v7422_v22, %v7419_v45 }
 0x828   : > { %8117 = vst [vmem:[%s291_s12 + $0x18] sm:$0xff] %v8087_v57  }
 0x829 PF: > { %s18_s24 = sadd.s32 1, %s9154_s24  }
 0x82a   : > { %p15_p4 = scmp.ge.s32.totalorder %s18_s24, 4  }
 0x82c   :  { %17 = sbr.rel (!%p15_p4) target bundleno = 1 (0x1), region = 88 }

</bundles_post_ra>
